<compile_context>
chip_gen: v5e
topology: v5e:2x2
jax: 0.10.0
libtpu: 0.0.40
codegen_flags: <defaults>
</compile_context>

<pallas_src>
import jax
import jax.numpy as jnp
from jax.experimental import pallas as pl
from jax.experimental.pallas import tpu as pltpu

# ---- shapes implied by the PyTorch module (fc1 in_features = 64*498) --------
L_IN = 1000          # input length so that 64 * 498 features reach fc1
K = 3                # conv kernel size
C1 = 32              # conv1 out channels
C2 = 64              # conv2 out channels
L1 = L_IN - K + 1    # 998 (pool1 has kernel=1/stride=1 -> identity)
L2 = L1 - K + 1      # 996
L_POOL = L2 // 2     # 498 (maxpool kernel=2 stride=2)
FC_IN = C2 * L_POOL  # 31872
FC_HID = 128
FC_OUT = 1

# conv kernel L-chunking: 996 conv2 rows = 3 chunks of 332 -> 3 * 83 packed rows
N_CHUNK = 3
CHUNK_L2 = L2 // N_CHUNK        # 332 conv2 rows per chunk
CHUNK_OUT = CHUNK_L2 // 4       # 83 packed output rows (2 pooled positions each)

# fc1 reduction tiling: FC_IN = 3 * 10624 (lane-aligned K tiles)
TK = 128 * 83                   # 10624
NK = FC_IN // TK                # 3


# ----------------------------- conv + pool kernel ----------------------------
def _conv_pool_kernel(x_ref, w1_ref, b1_ref, w2_ref, b2_ref, out_ref,
                      h1_scr, h2_scr):
    # x_ref:  (1, L_IN, 1)   w1_ref: (K, C1)      b1_ref: (1, C1)
    # w2_ref: (K*C1, C2)     b2_ref: (1, C2)
    # out_ref: (1, N_CHUNK, CHUNK_OUT, 2*C2) -- flat feature index = l*C2 + c
    # h1_scr: (L1, C1) VMEM  h2_scr: (CHUNK_L2, C2) VMEM
    x = x_ref[0]                                    # (L_IN, 1)
    xb = jnp.broadcast_to(x, (L_IN, C1))            # single hoisted lane-broadcast
    w1 = w1_ref[...]

    # conv1 (in_channels = 1) + bias + relu -> h1_scr: (L1, C1); pool1 = identity
    h1 = xb[0:L1, :] * w1[0:1, :]
    h1 = h1 + xb[1:1 + L1, :] * w1[1:2, :]
    h1 = h1 + xb[2:2 + L1, :] * w1[2:3, :]
    h1_scr[...] = jnp.maximum(h1 + b1_ref[...], 0.0)

    # conv2 + relu + maxpool(k=2,s=2), chunked over L2 to bound live vregs.
    @pl.loop(0, N_CHUNK)
    def _(c):
        base = pl.multiple_of(c * CHUNK_L2, 4)
        # one fused (CHUNK_L2, K*C1) @ (K*C1, C2) MXU matmul instead of 3 thin ones
        h1s = h1_scr[pl.ds(base, CHUNK_L2 + K - 1), :]            # (334, C1)
        h1cat = jnp.concatenate(
            [h1s[kk:kk + CHUNK_L2, :] for kk in range(K)], axis=1)  # (332, K*C1)
        acc = jnp.dot(h1cat, w2_ref[...], preferred_element_type=jnp.float32)
        h2_scr[...] = jnp.maximum(acc + b2_ref[...], 0.0)          # (332, C2)

        # pool pairs and pack two adjacent pooled positions per 128-lane row
        a0 = h2_scr[pl.ds(0, CHUNK_OUT, stride=4), :]
        a1 = h2_scr[pl.ds(1, CHUNK_OUT, stride=4), :]
        a2 = h2_scr[pl.ds(2, CHUNK_OUT, stride=4), :]
        a3 = h2_scr[pl.ds(3, CHUNK_OUT, stride=4), :]
        packed = jnp.concatenate(
            [jnp.maximum(a0, a1), jnp.maximum(a2, a3)], axis=1)    # (83, 128)
        out_ref[0, c] = packed


def conv_pool(x_lc, w1_kc, b1, w2_flat, b2):
    B = x_lc.shape[0]
    return pl.pallas_call(
        _conv_pool_kernel,
        out_shape=jax.ShapeDtypeStruct((B, N_CHUNK, CHUNK_OUT, 2 * C2),
                                       jnp.float32),
        grid_spec=pltpu.PrefetchScalarGridSpec(
            num_scalar_prefetch=0,
            grid=(B,),
            in_specs=[
                pl.BlockSpec((1, L_IN, 1), lambda b: (b, 0, 0)),
                pl.BlockSpec((K, C1), lambda b: (0, 0)),
                pl.BlockSpec((1, C1), lambda b: (0, 0)),
                pl.BlockSpec((K * C1, C2), lambda b: (0, 0)),
                pl.BlockSpec((1, C2), lambda b: (0, 0)),
            ],
            out_specs=pl.BlockSpec((1, N_CHUNK, CHUNK_OUT, 2 * C2),
                                   lambda b: (b, 0, 0, 0)),
            scratch_shapes=[pltpu.VMEM((L1, C1), jnp.float32),
                            pltpu.VMEM((CHUNK_L2, C2), jnp.float32)],
        ),
        compiler_params=pltpu.CompilerParams(
            dimension_semantics=("parallel",)),
    )(x_lc, w1_kc, b1, w2_flat, b2)


# ------------------------------ fc1 + fc2 kernel ------------------------------
def _fc_kernel(x_ref, w1_ref, b1_ref, w2_ref, b2_ref, out_ref, acc_ref):
    k = pl.program_id(0)

    @pl.when(k == 0)
    def _():
        acc_ref[...] = jnp.zeros_like(acc_ref)

    acc_ref[...] += jnp.dot(x_ref[...], w1_ref[...],
                            preferred_element_type=jnp.float32)

    @pl.when(k == pl.num_programs(0) - 1)
    def _():
        h = jnp.maximum(acc_ref[...] + b1_ref[...], 0.0)        # relu(fc1)
        out_ref[...] = (jnp.dot(h, w2_ref[...],
                                preferred_element_type=jnp.float32)
                        + b2_ref[...])                          # fc2


def fc_head(x_flat, w1t, b1, w2t, b2):
    # w1t is the pre-transposed + pre-permuted (FC_IN, FC_HID) fc1 weight.
    B = x_flat.shape[0]
    return pl.pallas_call(
        _fc_kernel,
        out_shape=jax.ShapeDtypeStruct((B, FC_OUT), jnp.float32),
        grid_spec=pltpu.PrefetchScalarGridSpec(
            num_scalar_prefetch=0,
            grid=(NK,),
            in_specs=[
                pl.BlockSpec((B, TK), lambda k: (0, k)),
                pl.BlockSpec((TK, FC_HID), lambda k: (k, 0)),
                pl.BlockSpec((1, FC_HID), lambda k: (0, 0)),
                pl.BlockSpec((FC_HID, FC_OUT), lambda k: (0, 0)),
                pl.BlockSpec((1, FC_OUT), lambda k: (0, 0)),
            ],
            out_specs=pl.BlockSpec((B, FC_OUT), lambda k: (0, 0)),
            scratch_shapes=[pltpu.VMEM((B, FC_HID), jnp.float32)],
        ),
        compiler_params=pltpu.CompilerParams(
            dimension_semantics=("arbitrary",),
            # actual need ~11 MiB (double-buffered 5.4 MiB weight tiles);
            # 32 MiB gives headroom on v5e (16 MiB default scoped limit) and
            # stays well under v7x's 64 MiB physical VMEM.
            vmem_limit_bytes=32 * 1024 * 1024),
    )(x_flat, w1t, b1, w2t, b2)


# --------------------- one-time parameter layout preparation ------------------
def prepare_params(p):
    """Done ONCE (not per forward call): all transposes/permutations live here."""
    w1_kc = jnp.transpose(p['w_conv1'][:, 0, :], (1, 0))                # (K, C1)
    b1c = p['b_conv1'].reshape(1, C1)
    # conv2 weight flattened for the fused matmul: row index = k*C1 + cin
    w2_flat = jnp.transpose(p['w_conv2'], (2, 1, 0)).reshape(K * C1, C2)
    b2c = p['b_conv2'].reshape(1, C2)
    # fc1: torch layout (FC_HID, FC_IN) with feature = c*L_POOL + l  ->
    #      (FC_IN, FC_HID) with row index l*C2 + c (matches kernel flat order)
    wfc1 = p['w_fc1'].reshape(FC_HID, C2, L_POOL)
    wfc1 = jnp.transpose(wfc1, (2, 1, 0)).reshape(FC_IN, FC_HID)
    bfc1 = p['b_fc1'].reshape(1, FC_HID)
    wfc2 = jnp.transpose(p['w_fc2'], (1, 0))                            # (128, 1)
    bfc2 = p['b_fc2'].reshape(1, FC_OUT)
    return {'w1': w1_kc, 'b1': b1c, 'w2': w2_flat, 'b2': b2c,
            'wfc1': wfc1, 'bfc1': bfc1, 'wfc2': wfc2, 'bfc2': bfc2}


# ------------------------------- glue / wrapper -------------------------------
def cnn_forward(x, prep):
    """x: (B, 1, L_IN) float32, PyTorch NCL layout. Returns (B, 1)."""
    B = x.shape[0]
    x_lc = x.reshape(B, L_IN, 1)                 # free: middle dim has size 1
    pooled = conv_pool(x_lc, prep['w1'], prep['b1'],
                       prep['w2'], prep['b2'])   # (B, 3, 83, 128)
    flat = pooled.reshape(B, FC_IN)              # free: already l*C2+c order
    return fc_head(flat, prep['wfc1'], prep['bfc1'], prep['wfc2'], prep['bfc2'])


# ------------------------- deterministic parameter init -----------------------
def init_params(key):
    ks = jax.random.split(key, 8)

    def u(k, shape, fan_in):
        b = 1.0 / jnp.sqrt(jnp.float32(fan_in))
        return jax.random.uniform(k, shape, jnp.float32, -b, b)

    return {
        'w_conv1': u(ks[0], (C1, 1, K), 1 * K),     # torch conv1 weight layout
        'b_conv1': u(ks[1], (C1,), 1 * K),
        'w_conv2': u(ks[2], (C2, C1, K), C1 * K),
        'b_conv2': u(ks[3], (C2,), C1 * K),
        'w_fc1':   u(ks[4], (FC_HID, FC_IN), FC_IN),
        'b_fc1':   u(ks[5], (FC_HID,), FC_IN),
        'w_fc2':   u(ks[6], (FC_OUT, FC_HID), FC_HID),
        'b_fc2':   u(ks[7], (FC_OUT,), FC_HID),
    }


# ------------------------------- pure-JAX reference ---------------------------
def reference_forward(x, p):
    B = x.shape[0]
    x0 = x[:, 0, :]                                             # (B, L_IN)
    h1 = sum(x0[:, None, k:k + L1] * p['w_conv1'][None, :, 0, k, None]
             for k in range(K)) + p['b_conv1'][None, :, None]
    h1 = jnp.maximum(h1, 0.0)                                   # (B, C1, L1)
    h2 = sum(jnp.einsum('bcl,oc->bol', h1[:, :, k:k + L2],
                        p['w_conv2'][:, :, k]) for k in range(K))
    h2 = jnp.maximum(h2 + p['b_conv2'][None, :, None], 0.0)     # (B, C2, L2)
    pooled = jnp.max(h2.reshape(B, C2, L_POOL, 2), axis=-1)
    flat = pooled.reshape(B, FC_IN)
    h = jnp.maximum(flat @ p['w_fc1'].T + p['b_fc1'], 0.0)
    return h @ p['w_fc2'].T + p['b_fc2']


if __name__ == "__main__":
    key = jax.random.PRNGKey(0)
    pkey, xkey = jax.random.split(key)
    params = init_params(pkey)
    prep = prepare_params(params)        # one-time layout prep, outside forward
    x = jax.random.normal(xkey, (2, 1, L_IN), dtype=jnp.float32)

    fwd = jax.jit(cnn_forward)
    out = jax.block_until_ready(fwd(x, prep))
    ref = jax.block_until_ready(reference_forward(x, params))

    assert out.shape == (2, 1), out.shape
    assert jnp.allclose(out, ref, atol=1e-3, rtol=1e-3), (out, ref)
    print("KERNEL_OK")
</pallas_src>

<mosaic_0001>
module attributes {stable_mosaic.version = 11 : i64} {
  func.func @_conv_pool_kernel(%arg0: i32, %arg1: memref<1x1000x1xf32, #tpu.memory_space<vmem>>, %arg2: memref<3x32xf32, #tpu.memory_space<vmem>>, %arg3: memref<1x32xf32, #tpu.memory_space<vmem>>, %arg4: memref<96x64xf32, #tpu.memory_space<vmem>>, %arg5: memref<1x64xf32, #tpu.memory_space<vmem>>, %arg6: memref<1x3x83x128xf32, #tpu.memory_space<vmem>>, %arg7: memref<998x32xf32, #tpu.memory_space<vmem>>, %arg8: memref<332x64xf32, #tpu.memory_space<vmem>>) attributes {dimension_semantics = [#tpu.dimension_semantics<parallel>], iteration_bounds = array<i64: 2>, scalar_prefetch = 0 : i64, scratch_operands = 2 : i64, tpu.core_type = #tpu.core_type<tc>, window_params = [{transform_indices = @transform_0, window_bounds = array<i64: 1, 1000, 1>}, {pipeline_mode = #tpu.pipeline_mode<synchronous>, transform_indices = @transform_1, window_bounds = array<i64: 3, 32>}, {pipeline_mode = #tpu.pipeline_mode<synchronous>, transform_indices = @transform_2, window_bounds = array<i64: 1, 32>}, {pipeline_mode = #tpu.pipeline_mode<synchronous>, transform_indices = @transform_3, window_bounds = array<i64: 96, 64>}, {pipeline_mode = #tpu.pipeline_mode<synchronous>, transform_indices = @transform_4, window_bounds = array<i64: 1, 64>}, {transform_indices = @transform_5, window_bounds = array<i64: 1, 3, 83, 128>}]} {
    %c0 = arith.constant 0 : index
    %c0_0 = arith.constant 0 : index
    %c0_1 = arith.constant 0 : index
    %0 = vector.load %arg1[%c0, %c0_0, %c0_1] : memref<1x1000x1xf32, #tpu.memory_space<vmem>>, vector<1x1000x1xf32>
    %1 = vector.shape_cast %0 : vector<1x1000x1xf32> to vector<1000x1xf32>
    %2 = vector.shape_cast %1 : vector<1000x1xf32> to vector<1000x1xf32>
    %3 = vector.broadcast %2 : vector<1000x1xf32> to vector<1000x32xf32>
    %c0_2 = arith.constant 0 : index
    %c0_3 = arith.constant 0 : index
    %4 = vector.load %arg2[%c0_2, %c0_3] : memref<3x32xf32, #tpu.memory_space<vmem>>, vector<3x32xf32>
    %5 = vector.extract_strided_slice %3 {offsets = [0, 0], sizes = [998, 32], strides = [1, 1]} : vector<1000x32xf32> to vector<998x32xf32>
    %6 = vector.extract_strided_slice %4 {offsets = [0, 0], sizes = [1, 32], strides = [1, 1]} : vector<3x32xf32> to vector<1x32xf32>
    %7 = vector.broadcast %6 : vector<1x32xf32> to vector<998x32xf32>
    %8 = arith.mulf %5, %7 : vector<998x32xf32>
    %9 = vector.extract_strided_slice %3 {offsets = [1, 0], sizes = [998, 32], strides = [1, 1]} : vector<1000x32xf32> to vector<998x32xf32>
    %10 = vector.extract_strided_slice %4 {offsets = [1, 0], sizes = [1, 32], strides = [1, 1]} : vector<3x32xf32> to vector<1x32xf32>
    %11 = vector.broadcast %10 : vector<1x32xf32> to vector<998x32xf32>
    %12 = arith.mulf %9, %11 : vector<998x32xf32>
    %13 = arith.addf %8, %12 : vector<998x32xf32>
    %14 = vector.extract_strided_slice %3 {offsets = [2, 0], sizes = [998, 32], strides = [1, 1]} : vector<1000x32xf32> to vector<998x32xf32>
    %15 = vector.extract_strided_slice %4 {offsets = [2, 0], sizes = [1, 32], strides = [1, 1]} : vector<3x32xf32> to vector<1x32xf32>
    %16 = vector.broadcast %15 : vector<1x32xf32> to vector<998x32xf32>
    %17 = arith.mulf %14, %16 : vector<998x32xf32>
    %18 = arith.addf %13, %17 : vector<998x32xf32>
    %c0_4 = arith.constant 0 : index
    %c0_5 = arith.constant 0 : index
    %19 = vector.load %arg3[%c0_4, %c0_5] : memref<1x32xf32, #tpu.memory_space<vmem>>, vector<1x32xf32>
    %20 = vector.broadcast %19 : vector<1x32xf32> to vector<998x32xf32>
    %21 = arith.addf %18, %20 : vector<998x32xf32>
    %cst = arith.constant 0.000000e+00 : f32
    %22 = vector.broadcast %cst : f32 to vector<998x32xf32>
    %23 = arith.maximumf %21, %22 : vector<998x32xf32>
    %c0_6 = arith.constant 0 : index
    %c0_7 = arith.constant 0 : index
    %24 = vector.load %arg7[%c0_6, %c0_7] : memref<998x32xf32, #tpu.memory_space<vmem>>, vector<998x32xf32>
    tpu.vector_store %arg7[%c0_6, %c0_7], %23 {strides = array<i32>} : memref<998x32xf32, #tpu.memory_space<vmem>>, vector<998x32xf32>,
    %c0_i32 = arith.constant 0 : i32
    %c3_i32 = arith.constant 3 : i32
    %25 = arith.addi %c0_i32, %c3_i32 : i32
    %c1_i32 = arith.constant 1 : i32
    scf.for %arg9 = %c0_i32 to %25 step %c1_i32  : i32 {
      %c1_i32_9 = arith.constant 1 : i32
      %26 = arith.muli %arg9, %c1_i32_9 : i32
      %c0_i32_10 = arith.constant 0 : i32
      %27 = arith.addi %c0_i32_10, %26 : i32
      %c332_i32 = arith.constant 332 : i32
      %28 = arith.muli %27, %c332_i32 : i32
      %29 = tpu.assume_multiple %28, 4 : i32
      %30 = arith.index_cast %29 : i32 to index
      %c0_11 = arith.constant 0 : index
      %31 = vector.load %arg7[%30, %c0_11] : memref<998x32xf32, #tpu.memory_space<vmem>>, vector<334x32xf32>
      %32 = vector.extract_strided_slice %31 {offsets = [0, 0], sizes = [332, 32], strides = [1, 1]} : vector<334x32xf32> to vector<332x32xf32>
      %33 = vector.extract_strided_slice %31 {offsets = [1, 0], sizes = [332, 32], strides = [1, 1]} : vector<334x32xf32> to vector<332x32xf32>
      %34 = vector.extract_strided_slice %31 {offsets = [2, 0], sizes = [332, 32], strides = [1, 1]} : vector<334x32xf32> to vector<332x32xf32>
      %35 = tpu.concatenate %32, %33, %34 in 1 : vector<332x32xf32>, vector<332x32xf32>, vector<332x32xf32> -> vector<332x96xf32>
      %c0_12 = arith.constant 0 : index
      %c0_13 = arith.constant 0 : index
      %36 = vector.load %arg4[%c0_12, %c0_13] : memref<96x64xf32, #tpu.memory_space<vmem>>, vector<96x64xf32>
      %cst_14 = arith.constant dense<0.000000e+00> : vector<332x64xf32>
      %37 = tpu.matmul %35, %36, %cst_14 {dimension_numbers = #tpu.dot_dimension_numbers<[1], [0], [0], [1], [0, 0, 1, 1], [], []>} : vector<332x96xf32>, vector<96x64xf32>, vector<332x64xf32> -> vector<332x64xf32>
      %c0_15 = arith.constant 0 : index
      %c0_16 = arith.constant 0 : index
      %38 = vector.load %arg5[%c0_15, %c0_16] : memref<1x64xf32, #tpu.memory_space<vmem>>, vector<1x64xf32>
      %39 = vector.broadcast %38 : vector<1x64xf32> to vector<332x64xf32>
      %40 = arith.addf %37, %39 : vector<332x64xf32>
      %cst_17 = arith.constant 0.000000e+00 : f32
      %41 = vector.broadcast %cst_17 : f32 to vector<332x64xf32>
      %42 = arith.maximumf %40, %41 : vector<332x64xf32>
      %c0_18 = arith.constant 0 : index
      %c0_19 = arith.constant 0 : index
      %43 = vector.load %arg8[%c0_18, %c0_19] : memref<332x64xf32, #tpu.memory_space<vmem>>, vector<332x64xf32>
      tpu.vector_store %arg8[%c0_18, %c0_19], %42 {strides = array<i32>} : memref<332x64xf32, #tpu.memory_space<vmem>>, vector<332x64xf32>,
      %c0_20 = arith.constant 0 : index
      %c0_21 = arith.constant 0 : index
      %44 = tpu.strided_load %arg8[%c0_20, %c0_21] {strides = array<i32: 4, 1>} : memref<332x64xf32, #tpu.memory_space<vmem>>, vector<83x64xf32>
      %c1 = arith.constant 1 : index
      %c0_22 = arith.constant 0 : index
      %45 = tpu.strided_load %arg8[%c1, %c0_22] {strides = array<i32: 4, 1>} : memref<332x64xf32, #tpu.memory_space<vmem>>, vector<83x64xf32>
      %c2 = arith.constant 2 : index
      %c0_23 = arith.constant 0 : index
      %46 = tpu.strided_load %arg8[%c2, %c0_23] {strides = array<i32: 4, 1>} : memref<332x64xf32, #tpu.memory_space<vmem>>, vector<83x64xf32>
      %c3 = arith.constant 3 : index
      %c0_24 = arith.constant 0 : index
      %47 = tpu.strided_load %arg8[%c3, %c0_24] {strides = array<i32: 4, 1>} : memref<332x64xf32, #tpu.memory_space<vmem>>, vector<83x64xf32>
      %48 = arith.maximumf %44, %45 : vector<83x64xf32>
      %49 = arith.maximumf %46, %47 : vector<83x64xf32>
      %50 = tpu.concatenate %48, %49 in 1 : vector<83x64xf32>, vector<83x64xf32> -> vector<83x128xf32>
      %c0_25 = arith.constant 0 : index
      %51 = arith.index_cast %27 : i32 to index
      %c0_26 = arith.constant 0 : index
      %c0_27 = arith.constant 0 : index
      %52 = vector.load %arg6[%c0_25, %51, %c0_26, %c0_27] : memref<1x3x83x128xf32, #tpu.memory_space<vmem>>, vector<1x1x83x128xf32>
      %53 = vector.shape_cast %52 : vector<1x1x83x128xf32> to vector<83x128xf32>
      %54 = vector.shape_cast %50 : vector<83x128xf32> to vector<1x1x83x128xf32>
      tpu.vector_store %arg6[%c0_25, %51, %c0_26, %c0_27], %54 {strides = array<i32>} : memref<1x3x83x128xf32, #tpu.memory_space<vmem>>, vector<1x1x83x128xf32>,
    }
    %c3_i32_8 = arith.constant 3 : i32
    return
  }
  func.func @transform_0(%arg0: i32) -> (i32, i32, i32) {
    %c0_i32 = arith.constant 0 : i32
    %c0_i32_0 = arith.constant 0 : i32
    %c0_i32_1 = arith.constant 0 : i32
    return %arg0, %c0_i32, %c0_i32_0 : i32, i32, i32
  }
  func.func @transform_1(%arg0: i32) -> (i32, i32) {
    %c0_i32 = arith.constant 0 : i32
    %c0_i32_0 = arith.constant 0 : i32
    %c0_i32_1 = arith.constant 0 : i32
    return %c0_i32, %c0_i32_0 : i32, i32
  }
  func.func @transform_2(%arg0: i32) -> (i32, i32) {
    %c0_i32 = arith.constant 0 : i32
    %c0_i32_0 = arith.constant 0 : i32
    %c0_i32_1 = arith.constant 0 : i32
    return %c0_i32, %c0_i32_0 : i32, i32
  }
  func.func @transform_3(%arg0: i32) -> (i32, i32) {
    %c0_i32 = arith.constant 0 : i32
    %c0_i32_0 = arith.constant 0 : i32
    %c0_i32_1 = arith.constant 0 : i32
    return %c0_i32, %c0_i32_0 : i32, i32
  }
  func.func @transform_4(%arg0: i32) -> (i32, i32) {
    %c0_i32 = arith.constant 0 : i32
    %c0_i32_0 = arith.constant 0 : i32
    %c0_i32_1 = arith.constant 0 : i32
    return %c0_i32, %c0_i32_0 : i32, i32
  }
  func.func @transform_5(%arg0: i32) -> (i32, i32, i32, i32) {
    %c0_i32 = arith.constant 0 : i32
    %c0_i32_0 = arith.constant 0 : i32
    %c0_i32_1 = arith.constant 0 : i32
    %c0_i32_2 = arith.constant 0 : i32
    return %arg0, %c0_i32, %c0_i32_0, %c0_i32_1 : i32, i32, i32, i32
  }
}

module attributes {stable_mosaic.version = 11 : i64} {
  func.func @_fc_kernel(%arg0: i32, %arg1: memref<2x10624xf32, #tpu.memory_space<vmem>>, %arg2: memref<10624x128xf32, #tpu.memory_space<vmem>>, %arg3: memref<1x128xf32, #tpu.memory_space<vmem>>, %arg4: memref<128x1xf32, #tpu.memory_space<vmem>>, %arg5: memref<1x1xf32, #tpu.memory_space<vmem>>, %arg6: memref<2x1xf32, #tpu.memory_space<vmem>>, %arg7: memref<2x128xf32, #tpu.memory_space<vmem>>) attributes {dimension_semantics = [#tpu.dimension_semantics<arbitrary>], iteration_bounds = array<i64: 3>, scalar_prefetch = 0 : i64, scratch_operands = 1 : i64, tpu.core_type = #tpu.core_type<tc>, window_params = [{transform_indices = @transform_0, window_bounds = array<i64: 2, 10624>}, {transform_indices = @transform_1, window_bounds = array<i64: 10624, 128>}, {pipeline_mode = #tpu.pipeline_mode<synchronous>, transform_indices = @transform_2, window_bounds = array<i64: 1, 128>}, {pipeline_mode = #tpu.pipeline_mode<synchronous>, transform_indices = @transform_3, window_bounds = array<i64: 128, 1>}, {pipeline_mode = #tpu.pipeline_mode<synchronous>, transform_indices = @transform_4, window_bounds = array<i64: 1, 1>}, {pipeline_mode = #tpu.pipeline_mode<synchronous>, transform_indices = @transform_5, window_bounds = array<i64: 2, 1>}]} {
    %c0_i32 = arith.constant 0 : i32
    %0 = arith.cmpi eq, %arg0, %c0_i32 : i32
    %1 = arith.extui %0 : i1 to i32
    %c0_i32_0 = arith.constant 0 : i32
    %2 = arith.cmpi ne, %1, %c0_i32_0 : i32
    scf.if %2 {
      %cst_9 = arith.constant 0.000000e+00 : f32
      %12 = vector.broadcast %cst_9 : f32 to vector<2x128xf32>
      %c0_10 = arith.constant 0 : index
      %c0_11 = arith.constant 0 : index
      %13 = vector.load %arg7[%c0_10, %c0_11] : memref<2x128xf32, #tpu.memory_space<vmem>>, vector<2x128xf32>
      tpu.vector_store %arg7[%c0_10, %c0_11], %12 {strides = array<i32>} : memref<2x128xf32, #tpu.memory_space<vmem>>, vector<2x128xf32>,
    } else {
    }
    %c0 = arith.constant 0 : index
    %c0_1 = arith.constant 0 : index
    %3 = vector.load %arg7[%c0, %c0_1] : memref<2x128xf32, #tpu.memory_space<vmem>>, vector<2x128xf32>
    %c0_2 = arith.constant 0 : index
    %c0_3 = arith.constant 0 : index
    %4 = vector.load %arg1[%c0_2, %c0_3] : memref<2x10624xf32, #tpu.memory_space<vmem>>, vector<2x10624xf32>
    %c0_4 = arith.constant 0 : index
    %c0_5 = arith.constant 0 : index
    %5 = vector.load %arg2[%c0_4, %c0_5] : memref<10624x128xf32, #tpu.memory_space<vmem>>, vector<10624x128xf32>
    %cst = arith.constant dense<0.000000e+00> : vector<2x128xf32>
    %6 = tpu.matmul %4, %5, %cst {dimension_numbers = #tpu.dot_dimension_numbers<[1], [0], [0], [1], [0, 0, 1, 1], [], []>} : vector<2x10624xf32>, vector<10624x128xf32>, vector<2x128xf32> -> vector<2x128xf32>
    %7 = arith.addf %3, %6 : vector<2x128xf32>
    %c0_6 = arith.constant 0 : index
    %c0_7 = arith.constant 0 : index
    %8 = vector.load %arg7[%c0_6, %c0_7] : memref<2x128xf32, #tpu.memory_space<vmem>>, vector<2x128xf32>
    tpu.vector_store %arg7[%c0_6, %c0_7], %7 {strides = array<i32>} : memref<2x128xf32, #tpu.memory_space<vmem>>, vector<2x128xf32>,
    %c2_i32 = arith.constant 2 : i32
    %9 = arith.cmpi eq, %arg0, %c2_i32 : i32
    %10 = arith.extui %9 : i1 to i32
    %c0_i32_8 = arith.constant 0 : i32
    %11 = arith.cmpi ne, %10, %c0_i32_8 : i32
    scf.if %11 {
      %c0_9 = arith.constant 0 : index
      %c0_10 = arith.constant 0 : index
      %12 = vector.load %arg7[%c0_9, %c0_10] : memref<2x128xf32, #tpu.memory_space<vmem>>, vector<2x128xf32>
      %c0_11 = arith.constant 0 : index
      %c0_12 = arith.constant 0 : index
      %13 = vector.load %arg3[%c0_11, %c0_12] : memref<1x128xf32, #tpu.memory_space<vmem>>, vector<1x128xf32>
      %14 = vector.broadcast %13 : vector<1x128xf32> to vector<2x128xf32>
      %15 = arith.addf %12, %14 : vector<2x128xf32>
      %cst_13 = arith.constant 0.000000e+00 : f32
      %16 = vector.broadcast %cst_13 : f32 to vector<2x128xf32>
      %17 = arith.maximumf %15, %16 : vector<2x128xf32>
      %c0_14 = arith.constant 0 : index
      %c0_15 = arith.constant 0 : index
      %18 = vector.load %arg4[%c0_14, %c0_15] : memref<128x1xf32, #tpu.memory_space<vmem>>, vector<128x1xf32>
      %cst_16 = arith.constant dense<0.000000e+00> : vector<2x1xf32>
      %19 = tpu.matmul %17, %18, %cst_16 {dimension_numbers = #tpu.dot_dimension_numbers<[1], [0], [0], [1], [0, 0, 1, 1], [], []>} : vector<2x128xf32>, vector<128x1xf32>, vector<2x1xf32> -> vector<2x1xf32>
      %c0_17 = arith.constant 0 : index
      %c0_18 = arith.constant 0 : index
      %20 = vector.load %arg5[%c0_17, %c0_18] : memref<1x1xf32, #tpu.memory_space<vmem>>, vector<1x1xf32>
      %21 = vector.broadcast %20 : vector<1x1xf32> to vector<2x1xf32>
      %22 = arith.addf %19, %21 : vector<2x1xf32>
      %c0_19 = arith.constant 0 : index
      %c0_20 = arith.constant 0 : index
      %23 = vector.load %arg6[%c0_19, %c0_20] : memref<2x1xf32, #tpu.memory_space<vmem>>, vector<2x1xf32>
      tpu.vector_store %arg6[%c0_19, %c0_20], %22 {strides = array<i32>} : memref<2x1xf32, #tpu.memory_space<vmem>>, vector<2x1xf32>,
    } else {
    }
    return
  }
  func.func @transform_0(%arg0: i32) -> (i32, i32) {
    %c0_i32 = arith.constant 0 : i32
    %c0_i32_0 = arith.constant 0 : i32
    return %c0_i32, %arg0 : i32, i32
  }
  func.func @transform_1(%arg0: i32) -> (i32, i32) {
    %c0_i32 = arith.constant 0 : i32
    %c0_i32_0 = arith.constant 0 : i32
    return %arg0, %c0_i32 : i32, i32
  }
  func.func @transform_2(%arg0: i32) -> (i32, i32) {
    %c0_i32 = arith.constant 0 : i32
    %c0_i32_0 = arith.constant 0 : i32
    %c0_i32_1 = arith.constant 0 : i32
    return %c0_i32, %c0_i32_0 : i32, i32
  }
  func.func @transform_3(%arg0: i32) -> (i32, i32) {
    %c0_i32 = arith.constant 0 : i32
    %c0_i32_0 = arith.constant 0 : i32
    %c0_i32_1 = arith.constant 0 : i32
    return %c0_i32, %c0_i32_0 : i32, i32
  }
  func.func @transform_4(%arg0: i32) -> (i32, i32) {
    %c0_i32 = arith.constant 0 : i32
    %c0_i32_0 = arith.constant 0 : i32
    %c0_i32_1 = arith.constant 0 : i32
    return %c0_i32, %c0_i32_0 : i32, i32
  }
  func.func @transform_5(%arg0: i32) -> (i32, i32) {
    %c0_i32 = arith.constant 0 : i32
    %c0_i32_0 = arith.constant 0 : i32
    %c0_i32_1 = arith.constant 0 : i32
    return %c0_i32, %c0_i32_0 : i32, i32
  }
}

</mosaic_0001>

<bundles_post_ra>
// kernel: cnn_forward.2
= control target key start
LH: loop header
LB: loop body
LE: loop exit
PB: predicated region body
PF: predicated region fallthrough
CT: control target
= control target key end

     0   :  { %10 = vsyncpa [#allocation5], 0  ;;  %s7163_s0 = inlined_call_operand.vmem [shape: f32[2,1000,1], index: 0, kind: input, shape index: {}]   ;;  %s7164_s1 = inlined_call_operand.hbm [shape: f32[3,32], index: 1, kind: input, shape index: {}]   ;;  %s7165_s2 = inlined_call_operand.hbm [shape: f32[1,32], index: 2, kind: input, shape index: {}]   ;;  %s7166_s3 = inlined_call_operand.vmem [shape: f32[96,64], index: 3, kind: input, shape index: {}]   ;;  %s7167_s4 = inlined_call_operand.hbm [shape: f32[1,64], index: 4, kind: input, shape index: {}]   ;;  %s7168_s5 = inlined_call_operand.vmem [shape: f32[2,3,83,128], index: 5, kind: output, shape index: {}]  }
   0x1   :  { %11 = vsyncpa [#allocation7], 0  ;;  %s4570_s18 = smov 0  }
   0x2 LB: > { %s182_s21 = sshll.u32 %s7165_s2, 4  ;;  %s4579_s22 = sadd.s32 4294967295, %s4528_s18   ;;  %s4528_s18 = sphi %s4570_s18, %s17_s18   ;;  %s183_s21 = int_to_ptr.hbm [resolvable:$true] %s182_s21 }
   0x3   : > { %p4269_p0 = scmp.ge.s32.totalorder %s4528_s18, 1  ;;  %p158_p1 = scmp.lt.s32.totalorder %s4528_s18, 3 }
   0x4   : > { %p4384_p2 = scmp.eq.s32.totalorder %s4579_s22, 0  ;;  %s4534_s24 = smov [#allocation6]  }
   0x5   : > { %p4584_p3 = pnand %p4269_p0, %p158_p1  ;;  %s184_s25 = sshll.u32 %s4534_s24, 4  ;;  %s185_s25 = int_to_ptr.vmem [resolvable:$true] %s184_s25 }
   0x6   : > { %s170_s28 = sshll.u32 %s7164_s1, 4  ;;  %s197_s6 = sshll.u32 %s7167_s4, 4  ;;  %s171_s28 = int_to_ptr.hbm [resolvable:$true] %s170_s28  ;;  %s198_s6 = int_to_ptr.hbm [resolvable:$true] %s197_s6 }
   0x7   : > { %p4374_p4 = pneg %p4584_p3  ;;  %s4535_s7 = smov [#allocation4]  }
   0x8   : > { %s172_s8 = sshll.u32 %s4535_s7, 4  ;;  %s4536_s9 = smov [#allocation8]   ;;  %s173_s8 = int_to_ptr.vmem [resolvable:$true] %s172_s8 }
   0x9   : > { %p4375_p5 = pnand %p4384_p2, %p4374_p4  ;;  %s199_s10 = sshll.u32 %s4536_s9, 4  ;;  %s200_s10 = int_to_ptr.vmem [resolvable:$true] %s199_s10 }
   0xa   : > { %220 = sbr.rel (%p4584_p3) target bundleno = 1108 (0x454), region = 40 }
   0xb   : > { %4380 = dma.hbm_to_vmem [thread:$0]  (!%p4375_p5), %s183_s21, 16, %s185_s25, [#allocation7]  }
   0xc   : > { %4377 = dma.hbm_to_vmem [thread:$0]  (!%p4375_p5), %s171_s28, 64, %s173_s8, [#allocation5]  }
   0xd   : > { %4383 = dma.hbm_to_vmem [thread:$0]  (!%p4375_p5), %s198_s6, 16, %s200_s10, [#allocation7]  }
   0xf   : > { %4519 = dma.done.wait (%p4384_p2), [#allocation5], 64  }
  0x10   : > { %4521 = vsyncadd (%p4384_p2), [#allocation5], 4294967232 }
  0x11   : > { %4523 = dma.done.wait (%p4384_p2), [#allocation7], 32  }
  0x12   : > { %4525 = vsyncadd (%p4384_p2), [#allocation7], 4294967264  ;;  %p259_p6 = scmp.lt.s32.totalorder %s4579_s22, 1  ;;  %v4537_v0 = vmov 0   ;;  %v394_v37 = vld [vmem:[#allocation4] sm:$0x7] }
  0x13   : > { %4414 = vset.pattern.permute.xlu2 %v4537_v0  ;;  %4413 = vset.pattern.permute.xlu1 %v4537_v0  ;;  %v4656_v39 = vperm.slane %v394_v37, 1  ;;  %v4658_v40 = vperm.slane %v394_v37, 2  ;;  %v4669_v46 = vperm.slane %v394_v37, 0  ;;  %vm1397_vm0 = vcmask 1046528   ;;  %v4695_v60 = vld [vmem:[#allocation6] ss:$0 sm:$0xff] }
  0x14   : > { %4412 = vset.pattern.permute.xlu0 %v4537_v0  ;;  %s7171_s22 = smov (!%p259_p6, %s4579_s22), 1  ;;  %vm2148_vm1 = vcmask 1045504   ;;  %vm2902_vm2 = vcmask 261120   ;;  %vm3027_vm3 = vcmask 259072   ;;  %s6352_s20 = smov 0  }
  0x15   : > { %s4360_s11 = smul.u32 1000, %s7171_s22 }
  0x16   : > { %s4361_s12 = smul.u32 264, %s7171_s22 }
  0x17   : > { %s4613_s15 = scalar_lea.vmem %s7163_s0, %s4360_s11 }
  0x18   : > { %s4618_s19 = scalar_lea.vmem %s7168_s5, %s4361_s12  ;;  %v273_v1 = vld [vmem:[%s4613_s15 + $0x20] sm:$0xff]  ;;  %v271_v2 = vld [vmem:[%s4613_s15 + $0x10] sm:$0xff]  ;;  %v274_v4 = vld [vmem:[%s4613_s15 + $0x28] sm:$0xff] }
  0x19   : > { %v269_v3 = vld [vmem:[%s4613_s15] sm:$0xff]  ;;  %417 = vperm.xlu2 %4414, %v273_v1   ;;  %407 = vperm.xlu1 %4413, %v271_v2   ;;  %v272_v5 = vld [vmem:[%s4613_s15 + $0x18] sm:$0xff]  ;;  %v270_v6 = vld [vmem:[%s4613_s15 + $0x8] sm:$0xff] }
  0x1a   : > { %397 = vperm.xlu0 %4412, %v269_v3   ;;  %v277_v7 = vld [vmem:[%s4613_s15 + $0x40] sm:$0xff]  ;;  %v276_v8 = vld [vmem:[%s4613_s15 + $0x38] sm:$0xff]  ;;  %v275_v9 = vld [vmem:[%s4613_s15 + $0x30] sm:$0xff] }
  0x1b   : > { %v280_v10 = vld [vmem:[%s4613_s15 + $0x58] sm:$0xff]  ;;  %v279_v11 = vld [vmem:[%s4613_s15 + $0x50] sm:$0xff]  ;;  %v278_v12 = vld [vmem:[%s4613_s15 + $0x48] sm:$0xff] }
  0x1c   : > { %v283_v13 = vld [vmem:[%s4613_s15 + $0x70] sm:$0xff]  ;;  %v282_v14 = vld [vmem:[%s4613_s15 + $0x68] sm:$0xff]  ;;  %v281_v15 = vld [vmem:[%s4613_s15 + $0x60] sm:$0xff] }
  0x1d   : > { %v286_v16 = vld [vmem:[%s4613_s15 + $0x88] sm:$0xff]  ;;  %v285_v17 = vld [vmem:[%s4613_s15 + $0x80] sm:$0xff]  ;;  %v284_v18 = vld [vmem:[%s4613_s15 + $0x78] sm:$0xff] }
  0x1e   : > { %v289_v19 = vld [vmem:[%s4613_s15 + $0xa0] sm:$0xff]  ;;  %v288_v20 = vld [vmem:[%s4613_s15 + $0x98] sm:$0xff]  ;;  %v287_v21 = vld [vmem:[%s4613_s15 + $0x90] sm:$0xff] }
  0x1f   : > { %v292_v22 = vld [vmem:[%s4613_s15 + $0xb8] sm:$0xff]  ;;  %v291_v23 = vld [vmem:[%s4613_s15 + $0xb0] sm:$0xff]  ;;  %v290_v24 = vld [vmem:[%s4613_s15 + $0xa8] sm:$0xff] }
  0x20   : > { %v295_v25 = vld [vmem:[%s4613_s15 + $0xd0] sm:$0xff]  ;;  %v294_v26 = vld [vmem:[%s4613_s15 + $0xc8] sm:$0xff]  ;;  %v293_v27 = vld [vmem:[%s4613_s15 + $0xc0] sm:$0xff] }
  0x21   : > { %422 = vperm.xlu2 %4414, %v274_v4   ;;  %412 = vperm.xlu1 %4413, %v272_v5   ;;  %v298_v28 = vld [vmem:[%s4613_s15 + $0xe8] sm:$0xff]  ;;  %v297_v29 = vld [vmem:[%s4613_s15 + $0xe0] sm:$0xff]  ;;  %v296_v30 = vld [vmem:[%s4613_s15 + $0xd8] sm:$0xff] }
  0x22   : > { %402 = vperm.xlu0 %4412, %v270_v6   ;;  %v301_v31 = vld [vmem:[%s4613_s15 + $0x100] sm:$0xff]  ;;  %v300_v32 = vld [vmem:[%s4613_s15 + $0xf8] sm:$0xff]  ;;  %v299_v33 = vld [vmem:[%s4613_s15 + $0xf0] sm:$0xff] }
  0x23   : > { %v304_v34 = vld [vmem:[%s4613_s15 + $0x118] sm:$0xff]  ;;  %v303_v35 = vld [vmem:[%s4613_s15 + $0x110] sm:$0xff]  ;;  %v302_v36 = vld [vmem:[%s4613_s15 + $0x108] sm:$0xff] }
  0x24   : > { %v307_v41 = vld [vmem:[%s4613_s15 + $0x130] sm:$0xff]  ;;  %v306_v42 = vld [vmem:[%s4613_s15 + $0x128] sm:$0xff]  ;;  %v305_v43 = vld [vmem:[%s4613_s15 + $0x120] sm:$0xff] }
  0x25   : > { %v310_v55 = vld [vmem:[%s4613_s15 + $0x148] sm:$0xff]  ;;  %v309_v56 = vld [vmem:[%s4613_s15 + $0x140] sm:$0xff]  ;;  %v308_v57 = vld [vmem:[%s4613_s15 + $0x138] sm:$0xff] }
  0x26   : > { %v313_v1 = vld [vmem:[%s4613_s15 + $0x160] sm:$0xff]  ;;  %v312_v2 = vld [vmem:[%s4613_s15 + $0x158] sm:$0xff]  ;;  %v311_v4 = vld [vmem:[%s4613_s15 + $0x150] sm:$0xff] }
  0x27   : > { %v318_v37 = vld [vmem:[%s4613_s15 + $0x188] sm:$0xff] }
  0x29   : > { %437 = vperm.xlu2 %4414, %v277_v7   ;;  %432 = vperm.xlu1 %4413, %v276_v8   ;;  %v316_v8 = vld [vmem:[%s4613_s15 + $0x178] sm:$0xff] }
  0x2a   : > { %427 = vperm.xlu0 %4412, %v275_v9   ;;  %v315_v9 = vld [vmem:[%s4613_s15 + $0x170] sm:$0xff] }
  0x31   : > { %452 = vperm.xlu2 %4414, %v280_v10   ;;  %447 = vperm.xlu1 %4413, %v279_v11   ;;  %v314_v11 = vld [vmem:[%s4613_s15 + $0x168] sm:$0xff] }
  0x32   : > { %442 = vperm.xlu0 %4412, %v278_v12  }
  0x39   : > { %467 = vperm.xlu2 %4414, %v283_v13   ;;  %462 = vperm.xlu1 %4413, %v282_v14  }
  0x3a   : > { %457 = vperm.xlu0 %4412, %v281_v15  }
  0x41   : > { %482 = vperm.xlu2 %4414, %v286_v16   ;;  %477 = vperm.xlu1 %4413, %v285_v17  }
  0x42   : > { %472 = vperm.xlu0 %4412, %v284_v18  }
  0x49   : > { %497 = vperm.xlu2 %4414, %v289_v19   ;;  %492 = vperm.xlu1 %4413, %v288_v20  }
  0x4a   : > { %487 = vperm.xlu0 %4412, %v287_v21  }
  0x51   : > { %512 = vperm.xlu2 %4414, %v292_v22   ;;  %507 = vperm.xlu1 %4413, %v291_v23  }
  0x52   : > { %502 = vperm.xlu0 %4412, %v290_v24  }
  0x59   : > { %527 = vperm.xlu2 %4414, %v295_v25   ;;  %522 = vperm.xlu1 %4413, %v294_v26  }
  0x5a   : > { %517 = vperm.xlu0 %4412, %v293_v27  }
  0x61   : > { %542 = vperm.xlu2 %4414, %v298_v28   ;;  %537 = vperm.xlu1 %4413, %v297_v29  }
  0x62   : > { %532 = vperm.xlu0 %4412, %v296_v30  }
  0x69   : > { %557 = vperm.xlu2 %4414, %v301_v31   ;;  %552 = vperm.xlu1 %4413, %v300_v32   ;;  %v319_v32 = vld [vmem:[%s4613_s15 + $0x190] sm:$0xff] }
  0x6a   : > { %547 = vperm.xlu0 %4412, %v299_v33  }
  0x71   : > { %572 = vperm.xlu2 %4414, %v304_v34   ;;  %567 = vperm.xlu1 %4413, %v303_v35  }
  0x72   : > { %562 = vperm.xlu0 %4412, %v302_v36  }
  0x73   : > { %v418_v38 = vpop.permute.xlu2 %417 }
  0x74   : > { %v4664_v44 = vmul.f32 %v4656_v39, %v418_v38  ;;  %v4667_v45 = vmul.f32 %v4658_v40, %v418_v38  ;;  %v1025_v52 = vmul.f32 %v4669_v46, %v418_v38 }
  0x76   : > { %v1405_v48 = vrot.slane %v4664_v44, 1  ;;  %v2156_v49 = vrot.slane %v4667_v45, 2 }
  0x79   : > { %587 = vperm.xlu2 %4414, %v307_v41   ;;  %582 = vperm.xlu1 %4413, %v306_v42  }
  0x7a   : > { %577 = vperm.xlu0 %4412, %v305_v43  }
  0x7b   : > { %v423_v47 = vpop.permute.xlu2 %422 }
  0x7c   : > { %v4674_v50 = vmul.f32 %v4656_v39, %v423_v47  ;;  %v4677_v51 = vmul.f32 %v4658_v40, %v423_v47  ;;  %v4714_v13 = vmul.f32 %v4669_v46, %v423_v47  ;;  %v317_v47 = vld [vmem:[%s4613_s15 + $0x180] sm:$0xff] }
  0x7e   : > { %v1407_v53 = vrot.slane %v4674_v50, 1  ;;  %v2158_v54 = vrot.slane %v4677_v51, 2 }
  0x80   : > { %v1408_v58 = vsel %vm1397_vm0, %v1405_v48, %v1407_v53  ;;  %v2159_v59 = vsel %vm2148_vm1, %v2156_v49, %v2158_v54 }
  0x81   : > { %v1776_v61 = vadd.f32 %v1408_v58, %v1025_v52  ;;  %602 = vperm.xlu2 %4414, %v310_v55   ;;  %597 = vperm.xlu1 %4413, %v309_v56  }
  0x82   : > { %592 = vperm.xlu0 %4412, %v308_v57  }
  0x83   : > { %v2527_v62 = vadd.f32 %v2159_v59, %v1776_v61  ;;  %v438_v63 = vpop.permute.xlu2 %437 }
  0x84   : > { %v4707_v10 = vmul.f32 %v4656_v39, %v438_v63  ;;  %v4711_v12 = vmul.f32 %v4658_v40, %v438_v63  ;;  %v4717_v14 = vmul.f32 %v4669_v46, %v438_v63 }
  0x85   : > { %v2656_v0 = vadd.f32 %v4695_v60, %v2527_v62 }
  0x86   : > { %v1413_v15 = vrot.slane %v4707_v10, 1  ;;  %v2164_v19 = vrot.slane %v4711_v12, 2 }
  0x87   : > { %v2781_v3 = vmax.f32 %v2656_v0, 0.0 }
  0x89   : > { %2907 = vst.msk [vmem:[#allocation2 + $0x20] sm:$0xff] %vm2902_vm2, %v2781_v3  ;;  %617 = vperm.xlu2 %4414, %v313_v1   ;;  %612 = vperm.xlu1 %4413, %v312_v2  }
  0x8a   : > { %607 = vperm.xlu0 %4412, %v311_v4  }
  0x8b   : > { %v4702_v5 = vpop.permute.xlu2 %452  ;;  %v408_v6 = vpop.permute.xlu1 %407 }
  0x8c   : > { %v398_v7 = vpop.permute.xlu0 %397  ;;  %v1149_v16 = vmul.f32 %v4656_v39, %v408_v6  ;;  %v4726_v20 = vmul.f32 %v4669_v46, %v4702_v5  ;;  %v1900_v21 = vmul.f32 %v4658_v40, %v408_v6  ;;  %v4736_v28 = vmul.f32 %v4656_v39, %v4702_v5 }
  0x8d   : > { %v1147_v22 = vmul.f32 %v4656_v39, %v398_v7  ;;  %v1898_v24 = vmul.f32 %v4658_v40, %v398_v7  ;;  %v1023_v29 = vmul.f32 %v4669_v46, %v408_v6  ;;  %v1021_v30 = vmul.f32 %v4669_v46, %v398_v7 }
  0x8e   : > { %v1401_v33 = vrot.slane %v1149_v16, 1  ;;  %v2152_v38 = vrot.slane %v1900_v21, 2  ;;  %v4761_v45 = vmul.f32 %v4658_v40, %v4702_v5 }
  0x8f   : > { %v1398_v41 = vrot.slane %v1147_v22, 1  ;;  %v2149_v52 = vrot.slane %v1898_v24, 2 }
  0x91   : > { %632 = vperm.xlu2 %4414, %v316_v8   ;;  %627 = vperm.xlu1 %4413, %v315_v9   ;;  %v1419_v9 = vrot.slane %v4736_v28, 1 }
  0x92   : > { %622 = vperm.xlu0 %4412, %v314_v11  }
  0x93   : > { %v4721_v17 = vpop.permute.xlu2 %467  ;;  %v413_v18 = vpop.permute.xlu1 %412 }
  0x94   : > { %v403_v23 = vpop.permute.xlu0 %402  ;;  %v1150_v25 = vmul.f32 %v4656_v39, %v413_v18  ;;  %v1901_v26 = vmul.f32 %v4658_v40, %v413_v18  ;;  %v1024_v42 = vmul.f32 %v4669_v46, %v413_v18  ;;  %v4765_v16 = vmul.f32 %v4656_v39, %v4721_v17 }
  0x95   : > { %v1148_v27 = vmul.f32 %v4656_v39, %v403_v23  ;;  %v1899_v31 = vmul.f32 %v4658_v40, %v403_v23  ;;  %v1022_v57 = vmul.f32 %v4669_v46, %v403_v23  ;;  %v322_v23 = vld [vmem:[%s4613_s15 + $0x1a8] sm:$0xff]  ;;  %v4773_v24 = vmul.f32 %v4658_v40, %v4721_v17 }
  0x96   : > { %v1403_v34 = vrot.slane %v1150_v25, 1  ;;  %v2154_v35 = vrot.slane %v1901_v26, 2 }
  0x97   : > { %v1399_v36 = vrot.slane %v1148_v27, 1  ;;  %v2150_v43 = vrot.slane %v1899_v31, 2  ;;  %v321_v27 = vld [vmem:[%s4613_s15 + $0x1a0] sm:$0xff] }
  0x98   : > { %v1404_v55 = vsel %vm1397_vm0, %v1401_v33, %v1403_v34  ;;  %v1406_v56 = vsel %vm1397_vm0, %v1403_v34, %v1405_v48  ;;  %v2155_v63 = vsel %vm2148_vm1, %v2152_v38, %v2154_v35  ;;  %v2157_v0 = vsel %vm2148_vm1, %v2154_v35, %v2156_v49 }
  0x99   : > { %647 = vperm.xlu2 %4414, %v319_v32   ;;  %v1774_v58 = vadd.f32 %v1404_v55, %v1023_v29  ;;  %v1775_v59 = vadd.f32 %v1406_v56, %v1024_v42  ;;  %v1400_v61 = vsel %vm1397_vm0, %v1398_v41, %v1399_v36  ;;  %v1402_v62 = vsel %vm1397_vm0, %v1399_v36, %v1401_v33  ;;  %v320_v33 = vld [vmem:[%s4613_s15 + $0x198] sm:$0xff] }
  0x9a   : > { %642 = vperm.xlu1 %4413, %v318_v37   ;;  %v1772_v1 = vadd.f32 %v1400_v61, %v1021_v30  ;;  %v1773_v44 = vadd.f32 %v1402_v62, %v1022_v57  ;;  %637 = vperm.xlu0 %4412, %v317_v47   ;;  %v2151_v6 = vsel %vm2148_vm1, %v2149_v52, %v2150_v43  ;;  %v1425_v52 = vrot.slane %v4765_v16, 1 }
  0x9b   : > { %v483_v48 = vpop.permute.xlu2 %482  ;;  %v433_v2 = vpop.permute.xlu1 %432  ;;  %v2525_v3 = vadd.f32 %v2155_v63, %v1774_v58  ;;  %v2526_v4 = vadd.f32 %v2157_v0, %v1775_v59  ;;  %v2153_v7 = vsel %vm2148_vm1, %v2150_v43, %v2152_v38  ;;  %v2170_v38 = vrot.slane %v4761_v45, 2 }
  0x9c   : > { %v428_v8 = vpop.permute.xlu0 %427  ;;  %v2523_v49 = vadd.f32 %v2151_v6, %v1772_v1  ;;  %v2524_v11 = vadd.f32 %v2153_v7, %v1773_v44  ;;  %v1154_v22 = vmul.f32 %v4656_v39, %v433_v2  ;;  %v1905_v26 = vmul.f32 %v4658_v40, %v433_v2 }
  0x9d   : > { %v2654_v18 = vadd.f32 %v4695_v60, %v2525_v3  ;;  %v2655_v21 = vadd.f32 %v4695_v60, %v2526_v4  ;;  %v1028_v31 = vmul.f32 %v4669_v46, %v433_v2  ;;  %v1153_v37 = vmul.f32 %v4656_v39, %v428_v8 }
  0x9e   : > { %v2652_v5 = vadd.f32 %v4695_v60, %v2523_v49  ;;  %v2653_v25 = vadd.f32 %v4695_v60, %v2524_v11  ;;  %v1411_v32 = vrot.slane %v1154_v22, 1  ;;  %v2162_v36 = vrot.slane %v1905_v26, 2 }
  0x9f   : > { %v2779_v29 = vmax.f32 %v2654_v18, 0.0  ;;  %v2780_v30 = vmax.f32 %v2655_v21, 0.0  ;;  %v4785_v41 = vmul.f32 %v4656_v39, %v483_v48  ;;  %v1904_v43 = vmul.f32 %v4658_v40, %v428_v8  ;;  %v324_v18 = vld [vmem:[%s4613_s15 + $0x1b8] sm:$0xff] }
  0xa0   : > { %v2777_v34 = vmax.f32 %v2652_v5, 0.0  ;;  %v2778_v35 = vmax.f32 %v2653_v25, 0.0  ;;  %v1414_v42 = vsel %vm1397_vm0, %v1411_v32, %v1413_v15  ;;  %v4793_v47 = vmul.f32 %v4669_v46, %v4721_v17 }
  0xa1   : > { %662 = vperm.xlu2 %4414, %v322_v23   ;;  %2905 = vst.msk [vmem:[#allocation2 + $0x10] sm:$0xff] %vm2902_vm2, %v2779_v29  ;;  %v1779_v55 = vadd.f32 %v1414_v42, %v1028_v31  ;;  %v1409_v56 = vrot.slane %v1153_v37, 1  ;;  %v4799_v59 = vmul.f32 %v4658_v40, %v483_v48  ;;  %v2165_v17 = vsel %vm2148_vm1, %v2162_v36, %v2164_v19 }
  0xa2   : > { %657 = vperm.xlu1 %4413, %v321_v27   ;;  %2906 = vst.msk [vmem:[#allocation2 + $0x18] sm:$0xff] %vm2902_vm2, %v2780_v30  ;;  %652 = vperm.xlu0 %4412, %v320_v33   ;;  %v1027_v61 = vmul.f32 %v4669_v46, %v428_v8  ;;  %v2160_v62 = vrot.slane %v1904_v43, 2  ;;  %v2176_v0 = vrot.slane %v4773_v24, 2  ;;  %v4812_v3 = vmul.f32 %v4669_v46, %v483_v48  ;;  %v325_v8 = vld [vmem:[%s4613_s15 + $0x1c0] sm:$0xff] }
  0xa3   : > { %v498_v57 = vpop.permute.xlu2 %497  ;;  %v448_v58 = vpop.permute.xlu1 %447  ;;  %2903 = vst.msk [vmem:[#allocation2] sm:$0xff] %vm2902_vm2, %v2777_v34  ;;  %v2530_v1 = vadd.f32 %v2165_v17, %v1779_v55  ;;  %v1410_v44 = vsel %vm1397_vm0, %v1407_v53, %v1409_v56  ;;  %v1412_v2 = vsel %vm1397_vm0, %v1409_v56, %v1411_v32  ;;  %v1431_v4 = vrot.slane %v4785_v41, 1 }
  0xa4   : > { %v443_v63 = vpop.permute.xlu0 %442  ;;  %2904 = vst.msk [vmem:[#allocation2 + $0x8] sm:$0xff] %vm2902_vm2, %v2778_v35  ;;  %v1777_v6 = vadd.f32 %v1410_v44, %v4714_v13  ;;  %v1778_v7 = vadd.f32 %v1412_v2, %v1027_v61  ;;  %v2161_v50 = vsel %vm2148_vm1, %v2158_v54, %v2160_v62  ;;  %v2163_v53 = vsel %vm2148_vm1, %v2160_v62, %v2162_v36  ;;  %v323_v13 = vld [vmem:[%s4613_s15 + $0x1b0] sm:$0xff] }
  0xa5   : > { %v2659_v49 = vadd.f32 %v4695_v60, %v2530_v1  ;;  %v1157_v11 = vmul.f32 %v4656_v39, %v448_v58  ;;  %v2182_v48 = vrot.slane %v4799_v59, 2  ;;  %v1908_v23 = vmul.f32 %v4658_v40, %v448_v58 }
  0xa6   : > { %v2528_v21 = vadd.f32 %v2161_v50, %v1777_v6  ;;  %v2529_v22 = vadd.f32 %v2163_v53, %v1778_v7  ;;  %v1156_v26 = vmul.f32 %v4656_v39, %v443_v63  ;;  %v1907_v51 = vmul.f32 %v4658_v40, %v443_v63  ;;  %v328_v6 = vld [vmem:[%s4613_s15 + $0x1d8] sm:$0xff] }
  0xa7   : > { %v2784_v5 = vmax.f32 %v2659_v49, 0.0  ;;  %v1417_v25 = vrot.slane %v1157_v11, 1  ;;  %v1031_v29 = vmul.f32 %v4669_v46, %v448_v58  ;;  %v2168_v30 = vrot.slane %v1908_v23, 2  ;;  %v327_v49 = vld [vmem:[%s4613_s15 + $0x1d0] sm:$0xff]  ;;  %v326_v11 = vld [vmem:[%s4613_s15 + $0x1c8] sm:$0xff] }
  0xa8   : > { %v2657_v54 = vadd.f32 %v4695_v60, %v2528_v21  ;;  %v2658_v27 = vadd.f32 %v4695_v60, %v2529_v22  ;;  %v4834_v31 = vmul.f32 %v4656_v39, %v498_v57  ;;  %v1415_v33 = vrot.slane %v1156_v26, 1 }
  0xa9   : > { %677 = vperm.xlu2 %4414, %v325_v8   ;;  %2910 = vst.msk [vmem:[#allocation2 + $0x38] sm:$0xff] %vm2902_vm2, %v2784_v5  ;;  %v1420_v32 = vsel %vm1397_vm0, %v1417_v25, %v1419_v9  ;;  %v2166_v34 = vrot.slane %v1907_v51, 2  ;;  %v1030_v55 = vmul.f32 %v4669_v46, %v443_v63  ;;  %v4841_v58 = vmul.f32 %v4669_v46, %v498_v57 }
  0xaa   : > { %672 = vperm.xlu1 %4413, %v324_v18   ;;  %667 = vperm.xlu0 %4412, %v323_v13   ;;  %v2782_v37 = vmax.f32 %v2657_v54, 0.0  ;;  %v2783_v42 = vmax.f32 %v2658_v27, 0.0  ;;  %v1782_v43 = vadd.f32 %v1420_v32, %v1031_v29  ;;  %v2171_v17 = vsel %vm2148_vm1, %v2168_v30, %v2170_v38 }
  0xab   : > { %v513_v35 = vpop.permute.xlu2 %512  ;;  %v463_v36 = vpop.permute.xlu1 %462  ;;  %v1416_v61 = vsel %vm1397_vm0, %v1413_v15, %v1415_v33  ;;  %v1418_v62 = vsel %vm1397_vm0, %v1415_v33, %v1417_v25  ;;  %v4852_v63 = vmul.f32 %v4658_v40, %v498_v57  ;;  %v1437_v7 = vrot.slane %v4834_v31, 1 }
  0xac   : > { %v458_v56 = vpop.permute.xlu0 %457  ;;  %2908 = vst.msk [vmem:[#allocation2 + $0x28] sm:$0xff] %vm2902_vm2, %v2782_v37  ;;  %v2533_v1 = vadd.f32 %v2171_v17, %v1782_v43  ;;  %v1780_v44 = vadd.f32 %v1416_v61, %v4717_v14  ;;  %v1781_v2 = vadd.f32 %v1418_v62, %v1030_v55  ;;  %v2167_v10 = vsel %vm2148_vm1, %v2164_v19, %v2166_v34 }
  0xad   : > { %2909 = vst.msk [vmem:[#allocation2 + $0x30] sm:$0xff] %vm2902_vm2, %v2783_v42  ;;  %v2169_v15 = vsel %vm2148_vm1, %v2166_v34, %v2168_v30  ;;  %v1160_v8 = vmul.f32 %v4656_v39, %v463_v36  ;;  %v1911_v14 = vmul.f32 %v4658_v40, %v463_v36  ;;  %v4868_v18 = vmul.f32 %v4656_v39, %v513_v35 }
  0xae   : > { %v2662_v57 = vadd.f32 %v4695_v60, %v2533_v1  ;;  %v2531_v50 = vadd.f32 %v2167_v10, %v1780_v44  ;;  %v2532_v53 = vadd.f32 %v2169_v15, %v1781_v2  ;;  %v4871_v21 = vmul.f32 %v4658_v40, %v513_v35  ;;  %v331_v1 = vld [vmem:[%s4613_s15 + $0x1f0] sm:$0xff]  ;;  %v330_v15 = vld [vmem:[%s4613_s15 + $0x1e8] sm:$0xff] }
  0xaf   : > { %v1034_v12 = vmul.f32 %v4669_v46, %v463_v36  ;;  %v1423_v19 = vrot.slane %v1160_v8, 1  ;;  %v2174_v5 = vrot.slane %v1911_v14, 2  ;;  %v2188_v25 = vrot.slane %v4852_v63, 2 }
  0xb0   : > { %v2787_v22 = vmax.f32 %v2662_v57, 0.0  ;;  %v2660_v23 = vadd.f32 %v4695_v60, %v2531_v50  ;;  %v2661_v13 = vadd.f32 %v4695_v60, %v2532_v53  ;;  %v1159_v51 = vmul.f32 %v4656_v39, %v458_v56  ;;  %v329_v50 = vld [vmem:[%s4613_s15 + $0x1e0] sm:$0xff] }
  0xb1   : > { %692 = vperm.xlu2 %4414, %v328_v6   ;;  %v1426_v26 = vsel %vm1397_vm0, %v1423_v19, %v1425_v52  ;;  %v1910_v54 = vmul.f32 %v4658_v40, %v458_v56  ;;  %v4884_v33 = vmul.f32 %v4669_v46, %v513_v35  ;;  %v1443_v37 = vrot.slane %v4868_v18, 1 }
  0xb2   : > { %687 = vperm.xlu1 %4413, %v327_v49   ;;  %682 = vperm.xlu0 %4412, %v326_v11   ;;  %2913 = vst.msk [vmem:[#allocation2 + $0x50] sm:$0xff] %vm2902_vm2, %v2787_v22  ;;  %v2785_v30 = vmax.f32 %v2660_v23, 0.0  ;;  %v2786_v32 = vmax.f32 %v2661_v13, 0.0  ;;  %v1785_v34 = vadd.f32 %v1426_v26, %v1034_v12  ;;  %v2177_v42 = vsel %vm2148_vm1, %v2174_v5, %v2176_v0 }
  0xb3   : > { %v528_v27 = vpop.permute.xlu2 %527  ;;  %v478_v29 = vpop.permute.xlu1 %477  ;;  %v1421_v43 = vrot.slane %v1159_v51, 1  ;;  %v2172_v55 = vrot.slane %v1910_v54, 2  ;;  %v2194_v17 = vrot.slane %v4871_v21, 2  ;;  %v1033_v35 = vmul.f32 %v4669_v46, %v458_v56 }
  0xb4   : > { %v473_v36 = vpop.permute.xlu0 %472  ;;  %2911 = vst.msk [vmem:[#allocation2 + $0x40] sm:$0xff] %vm2902_vm2, %v2785_v30  ;;  %v2536_v61 = vadd.f32 %v2177_v42, %v1785_v34  ;;  %v1163_v62 = vmul.f32 %v4656_v39, %v478_v29  ;;  %v4901_v6 = vmul.f32 %v4669_v46, %v528_v27  ;;  %v4904_v10 = vmul.f32 %v4656_v39, %v528_v27 }
  0xb5   : > { %2912 = vst.msk [vmem:[#allocation2 + $0x48] sm:$0xff] %vm2902_vm2, %v2786_v32  ;;  %v1422_v44 = vsel %vm1397_vm0, %v1419_v9, %v1421_v43  ;;  %v1424_v2 = vsel %vm1397_vm0, %v1421_v43, %v1423_v19  ;;  %v1037_v57 = vmul.f32 %v4669_v46, %v478_v29  ;;  %v2173_v28 = vsel %vm2148_vm1, %v2170_v38, %v2172_v55 }
  0xb6   : > { %v2665_v56 = vadd.f32 %v4695_v60, %v2536_v61  ;;  %v1783_v8 = vadd.f32 %v1422_v44, %v4726_v20  ;;  %v1784_v49 = vadd.f32 %v1424_v2, %v1033_v35  ;;  %v2175_v9 = vsel %vm2148_vm1, %v2172_v55, %v2174_v5  ;;  %v334_v2 = vld [vmem:[%s4613_s15 + $0x208] sm:$0xff] }
  0xb7   : > { %v1429_v53 = vrot.slane %v1163_v62, 1  ;;  %v1914_v14 = vmul.f32 %v4658_v40, %v478_v29  ;;  %v1162_v22 = vmul.f32 %v4656_v39, %v473_v36  ;;  %v4918_v20 = vmul.f32 %v4658_v40, %v528_v27 }
  0xb8   : > { %v2790_v11 = vmax.f32 %v2665_v56, 0.0  ;;  %v2534_v12 = vadd.f32 %v2173_v28, %v1783_v8  ;;  %v2535_v19 = vadd.f32 %v2175_v9, %v1784_v49  ;;  %v1913_v23 = vmul.f32 %v4658_v40, %v473_v36  ;;  %v332_v49 = vld [vmem:[%s4613_s15 + $0x1f8] sm:$0xff] }
  0xb9   : > { %707 = vperm.xlu2 %4414, %v331_v1   ;;  %v1432_v45 = vsel %vm1397_vm0, %v1429_v53, %v1431_v4  ;;  %v2180_v38 = vrot.slane %v1914_v14, 2  ;;  %v1427_v27 = vrot.slane %v1162_v22, 1  ;;  %v1036_v32 = vmul.f32 %v4669_v46, %v473_v36 }
  0xba   : > { %702 = vperm.xlu1 %4413, %v330_v15   ;;  %697 = vperm.xlu0 %4412, %v329_v50   ;;  %2916 = vst.msk [vmem:[#allocation2 + $0x68] sm:$0xff] %vm2902_vm2, %v2790_v11  ;;  %v2663_v26 = vadd.f32 %v4695_v60, %v2534_v12  ;;  %v2664_v51 = vadd.f32 %v4695_v60, %v2535_v19  ;;  %v2178_v34 = vrot.slane %v1913_v23, 2  ;;  %v1449_v62 = vrot.slane %v4904_v10, 1  ;;  %v333_v15 = vld [vmem:[%s4613_s15 + $0x200] sm:$0xff] }
  0xbb   : > { %v543_v13 = vpop.permute.xlu2 %542  ;;  %v493_v5 = vpop.permute.xlu1 %492  ;;  %v1788_v54 = vadd.f32 %v1432_v45, %v1037_v57  ;;  %v2183_v30 = vsel %vm2148_vm1, %v2180_v38, %v2182_v48  ;;  %v1428_v35 = vsel %vm1397_vm0, %v1425_v52, %v1427_v27  ;;  %v2200_v1 = vrot.slane %v4918_v20, 2 }
  0xbc   : > { %v488_v29 = vpop.permute.xlu0 %487  ;;  %v4932_v42 = vmul.f32 %v4656_v39, %v543_v13  ;;  %v2788_v43 = vmax.f32 %v2663_v26, 0.0  ;;  %v2789_v55 = vmax.f32 %v2664_v51, 0.0  ;;  %v1430_v44 = vsel %vm1397_vm0, %v1427_v27, %v1429_v53 }
  0xbd   : > { %v2539_v61 = vadd.f32 %v2183_v30, %v1788_v54  ;;  %v1786_v36 = vadd.f32 %v1428_v35, %v4793_v47  ;;  %v1787_v8 = vadd.f32 %v1430_v44, %v1036_v32  ;;  %v2179_v16 = vsel %vm2148_vm1, %v2176_v0, %v2178_v34 }
  0xbe   : > { %2914 = vst.msk [vmem:[#allocation2 + $0x58] sm:$0xff] %vm2902_vm2, %v2788_v43  ;;  %v4949_v52 = vmul.f32 %v4658_v40, %v543_v13  ;;  %v2181_v57 = vsel %vm2148_vm1, %v2178_v34, %v2180_v38  ;;  %v1166_v50 = vmul.f32 %v4656_v39, %v493_v5  ;;  %v1917_v28 = vmul.f32 %v4658_v40, %v493_v5 }
  0xbf   : > { %v2668_v56 = vadd.f32 %v4695_v60, %v2539_v61  ;;  %2915 = vst.msk [vmem:[#allocation2 + $0x60] sm:$0xff] %vm2902_vm2, %v2789_v55  ;;  %v2537_v47 = vadd.f32 %v2179_v16, %v1786_v36  ;;  %v2538_v53 = vadd.f32 %v2181_v57, %v1787_v8  ;;  %v4957_v14 = vmul.f32 %v4669_v46, %v543_v13  ;;  %v337_v36 = vld [vmem:[%s4613_s15 + $0x220] sm:$0xff]  ;;  %v336_v16 = vld [vmem:[%s4613_s15 + $0x218] sm:$0xff] }
  0xc0   : > { %v1455_v24 = vrot.slane %v4932_v42, 1  ;;  %v1435_v11 = vrot.slane %v1166_v50, 1  ;;  %v2186_v12 = vrot.slane %v1917_v28, 2  ;;  %v1165_v19 = vmul.f32 %v4656_v39, %v488_v29 }
  0xc1   : > { %v2793_v9 = vmax.f32 %v2668_v56, 0.0  ;;  %722 = vperm.xlu2 %4414, %v334_v2   ;;  %v2666_v0 = vadd.f32 %v4695_v60, %v2537_v47  ;;  %v2667_v38 = vadd.f32 %v4695_v60, %v2538_v53  ;;  %v2206_v23 = vrot.slane %v4949_v52, 2 }
  0xc2   : > { %717 = vperm.xlu1 %4413, %v333_v15   ;;  %712 = vperm.xlu0 %4412, %v332_v49   ;;  %v1040_v13 = vmul.f32 %v4669_v46, %v493_v5  ;;  %v1916_v26 = vmul.f32 %v4658_v40, %v488_v29  ;;  %v1438_v27 = vsel %vm1397_vm0, %v1435_v11, %v1437_v7  ;;  %v1433_v32 = vrot.slane %v1165_v19, 1  ;;  %v335_v49 = vld [vmem:[%s4613_s15 + $0x210] sm:$0xff] }
  0xc3   : > { %v558_v22 = vpop.permute.xlu2 %557  ;;  %v508_v45 = vpop.permute.xlu1 %507  ;;  %2919 = vst.msk [vmem:[#allocation2 + $0x80] sm:$0xff] %vm2902_vm2, %v2793_v9  ;;  %v2791_v54 = vmax.f32 %v2666_v0, 0.0  ;;  %v1039_v30 = vmul.f32 %v4669_v46, %v488_v29  ;;  %v2792_v34 = vmax.f32 %v2667_v38, 0.0  ;;  %v2189_v5 = vsel %vm2148_vm1, %v2186_v12, %v2188_v25 }
  0xc4   : > { %v503_v51 = vpop.permute.xlu0 %502  ;;  %v1791_v43 = vadd.f32 %v1438_v27, %v1040_v13  ;;  %v2184_v55 = vrot.slane %v1916_v26, 2  ;;  %v4972_v61 = vmul.f32 %v4656_v39, %v558_v22  ;;  %v1434_v35 = vsel %vm1397_vm0, %v1431_v4, %v1433_v32 }
  0xc5   : > { %2917 = vst.msk [vmem:[#allocation2 + $0x70] sm:$0xff] %vm2902_vm2, %v2791_v54  ;;  %v1436_v29 = vsel %vm1397_vm0, %v1433_v32, %v1435_v11  ;;  %v4983_v44 = vmul.f32 %v4669_v46, %v558_v22  ;;  %v1789_v15 = vadd.f32 %v1434_v35, %v4812_v3  ;;  %v4989_v8 = vmul.f32 %v4658_v40, %v558_v22 }
  0xc6   : > { %2918 = vst.msk [vmem:[#allocation2 + $0x78] sm:$0xff] %vm2902_vm2, %v2792_v34  ;;  %v2542_v2 = vadd.f32 %v2189_v5, %v1791_v43  ;;  %v1790_v56 = vadd.f32 %v1436_v29, %v1039_v30  ;;  %v2185_v41 = vsel %vm2148_vm1, %v2182_v48, %v2184_v55  ;;  %v2187_v4 = vsel %vm2148_vm1, %v2184_v55, %v2186_v12 }
  0xc7   : > { %v1169_v57 = vmul.f32 %v4656_v39, %v508_v45  ;;  %v1920_v47 = vmul.f32 %v4658_v40, %v508_v45  ;;  %v2540_v28 = vadd.f32 %v2185_v41, %v1789_v15  ;;  %v1461_v9 = vrot.slane %v4972_v61, 1  ;;  %v338_v41 = vld [vmem:[%s4613_s15 + $0x228] sm:$0xff] }
  0xc8   : > { %v2671_v50 = vadd.f32 %v4695_v60, %v2542_v2  ;;  %v2541_v3 = vadd.f32 %v2187_v4, %v1790_v56  ;;  %v1168_v11 = vmul.f32 %v4656_v39, %v503_v51  ;;  %v1919_v59 = vmul.f32 %v4658_v40, %v503_v51  ;;  %v340_v2 = vld [vmem:[%s4613_s15 + $0x238] sm:$0xff]  ;;  %v350_v61 = vld [vmem:[%s4613_s15 + $0x288] sm:$0xff] }
  0xc9   : > { %737 = vperm.xlu2 %4414, %v337_v36   ;;  %v1441_v53 = vrot.slane %v1169_v57, 1  ;;  %v2192_v0 = vrot.slane %v1920_v47, 2  ;;  %v2669_v22 = vadd.f32 %v4695_v60, %v2540_v28  ;;  %v1043_v13 = vmul.f32 %v4669_v46, %v508_v45 }
  0xca   : > { %732 = vperm.xlu1 %4413, %v336_v16   ;;  %727 = vperm.xlu0 %4412, %v335_v49   ;;  %v2796_v19 = vmax.f32 %v2671_v50, 0.0  ;;  %v2670_v38 = vadd.f32 %v4695_v60, %v2541_v3  ;;  %v2212_v54 = vrot.slane %v4989_v8, 2  ;;  %v1439_v30 = vrot.slane %v1168_v11, 1  ;;  %v339_v49 = vld [vmem:[%s4613_s15 + $0x230] sm:$0xff] }
  0xcb   : > { %v573_v48 = vpop.permute.xlu2 %572  ;;  %v523_v12 = vpop.permute.xlu1 %522  ;;  %v1444_v27 = vsel %vm1397_vm0, %v1441_v53, %v1443_v37  ;;  %v2190_v32 = vrot.slane %v1919_v59, 2  ;;  %v2794_v34 = vmax.f32 %v2669_v22, 0.0  ;;  %v1042_v5 = vmul.f32 %v4669_v46, %v503_v51 }
  0xcc   : > { %v518_v26 = vpop.permute.xlu0 %517  ;;  %2922 = vst.msk [vmem:[#allocation2 + $0x98] sm:$0xff] %vm2902_vm2, %v2796_v19  ;;  %v2795_v43 = vmax.f32 %v2670_v38, 0.0  ;;  %v1794_v55 = vadd.f32 %v1444_v27, %v1043_v13  ;;  %v2195_v45 = vsel %vm2148_vm1, %v2192_v0, %v2194_v17  ;;  %v1440_v35 = vsel %vm1397_vm0, %v1437_v7, %v1439_v30 }
  0xcd   : > { %v1442_v29 = vsel %vm1397_vm0, %v1439_v30, %v1441_v53  ;;  %v5020_v36 = vmul.f32 %v4669_v46, %v573_v48  ;;  %2920 = vst.msk [vmem:[#allocation2 + $0x88] sm:$0xff] %vm2902_vm2, %v2794_v34  ;;  %v1792_v56 = vadd.f32 %v1440_v35, %v4841_v58  ;;  %v5026_v16 = vmul.f32 %v4656_v39, %v573_v48 }
  0xce   : > { %v2545_v15 = vadd.f32 %v2195_v45, %v1794_v55  ;;  %v1793_v51 = vadd.f32 %v1442_v29, %v1042_v5  ;;  %2921 = vst.msk [vmem:[#allocation2 + $0x90] sm:$0xff] %vm2902_vm2, %v2795_v43  ;;  %v2191_v31 = vsel %vm2148_vm1, %v2188_v25, %v2190_v32  ;;  %v2193_v7 = vsel %vm2148_vm1, %v2190_v32, %v2192_v0  ;;  %v343_v29 = vld [vmem:[%s4613_s15 + $0x250] sm:$0xff] }
  0xcf   : > { %v1172_v4 = vmul.f32 %v4656_v39, %v523_v12  ;;  %v1923_v57 = vmul.f32 %v4658_v40, %v523_v12  ;;  %v2543_v47 = vadd.f32 %v2191_v31, %v1792_v56  ;;  %v5039_v28 = vmul.f32 %v4658_v40, %v573_v48 }
  0xd0   : > { %v2674_v58 = vadd.f32 %v4695_v60, %v2545_v15  ;;  %v2544_v50 = vadd.f32 %v2193_v7, %v1793_v51  ;;  %v1046_v3 = vmul.f32 %v4669_v46, %v523_v12  ;;  %v1171_v25 = vmul.f32 %v4656_v39, %v518_v26  ;;  %v341_v7 = vld [vmem:[%s4613_s15 + $0x240] sm:$0xff] }
  0xd1   : > { %752 = vperm.xlu2 %4414, %v340_v2   ;;  %v1447_v53 = vrot.slane %v1172_v4, 1  ;;  %v2198_v63 = vrot.slane %v1923_v57, 2  ;;  %v2672_v19 = vadd.f32 %v4695_v60, %v2543_v47  ;;  %v1922_v48 = vmul.f32 %v4658_v40, %v518_v26 }
  0xd2   : > { %747 = vperm.xlu1 %4413, %v339_v49   ;;  %742 = vperm.xlu0 %4412, %v338_v41   ;;  %v2799_v59 = vmax.f32 %v2674_v58, 0.0  ;;  %v2673_v22 = vadd.f32 %v4695_v60, %v2544_v50  ;;  %v1467_v13 = vrot.slane %v5026_v16, 1  ;;  %v1045_v27 = vmul.f32 %v4669_v46, %v518_v26  ;;  %v342_v49 = vld [vmem:[%s4613_s15 + $0x248] sm:$0xff] }
  0xd3   : > { %v588_v0 = vpop.permute.xlu2 %587  ;;  %v538_v11 = vpop.permute.xlu1 %537  ;;  %v1450_v12 = vsel %vm1397_vm0, %v1447_v53, %v1449_v62  ;;  %v1445_v30 = vrot.slane %v1171_v25, 1  ;;  %v2797_v32 = vmax.f32 %v2672_v19, 0.0  ;;  %v2196_v55 = vrot.slane %v1922_v48, 2 }
  0xd4   : > { %v533_v38 = vpop.permute.xlu0 %532  ;;  %2925 = vst.msk [vmem:[#allocation2 + $0xb0] sm:$0xff] %vm2902_vm2, %v2799_v59  ;;  %v2798_v34 = vmax.f32 %v2673_v22, 0.0  ;;  %v1797_v43 = vadd.f32 %v1450_v12, %v1046_v3  ;;  %v2201_v5 = vsel %vm2148_vm1, %v2198_v63, %v2200_v1  ;;  %v5060_v26 = vmul.f32 %v4656_v39, %v588_v0 }
  0xd5   : > { %v1446_v45 = vsel %vm1397_vm0, %v1443_v37, %v1445_v30  ;;  %v1448_v35 = vsel %vm1397_vm0, %v1445_v30, %v1447_v53  ;;  %2923 = vst.msk [vmem:[#allocation2 + $0xa0] sm:$0xff] %vm2902_vm2, %v2797_v32  ;;  %v2218_v2 = vrot.slane %v5039_v28, 2  ;;  %v2197_v18 = vsel %vm2148_vm1, %v2194_v17, %v2196_v55 }
  0xd6   : > { %v2548_v15 = vadd.f32 %v2201_v5, %v1797_v43  ;;  %v1795_v56 = vadd.f32 %v1446_v45, %v4884_v33  ;;  %v1796_v51 = vadd.f32 %v1448_v35, %v1045_v27  ;;  %2924 = vst.msk [vmem:[#allocation2 + $0xa8] sm:$0xff] %vm2902_vm2, %v2798_v34  ;;  %v2199_v37 = vsel %vm2148_vm1, %v2196_v55, %v2198_v63  ;;  %v346_v35 = vld [vmem:[%s4613_s15 + $0x268] sm:$0xff] }
  0xd7   : > { %v5073_v41 = vmul.f32 %v4669_v46, %v588_v0  ;;  %v5076_v31 = vmul.f32 %v4658_v40, %v588_v0  ;;  %v1175_v58 = vmul.f32 %v4656_v39, %v538_v11  ;;  %v1473_v21 = vrot.slane %v5060_v26, 1 }
  0xd8   : > { %v2677_v4 = vadd.f32 %v4695_v60, %v2548_v15  ;;  %v2546_v33 = vadd.f32 %v2197_v18, %v1795_v56  ;;  %v2547_v57 = vadd.f32 %v2199_v37, %v1796_v51  ;;  %v1926_v17 = vmul.f32 %v4658_v40, %v538_v11  ;;  %v345_v56 = vld [vmem:[%s4613_s15 + $0x260] sm:$0xff]  ;;  %v344_v37 = vld [vmem:[%s4613_s15 + $0x258] sm:$0xff] }
  0xd9   : > { %767 = vperm.xlu2 %4414, %v343_v29   ;;  %v1174_v47 = vmul.f32 %v4656_v39, %v533_v38  ;;  %v1925_v50 = vmul.f32 %v4658_v40, %v533_v38  ;;  %v1453_v59 = vrot.slane %v1175_v58, 1  ;;  %v1049_v22 = vmul.f32 %v4669_v46, %v538_v11 }
  0xda   : > { %762 = vperm.xlu1 %4413, %v342_v49   ;;  %v2802_v63 = vmax.f32 %v2677_v4, 0.0  ;;  %v2675_v25 = vadd.f32 %v4695_v60, %v2546_v33  ;;  %v2676_v0 = vadd.f32 %v4695_v60, %v2547_v57  ;;  %757 = vperm.xlu0 %4412, %v341_v7   ;;  %v2204_v48 = vrot.slane %v1926_v17, 2 }
  0xdb   : > { %v603_v3 = vpop.permute.xlu2 %602  ;;  %v553_v53 = vpop.permute.xlu1 %552  ;;  %v1451_v12 = vrot.slane %v1174_v47, 1  ;;  %v2202_v27 = vrot.slane %v1925_v50, 2  ;;  %v1456_v34 = vsel %vm1397_vm0, %v1453_v59, %v1455_v24  ;;  %v1048_v43 = vmul.f32 %v4669_v46, %v533_v38 }
  0xdc   : > { %v548_v19 = vpop.permute.xlu0 %547  ;;  %2928 = vst.msk [vmem:[#allocation2 + $0xc8] sm:$0xff] %vm2902_vm2, %v2802_v63  ;;  %v2800_v30 = vmax.f32 %v2675_v25, 0.0  ;;  %v2801_v32 = vmax.f32 %v2676_v0, 0.0  ;;  %v1800_v55 = vadd.f32 %v1456_v34, %v1049_v22  ;;  %v5098_v45 = vmul.f32 %v4656_v39, %v603_v3 }
  0xdd   : > { %v1452_v11 = vsel %vm1397_vm0, %v1449_v62, %v1451_v12  ;;  %v1454_v5 = vsel %vm1397_vm0, %v1451_v12, %v1453_v59  ;;  %v2224_v29 = vrot.slane %v5076_v31, 2  ;;  %v2207_v38 = vsel %vm2148_vm1, %v2204_v48, %v2206_v23 }
  0xde   : > { %2926 = vst.msk [vmem:[#allocation2 + $0xb8] sm:$0xff] %vm2902_vm2, %v2800_v30  ;;  %v1798_v15 = vadd.f32 %v1452_v11, %v4901_v6  ;;  %v1799_v10 = vadd.f32 %v1454_v5, %v1048_v43  ;;  %v2551_v62 = vadd.f32 %v2207_v38, %v1800_v55  ;;  %v2203_v51 = vsel %vm2148_vm1, %v2200_v1, %v2202_v27  ;;  %v349_v5 = vld [vmem:[%s4613_s15 + $0x280] sm:$0xff] }
  0xdf   : > { %2927 = vst.msk [vmem:[#allocation2 + $0xc0] sm:$0xff] %vm2902_vm2, %v2801_v32  ;;  %v2205_v49 = vsel %vm2148_vm1, %v2202_v27, %v2204_v48  ;;  %v5114_v18 = vmul.f32 %v4669_v46, %v603_v3  ;;  %v1178_v33 = vmul.f32 %v4656_v39, %v553_v53  ;;  %v1929_v6 = vmul.f32 %v4658_v40, %v553_v53 }
  0xe0   : > { %v2549_v7 = vadd.f32 %v2203_v51, %v1798_v15  ;;  %v2550_v4 = vadd.f32 %v2205_v49, %v1799_v10  ;;  %v2680_v57 = vadd.f32 %v4695_v60, %v2551_v62  ;;  %v1479_v58 = vrot.slane %v5098_v45, 1  ;;  %v348_v10 = vld [vmem:[%s4613_s15 + $0x278] sm:$0xff]  ;;  %v347_v51 = vld [vmem:[%s4613_s15 + $0x270] sm:$0xff] }
  0xe1   : > { %782 = vperm.xlu2 %4414, %v346_v35   ;;  %v5122_v20 = vmul.f32 %v4658_v40, %v603_v3  ;;  %v1177_v1 = vmul.f32 %v4656_v39, %v548_v19  ;;  %v1459_v25 = vrot.slane %v1178_v33, 1  ;;  %v2210_v0 = vrot.slane %v1929_v6, 2  ;;  %v359_v45 = vld [vmem:[%s4613_s15 + $0x2d0] sm:$0xff] }
  0xe2   : > { %777 = vperm.xlu1 %4413, %v345_v56   ;;  %v2678_v50 = vadd.f32 %v4695_v60, %v2549_v7  ;;  %v2679_v63 = vadd.f32 %v4695_v60, %v2550_v4  ;;  %772 = vperm.xlu0 %4412, %v344_v37   ;;  %v2805_v22 = vmax.f32 %v2680_v57, 0.0  ;;  %v1052_v48 = vmul.f32 %v4669_v46, %v553_v53 }
  0xe3   : > { %v618_v17 = vpop.permute.xlu2 %617  ;;  %v568_v47 = vpop.permute.xlu1 %567  ;;  %v1457_v12 = vrot.slane %v1177_v1, 1  ;;  %v1928_v3 = vmul.f32 %v4658_v40, %v548_v19  ;;  %v1462_v32 = vsel %vm1397_vm0, %v1459_v25, %v1461_v9  ;;  %v1051_v34 = vmul.f32 %v4669_v46, %v548_v19  ;;  %v5165_v1 = vld [vmem:[#allocation6] ss:$0 sm:$0xff] }
  0xe4   : > { %v563_v59 = vpop.permute.xlu0 %562  ;;  %v2803_v27 = vmax.f32 %v2678_v50, 0.0  ;;  %v2804_v30 = vmax.f32 %v2679_v63, 0.0  ;;  %2931 = vst.msk [vmem:[#allocation2 + $0xe0] sm:$0xff] %vm2902_vm2, %v2805_v22  ;;  %v1803_v43 = vadd.f32 %v1462_v32, %v1052_v48  ;;  %v2230_v35 = vrot.slane %v5122_v20, 2 }
  0xe5   : > { %v1458_v53 = vsel %vm1397_vm0, %v1455_v24, %v1457_v12  ;;  %v1460_v55 = vsel %vm1397_vm0, %v1457_v12, %v1459_v25  ;;  %v2208_v11 = vrot.slane %v1928_v3, 2  ;;  %v2213_v19 = vsel %vm2148_vm1, %v2210_v0, %v2212_v54 }
  0xe6   : > { %2929 = vst.msk [vmem:[#allocation2 + $0xd0] sm:$0xff] %vm2902_vm2, %v2803_v27  ;;  %v1801_v38 = vadd.f32 %v1458_v53, %v4957_v14  ;;  %v1802_v15 = vadd.f32 %v1460_v55, %v1051_v34  ;;  %v2554_v42 = vadd.f32 %v2213_v19, %v1803_v43  ;;  %v5152_v62 = vmul.f32 %v4656_v39, %v618_v17  ;;  %v352_v55 = vld [vmem:[%s4613_s15 + $0x298] sm:$0xff] }
  0xe7   : > { %2930 = vst.msk [vmem:[#allocation2 + $0xd8] sm:$0xff] %vm2902_vm2, %v2804_v30  ;;  %v2209_v24 = vsel %vm2148_vm1, %v2206_v23, %v2208_v11  ;;  %v2211_v56 = vsel %vm2148_vm1, %v2208_v11, %v2210_v0  ;;  %v5156_v7 = vmul.f32 %v4669_v46, %v618_v17  ;;  %v5159_v14 = vmul.f32 %v4658_v40, %v618_v17 }
  0xe8   : > { %v2552_v49 = vadd.f32 %v2209_v24, %v1801_v38  ;;  %v2553_v37 = vadd.f32 %v2211_v56, %v1802_v15  ;;  %v2683_v4 = vadd.f32 %v4695_v60, %v2554_v42  ;;  %v1055_v52 = vmul.f32 %v4669_v46, %v568_v47  ;;  %v351_v15 = vld [vmem:[%s4613_s15 + $0x290] sm:$0xff] }
  0xe9   : > { %797 = vperm.xlu2 %4414, %v349_v5   ;;  %v1181_v23 = vmul.f32 %v4656_v39, %v568_v47  ;;  %v1932_v33 = vmul.f32 %v4658_v40, %v568_v47  ;;  %v1180_v17 = vmul.f32 %v4656_v39, %v563_v59  ;;  %v1931_v25 = vmul.f32 %v4658_v40, %v563_v59 }
  0xea   : > { %792 = vperm.xlu1 %4413, %v348_v10   ;;  %v2681_v50 = vadd.f32 %v5165_v1, %v2552_v49  ;;  %v2682_v63 = vadd.f32 %v5165_v1, %v2553_v37  ;;  %787 = vperm.xlu0 %4412, %v347_v51   ;;  %v2808_v0 = vmax.f32 %v2683_v4, 0.0  ;;  %v1485_v22 = vrot.slane %v5152_v62, 1 }
  0xeb   : > { %v633_v6 = vpop.permute.xlu2 %632  ;;  %v583_v57 = vpop.permute.xlu1 %582  ;;  %v1465_v47 = vrot.slane %v1181_v23, 1  ;;  %v2216_v48 = vrot.slane %v1932_v33, 2  ;;  %v1463_v27 = vrot.slane %v1180_v17, 1  ;;  %v2214_v30 = vrot.slane %v1931_v25, 2 }
  0xec   : > { %v578_v60 = vpop.permute.xlu0 %577  ;;  %v2806_v12 = vmax.f32 %v2681_v50, 0.0  ;;  %v2807_v3 = vmax.f32 %v2682_v63, 0.0  ;;  %2934 = vst.msk [vmem:[#allocation2 + $0xf8] sm:$0xff] %vm2902_vm2, %v2808_v0  ;;  %v2236_v32 = vrot.slane %v5159_v14, 2  ;;  %v1054_v43 = vmul.f32 %v4669_v46, %v563_v59 }
  0xed   : > { %v1468_v34 = vsel %vm1397_vm0, %v1465_v47, %v1467_v13  ;;  %v5179_v53 = vmul.f32 %v4656_v39, %v633_v6  ;;  %v1464_v5 = vsel %vm1397_vm0, %v1461_v9, %v1463_v27  ;;  %v1466_v19 = vsel %vm1397_vm0, %v1463_v27, %v1465_v47 }
  0xee   : > { %2932 = vst.msk [vmem:[#allocation2 + $0xe8] sm:$0xff] %vm2902_vm2, %v2806_v12  ;;  %v1806_v11 = vadd.f32 %v1468_v34, %v1055_v52  ;;  %v5188_v38 = vmul.f32 %v4669_v46, %v633_v6  ;;  %v2219_v59 = vsel %vm2148_vm1, %v2216_v48, %v2218_v2  ;;  %v1804_v10 = vadd.f32 %v1464_v5, %v4983_v44 }
  0xef   : > { %2933 = vst.msk [vmem:[#allocation2 + $0xf0] sm:$0xff] %vm2902_vm2, %v2807_v3  ;;  %v1805_v42 = vadd.f32 %v1466_v19, %v1054_v43  ;;  %v5197_v24 = vmul.f32 %v4658_v40, %v633_v6  ;;  %v2215_v56 = vsel %vm2148_vm1, %v2212_v54, %v2214_v30  ;;  %v2217_v51 = vsel %vm2148_vm1, %v2214_v30, %v2216_v48 }
  0xf0   : > { %v2557_v9 = vadd.f32 %v2219_v59, %v1806_v11  ;;  %v1184_v49 = vmul.f32 %v4656_v39, %v583_v57  ;;  %v2555_v37 = vadd.f32 %v2215_v56, %v1804_v10  ;;  %v1491_v52 = vrot.slane %v5179_v53, 1  ;;  %v354_v59 = vld [vmem:[%s4613_s15 + $0x2a8] sm:$0xff] }
  0xf1   : > { %812 = vperm.xlu2 %4414, %v352_v55   ;;  %v2556_v4 = vadd.f32 %v2217_v51, %v1805_v42  ;;  %v1935_v44 = vmul.f32 %v4658_v40, %v583_v57  ;;  %v1183_v8 = vmul.f32 %v4656_v39, %v578_v60  ;;  %v1934_v54 = vmul.f32 %v4658_v40, %v578_v60 }
  0xf2   : > { %807 = vperm.xlu1 %4413, %v351_v15   ;;  %v2686_v6 = vadd.f32 %v5165_v1, %v2557_v9  ;;  %v1471_v50 = vrot.slane %v1184_v49, 1  ;;  %802 = vperm.xlu0 %4412, %v350_v61   ;;  %v2684_v17 = vadd.f32 %v5165_v1, %v2555_v37  ;;  %v1058_v0 = vmul.f32 %v4669_v46, %v583_v57  ;;  %v355_v15 = vld [vmem:[%s4613_s15 + $0x2b0] sm:$0xff]  ;;  %v353_v9 = vld [vmem:[%s4613_s15 + $0x2a0] sm:$0xff] }
  0xf3   : > { %v648_v23 = vpop.permute.xlu2 %647  ;;  %v598_v33 = vpop.permute.xlu1 %597  ;;  %v2685_v25 = vadd.f32 %v5165_v1, %v2556_v4  ;;  %v2222_v47 = vrot.slane %v1935_v44, 2  ;;  %v1469_v3 = vrot.slane %v1183_v8, 1  ;;  %v2220_v27 = vrot.slane %v1934_v54, 2 }
  0xf4   : > { %v593_v63 = vpop.permute.xlu0 %592  ;;  %v2811_v48 = vmax.f32 %v2686_v6, 0.0  ;;  %v1474_v12 = vsel %vm1397_vm0, %v1471_v50, %v1473_v21  ;;  %v2809_v30 = vmax.f32 %v2684_v17, 0.0  ;;  %v1057_v55 = vmul.f32 %v4669_v46, %v578_v60 }
  0xf5   : > { %v2810_v34 = vmax.f32 %v2685_v25, 0.0  ;;  %v1809_v43 = vadd.f32 %v1474_v12, %v1058_v0  ;;  %v2225_v57 = vsel %vm2148_vm1, %v2222_v47, %v2224_v29  ;;  %v1470_v11 = vsel %vm1397_vm0, %v1467_v13, %v1469_v3 }
  0xf6   : > { %2937 = vst.msk [vmem:[#allocation2 + $0x110] sm:$0xff] %vm2902_vm2, %v2811_v48  ;;  %v1472_v5 = vsel %vm1397_vm0, %v1469_v3, %v1471_v50  ;;  %v2221_v19 = vsel %vm2148_vm1, %v2218_v2, %v2220_v27  ;;  %v1807_v10 = vadd.f32 %v1470_v11, %v5020_v36  ;;  %v2223_v61 = vsel %vm2148_vm1, %v2220_v27, %v2222_v47 }
  0xf7   : > { %2935 = vst.msk [vmem:[#allocation2 + $0x100] sm:$0xff] %vm2902_vm2, %v2809_v30  ;;  %v2560_v60 = vadd.f32 %v2225_v57, %v1809_v43  ;;  %v1808_v42 = vadd.f32 %v1472_v5, %v1057_v55  ;;  %v5236_v16 = vmul.f32 %v4656_v39, %v648_v23  ;;  %v5239_v28 = vmul.f32 %v4658_v40, %v648_v23  ;;  %v358_v5 = vld [vmem:[%s4613_s15 + $0x2c8] sm:$0xff] }
  0xf8   : > { %2936 = vst.msk [vmem:[#allocation2 + $0x108] sm:$0xff] %vm2902_vm2, %v2810_v34  ;;  %v1187_v13 = vmul.f32 %v4656_v39, %v598_v33  ;;  %v1938_v2 = vmul.f32 %v4658_v40, %v598_v33  ;;  %v2242_v56 = vrot.slane %v5197_v24, 2  ;;  %v2558_v51 = vadd.f32 %v2221_v19, %v1807_v10  ;;  %v357_v19 = vld [vmem:[%s4613_s15 + $0x2c0] sm:$0xff] }
  0xf9   : > { %v2689_v36 = vadd.f32 %v5165_v1, %v2560_v60  ;;  %v2559_v49 = vadd.f32 %v2223_v61, %v1808_v42  ;;  %827 = vperm.xlu2 %4414, %v355_v15   ;;  %v5246_v44 = vmul.f32 %v4669_v46, %v648_v23  ;;  %v1061_v6 = vmul.f32 %v4669_v46, %v598_v33  ;;  %v356_v42 = vld [vmem:[%s4613_s15 + $0x2b8] sm:$0xff] }
  0xfa   : > { %822 = vperm.xlu1 %4413, %v354_v59   ;;  %v1477_v50 = vrot.slane %v1187_v13, 1  ;;  %v2228_v8 = vrot.slane %v1938_v2, 2  ;;  %817 = vperm.xlu0 %4412, %v353_v9   ;;  %v2687_v25 = vadd.f32 %v5165_v1, %v2558_v51  ;;  %v1186_v47 = vmul.f32 %v4656_v39, %v593_v63 }
  0xfb   : > { %v663_v37 = vpop.permute.xlu2 %662  ;;  %v613_v4 = vpop.permute.xlu1 %612  ;;  %v2814_v17 = vmax.f32 %v2689_v36, 0.0  ;;  %v2688_v0 = vadd.f32 %v5165_v1, %v2559_v49  ;;  %v1497_v48 = vrot.slane %v5236_v16, 1  ;;  %v2248_v23 = vrot.slane %v5239_v28, 2 }
  0xfc   : > { %v608_v54 = vpop.permute.xlu0 %607  ;;  %v1480_v33 = vsel %vm1397_vm0, %v1477_v50, %v1479_v58  ;;  %v1937_v12 = vmul.f32 %v4658_v40, %v593_v63  ;;  %v2812_v3 = vmax.f32 %v2687_v25, 0.0  ;;  %v1475_v34 = vrot.slane %v1186_v47, 1 }
  0xfd   : > { %2940 = vst.msk [vmem:[#allocation2 + $0x128] sm:$0xff] %vm2902_vm2, %v2814_v17  ;;  %v2813_v27 = vmax.f32 %v2688_v0, 0.0  ;;  %v1812_v30 = vadd.f32 %v1480_v33, %v1061_v6  ;;  %v2231_v43 = vsel %vm2148_vm1, %v2228_v8, %v2230_v35  ;;  %v1060_v55 = vmul.f32 %v4669_v46, %v593_v63 }
  0xfe   : > { %v2226_v57 = vrot.slane %v1937_v12, 2  ;;  %v5264_v11 = vmul.f32 %v4669_v46, %v663_v37  ;;  %2938 = vst.msk [vmem:[#allocation2 + $0x118] sm:$0xff] %vm2902_vm2, %v2812_v3  ;;  %v1476_v59 = vsel %vm1397_vm0, %v1473_v21, %v1475_v34  ;;  %v1478_v60 = vsel %vm1397_vm0, %v1475_v34, %v1477_v50 }
  0xff   : > { %v2563_v15 = vadd.f32 %v2231_v43, %v1812_v30  ;;  %v1190_v10 = vmul.f32 %v4656_v39, %v613_v4  ;;  %2939 = vst.msk [vmem:[#allocation2 + $0x120] sm:$0xff] %vm2902_vm2, %v2813_v27  ;;  %v1810_v63 = vadd.f32 %v1476_v59, %v5073_v41  ;;  %v1811_v61 = vadd.f32 %v1478_v60, %v1060_v55  ;;  %v360_v60 = vld [vmem:[%s4613_s15 + $0x2d8] sm:$0xff] }
 0x100   : > { %v5278_v9 = vmul.f32 %v4656_v39, %v663_v37  ;;  %v5281_v13 = vmul.f32 %v4658_v40, %v663_v37  ;;  %v2227_v21 = vsel %vm2148_vm1, %v2224_v29, %v2226_v57  ;;  %v2229_v2 = vsel %vm2148_vm1, %v2226_v57, %v2228_v8 }
 0x101   : > { %v2692_v26 = vadd.f32 %v5165_v1, %v2563_v15  ;;  %v1483_v36 = vrot.slane %v1190_v10, 1  ;;  %842 = vperm.xlu2 %4414, %v358_v5   ;;  %v2561_v49 = vadd.f32 %v2227_v21, %v1810_v63  ;;  %v2562_v6 = vadd.f32 %v2229_v2, %v1811_v61  ;;  %v361_v5 = vld [vmem:[%s4613_s15 + $0x2e0] sm:$0xff] }
 0x102   : > { %837 = vperm.xlu1 %4413, %v357_v19   ;;  %v1064_v50 = vmul.f32 %v4669_v46, %v613_v4  ;;  %v1941_v37 = vmul.f32 %v4658_v40, %v613_v4  ;;  %832 = vperm.xlu0 %4412, %v356_v42   ;;  %v1189_v29 = vmul.f32 %v4656_v39, %v608_v54  ;;  %v1503_v4 = vrot.slane %v5278_v9, 1 }
 0x103   : > { %v678_v51 = vpop.permute.xlu2 %677  ;;  %v628_v41 = vpop.permute.xlu1 %627  ;;  %v2817_v25 = vmax.f32 %v2692_v26, 0.0  ;;  %v1486_v31 = vsel %vm1397_vm0, %v1483_v36, %v1485_v22  ;;  %v1940_v8 = vmul.f32 %v4658_v40, %v608_v54  ;;  %v2690_v0 = vadd.f32 %v5165_v1, %v2561_v49 }
 0x104   : > { %v623_v17 = vpop.permute.xlu0 %622  ;;  %v2691_v47 = vadd.f32 %v5165_v1, %v2562_v6  ;;  %v1815_v33 = vadd.f32 %v1486_v31, %v1064_v50  ;;  %v2234_v12 = vrot.slane %v1941_v37, 2  ;;  %v1063_v3 = vmul.f32 %v4669_v46, %v608_v54 }
 0x105   : > { %2943 = vst.msk [vmem:[#allocation2 + $0x140] sm:$0xff] %vm2902_vm2, %v2817_v25  ;;  %v1481_v27 = vrot.slane %v1189_v29, 1  ;;  %v2232_v30 = vrot.slane %v1940_v8, 2  ;;  %v2815_v34 = vmax.f32 %v2690_v0, 0.0  ;;  %v5304_v57 = vmul.f32 %v4656_v39, %v678_v51 }
 0x106   : > { %v2816_v43 = vmax.f32 %v2691_v47, 0.0  ;;  %v2237_v55 = vsel %vm2148_vm1, %v2234_v12, %v2236_v32  ;;  %v5312_v59 = vmul.f32 %v4669_v46, %v678_v51  ;;  %v5321_v61 = vmul.f32 %v4658_v40, %v678_v51 }
 0x107   : > { %v2566_v19 = vadd.f32 %v2237_v55, %v1815_v33  ;;  %v1482_v15 = vsel %vm1397_vm0, %v1479_v58, %v1481_v27  ;;  %v1484_v54 = vsel %vm1397_vm0, %v1481_v27, %v1483_v36  ;;  %2941 = vst.msk [vmem:[#allocation2 + $0x130] sm:$0xff] %vm2902_vm2, %v2815_v34  ;;  %v2233_v63 = vsel %vm2148_vm1, %v2230_v35, %v2232_v30 }
 0x108   : > { %v1813_v10 = vadd.f32 %v1482_v15, %v5114_v18  ;;  %v1814_v42 = vadd.f32 %v1484_v54, %v1063_v3  ;;  %2942 = vst.msk [vmem:[#allocation2 + $0x138] sm:$0xff] %vm2902_vm2, %v2816_v43  ;;  %v2254_v58 = vrot.slane %v5281_v13, 2  ;;  %v2235_v21 = vsel %vm2148_vm1, %v2232_v30, %v2234_v12  ;;  %v364_v54 = vld [vmem:[%s4613_s15 + $0x2f8] sm:$0xff] }
 0x109   : > { %v2695_v26 = vadd.f32 %v5165_v1, %v2566_v19  ;;  %v1193_v2 = vmul.f32 %v4656_v39, %v628_v41  ;;  %857 = vperm.xlu2 %4414, %v361_v5   ;;  %v1509_v35 = vrot.slane %v5304_v57, 1  ;;  %v1944_v51 = vmul.f32 %v4658_v40, %v628_v41  ;;  %v374_v57 = vld [vmem:[%s4613_s15 + $0x348] sm:$0xff] }
 0x10a   : > { %v2564_v36 = vadd.f32 %v2233_v63, %v1813_v10  ;;  %v2565_v20 = vadd.f32 %v2235_v21, %v1814_v42  ;;  %852 = vperm.xlu1 %4413, %v360_v60   ;;  %v1192_v37 = vmul.f32 %v4656_v39, %v623_v17  ;;  %v1943_v25 = vmul.f32 %v4658_v40, %v623_v17  ;;  %v363_v63 = vld [vmem:[%s4613_s15 + $0x2f0] sm:$0xff] }
 0x10b   : > { %v693_v18 = vpop.permute.xlu2 %692  ;;  %v2820_v6 = vmax.f32 %v2695_v26, 0.0  ;;  %v1489_v50 = vrot.slane %v1193_v2, 1  ;;  %847 = vperm.xlu0 %4412, %v359_v45   ;;  %v1067_v0 = vmul.f32 %v4669_v46, %v628_v41  ;;  %v2240_v47 = vrot.slane %v1944_v51, 2  ;;  %v362_v45 = vld [vmem:[%s4613_s15 + $0x2e8] sm:$0xff] }
 0x10c   : > { %v643_v49 = vpop.permute.xlu1 %642  ;;  %v638_v31 = vpop.permute.xlu0 %637  ;;  %v2693_v29 = vadd.f32 %v5165_v1, %v2564_v36  ;;  %v2694_v8 = vadd.f32 %v5165_v1, %v2565_v20  ;;  %v2260_v33 = vrot.slane %v5321_v61, 2  ;;  %v1487_v3 = vrot.slane %v1192_v37, 1 }
 0x10d   : > { %2946 = vst.msk [vmem:[#allocation2 + $0x158] sm:$0xff] %vm2902_vm2, %v2820_v6  ;;  %v1492_v12 = vsel %vm1397_vm0, %v1489_v50, %v1491_v52  ;;  %v2238_v27 = vrot.slane %v1943_v25, 2  ;;  %v1066_v55 = vmul.f32 %v4669_v46, %v623_v17  ;;  %v2243_v41 = vsel %vm2148_vm1, %v2240_v47, %v2242_v56 }
 0x10e   : > { %v2818_v30 = vmax.f32 %v2693_v29, 0.0  ;;  %v2819_v34 = vmax.f32 %v2694_v8, 0.0  ;;  %v1818_v43 = vadd.f32 %v1492_v12, %v1067_v0  ;;  %v1488_v5 = vsel %vm1397_vm0, %v1485_v22, %v1487_v3 }
 0x10f   : > { %v1490_v19 = vsel %vm1397_vm0, %v1487_v3, %v1489_v50  ;;  %v5350_v15 = vmul.f32 %v4669_v46, %v693_v18  ;;  %v1816_v10 = vadd.f32 %v1488_v5, %v5156_v7  ;;  %v5356_v42 = vmul.f32 %v4656_v39, %v693_v18 }
 0x110   : > { %2944 = vst.msk [vmem:[#allocation2 + $0x148] sm:$0xff] %vm2902_vm2, %v2818_v30  ;;  %v2569_v60 = vadd.f32 %v2243_v41, %v1818_v43  ;;  %v1817_v17 = vadd.f32 %v1490_v19, %v1066_v55  ;;  %v2239_v62 = vsel %vm2148_vm1, %v2236_v32, %v2238_v27  ;;  %v2241_v22 = vsel %vm2148_vm1, %v2238_v27, %v2240_v47  ;;  %v367_v19 = vld [vmem:[%s4613_s15 + $0x310] sm:$0xff] }
 0x111   : > { %2945 = vst.msk [vmem:[#allocation2 + $0x150] sm:$0xff] %vm2902_vm2, %v2819_v34  ;;  %v1196_v26 = vmul.f32 %v4656_v39, %v643_v49  ;;  %v1947_v21 = vmul.f32 %v4658_v40, %v643_v49  ;;  %v2567_v36 = vadd.f32 %v2239_v62, %v1816_v10  ;;  %v5369_v51 = vmul.f32 %v4658_v40, %v693_v18 }
 0x112   : > { %v2698_v7 = vadd.f32 %v5165_v1, %v2569_v60  ;;  %v2568_v20 = vadd.f32 %v2241_v22, %v1817_v17  ;;  %872 = vperm.xlu2 %4414, %v364_v54   ;;  %v1070_v14 = vmul.f32 %v4669_v46, %v643_v49  ;;  %v1195_v37 = vmul.f32 %v4656_v39, %v638_v31  ;;  %v365_v22 = vld [vmem:[%s4613_s15 + $0x300] sm:$0xff] }
 0x113   : > { %v708_v2 = vpop.permute.xlu2 %707  ;;  %v1495_v50 = vrot.slane %v1196_v26, 1  ;;  %v2246_v32 = vrot.slane %v1947_v21, 2  ;;  %867 = vperm.xlu1 %4413, %v363_v63   ;;  %862 = vperm.xlu0 %4412, %v362_v45   ;;  %v2696_v8 = vadd.f32 %v5165_v1, %v2567_v36  ;;  %v1946_v18 = vmul.f32 %v4658_v40, %v638_v31  ;;  %v366_v63 = vld [vmem:[%s4613_s15 + $0x308] sm:$0xff] }
 0x114   : > { %v658_v6 = vpop.permute.xlu1 %657  ;;  %v653_v25 = vpop.permute.xlu0 %652  ;;  %v2823_v29 = vmax.f32 %v2698_v7, 0.0  ;;  %v2697_v0 = vadd.f32 %v5165_v1, %v2568_v20  ;;  %v1515_v47 = vrot.slane %v5356_v42, 1  ;;  %v1069_v12 = vmul.f32 %v4669_v46, %v638_v31 }
 0x115   : > { %v1498_v49 = vsel %vm1397_vm0, %v1495_v50, %v1497_v48  ;;  %v1493_v3 = vrot.slane %v1195_v37, 1  ;;  %v2821_v27 = vmax.f32 %v2696_v8, 0.0  ;;  %v2244_v43 = vrot.slane %v1946_v18, 2 }
 0x116   : > { %2949 = vst.msk [vmem:[#allocation2 + $0x170] sm:$0xff] %vm2902_vm2, %v2823_v29  ;;  %v2822_v30 = vmax.f32 %v2697_v0, 0.0  ;;  %v1821_v34 = vadd.f32 %v1498_v49, %v1070_v14  ;;  %v2249_v55 = vsel %vm2148_vm1, %v2246_v32, %v2248_v23  ;;  %v5390_v31 = vmul.f32 %v4656_v39, %v708_v2 }
 0x117   : > { %v1494_v41 = vsel %vm1397_vm0, %v1491_v52, %v1493_v3  ;;  %v1496_v5 = vsel %vm1397_vm0, %v1493_v3, %v1495_v50  ;;  %2947 = vst.msk [vmem:[#allocation2 + $0x160] sm:$0xff] %vm2902_vm2, %v2821_v27  ;;  %v2266_v54 = vrot.slane %v5369_v51, 2  ;;  %v2245_v53 = vsel %vm2148_vm1, %v2242_v56, %v2244_v43 }
 0x118   : > { %v2572_v60 = vadd.f32 %v2249_v55, %v1821_v34  ;;  %v1819_v10 = vadd.f32 %v1494_v41, %v5188_v38  ;;  %v1820_v17 = vadd.f32 %v1496_v5, %v1069_v12  ;;  %2948 = vst.msk [vmem:[#allocation2 + $0x168] sm:$0xff] %vm2902_vm2, %v2822_v30  ;;  %v2247_v52 = vsel %vm2148_vm1, %v2244_v43, %v2246_v32  ;;  %v370_v5 = vld [vmem:[%s4613_s15 + $0x328] sm:$0xff] }
 0x119   : > { %v5403_v45 = vmul.f32 %v4669_v46, %v708_v2  ;;  %v5406_v62 = vmul.f32 %v4658_v40, %v708_v2  ;;  %v1199_v7 = vmul.f32 %v4656_v39, %v658_v6  ;;  %v1521_v56 = vrot.slane %v5390_v31, 1 }
 0x11a   : > { %v2701_v26 = vadd.f32 %v5165_v1, %v2572_v60  ;;  %v2570_v38 = vadd.f32 %v2245_v53, %v1819_v10  ;;  %v2571_v21 = vadd.f32 %v2247_v52, %v1820_v17  ;;  %887 = vperm.xlu2 %4414, %v367_v19   ;;  %v1950_v20 = vmul.f32 %v4658_v40, %v658_v6  ;;  %v369_v10 = vld [vmem:[%s4613_s15 + $0x320] sm:$0xff]  ;;  %v368_v52 = vld [vmem:[%s4613_s15 + $0x318] sm:$0xff] }
 0x11b   : > { %v723_v36 = vpop.permute.xlu2 %722  ;;  %v1198_v14 = vmul.f32 %v4656_v39, %v653_v25  ;;  %v1949_v50 = vmul.f32 %v4658_v40, %v653_v25  ;;  %882 = vperm.xlu1 %4413, %v366_v63   ;;  %v1501_v8 = vrot.slane %v1199_v7, 1  ;;  %877 = vperm.xlu0 %4412, %v365_v22   ;;  %v1073_v0 = vmul.f32 %v4669_v46, %v658_v6 }
 0x11c   : > { %v673_v24 = vpop.permute.xlu1 %672  ;;  %v668_v2 = vpop.permute.xlu0 %667  ;;  %v2826_v32 = vmax.f32 %v2701_v26, 0.0  ;;  %v2699_v37 = vadd.f32 %v5165_v1, %v2570_v38  ;;  %v2700_v29 = vadd.f32 %v5165_v1, %v2571_v21  ;;  %v2252_v18 = vrot.slane %v1950_v20, 2 }
 0x11d   : > { %v1499_v49 = vrot.slane %v1198_v14, 1  ;;  %v2250_v12 = vrot.slane %v1949_v50, 2  ;;  %v1504_v30 = vsel %vm1397_vm0, %v1501_v8, %v1503_v4  ;;  %v1072_v34 = vmul.f32 %v4669_v46, %v653_v25 }
 0x11e   : > { %2952 = vst.msk [vmem:[#allocation2 + $0x188] sm:$0xff] %vm2902_vm2, %v2826_v32  ;;  %v2824_v3 = vmax.f32 %v2699_v37, 0.0  ;;  %v2825_v27 = vmax.f32 %v2700_v29, 0.0  ;;  %v1824_v43 = vadd.f32 %v1504_v30, %v1073_v0  ;;  %v5428_v41 = vmul.f32 %v4656_v39, %v723_v36 }
 0x11f   : > { %v1500_v6 = vsel %vm1397_vm0, %v1497_v48, %v1499_v49  ;;  %v1502_v55 = vsel %vm1397_vm0, %v1499_v49, %v1501_v8  ;;  %v2272_v19 = vrot.slane %v5406_v62, 2  ;;  %v2255_v25 = vsel %vm2148_vm1, %v2252_v18, %v2254_v58 }
 0x120   : > { %2950 = vst.msk [vmem:[#allocation2 + $0x178] sm:$0xff] %vm2902_vm2, %v2824_v3  ;;  %v1822_v60 = vadd.f32 %v1500_v6, %v5246_v44  ;;  %v1823_v16 = vadd.f32 %v1502_v55, %v1072_v34  ;;  %v2575_v48 = vadd.f32 %v2255_v25, %v1824_v43  ;;  %v2251_v17 = vsel %vm2148_vm1, %v2248_v23, %v2250_v12  ;;  %v373_v55 = vld [vmem:[%s4613_s15 + $0x340] sm:$0xff] }
 0x121   : > { %2951 = vst.msk [vmem:[#allocation2 + $0x180] sm:$0xff] %vm2902_vm2, %v2825_v27  ;;  %v2253_v63 = vsel %vm2148_vm1, %v2250_v12, %v2252_v18  ;;  %v5444_v53 = vmul.f32 %v4669_v46, %v723_v36  ;;  %v1202_v38 = vmul.f32 %v4656_v39, %v673_v24  ;;  %v1953_v44 = vmul.f32 %v4658_v40, %v673_v24 }
 0x122   : > { %v2573_v22 = vadd.f32 %v2251_v17, %v1822_v60  ;;  %v2574_v26 = vadd.f32 %v2253_v63, %v1823_v16  ;;  %902 = vperm.xlu2 %4414, %v370_v5   ;;  %v2704_v20 = vadd.f32 %v5165_v1, %v2575_v48  ;;  %v1527_v28 = vrot.slane %v5428_v41, 1  ;;  %v372_v16 = vld [vmem:[%s4613_s15 + $0x338] sm:$0xff]  ;;  %v371_v17 = vld [vmem:[%s4613_s15 + $0x330] sm:$0xff] }
 0x123   : > { %v738_v21 = vpop.permute.xlu2 %737  ;;  %v5452_v23 = vmul.f32 %v4658_v40, %v723_v36  ;;  %v1201_v14 = vmul.f32 %v4656_v39, %v668_v2  ;;  %897 = vperm.xlu1 %4413, %v369_v10   ;;  %v1507_v29 = vrot.slane %v1202_v38, 1  ;;  %v2258_v8 = vrot.slane %v1953_v44, 2  ;;  %892 = vperm.xlu0 %4412, %v368_v52   ;;  %v383_v41 = vld [vmem:[%s4613_s15 + $0x390] sm:$0xff] }
 0x124   : > { %v688_v7 = vpop.permute.xlu1 %687  ;;  %v683_v50 = vpop.permute.xlu0 %682  ;;  %v2702_v32 = vadd.f32 %v5165_v1, %v2573_v22  ;;  %v2703_v37 = vadd.f32 %v5165_v1, %v2574_v26  ;;  %v2829_v0 = vmax.f32 %v2704_v20, 0.0  ;;  %v1076_v18 = vmul.f32 %v4669_v46, %v673_v24 }
 0x125   : > { %v1505_v49 = vrot.slane %v1201_v14, 1  ;;  %v1952_v12 = vmul.f32 %v4658_v40, %v668_v2  ;;  %v1510_v27 = vsel %vm1397_vm0, %v1507_v29, %v1509_v35  ;;  %v1075_v30 = vmul.f32 %v4669_v46, %v668_v2 }
 0x126   : > { %v2827_v36 = vmax.f32 %v2702_v32, 0.0  ;;  %v2828_v3 = vmax.f32 %v2703_v37, 0.0  ;;  %2955 = vst.msk [vmem:[#allocation2 + $0x1a0] sm:$0xff] %vm2902_vm2, %v2829_v0  ;;  %v1827_v34 = vadd.f32 %v1510_v27, %v1076_v18  ;;  %v2278_v5 = vrot.slane %v5452_v23, 2 }
 0x127   : > { %v1506_v24 = vsel %vm1397_vm0, %v1503_v4, %v1505_v49  ;;  %v1508_v43 = vsel %vm1397_vm0, %v1505_v49, %v1507_v29  ;;  %v2256_v6 = vrot.slane %v1952_v12, 2  ;;  %v2261_v2 = vsel %vm2148_vm1, %v2258_v8, %v2260_v33 }
 0x128   : > { %2953 = vst.msk [vmem:[#allocation2 + $0x190] sm:$0xff] %vm2902_vm2, %v2827_v36  ;;  %v1825_v25 = vadd.f32 %v1506_v24, %v5264_v11  ;;  %v1826_v60 = vadd.f32 %v1508_v43, %v1075_v30  ;;  %v2578_v9 = vadd.f32 %v2261_v2, %v1827_v34  ;;  %v5482_v48 = vmul.f32 %v4656_v39, %v738_v21  ;;  %v376_v43 = vld [vmem:[%s4613_s15 + $0x358] sm:$0xff] }
 0x129   : > { %2954 = vst.msk [vmem:[#allocation2 + $0x198] sm:$0xff] %vm2902_vm2, %v2828_v3  ;;  %v2257_v4 = vsel %vm2148_vm1, %v2254_v58, %v2256_v6  ;;  %v2259_v10 = vsel %vm2148_vm1, %v2256_v6, %v2258_v8  ;;  %v5486_v22 = vmul.f32 %v4669_v46, %v738_v21  ;;  %v5489_v11 = vmul.f32 %v4658_v40, %v738_v21 }
 0x12a   : > { %v2576_v63 = vadd.f32 %v2257_v4, %v1825_v25  ;;  %v2577_v52 = vadd.f32 %v2259_v10, %v1826_v60  ;;  %917 = vperm.xlu2 %4414, %v373_v55   ;;  %v2707_v13 = vadd.f32 %v5165_v1, %v2578_v9  ;;  %v1079_v58 = vmul.f32 %v4669_v46, %v688_v7  ;;  %v375_v60 = vld [vmem:[%s4613_s15 + $0x350] sm:$0xff] }
 0x12b   : > { %v753_v26 = vpop.permute.xlu2 %752  ;;  %v1205_v44 = vmul.f32 %v4656_v39, %v688_v7  ;;  %v1956_v20 = vmul.f32 %v4658_v40, %v688_v7  ;;  %912 = vperm.xlu1 %4413, %v372_v16   ;;  %v1204_v21 = vmul.f32 %v4656_v39, %v683_v50  ;;  %v1955_v29 = vmul.f32 %v4658_v40, %v683_v50 }
 0x12c   : > { %v703_v38 = vpop.permute.xlu1 %702  ;;  %v698_v14 = vpop.permute.xlu0 %697  ;;  %v2705_v32 = vadd.f32 %v5165_v1, %v2576_v63  ;;  %v2706_v37 = vadd.f32 %v5165_v1, %v2577_v52  ;;  %907 = vperm.xlu0 %4412, %v371_v17   ;;  %v2832_v8 = vmax.f32 %v2707_v13, 0.0  ;;  %v1533_v0 = vrot.slane %v5482_v48, 1 }
 0x12d   : > { %v1513_v18 = vrot.slane %v1205_v44, 1  ;;  %v2264_v49 = vrot.slane %v1956_v20, 2  ;;  %v1511_v36 = vrot.slane %v1204_v21, 1  ;;  %v2262_v3 = vrot.slane %v1955_v29, 2 }
 0x12e   : > { %v2830_v12 = vmax.f32 %v2705_v32, 0.0  ;;  %v2831_v7 = vmax.f32 %v2706_v37, 0.0  ;;  %2958 = vst.msk [vmem:[#allocation2 + $0x1b8] sm:$0xff] %vm2902_vm2, %v2832_v8  ;;  %v2284_v27 = vrot.slane %v5489_v11, 2  ;;  %v1078_v34 = vmul.f32 %v4669_v46, %v683_v50 }
 0x12f   : > { %v1516_v30 = vsel %vm1397_vm0, %v1513_v18, %v1515_v47  ;;  %v5507_v24 = vmul.f32 %v4656_v39, %v753_v26  ;;  %v1512_v55 = vsel %vm1397_vm0, %v1509_v35, %v1511_v36  ;;  %v1514_v2 = vsel %vm1397_vm0, %v1511_v36, %v1513_v18 }
 0x130   : > { %2956 = vst.msk [vmem:[#allocation2 + $0x1a8] sm:$0xff] %vm2902_vm2, %v2830_v12  ;;  %v1830_v6 = vadd.f32 %v1516_v30, %v1079_v58  ;;  %v5516_v25 = vmul.f32 %v4669_v46, %v753_v26  ;;  %v2267_v50 = vsel %vm2148_vm1, %v2264_v49, %v2266_v54  ;;  %v1828_v16 = vadd.f32 %v1512_v55, %v5312_v59 }
 0x131   : > { %2957 = vst.msk [vmem:[#allocation2 + $0x1b0] sm:$0xff] %vm2902_vm2, %v2831_v7  ;;  %v1829_v9 = vadd.f32 %v1514_v2, %v1078_v34  ;;  %v5525_v4 = vmul.f32 %v4658_v40, %v753_v26  ;;  %v2263_v10 = vsel %vm2148_vm1, %v2260_v33, %v2262_v3  ;;  %v2265_v17 = vsel %vm2148_vm1, %v2262_v3, %v2264_v49 }
 0x132   : > { %v2581_v35 = vadd.f32 %v2267_v50, %v1830_v6  ;;  %v1208_v63 = vmul.f32 %v4656_v39, %v703_v38  ;;  %932 = vperm.xlu2 %4414, %v376_v43   ;;  %v2579_v58 = vadd.f32 %v2263_v10, %v1828_v16  ;;  %v1539_v59 = vrot.slane %v5507_v24, 1  ;;  %v378_v50 = vld [vmem:[%s4613_s15 + $0x368] sm:$0xff] }
 0x133   : > { %v768_v52 = vpop.permute.xlu2 %767  ;;  %v2580_v44 = vadd.f32 %v2265_v17, %v1829_v9  ;;  %v1959_v26 = vmul.f32 %v4658_v40, %v703_v38  ;;  %927 = vperm.xlu1 %4413, %v375_v60   ;;  %v1207_v33 = vmul.f32 %v4656_v39, %v698_v14  ;;  %v1958_v37 = vmul.f32 %v4658_v40, %v698_v14  ;;  %v379_v60 = vld [vmem:[%s4613_s15 + $0x370] sm:$0xff] }
 0x134   : > { %v718_v13 = vpop.permute.xlu1 %717  ;;  %v5535_v20 = vpop.permute.xlu0 %712  ;;  %v2710_v61 = vadd.f32 %v5165_v1, %v2581_v35  ;;  %v1519_v32 = vrot.slane %v1208_v63, 1  ;;  %922 = vperm.xlu0 %4412, %v374_v57   ;;  %v2708_v21 = vadd.f32 %v5165_v1, %v2579_v58  ;;  %v1082_v8 = vmul.f32 %v4669_v46, %v703_v38  ;;  %v377_v35 = vld [vmem:[%s4613_s15 + $0x360] sm:$0xff] }
 0x135   : > { %v2709_v29 = vadd.f32 %v5165_v1, %v2580_v44  ;;  %v2270_v18 = vrot.slane %v1959_v26, 2  ;;  %v1517_v7 = vrot.slane %v1207_v33, 1  ;;  %v2268_v36 = vrot.slane %v1958_v37, 2 }
 0x136   : > { %v2835_v49 = vmax.f32 %v2710_v61, 0.0  ;;  %v1522_v12 = vsel %vm1397_vm0, %v1519_v32, %v1521_v56  ;;  %v2833_v3 = vmax.f32 %v2708_v21, 0.0  ;;  %v1081_v43 = vmul.f32 %v4669_v46, %v698_v14 }
 0x137   : > { %v2834_v30 = vmax.f32 %v2709_v29, 0.0  ;;  %v1833_v34 = vadd.f32 %v1522_v12, %v1082_v8  ;;  %v2273_v38 = vsel %vm2148_vm1, %v2270_v18, %v2272_v19  ;;  %v1518_v6 = vsel %vm1397_vm0, %v1515_v47, %v1517_v7 }
 0x138   : > { %2961 = vst.msk [vmem:[#allocation2 + $0x1d0] sm:$0xff] %vm2902_vm2, %v2835_v49  ;;  %v1520_v55 = vsel %vm1397_vm0, %v1517_v7, %v1519_v32  ;;  %v2269_v2 = vsel %vm2148_vm1, %v2266_v54, %v2268_v36  ;;  %v1831_v16 = vadd.f32 %v1518_v6, %v5350_v15  ;;  %v2271_v57 = vsel %vm2148_vm1, %v2268_v36, %v2270_v18 }
 0x139   : > { %2959 = vst.msk [vmem:[#allocation2 + $0x1c0] sm:$0xff] %vm2902_vm2, %v2833_v3  ;;  %v2584_v14 = vadd.f32 %v2273_v38, %v1833_v34  ;;  %v1832_v9 = vadd.f32 %v1520_v55, %v1081_v43  ;;  %v5566_v42 = vmul.f32 %v4656_v39, %v768_v52  ;;  %v5569_v51 = vmul.f32 %v4658_v40, %v768_v52  ;;  %v382_v55 = vld [vmem:[%s4613_s15 + $0x388] sm:$0xff] }
 0x13a   : > { %2960 = vst.msk [vmem:[#allocation2 + $0x1c8] sm:$0xff] %vm2902_vm2, %v2834_v30  ;;  %v1211_v47 = vmul.f32 %v4656_v39, %v718_v13  ;;  %v1962_v54 = vmul.f32 %v4658_v40, %v718_v13  ;;  %v2290_v17 = vrot.slane %v5525_v4, 2  ;;  %v2582_v63 = vadd.f32 %v2269_v2, %v1831_v16  ;;  %947 = vperm.xlu2 %4414, %v379_v60   ;;  %v381_v2 = vld [vmem:[%s4613_s15 + $0x380] sm:$0xff] }
 0x13b   : > { %v783_v10 = vpop.permute.xlu2 %782  ;;  %v2713_v15 = vadd.f32 %v5165_v1, %v2584_v14  ;;  %v2583_v58 = vadd.f32 %v2271_v57, %v1832_v9  ;;  %942 = vperm.xlu1 %4413, %v378_v50   ;;  %v5576_v61 = vmul.f32 %v4669_v46, %v768_v52  ;;  %v1085_v32 = vmul.f32 %v4669_v46, %v718_v13  ;;  %v380_v9 = vld [vmem:[%s4613_s15 + $0x378] sm:$0xff] }
 0x13c   : > { %v733_v44 = vpop.permute.xlu1 %732  ;;  %v728_v26 = vpop.permute.xlu0 %727  ;;  %v1525_v33 = vrot.slane %v1211_v47, 1  ;;  %v2276_v37 = vrot.slane %v1962_v54, 2  ;;  %937 = vperm.xlu0 %4412, %v377_v35   ;;  %v2711_v29 = vadd.f32 %v5165_v1, %v2582_v63  ;;  %v1210_v18 = vmul.f32 %v4656_v39, %v5535_v20 }
 0x13d   : > { %v2838_v21 = vmax.f32 %v2713_v15, 0.0  ;;  %v2712_v8 = vadd.f32 %v5165_v1, %v2583_v58  ;;  %v1545_v49 = vrot.slane %v5566_v42, 1  ;;  %v2296_v52 = vrot.slane %v5569_v51, 2 }
 0x13e   : > { %v1528_v13 = vsel %vm1397_vm0, %v1525_v33, %v1527_v28  ;;  %v1961_v12 = vmul.f32 %v4658_v40, %v5535_v20  ;;  %v2836_v7 = vmax.f32 %v2711_v29, 0.0  ;;  %v1523_v30 = vrot.slane %v1210_v18, 1 }
 0x13f   : > { %2964 = vst.msk [vmem:[#allocation2 + $0x1e8] sm:$0xff] %vm2902_vm2, %v2838_v21  ;;  %v2837_v36 = vmax.f32 %v2712_v8, 0.0  ;;  %v1836_v3 = vadd.f32 %v1528_v13, %v1085_v32  ;;  %v2279_v34 = vsel %vm2148_vm1, %v2276_v37, %v2278_v5  ;;  %v1084_v43 = vmul.f32 %v4669_v46, %v5535_v20 }
 0x140   : > { %v2274_v38 = vrot.slane %v1961_v12, 2  ;;  %v5597_v6 = vmul.f32 %v4669_v46, %v783_v10  ;;  %2962 = vst.msk [vmem:[#allocation2 + $0x1d8] sm:$0xff] %vm2902_vm2, %v2836_v7  ;;  %v1524_v50 = vsel %vm1397_vm0, %v1521_v56, %v1523_v30  ;;  %v1526_v14 = vsel %vm1397_vm0, %v1523_v30, %v1525_v33 }
 0x141   : > { %v2587_v60 = vadd.f32 %v2279_v34, %v1836_v3  ;;  %v1214_v16 = vmul.f32 %v4656_v39, %v733_v44  ;;  %2963 = vst.msk [vmem:[#allocation2 + $0x1e0] sm:$0xff] %vm2902_vm2, %v2837_v36  ;;  %v1834_v20 = vadd.f32 %v1524_v50, %v5403_v45  ;;  %v1835_v57 = vadd.f32 %v1526_v14, %v1084_v43  ;;  %v384_v50 = vld [vmem:[%s4613_s15 + $0x398] sm:$0xff] }
 0x142   : > { %v5611_v35 = vmul.f32 %v4656_v39, %v783_v10  ;;  %v5614_v47 = vmul.f32 %v4658_v40, %v783_v10  ;;  %v2275_v56 = vsel %vm2148_vm1, %v2272_v19, %v2274_v38  ;;  %v2277_v15 = vsel %vm2148_vm1, %v2274_v38, %v2276_v37  ;;  %962 = vperm.xlu2 %4414, %v382_v55   ;;  %v385_v38 = vld [vmem:[%s4613_s15 + $0x3a0] sm:$0xff] }
 0x143   : > { %v798_v54 = vpop.permute.xlu2 %797  ;;  %v2716_v31 = vadd.f32 %v5165_v1, %v2587_v60  ;;  %v1531_v63 = vrot.slane %v1214_v16, 1  ;;  %957 = vperm.xlu1 %4413, %v381_v2   ;;  %v2585_v32 = vadd.f32 %v2275_v56, %v1834_v20  ;;  %v2586_v33 = vadd.f32 %v2277_v15, %v1835_v57 }
 0x144   : > { %v748_v45 = vpop.permute.xlu1 %747  ;;  %v5621_v58 = vpop.permute.xlu0 %742  ;;  %v1088_v10 = vmul.f32 %v4669_v46, %v733_v44  ;;  %v1965_v21 = vmul.f32 %v4658_v40, %v733_v44  ;;  %952 = vperm.xlu0 %4412, %v380_v9   ;;  %v1213_v19 = vmul.f32 %v4656_v39, %v728_v26  ;;  %v1964_v37 = vmul.f32 %v4658_v40, %v728_v26 }
 0x145   : > { %v2841_v29 = vmax.f32 %v2716_v31, 0.0  ;;  %v1534_v62 = vsel %vm1397_vm0, %v1531_v63, %v1533_v0  ;;  %v2714_v8 = vadd.f32 %v5165_v1, %v2585_v32  ;;  %v2715_v18 = vadd.f32 %v5165_v1, %v2586_v33  ;;  %v5661_v31 = vld [vmem:[#allocation6] ss:$0 sm:$0xff] }
 0x146   : > { %v1839_v13 = vadd.f32 %v1534_v62, %v1088_v10  ;;  %v2282_v12 = vrot.slane %v1965_v21, 2  ;;  %v1551_v44 = vrot.slane %v5611_v35, 1  ;;  %v1087_v7 = vmul.f32 %v4669_v46, %v728_v26 }
 0x147   : > { %2967 = vst.msk [vmem:[#allocation2 + $0x200] sm:$0xff] %vm2902_vm2, %v2841_v29  ;;  %v1529_v36 = vrot.slane %v1213_v19, 1  ;;  %v2280_v3 = vrot.slane %v1964_v37, 2  ;;  %v2839_v30 = vmax.f32 %v2714_v8, 0.0  ;;  %v2840_v34 = vmax.f32 %v2715_v18, 0.0 }
 0x148   : > { %v2285_v43 = vsel %vm2148_vm1, %v2282_v12, %v2284_v27  ;;  %v5639_v1 = vmul.f32 %v4656_v39, %v798_v54  ;;  %v5647_v60 = vmul.f32 %v4669_v46, %v798_v54  ;;  %v5656_v20 = vmul.f32 %v4658_v40, %v798_v54 }
 0x149   : > { %v2590_v55 = vadd.f32 %v2285_v43, %v1839_v13  ;;  %v1530_v2 = vsel %vm1397_vm0, %v1527_v28, %v1529_v36  ;;  %v1532_v26 = vsel %vm1397_vm0, %v1529_v36, %v1531_v63  ;;  %2965 = vst.msk [vmem:[#allocation2 + $0x1f0] sm:$0xff] %vm2902_vm2, %v2839_v30  ;;  %v2281_v9 = vsel %vm2148_vm1, %v2278_v5, %v2280_v3 }
 0x14a   : > { %v1837_v14 = vadd.f32 %v1530_v2, %v5444_v53  ;;  %v1838_v16 = vadd.f32 %v1532_v26, %v1087_v7  ;;  %2966 = vst.msk [vmem:[#allocation2 + $0x1f8] sm:$0xff] %vm2902_vm2, %v2840_v34  ;;  %v2302_v57 = vrot.slane %v5614_v47, 2  ;;  %v2283_v53 = vsel %vm2148_vm1, %v2280_v3, %v2282_v12  ;;  %977 = vperm.xlu2 %4414, %v385_v38   ;;  %v388_v26 = vld [vmem:[%s4613_s15 + $0x3b8] sm:$0xff] }
 0x14b   : > { %v813_v28 = vpop.permute.xlu2 %812  ;;  %v2719_v56 = vadd.f32 %v5661_v31, %v2590_v55  ;;  %v1217_v15 = vmul.f32 %v4656_v39, %v748_v45  ;;  %v1557_v54 = vrot.slane %v5639_v1, 1  ;;  %v1968_v32 = vmul.f32 %v4658_v40, %v748_v45  ;;  %972 = vperm.xlu1 %4413, %v384_v50  }
 0x14c   : > { %v763_v23 = vpop.permute.xlu1 %762  ;;  %v2588_v5 = vadd.f32 %v2281_v9, %v1837_v14  ;;  %v2589_v63 = vadd.f32 %v2283_v53, %v1838_v16  ;;  %v758_v33 = vpop.permute.xlu0 %757  ;;  %v1216_v29 = vmul.f32 %v4656_v39, %v5621_v58  ;;  %v1967_v62 = vmul.f32 %v4658_v40, %v5621_v58  ;;  %967 = vperm.xlu0 %4412, %v383_v41   ;;  %v387_v9 = vld [vmem:[%s4613_s15 + $0x3b0] sm:$0xff]  ;;  %v386_v41 = vld [vmem:[%s4613_s15 + $0x3a8] sm:$0xff] }
 0x14d   : > { %v2844_v10 = vmax.f32 %v2719_v56, 0.0  ;;  %v1537_v21 = vrot.slane %v1217_v15, 1  ;;  %v1091_v8 = vmul.f32 %v4669_v46, %v748_v45  ;;  %v2288_v18 = vrot.slane %v1968_v32, 2 }
 0x14e   : > { %v2717_v19 = vadd.f32 %v5661_v31, %v2588_v5  ;;  %v2718_v37 = vadd.f32 %v5661_v31, %v2589_v63  ;;  %v2308_v13 = vrot.slane %v5656_v20, 2  ;;  %v1535_v7 = vrot.slane %v1216_v29, 1 }
 0x14f   : > { %2970 = vst.msk [vmem:[#allocation2 + $0x218] sm:$0xff] %vm2902_vm2, %v2844_v10  ;;  %v1540_v12 = vsel %vm1397_vm0, %v1537_v21, %v1539_v59  ;;  %v2286_v36 = vrot.slane %v1967_v62, 2  ;;  %v1090_v43 = vmul.f32 %v4669_v46, %v5621_v58  ;;  %v2291_v45 = vsel %vm2148_vm1, %v2288_v18, %v2290_v17 }
 0x150   : > { %v2842_v3 = vmax.f32 %v2717_v19, 0.0  ;;  %v2843_v30 = vmax.f32 %v2718_v37, 0.0  ;;  %v1842_v34 = vadd.f32 %v1540_v12, %v1091_v8  ;;  %v1536_v38 = vsel %vm1397_vm0, %v1533_v0, %v1535_v7 }
 0x151   : > { %v1538_v55 = vsel %vm1397_vm0, %v1535_v7, %v1537_v21  ;;  %v5690_v2 = vmul.f32 %v4669_v46, %v813_v28  ;;  %v1840_v14 = vadd.f32 %v1536_v38, %v5486_v22  ;;  %v5696_v16 = vmul.f32 %v4656_v39, %v813_v28 }
 0x152   : > { %2968 = vst.msk [vmem:[#allocation2 + $0x208] sm:$0xff] %vm2902_vm2, %v2842_v3  ;;  %v2593_v50 = vadd.f32 %v2291_v45, %v1842_v34  ;;  %v1841_v58 = vadd.f32 %v1538_v55, %v1090_v43  ;;  %v2287_v48 = vsel %vm2148_vm1, %v2284_v27, %v2286_v36  ;;  %v2289_v0 = vsel %vm2148_vm1, %v2286_v36, %v2288_v18  ;;  %v391_v55 = vld [vmem:[%s4613_s15 + $0x3d0] sm:$0xff] }
 0x153   : > { %2969 = vst.msk [vmem:[#allocation2 + $0x210] sm:$0xff] %vm2902_vm2, %v2843_v30  ;;  %v1220_v56 = vmul.f32 %v4656_v39, %v763_v23  ;;  %v1971_v53 = vmul.f32 %v4658_v40, %v763_v23  ;;  %v828_v15 = vpop.permute.xlu2 %827  ;;  %v2591_v63 = vadd.f32 %v2287_v48, %v1840_v14  ;;  %v5709_v10 = vmul.f32 %v4658_v40, %v813_v28 }
 0x154   : > { %v778_v22 = vpop.permute.xlu1 %777  ;;  %v2722_v5 = vadd.f32 %v5661_v31, %v2593_v50  ;;  %v2592_v32 = vadd.f32 %v2289_v0, %v1841_v58  ;;  %992 = vperm.xlu2 %4414, %v388_v26   ;;  %v5711_v21 = vpop.permute.xlu0 %772  ;;  %v1094_v11 = vmul.f32 %v4669_v46, %v763_v23  ;;  %v1219_v62 = vmul.f32 %v4656_v39, %v758_v33  ;;  %v389_v0 = vld [vmem:[%s4613_s15 + $0x3c0] sm:$0xff] }
 0x155   : > { %v1543_v27 = vrot.slane %v1220_v56, 1  ;;  %v2294_v29 = vrot.slane %v1971_v53, 2  ;;  %987 = vperm.xlu1 %4413, %v387_v9   ;;  %982 = vperm.xlu0 %4412, %v386_v41   ;;  %v2720_v37 = vadd.f32 %v5661_v31, %v2591_v63  ;;  %v1970_v28 = vmul.f32 %v4658_v40, %v758_v33  ;;  %v390_v9 = vld [vmem:[%s4613_s15 + $0x3c8] sm:$0xff] }
 0x156   : > { %v2847_v19 = vmax.f32 %v2722_v5, 0.0  ;;  %v2721_v8 = vadd.f32 %v5661_v31, %v2592_v32  ;;  %v1563_v18 = vrot.slane %v5696_v16, 1  ;;  %v1093_v12 = vmul.f32 %v4669_v46, %v758_v33 }
 0x157   : > { %v1546_v23 = vsel %vm1397_vm0, %v1543_v27, %v1545_v49  ;;  %v1541_v7 = vrot.slane %v1219_v62, 1  ;;  %v2845_v36 = vmax.f32 %v2720_v37, 0.0  ;;  %v2292_v34 = vrot.slane %v1970_v28, 2 }
 0x158   : > { %2973 = vst.msk [vmem:[#allocation2 + $0x230] sm:$0xff] %vm2902_vm2, %v2847_v19  ;;  %v2846_v3 = vmax.f32 %v2721_v8, 0.0  ;;  %v1845_v30 = vadd.f32 %v1546_v23, %v1094_v11  ;;  %v2297_v43 = vsel %vm2148_vm1, %v2294_v29, %v2296_v52  ;;  %v5732_v33 = vmul.f32 %v4656_v39, %v828_v15 }
 0x159   : > { %v1542_v45 = vsel %vm1397_vm0, %v1539_v59, %v1541_v7  ;;  %v1544_v38 = vsel %vm1397_vm0, %v1541_v7, %v1543_v27  ;;  %2971 = vst.msk [vmem:[#allocation2 + $0x220] sm:$0xff] %vm2902_vm2, %v2845_v36  ;;  %v2314_v26 = vrot.slane %v5709_v10, 2  ;;  %v2293_v24 = vsel %vm2148_vm1, %v2290_v17, %v2292_v34 }
 0x15a   : > { %v2596_v50 = vadd.f32 %v2297_v43, %v1845_v30  ;;  %v1843_v14 = vadd.f32 %v1542_v45, %v5516_v25  ;;  %v1844_v58 = vadd.f32 %v1544_v38, %v1093_v12  ;;  %2972 = vst.msk [vmem:[#allocation2 + $0x228] sm:$0xff] %vm2902_vm2, %v2846_v3  ;;  %v2295_v59 = vsel %vm2148_vm1, %v2292_v34, %v2294_v29 }
 0x15b   : > { %v5745_v41 = vmul.f32 %v4669_v46, %v828_v15  ;;  %v5748_v48 = vmul.f32 %v4658_v40, %v828_v15  ;;  %v843_v56 = vpop.permute.xlu2 %842  ;;  %v1223_v32 = vmul.f32 %v4656_v39, %v778_v22  ;;  %v1569_v17 = vrot.slane %v5732_v33, 1 }
 0x15c   : > { %v793_v53 = vpop.permute.xlu1 %792  ;;  %v2725_v25 = vadd.f32 %v5661_v31, %v2596_v50  ;;  %v2594_v5 = vadd.f32 %v2293_v24, %v1843_v14  ;;  %v2595_v63 = vadd.f32 %v2295_v59, %v1844_v58  ;;  %1007 = vperm.xlu2 %4414, %v391_v55   ;;  %v788_v4 = vpop.permute.xlu0 %787  ;;  %v1974_v11 = vmul.f32 %v4658_v40, %v778_v22  ;;  %v393_v14 = vld [vmem:[%s4613_s15 + $0x3e0] sm:$0xff]  ;;  %v392_v24 = vld [vmem:[%s4613_s15 + $0x3d8] sm:$0xff] }
 0x15d   : > { %v1222_v27 = vmul.f32 %v4656_v39, %v5711_v21  ;;  %v1973_v15 = vmul.f32 %v4658_v40, %v5711_v21  ;;  %1002 = vperm.xlu1 %4413, %v390_v9   ;;  %v1549_v37 = vrot.slane %v1223_v32, 1  ;;  %997 = vperm.xlu0 %4412, %v389_v0   ;;  %v1097_v8 = vmul.f32 %v4669_v46, %v778_v22 }
 0x15e   : > { %v2850_v29 = vmax.f32 %v2725_v25, 0.0  ;;  %v2723_v62 = vadd.f32 %v5661_v31, %v2594_v5  ;;  %v2724_v19 = vadd.f32 %v5661_v31, %v2595_v63  ;;  %v2300_v28 = vrot.slane %v1974_v11, 2 }
 0x15f   : > { %v1547_v23 = vrot.slane %v1222_v27, 1  ;;  %v2298_v12 = vrot.slane %v1973_v15, 2  ;;  %v1552_v3 = vsel %vm1397_vm0, %v1549_v37, %v1551_v44  ;;  %v1096_v30 = vmul.f32 %v4669_v46, %v5711_v21 }
 0x160   : > { %2976 = vst.msk [vmem:[#allocation2 + $0x248] sm:$0xff] %vm2902_vm2, %v2850_v29  ;;  %v2848_v7 = vmax.f32 %v2723_v62, 0.0  ;;  %v2849_v36 = vmax.f32 %v2724_v19, 0.0  ;;  %v1848_v34 = vadd.f32 %v1552_v3, %v1097_v8  ;;  %v5773_v45 = vmul.f32 %v4656_v39, %v843_v56 }
 0x161   : > { %v1548_v22 = vsel %vm1397_vm0, %v1545_v49, %v1547_v23  ;;  %v1550_v43 = vsel %vm1397_vm0, %v1547_v23, %v1549_v37  ;;  %v2320_v38 = vrot.slane %v5748_v48, 2  ;;  %v2303_v55 = vsel %vm2148_vm1, %v2300_v28, %v2302_v57 }
 0x162   : > { %2974 = vst.msk [vmem:[#allocation2 + $0x238] sm:$0xff] %vm2902_vm2, %v2848_v7  ;;  %v1846_v21 = vadd.f32 %v1548_v22, %v5576_v61  ;;  %v1847_v50 = vadd.f32 %v1550_v43, %v1096_v30  ;;  %v2599_v42 = vadd.f32 %v2303_v55, %v1848_v34  ;;  %v2299_v49 = vsel %vm2148_vm1, %v2296_v52, %v2298_v12 }
 0x163   : > { %2975 = vst.msk [vmem:[#allocation2 + $0x240] sm:$0xff] %vm2902_vm2, %v2849_v36  ;;  %v2301_v58 = vsel %vm2148_vm1, %v2298_v12, %v2300_v28  ;;  %v5788_v9 = vmul.f32 %v4669_v46, %v843_v56  ;;  %v858_v59 = vpop.permute.xlu2 %857  ;;  %v1226_v61 = vmul.f32 %v4656_v39, %v793_v53  ;;  %v1977_v63 = vmul.f32 %v4658_v40, %v793_v53 }
 0x164   : > { %v808_v0 = vpop.permute.xlu1 %807  ;;  %v2597_v25 = vadd.f32 %v2299_v49, %v1846_v21  ;;  %v2598_v5 = vadd.f32 %v2301_v58, %v1847_v50  ;;  %v803_v32 = vpop.permute.xlu0 %802  ;;  %v2728_v11 = vadd.f32 %v5661_v31, %v2599_v42  ;;  %v1575_v51 = vrot.slane %v5773_v45, 1 }
 0x165   : > { %v5796_v52 = vmul.f32 %v4658_v40, %v843_v56  ;;  %v1225_v27 = vmul.f32 %v4656_v39, %v788_v4  ;;  %1017 = vperm.xlu1 %4413, %v393_v14   ;;  %v1555_v62 = vrot.slane %v1226_v61, 1  ;;  %v2306_v19 = vrot.slane %v1977_v63, 2  ;;  %1012 = vperm.xlu0 %4412, %v392_v24  }
 0x166   : > { %v2726_v15 = vadd.f32 %v5661_v31, %v2597_v25  ;;  %v2727_v29 = vadd.f32 %v5661_v31, %v2598_v5  ;;  %v2853_v37 = vmax.f32 %v2728_v11, 0.0  ;;  %v1100_v8 = vmul.f32 %v4669_v46, %v793_v53 }
 0x167   : > { %v1553_v28 = vrot.slane %v1225_v27, 1  ;;  %v1976_v23 = vmul.f32 %v4658_v40, %v788_v4  ;;  %v1558_v56 = vsel %vm1397_vm0, %v1555_v62, %v1557_v54  ;;  %v1099_v36 = vmul.f32 %v4669_v46, %v788_v4 }
 0x168   : > { %v2851_v12 = vmax.f32 %v2726_v15, 0.0  ;;  %v2852_v7 = vmax.f32 %v2727_v29, 0.0  ;;  %2979 = vst.msk [vmem:[#allocation2 + $0x260] sm:$0xff] %vm2902_vm2, %v2853_v37  ;;  %v1851_v3 = vadd.f32 %v1558_v56, %v1100_v8  ;;  %v2326_v22 = vrot.slane %v5796_v52, 2 }
 0x169   : > { %v1554_v30 = vsel %vm1397_vm0, %v1551_v44, %v1553_v28  ;;  %v1556_v53 = vsel %vm1397_vm0, %v1553_v28, %v1555_v62  ;;  %v2304_v34 = vrot.slane %v1976_v23, 2  ;;  %v2309_v43 = vsel %vm2148_vm1, %v2306_v19, %v2308_v13 }
 0x16a   : > { %2977 = vst.msk [vmem:[#allocation2 + $0x250] sm:$0xff] %vm2902_vm2, %v2851_v12  ;;  %v1849_v4 = vadd.f32 %v1554_v30, %v5597_v6  ;;  %v1850_v55 = vadd.f32 %v1556_v53, %v1099_v36  ;;  %v2602_v21 = vadd.f32 %v2309_v43, %v1851_v3  ;;  %v5824_v50 = vmul.f32 %v4656_v39, %v858_v59 }
 0x16b   : > { %2978 = vst.msk [vmem:[#allocation2 + $0x258] sm:$0xff] %vm2902_vm2, %v2852_v7  ;;  %v2305_v35 = vsel %vm2148_vm1, %v2302_v57, %v2304_v34  ;;  %v2307_v44 = vsel %vm2148_vm1, %v2304_v34, %v2306_v19  ;;  %v5827_v58 = vmul.f32 %v4669_v46, %v858_v59  ;;  %v5830_v6 = vmul.f32 %v4658_v40, %v858_v59 }
 0x16c   : > { %v823_v14 = vpop.permute.xlu1 %822  ;;  %v2600_v42 = vadd.f32 %v2305_v35, %v1849_v4  ;;  %v2601_v49 = vadd.f32 %v2307_v44, %v1850_v55  ;;  %v873_v24 = vpop.permute.xlu2 %872  ;;  %v2731_v47 = vadd.f32 %v5661_v31, %v2602_v21  ;;  %v1103_v57 = vmul.f32 %v4669_v46, %v808_v0 }
 0x16d   : > { %v818_v25 = vpop.permute.xlu0 %817  ;;  %v1229_v5 = vmul.f32 %v4656_v39, %v808_v0  ;;  %v1980_v61 = vmul.f32 %v4658_v40, %v808_v0  ;;  %v1228_v27 = vmul.f32 %v4656_v39, %v803_v32  ;;  %v1979_v15 = vmul.f32 %v4658_v40, %v803_v32 }
 0x16e   : > { %v2729_v63 = vadd.f32 %v5661_v31, %v2600_v42  ;;  %v2730_v11 = vadd.f32 %v5661_v31, %v2601_v49  ;;  %v2856_v59 = vmax.f32 %v2731_v47, 0.0  ;;  %v1581_v29 = vrot.slane %v5824_v50, 1 }
 0x16f   : > { %v1561_v62 = vrot.slane %v1229_v5, 1  ;;  %v2312_v19 = vrot.slane %v1980_v61, 2  ;;  %v1559_v28 = vrot.slane %v1228_v27, 1  ;;  %v2310_v23 = vrot.slane %v1979_v15, 2 }
 0x170   : > { %v2854_v37 = vmax.f32 %v2729_v63, 0.0  ;;  %v2855_v8 = vmax.f32 %v2730_v11, 0.0  ;;  %2982 = vst.msk [vmem:[#allocation2 + $0x278] sm:$0xff] %vm2902_vm2, %v2856_v59  ;;  %v2332_v0 = vrot.slane %v5830_v6, 2  ;;  %v1102_v7 = vmul.f32 %v4669_v46, %v803_v32 }
 0x171   : > { %v1564_v12 = vsel %vm1397_vm0, %v1561_v62, %v1563_v18  ;;  %v5848_v56 = vmul.f32 %v4656_v39, %v873_v24  ;;  %v1560_v3 = vsel %vm1397_vm0, %v1557_v54, %v1559_v28  ;;  %v1562_v30 = vsel %vm1397_vm0, %v1559_v28, %v1561_v62 }
 0x172   : > { %2980 = vst.msk [vmem:[#allocation2 + $0x268] sm:$0xff] %vm2902_vm2, %v2854_v37  ;;  %v1854_v36 = vadd.f32 %v1564_v12, %v1103_v57  ;;  %v5856_v53 = vmul.f32 %v4669_v46, %v873_v24  ;;  %v2315_v32 = vsel %vm2148_vm1, %v2312_v19, %v2314_v26  ;;  %v1852_v34 = vadd.f32 %v1560_v3, %v5647_v60 }
 0x173   : > { %2981 = vst.msk [vmem:[#allocation2 + $0x270] sm:$0xff] %vm2902_vm2, %v2855_v8  ;;  %v1853_v43 = vadd.f32 %v1562_v30, %v1102_v7  ;;  %v5864_v4 = vmul.f32 %v4658_v40, %v873_v24  ;;  %v2311_v54 = vsel %vm2148_vm1, %v2308_v13, %v2310_v23  ;;  %v2313_v21 = vsel %vm2148_vm1, %v2310_v23, %v2312_v19 }
 0x174   : > { %v838_v1 = vpop.permute.xlu1 %837  ;;  %v2605_v55 = vadd.f32 %v2315_v32, %v1854_v36  ;;  %v1232_v35 = vmul.f32 %v4656_v39, %v823_v14  ;;  %v888_v44 = vpop.permute.xlu2 %887  ;;  %v2603_v49 = vadd.f32 %v2311_v54, %v1852_v34  ;;  %v1587_v60 = vrot.slane %v5848_v56, 1 }
 0x175   : > { %v833_v42 = vpop.permute.xlu0 %832  ;;  %v2604_v47 = vadd.f32 %v2313_v21, %v1853_v43  ;;  %v1983_v57 = vmul.f32 %v4658_v40, %v823_v14  ;;  %v1231_v61 = vmul.f32 %v4656_v39, %v818_v25  ;;  %v1982_v20 = vmul.f32 %v4658_v40, %v818_v25 }
 0x176   : > { %v2734_v24 = vadd.f32 %v5661_v31, %v2605_v55  ;;  %v1567_v5 = vrot.slane %v1232_v35, 1  ;;  %v2732_v13 = vadd.f32 %v5661_v31, %v2603_v49  ;;  %v1106_v11 = vmul.f32 %v4669_v46, %v823_v14 }
 0x177   : > { %v2733_v63 = vadd.f32 %v5661_v31, %v2604_v47  ;;  %v2318_v27 = vrot.slane %v1983_v57, 2  ;;  %v1565_v62 = vrot.slane %v1231_v61, 1  ;;  %v2316_v19 = vrot.slane %v1982_v20, 2 }
 0x178   : > { %v2859_v15 = vmax.f32 %v2734_v24, 0.0  ;;  %v1570_v59 = vsel %vm1397_vm0, %v1567_v5, %v1569_v17  ;;  %v2857_v37 = vmax.f32 %v2732_v13, 0.0  ;;  %v1105_v23 = vmul.f32 %v4669_v46, %v818_v25 }
 0x179   : > { %v2858_v8 = vmax.f32 %v2733_v63, 0.0  ;;  %v1857_v28 = vadd.f32 %v1570_v59, %v1106_v11  ;;  %v2321_v12 = vsel %vm2148_vm1, %v2318_v27, %v2320_v38  ;;  %v1566_v14 = vsel %vm1397_vm0, %v1563_v18, %v1565_v62 }
 0x17a   : > { %2985 = vst.msk [vmem:[#allocation2 + $0x290] sm:$0xff] %vm2902_vm2, %v2859_v15  ;;  %v1568_v7 = vsel %vm1397_vm0, %v1565_v62, %v1567_v5  ;;  %v2317_v36 = vsel %vm2148_vm1, %v2314_v26, %v2316_v19  ;;  %v1855_v25 = vadd.f32 %v1566_v14, %v5690_v2  ;;  %v2319_v32 = vsel %vm2148_vm1, %v2316_v19, %v2318_v27 }
 0x17b   : > { %2983 = vst.msk [vmem:[#allocation2 + $0x280] sm:$0xff] %vm2902_vm2, %v2857_v37  ;;  %v2608_v3 = vadd.f32 %v2321_v12, %v1857_v28  ;;  %v1856_v30 = vadd.f32 %v1568_v7, %v1105_v23  ;;  %v5899_v16 = vmul.f32 %v4656_v39, %v888_v44  ;;  %v5902_v18 = vmul.f32 %v4658_v40, %v888_v44 }
 0x17c   : > { %2984 = vst.msk [vmem:[#allocation2 + $0x288] sm:$0xff] %vm2902_vm2, %v2858_v8  ;;  %v1235_v10 = vmul.f32 %v4656_v39, %v838_v1  ;;  %v1986_v26 = vmul.f32 %v4658_v40, %v838_v1  ;;  %v903_v34 = vpop.permute.xlu2 %902  ;;  %v853_v43 = vpop.permute.xlu1 %852  ;;  %v2338_v55 = vrot.slane %v5864_v4, 2  ;;  %v2606_v54 = vadd.f32 %v2317_v36, %v1855_v25 }
 0x17d   : > { %v2737_v2 = vadd.f32 %v5661_v31, %v2608_v3  ;;  %v2607_v21 = vadd.f32 %v2319_v32, %v1856_v30  ;;  %v848_v35 = vpop.permute.xlu0 %847  ;;  %v5909_v49 = vmul.f32 %v4669_v46, %v888_v44  ;;  %v1109_v47 = vmul.f32 %v4669_v46, %v838_v1 }
 0x17e   : > { %v1573_v57 = vrot.slane %v1235_v10, 1  ;;  %v2324_v24 = vrot.slane %v1986_v26, 2  ;;  %v2735_v61 = vadd.f32 %v5661_v31, %v2606_v54  ;;  %v1234_v13 = vmul.f32 %v4656_v39, %v833_v42 }
 0x17f   : > { %v2862_v5 = vmax.f32 %v2737_v2, 0.0  ;;  %v2736_v20 = vadd.f32 %v5661_v31, %v2607_v21  ;;  %v1593_v63 = vrot.slane %v5899_v16, 1  ;;  %v2344_v11 = vrot.slane %v5902_v18, 2 }
 0x180   : > { %v1576_v44 = vsel %vm1397_vm0, %v1573_v57, %v1575_v51  ;;  %v1985_v27 = vmul.f32 %v4658_v40, %v833_v42  ;;  %v2860_v1 = vmax.f32 %v2735_v61, 0.0  ;;  %v1571_v62 = vrot.slane %v1234_v13, 1 }
 0x181   : > { %2988 = vst.msk [vmem:[#allocation2 + $0x2a8] sm:$0xff] %vm2902_vm2, %v2862_v5  ;;  %v2861_v15 = vmax.f32 %v2736_v20, 0.0  ;;  %v1860_v59 = vadd.f32 %v1576_v44, %v1109_v47  ;;  %v2327_v19 = vsel %vm2148_vm1, %v2324_v24, %v2326_v22  ;;  %v1108_v37 = vmul.f32 %v4669_v46, %v833_v42 }
 0x182   : > { %v2322_v8 = vrot.slane %v1985_v27, 2  ;;  %v5927_v28 = vmul.f32 %v4669_v46, %v903_v34  ;;  %2986 = vst.msk [vmem:[#allocation2 + $0x298] sm:$0xff] %vm2902_vm2, %v2860_v1  ;;  %v1572_v12 = vsel %vm1397_vm0, %v1569_v17, %v1571_v62  ;;  %v1574_v14 = vsel %vm1397_vm0, %v1571_v62, %v1573_v57 }
 0x183   : > { %v2611_v23 = vadd.f32 %v2327_v19, %v1860_v59  ;;  %v1238_v7 = vmul.f32 %v4656_v39, %v853_v43  ;;  %2987 = vst.msk [vmem:[#allocation2 + $0x2a0] sm:$0xff] %vm2902_vm2, %v2861_v15  ;;  %v1858_v36 = vadd.f32 %v1572_v12, %v5745_v41  ;;  %v1859_v42 = vadd.f32 %v1574_v14, %v1108_v37 }
 0x184   : > { %v5938_v3 = vmul.f32 %v4656_v39, %v903_v34  ;;  %v5941_v25 = vmul.f32 %v4658_v40, %v903_v34  ;;  %v918_v30 = vpop.permute.xlu2 %917  ;;  %v2323_v17 = vsel %vm2148_vm1, %v2320_v38, %v2322_v8  ;;  %v2325_v32 = vsel %vm2148_vm1, %v2322_v8, %v2324_v24 }
 0x185   : > { %v2740_v33 = vadd.f32 %v5661_v31, %v2611_v23  ;;  %v1579_v10 = vrot.slane %v1238_v7, 1  ;;  %v868_v26 = vpop.permute.xlu1 %867  ;;  %v863_v2 = vpop.permute.xlu0 %862  ;;  %v2609_v41 = vadd.f32 %v2323_v17, %v1858_v36  ;;  %v2610_v54 = vadd.f32 %v2325_v32, %v1859_v42 }
 0x186   : > { %v1112_v21 = vmul.f32 %v4669_v46, %v853_v43  ;;  %v1989_v47 = vmul.f32 %v4658_v40, %v853_v43  ;;  %v1237_v48 = vmul.f32 %v4656_v39, %v848_v35  ;;  %v1988_v38 = vmul.f32 %v4658_v40, %v848_v35 }
 0x187   : > { %v2865_v34 = vmax.f32 %v2740_v33, 0.0  ;;  %v1582_v57 = vsel %vm1397_vm0, %v1579_v10, %v1581_v29  ;;  %v2738_v24 = vadd.f32 %v5661_v31, %v2609_v41  ;;  %v2739_v5 = vadd.f32 %v5661_v31, %v2610_v54 }
 0x188   : > { %v1863_v61 = vadd.f32 %v1582_v57, %v1112_v21  ;;  %v2330_v20 = vrot.slane %v1989_v47, 2  ;;  %v1599_v13 = vrot.slane %v5938_v3, 1  ;;  %v1111_v43 = vmul.f32 %v4669_v46, %v848_v35 }
 0x189   : > { %2991 = vst.msk [vmem:[#allocation2 + $0x2c0] sm:$0xff] %vm2902_vm2, %v2865_v34  ;;  %v1577_v44 = vrot.slane %v1237_v48, 1  ;;  %v2328_v27 = vrot.slane %v1988_v38, 2  ;;  %v2863_v1 = vmax.f32 %v2738_v24, 0.0  ;;  %v2864_v15 = vmax.f32 %v2739_v5, 0.0 }
 0x18a   : > { %v2333_v59 = vsel %vm2148_vm1, %v2330_v20, %v2332_v0  ;;  %v5964_v62 = vmul.f32 %v4656_v39, %v918_v30  ;;  %v2350_v19 = vrot.slane %v5941_v25, 2  ;;  %v5974_v14 = vmul.f32 %v4669_v46, %v918_v30 }
 0x18b   : > { %v2614_v37 = vadd.f32 %v2333_v59, %v1863_v61  ;;  %v1578_v8 = vsel %vm1397_vm0, %v1575_v51, %v1577_v44  ;;  %v1580_v35 = vsel %vm1397_vm0, %v1577_v44, %v1579_v10  ;;  %2989 = vst.msk [vmem:[#allocation2 + $0x2b0] sm:$0xff] %vm2902_vm2, %v2863_v1  ;;  %v5977_v7 = vmul.f32 %v4658_v40, %v918_v30 }
 0x18c   : > { %v1861_v23 = vadd.f32 %v1578_v8, %v5788_v9  ;;  %v1862_v12 = vadd.f32 %v1580_v35, %v1111_v43  ;;  %v933_v36 = vpop.permute.xlu2 %932  ;;  %2990 = vst.msk [vmem:[#allocation2 + $0x2b8] sm:$0xff] %vm2902_vm2, %v2864_v15  ;;  %v2329_v51 = vsel %vm2148_vm1, %v2326_v22, %v2328_v27  ;;  %v2331_v42 = vsel %vm2148_vm1, %v2328_v27, %v2330_v20 }
 0x18d   : > { %v2743_v45 = vadd.f32 %v5661_v31, %v2614_v37  ;;  %v1241_v9 = vmul.f32 %v4656_v39, %v868_v26  ;;  %v883_v33 = vpop.permute.xlu1 %882  ;;  %v1605_v10 = vrot.slane %v5964_v62, 1  ;;  %v1992_v30 = vmul.f32 %v4658_v40, %v868_v26  ;;  %v878_v41 = vpop.permute.xlu0 %877 }
 0x18e   : > { %v2612_v17 = vadd.f32 %v2329_v51, %v1861_v23  ;;  %v2613_v32 = vadd.f32 %v2331_v42, %v1862_v12  ;;  %v1240_v47 = vmul.f32 %v4656_v39, %v863_v2  ;;  %v1991_v52 = vmul.f32 %v4658_v40, %v863_v2 }
 0x18f   : > { %v2868_v54 = vmax.f32 %v2743_v45, 0.0  ;;  %v1585_v21 = vrot.slane %v1241_v9, 1  ;;  %v1115_v57 = vmul.f32 %v4669_v46, %v868_v26  ;;  %v2336_v48 = vrot.slane %v1992_v30, 2 }
 0x190   : > { %v2741_v22 = vadd.f32 %v5661_v31, %v2612_v17  ;;  %v2742_v34 = vadd.f32 %v5661_v31, %v2613_v32  ;;  %v2356_v38 = vrot.slane %v5977_v7, 2  ;;  %v1583_v5 = vrot.slane %v1240_v47, 1 }
 0x191   : > { %2994 = vst.msk [vmem:[#allocation2 + $0x2d8] sm:$0xff] %vm2902_vm2, %v2868_v54  ;;  %v1588_v24 = vsel %vm1397_vm0, %v1585_v21, %v1587_v60  ;;  %v2334_v61 = vrot.slane %v1991_v52, 2  ;;  %v1114_v27 = vmul.f32 %v4669_v46, %v863_v2  ;;  %v2339_v26 = vsel %vm2148_vm1, %v2336_v48, %v2338_v55 }
 0x192   : > { %v2866_v20 = vmax.f32 %v2741_v22, 0.0  ;;  %v2867_v43 = vmax.f32 %v2742_v34, 0.0  ;;  %v1866_v44 = vadd.f32 %v1588_v24, %v1115_v57  ;;  %v1584_v1 = vsel %vm1397_vm0, %v1581_v29, %v1583_v5 }
 0x193   : > { %v1586_v15 = vsel %vm1397_vm0, %v1583_v5, %v1585_v21  ;;  %v6007_v59 = vmul.f32 %v4669_v46, %v933_v36  ;;  %v1864_v8 = vadd.f32 %v1584_v1, %v5827_v58  ;;  %v6012_v2 = vmul.f32 %v4656_v39, %v933_v36 }
 0x194   : > { %2992 = vst.msk [vmem:[#allocation2 + $0x2c8] sm:$0xff] %vm2902_vm2, %v2866_v20  ;;  %v2617_v37 = vadd.f32 %v2339_v26, %v1866_v44  ;;  %v1865_v35 = vadd.f32 %v1586_v15, %v1114_v27  ;;  %v2335_v50 = vsel %vm2148_vm1, %v2332_v0, %v2334_v61  ;;  %v2337_v29 = vsel %vm2148_vm1, %v2334_v61, %v2336_v48  ;;  %v948_v45 = vpop.permute.xlu2 %947 }
 0x195   : > { %2993 = vst.msk [vmem:[#allocation2 + $0x2d0] sm:$0xff] %vm2902_vm2, %v2867_v43  ;;  %v1244_v23 = vmul.f32 %v4656_v39, %v883_v33  ;;  %v1995_v12 = vmul.f32 %v4658_v40, %v883_v33  ;;  %v898_v51 = vpop.permute.xlu1 %897  ;;  %v2615_v42 = vadd.f32 %v2335_v50, %v1864_v8  ;;  %v6023_v17 = vmul.f32 %v4658_v40, %v933_v36  ;;  %v893_v32 = vpop.permute.xlu0 %892 }
 0x196   : > { %v2746_v58 = vadd.f32 %v5661_v31, %v2617_v37  ;;  %v2616_v9 = vadd.f32 %v2337_v29, %v1865_v35  ;;  %v1118_v6 = vmul.f32 %v4669_v46, %v883_v33  ;;  %v1243_v54 = vmul.f32 %v4656_v39, %v878_v41 }
 0x197   : > { %v1591_v30 = vrot.slane %v1244_v23, 1  ;;  %v2342_v0 = vrot.slane %v1995_v12, 2  ;;  %v2744_v47 = vadd.f32 %v5661_v31, %v2615_v42  ;;  %v1994_v22 = vmul.f32 %v4658_v40, %v878_v41 }
 0x198   : > { %v2871_v21 = vmax.f32 %v2746_v58, 0.0  ;;  %v2745_v52 = vadd.f32 %v5661_v31, %v2616_v9  ;;  %v1611_v34 = vrot.slane %v6012_v2, 1  ;;  %v1117_v57 = vmul.f32 %v4669_v46, %v878_v41 }
 0x199   : > { %v1594_v36 = vsel %vm1397_vm0, %v1591_v30, %v1593_v63  ;;  %v1589_v33 = vrot.slane %v1243_v54, 1  ;;  %v2869_v48 = vmax.f32 %v2744_v47, 0.0  ;;  %v2340_v61 = vrot.slane %v1994_v22, 2 }
 0x19a   : > { %2997 = vst.msk [vmem:[#allocation2 + $0x2f0] sm:$0xff] %vm2902_vm2, %v2871_v21  ;;  %v2870_v24 = vmax.f32 %v2745_v52, 0.0  ;;  %v1869_v5 = vadd.f32 %v1594_v36, %v1118_v6  ;;  %v2345_v20 = vsel %vm2148_vm1, %v2342_v0, %v2344_v11  ;;  %v6044_v27 = vmul.f32 %v4656_v39, %v948_v45 }
 0x19b   : > { %v1590_v43 = vsel %vm1397_vm0, %v1587_v60, %v1589_v33  ;;  %v1592_v44 = vsel %vm1397_vm0, %v1589_v33, %v1591_v30  ;;  %2995 = vst.msk [vmem:[#allocation2 + $0x2e0] sm:$0xff] %vm2902_vm2, %v2869_v48  ;;  %v2362_v41 = vrot.slane %v6023_v17, 2  ;;  %v2341_v56 = vsel %vm2148_vm1, %v2338_v55, %v2340_v61 }
 0x19c   : > { %v2620_v26 = vadd.f32 %v2345_v20, %v1869_v5  ;;  %v1867_v1 = vadd.f32 %v1590_v43, %v5856_v53  ;;  %v1868_v15 = vadd.f32 %v1592_v44, %v1117_v57  ;;  %2996 = vst.msk [vmem:[#allocation2 + $0x2e8] sm:$0xff] %vm2902_vm2, %v2870_v24  ;;  %v2343_v60 = vsel %vm2148_vm1, %v2340_v61, %v2342_v0  ;;  %v963_v35 = vpop.permute.xlu2 %962 }
 0x19d   : > { %v6055_v37 = vmul.f32 %v4669_v46, %v948_v45  ;;  %v6058_v8 = vmul.f32 %v4658_v40, %v948_v45  ;;  %v913_v50 = vpop.permute.xlu1 %912  ;;  %v1247_v12 = vmul.f32 %v4656_v39, %v898_v51  ;;  %v1617_v4 = vrot.slane %v6044_v27, 1 }
 0x19e   : > { %v2749_v29 = vadd.f32 %v5661_v31, %v2620_v26  ;;  %v2618_v53 = vadd.f32 %v2341_v56, %v1867_v1  ;;  %v2619_v23 = vadd.f32 %v2343_v60, %v1868_v15  ;;  %v908_v58 = vpop.permute.xlu0 %907  ;;  %v1998_v55 = vmul.f32 %v4658_v40, %v898_v51 }
 0x19f   : > { %v1246_v42 = vmul.f32 %v4656_v39, %v893_v32  ;;  %v1997_v9 = vmul.f32 %v4658_v40, %v893_v32  ;;  %v1597_v0 = vrot.slane %v1247_v12, 1  ;;  %v1121_v54 = vmul.f32 %v4669_v46, %v898_v51 }
 0x1a0   : > { %v2874_v6 = vmax.f32 %v2749_v29, 0.0  ;;  %v2747_v45 = vadd.f32 %v5661_v31, %v2618_v53  ;;  %v2748_v30 = vadd.f32 %v5661_v31, %v2619_v23  ;;  %v2348_v21 = vrot.slane %v1998_v55, 2 }
 0x1a1   : > { %v1595_v47 = vrot.slane %v1246_v42, 1  ;;  %v2346_v52 = vrot.slane %v1997_v9, 2  ;;  %v1600_v57 = vsel %vm1397_vm0, %v1597_v0, %v1599_v13  ;;  %v1120_v33 = vmul.f32 %v4669_v46, %v893_v32 }
 0x1a2   : > { %3000 = vst.msk [vmem:[#allocation2 + $0x308] sm:$0xff] %vm2902_vm2, %v2874_v6  ;;  %v2872_v22 = vmax.f32 %v2747_v45, 0.0  ;;  %v2873_v36 = vmax.f32 %v2748_v30, 0.0  ;;  %v1872_v48 = vadd.f32 %v1600_v57, %v1121_v54  ;;  %v6079_v5 = vmul.f32 %v4656_v39, %v963_v35 }
 0x1a3   : > { %v1596_v24 = vsel %vm1397_vm0, %v1593_v63, %v1595_v47  ;;  %v1598_v51 = vsel %vm1397_vm0, %v1595_v47, %v1597_v0  ;;  %v2368_v61 = vrot.slane %v6058_v8, 2  ;;  %v2351_v20 = vsel %vm2148_vm1, %v2348_v21, %v2350_v19 }
 0x1a4   : > { %2998 = vst.msk [vmem:[#allocation2 + $0x2f8] sm:$0xff] %vm2902_vm2, %v2872_v22  ;;  %v1870_v32 = vadd.f32 %v1596_v24, %v5909_v49  ;;  %v1871_v43 = vadd.f32 %v1598_v51, %v1120_v33  ;;  %v2623_v16 = vadd.f32 %v2351_v20, %v1872_v48  ;;  %v2347_v63 = vsel %vm2148_vm1, %v2344_v11, %v2346_v52  ;;  %v978_v29 = vpop.permute.xlu2 %977 }
 0x1a5   : > { %2999 = vst.msk [vmem:[#allocation2 + $0x300] sm:$0xff] %vm2902_vm2, %v2873_v36  ;;  %v2349_v44 = vsel %vm2148_vm1, %v2346_v52, %v2348_v21  ;;  %v6093_v26 = vmul.f32 %v4669_v46, %v963_v35  ;;  %v928_v1 = vpop.permute.xlu1 %927  ;;  %v1250_v60 = vmul.f32 %v4656_v39, %v913_v50  ;;  %v2001_v49 = vmul.f32 %v4658_v40, %v913_v50 }
 0x1a6   : > { %v2621_v15 = vadd.f32 %v2347_v63, %v1870_v32  ;;  %v2622_v56 = vadd.f32 %v2349_v44, %v1871_v43  ;;  %v923_v53 = vpop.permute.xlu0 %922  ;;  %v2752_v23 = vadd.f32 %v5661_v31, %v2623_v16  ;;  %v1623_v18 = vrot.slane %v6079_v5, 1 }
 0x1a7   : > { %v6100_v11 = vmul.f32 %v4658_v40, %v963_v35  ;;  %v1249_v12 = vmul.f32 %v4656_v39, %v908_v58  ;;  %v1603_v9 = vrot.slane %v1250_v60, 1  ;;  %v2354_v6 = vrot.slane %v2001_v49, 2 }
 0x1a8   : > { %v2750_v55 = vadd.f32 %v5661_v31, %v2621_v15  ;;  %v2751_v42 = vadd.f32 %v5661_v31, %v2622_v56  ;;  %v2877_v45 = vmax.f32 %v2752_v23, 0.0  ;;  %v1124_v30 = vmul.f32 %v4669_v46, %v913_v50 }
 0x1a9   : > { %v1601_v0 = vrot.slane %v1249_v12, 1  ;;  %v2000_v54 = vmul.f32 %v4658_v40, %v908_v58  ;;  %v1606_v35 = vsel %vm1397_vm0, %v1603_v9, %v1605_v10  ;;  %v1123_v52 = vmul.f32 %v4669_v46, %v908_v58 }
 0x1aa   : > { %v2875_v21 = vmax.f32 %v2750_v55, 0.0  ;;  %v2876_v47 = vmax.f32 %v2751_v42, 0.0  ;;  %3003 = vst.msk [vmem:[#allocation2 + $0x320] sm:$0xff] %vm2902_vm2, %v2877_v45  ;;  %v1875_v22 = vadd.f32 %v1606_v35, %v1124_v30  ;;  %v2374_v33 = vrot.slane %v6100_v11, 2 }
 0x1ab   : > { %v1602_v36 = vsel %vm1397_vm0, %v1599_v13, %v1601_v0  ;;  %v1604_v50 = vsel %vm1397_vm0, %v1601_v0, %v1603_v9  ;;  %v2352_v57 = vrot.slane %v2000_v54, 2  ;;  %v2357_v48 = vsel %vm2148_vm1, %v2354_v6, %v2356_v38 }
 0x1ac   : > { %3001 = vst.msk [vmem:[#allocation2 + $0x310] sm:$0xff] %vm2902_vm2, %v2875_v21  ;;  %v1873_v58 = vadd.f32 %v1602_v36, %v5927_v28  ;;  %v1874_v24 = vadd.f32 %v1604_v50, %v1123_v52  ;;  %v2626_v51 = vadd.f32 %v2357_v48, %v1875_v22  ;;  %v6128_v20 = vmul.f32 %v4656_v39, %v978_v29 }
 0x1ad   : > { %3002 = vst.msk [vmem:[#allocation2 + $0x318] sm:$0xff] %vm2902_vm2, %v2876_v47  ;;  %v2353_v3 = vsel %vm2148_vm1, %v2350_v19, %v2352_v57  ;;  %v2355_v13 = vsel %vm2148_vm1, %v2352_v57, %v2354_v6  ;;  %v943_v32 = vpop.permute.xlu1 %942  ;;  %v6131_v63 = vmul.f32 %v4669_v46, %v978_v29  ;;  %v6134_v28 = vmul.f32 %v4658_v40, %v978_v29 }
 0x1ae   : > { %v2624_v43 = vadd.f32 %v2353_v3, %v1873_v58  ;;  %v2625_v16 = vadd.f32 %v2355_v13, %v1874_v24  ;;  %v938_v44 = vpop.permute.xlu0 %937  ;;  %v2755_v15 = vadd.f32 %v5661_v31, %v2626_v51  ;;  %v1127_v25 = vmul.f32 %v4669_v46, %v928_v1  ;;  %v993_v55 = vpop.permute.xlu2 %992 }
 0x1af   : > { %v1253_v19 = vmul.f32 %v4656_v39, %v928_v1  ;;  %v2004_v56 = vmul.f32 %v4658_v40, %v928_v1  ;;  %v1252_v23 = vmul.f32 %v4656_v39, %v923_v53  ;;  %v2003_v12 = vmul.f32 %v4658_v40, %v923_v53 }
 0x1b0   : > { %v2753_v60 = vadd.f32 %v5661_v31, %v2624_v43  ;;  %v2754_v49 = vadd.f32 %v5661_v31, %v2625_v16  ;;  %v2880_v29 = vmax.f32 %v2755_v15, 0.0  ;;  %v1629_v42 = vrot.slane %v6128_v20, 1  ;;  %v6177_v15 = vld [vmem:[#allocation6] ss:$0 sm:$0xff] }
 0x1b1   : > { %v1609_v9 = vrot.slane %v1253_v19, 1  ;;  %v2360_v6 = vrot.slane %v2004_v56, 2  ;;  %v1607_v0 = vrot.slane %v1252_v23, 1  ;;  %v2358_v54 = vrot.slane %v2003_v12, 2 }
 0x1b2   : > { %v2878_v45 = vmax.f32 %v2753_v60, 0.0  ;;  %v2879_v30 = vmax.f32 %v2754_v49, 0.0  ;;  %3006 = vst.msk [vmem:[#allocation2 + $0x338] sm:$0xff] %vm2902_vm2, %v2880_v29  ;;  %v2380_v1 = vrot.slane %v6134_v28, 2  ;;  %v1126_v21 = vmul.f32 %v4669_v46, %v923_v53 }
 0x1b3   : > { %v1612_v31 = vsel %vm1397_vm0, %v1609_v9, %v1611_v34  ;;  %v6152_v47 = vmul.f32 %v4656_v39, %v993_v55  ;;  %v1608_v52 = vsel %vm1397_vm0, %v1605_v10, %v1607_v0  ;;  %v1610_v22 = vsel %vm1397_vm0, %v1607_v0, %v1609_v9 }
 0x1b4   : > { %3004 = vst.msk [vmem:[#allocation2 + $0x328] sm:$0xff] %vm2902_vm2, %v2878_v45  ;;  %v1878_v35 = vadd.f32 %v1612_v31, %v1127_v25  ;;  %v6160_v36 = vmul.f32 %v4669_v46, %v993_v55  ;;  %v2363_v53 = vsel %vm2148_vm1, %v2360_v6, %v2362_v41  ;;  %v1876_v50 = vadd.f32 %v1608_v52, %v5974_v14 }
 0x1b5   : > { %3005 = vst.msk [vmem:[#allocation2 + $0x330] sm:$0xff] %vm2902_vm2, %v2879_v30  ;;  %v1877_v57 = vadd.f32 %v1610_v22, %v1126_v21  ;;  %v6168_v48 = vmul.f32 %v4658_v40, %v993_v55  ;;  %v958_v62 = vpop.permute.xlu1 %957  ;;  %v2359_v10 = vsel %vm2148_vm1, %v2356_v38, %v2358_v54  ;;  %v2361_v24 = vsel %vm2148_vm1, %v2358_v54, %v2360_v6 }
 0x1b6   : > { %v2629_v58 = vadd.f32 %v2363_v53, %v1878_v35  ;;  %v1256_v51 = vmul.f32 %v4656_v39, %v943_v32  ;;  %v953_v3 = vpop.permute.xlu0 %952  ;;  %v2627_v13 = vadd.f32 %v2359_v10, %v1876_v50  ;;  %v1635_v16 = vrot.slane %v6152_v47, 1  ;;  %v6188_v6 = vpop.permute.xlu2 %1007 }
 0x1b7   : > { %v2628_v43 = vadd.f32 %v2361_v24, %v1877_v57  ;;  %v2007_v14 = vmul.f32 %v4658_v40, %v943_v32  ;;  %v1255_v7 = vmul.f32 %v4656_v39, %v938_v44  ;;  %v2006_v38 = vmul.f32 %v4658_v40, %v938_v44 }
 0x1b8   : > { %v2758_v25 = vadd.f32 %v6177_v15, %v2629_v58  ;;  %v1615_v19 = vrot.slane %v1256_v51, 1  ;;  %v2756_v56 = vadd.f32 %v6177_v15, %v2627_v13  ;;  %v1130_v49 = vmul.f32 %v4669_v46, %v943_v32 }
 0x1b9   : > { %v2757_v60 = vadd.f32 %v6177_v15, %v2628_v43  ;;  %v2366_v23 = vrot.slane %v2007_v14, 2  ;;  %v1613_v29 = vrot.slane %v1255_v7, 1  ;;  %v2364_v9 = vrot.slane %v2006_v38, 2 }
 0x1ba   : > { %v2883_v12 = vmax.f32 %v2758_v25, 0.0  ;;  %v1618_v55 = vsel %vm1397_vm0, %v1615_v19, %v1617_v4  ;;  %v2881_v45 = vmax.f32 %v2756_v56, 0.0  ;;  %v1129_v54 = vmul.f32 %v4669_v46, %v938_v44 }
 0x1bb   : > { %v2882_v30 = vmax.f32 %v2757_v60, 0.0  ;;  %v1881_v0 = vadd.f32 %v1618_v55, %v1130_v49  ;;  %v2386_v31 = vrot.slane %v6168_v48, 2  ;;  %v2369_v32 = vsel %vm2148_vm1, %v2366_v23, %v2368_v61 }
 0x1bc   : > { %3009 = vst.msk [vmem:[#allocation2 + $0x350] sm:$0xff] %vm2902_vm2, %v2883_v12  ;;  %v1614_v21 = vsel %vm1397_vm0, %v1611_v34, %v1613_v29  ;;  %v1616_v35 = vsel %vm1397_vm0, %v1613_v29, %v1615_v19  ;;  %v6204_v53 = vmul.f32 %v4656_v39, %v6188_v6  ;;  %v2365_v2 = vsel %vm2148_vm1, %v2362_v41, %v2364_v9 }
 0x1bd   : > { %3007 = vst.msk [vmem:[#allocation2 + $0x340] sm:$0xff] %vm2902_vm2, %v2881_v45  ;;  %v2632_v52 = vadd.f32 %v2369_v32, %v1881_v0  ;;  %v1879_v22 = vadd.f32 %v1614_v21, %v6007_v59  ;;  %v1880_v44 = vadd.f32 %v1616_v35, %v1129_v54  ;;  %v2367_v34 = vsel %vm2148_vm1, %v2364_v9, %v2366_v23  ;;  %v973_v58 = vpop.permute.xlu1 %972 }
 0x1be   : > { %3008 = vst.msk [vmem:[#allocation2 + $0x348] sm:$0xff] %vm2902_vm2, %v2882_v30  ;;  %v1259_v50 = vmul.f32 %v4656_v39, %v958_v62  ;;  %v2010_v57 = vmul.f32 %v4658_v40, %v958_v62  ;;  %v6216_v51 = vmul.f32 %v4658_v40, %v6188_v6  ;;  %v968_v13 = vpop.permute.xlu0 %967  ;;  %v1641_v17 = vrot.slane %v6204_v53, 1 }
 0x1bf   : > { %v2761_v59 = vadd.f32 %v6177_v15, %v2632_v52  ;;  %v2630_v10 = vadd.f32 %v2365_v2, %v1879_v22  ;;  %v2631_v24 = vadd.f32 %v2367_v34, %v1880_v44  ;;  %v1133_v41 = vmul.f32 %v4669_v46, %v958_v62 }
 0x1c0   : > { %v1621_v43 = vrot.slane %v1259_v50, 1  ;;  %v2372_v14 = vrot.slane %v2010_v57, 2  ;;  %v1258_v38 = vmul.f32 %v4656_v39, %v953_v3  ;;  %v1132_v49 = vmul.f32 %v4669_v46, %v953_v3 }
 0x1c1   : > { %v2886_v25 = vmax.f32 %v2761_v59, 0.0  ;;  %v2759_v19 = vadd.f32 %v6177_v15, %v2630_v10  ;;  %v2760_v7 = vadd.f32 %v6177_v15, %v2631_v24  ;;  %v2009_v62 = vmul.f32 %v4658_v40, %v953_v3 }
 0x1c2   : > { %v1624_v56 = vsel %vm1397_vm0, %v1621_v43, %v1623_v18  ;;  %v2375_v60 = vsel %vm2148_vm1, %v2372_v14, %v2374_v33  ;;  %v1619_v29 = vrot.slane %v1258_v38, 1  ;;  %v1136_v45 = vmul.f32 %v4669_v46, %v973_v58 }
 0x1c3   : > { %3012 = vst.msk [vmem:[#allocation2 + $0x368] sm:$0xff] %vm2902_vm2, %v2886_v25  ;;  %v2884_v23 = vmax.f32 %v2759_v19, 0.0  ;;  %v2885_v12 = vmax.f32 %v2760_v7, 0.0  ;;  %v1884_v55 = vadd.f32 %v1624_v56, %v1133_v41  ;;  %v2370_v9 = vrot.slane %v2009_v62, 2 }
 0x1c4   : > { %v1262_v30 = vmul.f32 %v4656_v39, %v973_v58  ;;  %v2013_v0 = vmul.f32 %v4658_v40, %v973_v58  ;;  %v1620_v3 = vsel %vm1397_vm0, %v1617_v4, %v1619_v29  ;;  %v1622_v32 = vsel %vm1397_vm0, %v1619_v29, %v1621_v43 }
 0x1c5   : > { %3010 = vst.msk [vmem:[#allocation2 + $0x358] sm:$0xff] %vm2902_vm2, %v2884_v23  ;;  %v2635_v54 = vadd.f32 %v2375_v60, %v1884_v55  ;;  %v1261_v21 = vmul.f32 %v4656_v39, %v968_v13  ;;  %v1882_v35 = vadd.f32 %v1620_v3, %v6055_v37  ;;  %v1883_v52 = vadd.f32 %v1622_v32, %v1132_v49 }
 0x1c6   : > { %3011 = vst.msk [vmem:[#allocation2 + $0x360] sm:$0xff] %vm2902_vm2, %v2885_v12  ;;  %v2371_v22 = vsel %vm2148_vm1, %v2368_v61, %v2370_v9  ;;  %v2373_v44 = vsel %vm2148_vm1, %v2370_v9, %v2372_v14  ;;  %v1627_v27 = vrot.slane %v1262_v30, 1  ;;  %v2378_v34 = vrot.slane %v2013_v0, 2 }
 0x1c7   : > { %v2764_v2 = vadd.f32 %v6177_v15, %v2635_v54  ;;  %v1625_v4 = vrot.slane %v1261_v21, 1  ;;  %v988_v50 = vpop.permute.xlu1 %987  ;;  %v983_v57 = vpop.permute.xlu0 %982  ;;  %v2633_v58 = vadd.f32 %v2371_v22, %v1882_v35  ;;  %v2634_v59 = vadd.f32 %v2373_v44, %v1883_v52 }
 0x1c8   : > { %v1135_v10 = vmul.f32 %v4669_v46, %v968_v13  ;;  %v2012_v37 = vmul.f32 %v4658_v40, %v968_v13  ;;  %v1630_v8 = vsel %vm1397_vm0, %v1627_v27, %v1629_v42  ;;  %v2381_v61 = vsel %vm2148_vm1, %v2378_v34, %v2380_v1 }
 0x1c9   : > { %v2889_v24 = vmax.f32 %v2764_v2, 0.0  ;;  %v1626_v41 = vsel %vm1397_vm0, %v1623_v18, %v1625_v4  ;;  %v2762_v43 = vadd.f32 %v6177_v15, %v2633_v58  ;;  %v2763_v14 = vadd.f32 %v6177_v15, %v2634_v59 }
 0x1ca   : > { %v1887_v25 = vadd.f32 %v1630_v8, %v1136_v45  ;;  %v1628_v13 = vsel %vm1397_vm0, %v1625_v4, %v1627_v27  ;;  %v1885_v19 = vadd.f32 %v1626_v41, %v6093_v26  ;;  %v2376_v38 = vrot.slane %v2012_v37, 2 }
 0x1cb   : > { %3015 = vst.msk [vmem:[#allocation2 + $0x380] sm:$0xff] %vm2902_vm2, %v2889_v24  ;;  %v1886_v7 = vadd.f32 %v1628_v13, %v1135_v10  ;;  %v1265_v56 = vmul.f32 %v4656_v39, %v988_v50  ;;  %v2887_v60 = vmax.f32 %v2762_v43, 0.0  ;;  %v2888_v49 = vmax.f32 %v2763_v14, 0.0 }
 0x1cc   : > { %v2638_v5 = vadd.f32 %v2381_v61, %v1887_v25  ;;  %v2016_v18 = vmul.f32 %v4658_v40, %v988_v50  ;;  %v2377_v62 = vsel %vm2148_vm1, %v2374_v33, %v2376_v38  ;;  %v2379_v23 = vsel %vm2148_vm1, %v2376_v38, %v2378_v34 }
 0x1cd   : > { %v1139_v12 = vmul.f32 %v4669_v46, %v988_v50  ;;  %v1633_v55 = vrot.slane %v1265_v56, 1  ;;  %3013 = vst.msk [vmem:[#allocation2 + $0x370] sm:$0xff] %vm2902_vm2, %v2887_v60  ;;  %v2636_v29 = vadd.f32 %v2377_v62, %v1885_v19  ;;  %v2637_v9 = vadd.f32 %v2379_v23, %v1886_v7 }
 0x1ce   : > { %v2767_v26 = vadd.f32 %v6177_v15, %v2638_v5  ;;  %v2384_v45 = vrot.slane %v2016_v18, 2  ;;  %v2392_v30 = vrot.slane %v6216_v51, 2  ;;  %3014 = vst.msk [vmem:[#allocation2 + $0x378] sm:$0xff] %vm2902_vm2, %v2888_v49  ;;  %v1264_v33 = vmul.f32 %v4656_v39, %v983_v57 }
 0x1cf   : > { %v1636_v11 = vsel %vm1397_vm0, %v1633_v55, %v1635_v16  ;;  %v2015_v0 = vmul.f32 %v4658_v40, %v983_v57  ;;  %v1003_v54 = vpop.permute.xlu1 %1002  ;;  %v2765_v32 = vadd.f32 %v6177_v15, %v2636_v29  ;;  %v2766_v21 = vadd.f32 %v6177_v15, %v2637_v9  ;;  %v998_v52 = vpop.permute.xlu0 %997 }
 0x1d0   : > { %v2892_v3 = vmax.f32 %v2767_v26, 0.0  ;;  %v1890_v35 = vadd.f32 %v1636_v11, %v1139_v12  ;;  %v2387_v22 = vsel %vm2148_vm1, %v2384_v45, %v2386_v31  ;;  %v1138_v44 = vmul.f32 %v4669_v46, %v983_v57 }
 0x1d1   : > { %v1631_v2 = vrot.slane %v1264_v33, 1  ;;  %v2382_v27 = vrot.slane %v2015_v0, 2  ;;  %v2890_v34 = vmax.f32 %v2765_v32, 0.0  ;;  %v2891_v4 = vmax.f32 %v2766_v21, 0.0 }
 0x1d2   : > { %3018 = vst.msk [vmem:[#allocation2 + $0x398] sm:$0xff] %vm2902_vm2, %v2892_v3  ;;  %v2641_v50 = vadd.f32 %v2387_v22, %v1890_v35  ;;  %v1268_v58 = vmul.f32 %v4656_v39, %v1003_v54  ;;  %v1142_v57 = vmul.f32 %v4669_v46, %v1003_v54  ;;  %v1267_v28 = vmul.f32 %v4656_v39, %v998_v52 }
 0x1d3   : > { %v1632_v59 = vsel %vm1397_vm0, %v1629_v42, %v1631_v2  ;;  %v1634_v10 = vsel %vm1397_vm0, %v1631_v2, %v1633_v55  ;;  %v2383_v37 = vsel %vm2148_vm1, %v2380_v1, %v2382_v27  ;;  %3016 = vst.msk [vmem:[#allocation2 + $0x388] sm:$0xff] %vm2902_vm2, %v2890_v34  ;;  %v2385_v20 = vsel %vm2148_vm1, %v2382_v27, %v2384_v45 }
 0x1d4   : > { %v2770_v24 = vadd.f32 %v6177_v15, %v2641_v50  ;;  %v1888_v8 = vadd.f32 %v1632_v59, %v6131_v63  ;;  %v1889_v61 = vadd.f32 %v1634_v10, %v1138_v44  ;;  %v1639_v41 = vrot.slane %v1268_v58, 1  ;;  %3017 = vst.msk [vmem:[#allocation2 + $0x390] sm:$0xff] %vm2902_vm2, %v2891_v4 }
 0x1d5   : > { %v2019_v42 = vmul.f32 %v4658_v40, %v1003_v54  ;;  %v2018_v1 = vmul.f32 %v4658_v40, %v998_v52  ;;  %v1637_v7 = vrot.slane %v1267_v28, 1  ;;  %v1141_v5 = vmul.f32 %v4669_v46, %v998_v52 }
 0x1d6   : > { %v2895_v43 = vmax.f32 %v2770_v24, 0.0  ;;  %v2639_v14 = vadd.f32 %v2383_v37, %v1888_v8  ;;  %v2640_v25 = vadd.f32 %v2385_v20, %v1889_v61  ;;  %v1642_v13 = vsel %vm1397_vm0, %v1639_v41, %v1641_v17 }
 0x1d7   : > { %v1893_v63 = vadd.f32 %v1642_v13, %v1142_v57  ;;  %v2390_v19 = vrot.slane %v2019_v42, 2  ;;  %v2388_v38 = vrot.slane %v2018_v1, 2  ;;  %v1018_v56 = vpop.permute.xlu1 %1017  ;;  %v1638_v23 = vsel %vm1397_vm0, %v1635_v16, %v1637_v7  ;;  %v1013_v26 = vpop.permute.xlu0 %1012 }
 0x1d8   : > { %3021 = vst.msk [vmem:[#allocation2 + $0x3b0] sm:$0xff] %vm2902_vm2, %v2895_v43  ;;  %v2768_v60 = vadd.f32 %v6177_v15, %v2639_v14  ;;  %v2769_v49 = vadd.f32 %v6177_v15, %v2640_v25  ;;  %v1271_v18 = vmul.f32 %v4656_v39, %v1018_v56  ;;  %v1640_v12 = vsel %vm1397_vm0, %v1637_v7, %v1639_v41 }
 0x1d9   : > { %v2393_v62 = vsel %vm2148_vm1, %v2390_v19, %v2392_v30  ;;  %v1145_v55 = vmul.f32 %v4669_v46, %v1018_v56  ;;  %v1891_v11 = vadd.f32 %v1638_v23, %v6160_v36  ;;  %v1892_v33 = vadd.f32 %v1640_v12, %v1141_v5 }
 0x1da   : > { %v2893_v29 = vmax.f32 %v2768_v60, 0.0  ;;  %v2894_v9 = vmax.f32 %v2769_v49, 0.0  ;;  %v2644_v45 = vadd.f32 %v2393_v62, %v1893_v63  ;;  %v2389_v0 = vsel %vm2148_vm1, %v2386_v31, %v2388_v38 }
 0x1db   : > { %v1645_v54 = vrot.slane %v1271_v18, 1  ;;  %v2022_v47 = vmul.f32 %v4658_v40, %v1018_v56  ;;  %v2391_v3 = vsel %vm2148_vm1, %v2388_v38, %v2390_v19  ;;  %v2642_v32 = vadd.f32 %v2389_v0, %v1891_v11 }
 0x1dc   : > { %3019 = vst.msk [vmem:[#allocation2 + $0x3a0] sm:$0xff] %vm2902_vm2, %v2893_v29  ;;  %v2773_v16 = vadd.f32 %v6177_v15, %v2644_v45  ;;  %v1270_v21 = vmul.f32 %v4656_v39, %v1013_v26  ;;  %v2643_v36 = vadd.f32 %v2391_v3, %v1892_v33  ;;  %v2021_v48 = vmul.f32 %v4658_v40, %v1013_v26 }
 0x1dd   : > { %3020 = vst.msk [vmem:[#allocation2 + $0x3a8] sm:$0xff] %vm2902_vm2, %v2894_v9  ;;  %v1896_v35 = vadd.f32 %v1645_v54, %v1145_v55  ;;  %v2396_v52 = vrot.slane %v2022_v47, 2  ;;  %v1143_v31 = vmul.f32 %v4669_v46, %v6188_v6  ;;  %v2771_v44 = vadd.f32 %v6177_v15, %v2642_v32 }
 0x1de   : > { %v2898_v22 = vmax.f32 %v2773_v16, 0.0  ;;  %v1643_v2 = vrot.slane %v1270_v21, 1  ;;  %v2772_v27 = vadd.f32 %v6177_v15, %v2643_v36  ;;  %v1144_v4 = vmul.f32 %v4669_v46, %v1013_v26 }
 0x1df   : > { %v2647_v34 = vadd.f32 %v2396_v52, %v1896_v35  ;;  %v2394_v39 = vrot.slane %v2021_v48, 2  ;;  %v2896_v50 = vmax.f32 %v2771_v44, 0.0 }
 0x1e0   : > { %3024 = vst.msk [vmem:[#allocation2 + $0x3c8] sm:$0xff] %vm2902_vm2, %v2898_v22  ;;  %v1644_v40 = vsel %vm1397_vm0, %v1641_v17, %v1643_v2  ;;  %v1646_v58 = vsel %vm1397_vm0, %v1643_v2, %v1645_v54  ;;  %v2897_v6 = vmax.f32 %v2772_v27, 0.0 }
 0x1e1   : > { %v2776_v59 = vadd.f32 %v6177_v15, %v2647_v34  ;;  %v1894_v10 = vadd.f32 %v1644_v40, %v1143_v31  ;;  %v1895_v37 = vadd.f32 %v1646_v58, %v1144_v4  ;;  %3022 = vst.msk [vmem:[#allocation2 + $0x3b8] sm:$0xff] %vm2902_vm2, %v2896_v50  ;;  %v2395_v46 = vsel %vm2148_vm1, %v2392_v30, %v2394_v39 }
 0x1e2   : > { %v2397_v57 = vsel %vm2148_vm1, %v2394_v39, %v2396_v52  ;;  %3023 = vst.msk [vmem:[#allocation2 + $0x3c0] sm:$0xff] %vm2902_vm2, %v2897_v6 }
 0x1e3   : > { %v2901_v53 = vmax.f32 %v2776_v59, 0.0  ;;  %v2645_v17 = vadd.f32 %v2395_v46, %v1894_v10  ;;  %v2646_v24 = vadd.f32 %v2397_v57, %v1895_v37 }
 0x1e5   : > { %3028 = vst.msk [vmem:[#allocation2 + $0x3e0] sm:$0x3f] %vm3027_vm3, %v2901_v53  ;;  %v2774_v8 = vadd.f32 %v6177_v15, %v2645_v17  ;;  %v2775_v61 = vadd.f32 %v6177_v15, %v2646_v24 }
 0x1e7   : > { %v2899_v41 = vmax.f32 %v2774_v8, 0.0  ;;  %v2900_v20 = vmax.f32 %v2775_v61, 0.0 }
 0x1e9   : > { %3025 = vst.msk [vmem:[#allocation2 + $0x3d0] sm:$0xff] %vm2902_vm2, %v2899_v41 }
 0x1ea   : > { %3026 = vst.msk [vmem:[#allocation2 + $0x3d8] sm:$0xff] %vm2902_vm2, %v2900_v20 }
 0x1eb LB: >> { %s3035_s21 = smul.u32 332, %s4532_s20  ;;  %s4538_s23 = smov 64   ;;  %vm3581_vm4 = vcmask 523264   ;;  %vm3640_vm5 = vcmask 785408   ;;  %vm3993_vm6 = vcmask 519168   ;;  %s4532_s20 = sphi %s6352_s20, %s3034_s20  }
 0x1ec   : >> { %s4539_s24 = smov 32  }
 0x1ed   : >> { %s6358_s22 = scalar_lea.vmem [#allocation2], %s3035_s21 }
 0x1f1   : >> { %v6361_v15 = vld [vmem:[%s6358_s22 + $0xa0] sm:$0xff]  ;;  %v6364_v51 = vld [vmem:[%s6358_s22 + $0xa8] sm:$0xff]  ;;  %v6371_v43 = vld [vmem:[%s6358_s22 + $0xf8] sm:$0xff] }
 0x1f2   : >> { %v3369_v30 = vrot.slane %v6361_v15, 2  ;;  %v3371_v42 = vrot.slane %v6364_v51, 2  ;;  %v3160_v28 = vrot.slane %v6361_v15, 1  ;;  %v3162_v1 = vrot.slane %v6364_v51, 1  ;;  %v6374_v14 = vld [vmem:[%s6358_s22 + $0x100] sm:$0xff]  ;;  %v6389_v56 = vld [vmem:[%s6358_s22 + $0xb0] sm:$0xff] }
 0x1f3   : >> { %v3391_v63 = vrot.slane %v6371_v43, 2  ;;  %v3393_v19 = vrot.slane %v6374_v14, 2  ;;  %v3182_v7 = vrot.slane %v6371_v43, 1  ;;  %v3184_v38 = vrot.slane %v6374_v14, 1  ;;  %v6400_v62 = vld [vmem:[%s6358_s22 + $0x108] sm:$0xff]  ;;  %v6412_v45 = vld [vmem:[%s6358_s22] sm:$0xff] }
 0x1f4   : >> { %v3372_v25 = vsel %vm2148_vm1, %v3369_v30, %v3371_v42  ;;  %v3163_v13 = vsel %vm1397_vm0, %v3160_v28, %v3162_v1  ;;  %v3164_v60 = vrot.slane %v6389_v56, 1  ;;  %v3186_v23 = vrot.slane %v6400_v62, 1  ;;  %v6415_v11 = vld [vmem:[%s6358_s22 + $0x8] sm:$0xff]  ;;  %v6419_v33 = vld [vmem:[%s6358_s22 + $0x50] sm:$0xff]  ;;  %v6422_v0 = vld [vmem:[%s6358_s22 + $0x58] sm:$0xff] }
 0x1f5   : >> { %3453 = vrot.lane.b32.xlu1 %v3372_v25, %s4538_s23  ;;  %3244 = vrot.lane.b32.xlu0 %v3163_v13, %s4539_s24  ;;  %v3394_v5 = vsel %vm2148_vm1, %v3391_v63, %v3393_v19  ;;  %v3185_v18 = vsel %vm1397_vm0, %v3182_v7, %v3184_v38  ;;  %v3395_v12 = vrot.slane %v6400_v62, 2  ;;  %v3373_v55 = vrot.slane %v6389_v56, 2  ;;  %v6439_v48 = vld [vmem:[%s6358_s22 + $0xb8] sm:$0xff]  ;;  %v6442_v31 = vld [vmem:[%s6358_s22 + $0x110] sm:$0xff] }
 0x1f6   : >> { %v3165_v49 = vsel %vm1397_vm0, %v3162_v1, %v3164_v60  ;;  %v3187_v26 = vsel %vm1397_vm0, %v3184_v38, %v3186_v23  ;;  %v3122_v54 = vrot.slane %v6415_v11, 1  ;;  %v3121_v47 = vrot.slane %v6412_v45, 1  ;;  %v6457_v50 = vld [vmem:[%s6358_s22 + $0x10] sm:$0xff]  ;;  %v6468_v46 = vld [vmem:[%s6358_s22 + $0x60] sm:$0xff]  ;;  %v6484_v20 = vld [vmem:[%s6358_s22 + $0x118] sm:$0xff] }
 0x1f7   : >> { %3246 = vrot.lane.b32.xlu2 %v3165_v49, %s4539_s24  ;;  %v3396_v29 = vsel %vm2148_vm1, %v3393_v19, %v3395_v12  ;;  %v3374_v9 = vsel %vm2148_vm1, %v3371_v42, %v3373_v55  ;;  %v3140_v16 = vrot.slane %v6419_v33, 1  ;;  %v3142_v3 = vrot.slane %v6422_v0, 1  ;;  %v6480_v41 = vld [vmem:[%s6358_s22 + $0xc0] sm:$0xff]  ;;  %v6503_v49 = vld [vmem:[%s6358_s22 + $0x68] sm:$0xff] }
 0x1f8   : >> { %v3330_v32 = vrot.slane %v6412_v45, 2  ;;  %v3331_v21 = vrot.slane %v6415_v11, 2  ;;  %v3123_v36 = vsel %vm1397_vm0, %v3121_v47, %v3122_v54  ;;  %v3351_v22 = vrot.slane %v6422_v0, 2 }
 0x1f9   : >> { %v3143_v35 = vsel %vm1397_vm0, %v3140_v16, %v3142_v3  ;;  %v3349_v44 = vrot.slane %v6419_v33, 2  ;;  %v3166_v2 = vrot.slane %v6439_v48, 1  ;;  %v3188_v27 = vrot.slane %v6442_v31, 1 }
 0x1fa   : >> { %v3332_v52 = vsel %vm2148_vm1, %v3330_v32, %v3331_v21  ;;  %v3375_v40 = vrot.slane %v6439_v48, 2  ;;  %v3397_v58 = vrot.slane %v6442_v31, 2  ;;  %v3124_v6 = vrot.slane %v6457_v50, 1  ;;  %v3632_v32 = vld [vmem:[%s7166_s3 + $0x40] sm:$0xff] }
 0x1fb   : >> { %v3352_v34 = vsel %vm2148_vm1, %v3349_v44, %v3351_v22  ;;  %v3167_v4 = vsel %vm1397_vm0, %v3164_v60, %v3166_v2  ;;  %v3189_v39 = vsel %vm1397_vm0, %v3186_v23, %v3188_v27  ;;  %v3144_v57 = vrot.slane %v6468_v46, 1  ;;  %v6500_v60 = vld [vmem:[%s6358_s22 + $0x18] sm:$0xff]  ;;  %v3634_v23 = vld [vmem:[%s7166_s3 + $0x50] sm:$0xff] }
 0x1fc   : >> { %v3376_v59 = vsel %vm2148_vm1, %v3373_v55, %v3375_v40  ;;  %v3398_v10 = vsel %vm2148_vm1, %v3395_v12, %v3397_v58  ;;  %v3125_v37 = vsel %vm1397_vm0, %v3122_v54, %v3124_v6  ;;  %v3333_v53 = vrot.slane %v6457_v50, 2  ;;  %v6527_v54 = vld [vmem:[%s6358_s22 + $0xc8] sm:$0xff] }
 0x1fd   : >> { %3475 = vrot.lane.b32.xlu1 %v3394_v5, %s4538_s23  ;;  %3266 = vrot.lane.b32.xlu0 %v3185_v18, %s4539_s24  ;;  %v3353_v17 = vrot.slane %v6468_v46, 2  ;;  %v3145_v24 = vsel %vm1397_vm0, %v3142_v3, %v3144_v57  ;;  %v3168_v42 = vrot.slane %v6480_v41, 1  ;;  %v3190_v1 = vrot.slane %v6484_v20, 1  ;;  %v3635_v18 = vld [vmem:[%s7166_s3 + $0x58] sm:$0xff]  ;;  %v3633_v3 = vld [vmem:[%s7166_s3 + $0x48] sm:$0xff] }
 0x1fe   : >> { %v3334_v8 = vsel %vm2148_vm1, %v3331_v21, %v3333_v53  ;;  %v3377_v25 = vrot.slane %v6480_v41, 2  ;;  %v3399_v5 = vrot.slane %v6484_v20, 2  ;;  %v3126_v12 = vrot.slane %v6500_v60, 1  ;;  %4325 = vmatpush.msra.mxu2 %v3635_v18  ;;  %4326 = vmatpush.msra.mxu3 %v3635_v18 }
 0x1ff   : >> { %3268 = vrot.lane.b32.xlu2 %v3187_v26, %s4539_s24  ;;  %v3354_v61 = vsel %vm2148_vm1, %v3351_v22, %v3353_v17  ;;  %v3169_v13 = vsel %vm1397_vm0, %v3166_v2, %v3168_v42  ;;  %v3191_v19 = vsel %vm1397_vm0, %v3188_v27, %v3190_v1  ;;  %v3146_v55 = vrot.slane %v6503_v49, 1  ;;  %3771 = vmatpush.msra.mxu0 %v3635_v18  ;;  %v3630_v22 = vld [vmem:[%s7166_s3 + $0x30] sm:$0xff] }
 0x200   : >> { %v3378_v38 = vsel %vm2148_vm1, %v3375_v40, %v3377_v25  ;;  %v3400_v26 = vsel %vm2148_vm1, %v3397_v58, %v3399_v5  ;;  %4324 = vmatpush.msra.mxu1 %v3635_v18  ;;  %4328 = vmatpush.msra.mxu2 %v3634_v23  ;;  %v3335_v47 = vrot.slane %v6500_v60, 2  ;;  %v3355_v21 = vrot.slane %v6503_v49, 2  ;;  %v3628_v40 = vld [vmem:[%s7166_s3 + $0x20] sm:$0xff]  ;;  %v6623_v18 = vld [vmem:[%s6358_s22 + $0x128] sm:$0xff] }
 0x201   : >> { %4329 = vmatpush.msra.mxu3 %v3634_v23  ;;  %3772 = vmatpush.msra.mxu0 %v3634_v23  ;;  %v3379_v58 = vrot.slane %v6527_v54, 2 }
 0x202   : >> { %4327 = vmatpush.msra.mxu1 %v3634_v23  ;;  %4331 = vmatpush.msra.mxu2 %v3633_v3  ;;  %v3356_v2 = vsel %vm2148_vm1, %v3353_v17, %v3355_v21  ;;  %v6592_v17 = vld [vmem:[%s6358_s22 + $0x20] sm:$0xff] }
 0x203   : >> { %4332 = vmatpush.msra.mxu3 %v3633_v3  ;;  %3773 = vmatpush.msra.mxu0 %v3633_v3 }
 0x204   : >> { %4330 = vmatpush.msra.mxu1 %v3633_v3  ;;  %4334 = vmatpush.msra.mxu2 %v3632_v32 }
 0x205   : >> { %3477 = vrot.lane.b32.xlu1 %v3396_v29, %s4538_s23  ;;  %3455 = vrot.lane.b32.xlu0 %v3374_v9, %s4538_s23  ;;  %v3127_v29 = vsel %vm1397_vm0, %v3124_v6, %v3126_v12  ;;  %v3147_v9 = vsel %vm1397_vm0, %v3144_v57, %v3146_v55  ;;  %v3380_v57 = vsel %vm2148_vm1, %v3377_v25, %v3379_v58 }
 0x206   : >> { %4335 = vmatpush.msra.mxu3 %v3632_v32  ;;  %3774 = vmatpush.msra.mxu0 %v3632_v32 }
 0x207   : >> { %3204 = vrot.lane.b32.xlu2 %v3123_v36, %s4539_s24  ;;  %v3170_v36 = vrot.slane %v6527_v54, 1  ;;  %4333 = vmatpush.msra.mxu1 %v3632_v32 }
 0x209   : >> { %v3171_v27 = vsel %vm1397_vm0, %v3168_v42, %v3170_v36 }
 0x20d   : >> { %3224 = vrot.lane.b32.xlu0 %v3143_v35, %s4539_s24  ;;  %3413 = vrot.lane.b32.xlu1 %v3332_v52, %s4538_s23  ;;  %v3336_v35 = vsel %vm2148_vm1, %v3333_v53, %v3335_v47  ;;  %v3631_v52 = vld [vmem:[%s7166_s3 + $0x38] sm:$0xff] }
 0x20e   : >> { %4337 = vmatpush.msra.mxu2 %v3631_v52  ;;  %4338 = vmatpush.msra.mxu3 %v3631_v52 }
 0x20f   : >> { %3433 = vrot.lane.b32.xlu2 %v3352_v34, %s4538_s23  ;;  %v6556_v34 = vld [vmem:[%s6358_s22 + $0x120] sm:$0xff]  ;;  %3775 = vmatpush.msra.mxu0 %v3631_v52 }
 0x210   : >> { %4340 = vmatpush.msra.mxu2 %v3630_v22  ;;  %4336 = vmatpush.msra.mxu1 %v3631_v52  ;;  %v3401_v6 = vrot.slane %v6556_v34, 2 }
 0x211   : >> { %4341 = vmatpush.msra.mxu3 %v3630_v22  ;;  %3776 = vmatpush.msra.mxu0 %v3630_v22 }
 0x212   : >> { %4339 = vmatpush.msra.mxu1 %v3630_v22  ;;  %v3402_v53 = vsel %vm2148_vm1, %v3399_v5, %v3401_v6  ;;  %v6620_v5 = vld [vmem:[%s6358_s22 + $0xd0] sm:$0xff] }
 0x213   : >> { %v3381_v3 = vrot.slane %v6620_v5, 2 }
 0x215   : >> { %3248 = vrot.lane.b32.xlu0 %v3167_v4, %s4539_s24  ;;  %3270 = vrot.lane.b32.xlu1 %v3189_v39, %s4539_s24  ;;  %v3192_v4 = vrot.slane %v6556_v34, 1  ;;  %v3629_v39 = vld [vmem:[%s7166_s3 + $0x28] sm:$0xff] }
 0x216   : >> { %4343 = vmatpush.msra.mxu2 %v3629_v39  ;;  %4344 = vmatpush.msra.mxu3 %v3629_v39 }
 0x217   : >> { %3457 = vrot.lane.b32.xlu2 %v3376_v59, %s4538_s23  ;;  %v3193_v59 = vsel %vm1397_vm0, %v3190_v1, %v3192_v4  ;;  %3777 = vmatpush.msra.mxu0 %v3629_v39  ;;  %v3337_v1 = vrot.slane %v6592_v17, 2 }
 0x218   : >> { %4346 = vmatpush.msra.mxu2 %v3628_v40  ;;  %4342 = vmatpush.msra.mxu1 %v3629_v39 }
 0x219   : >> { %4347 = vmatpush.msra.mxu3 %v3628_v40  ;;  %3778 = vmatpush.msra.mxu0 %v3628_v40 }
 0x21a   : >> { %4345 = vmatpush.msra.mxu1 %v3628_v40 }
 0x21d   : >> { %3479 = vrot.lane.b32.xlu0 %v3398_v10, %s4538_s23  ;;  %3206 = vrot.lane.b32.xlu1 %v3125_v37, %s4539_s24  ;;  %v3627_v10 = vld [vmem:[%s7166_s3 + $0x18] sm:$0xff]  ;;  %v3626_v37 = vld [vmem:[%s7166_s3 + $0x10] sm:$0xff] }
 0x21e   : >> { %4349 = vmatpush.msra.mxu2 %v3627_v10  ;;  %4350 = vmatpush.msra.mxu3 %v3627_v10 }
 0x21f   : >> { %3226 = vrot.lane.b32.xlu2 %v3145_v24, %s4539_s24  ;;  %v6596_v24 = vld [vmem:[%s6358_s22 + $0x70] sm:$0xff]  ;;  %3779 = vmatpush.msra.mxu0 %v3627_v10 }
 0x220   : >> { %4352 = vmatpush.msra.mxu2 %v3626_v37  ;;  %v3148_v42 = vrot.slane %v6596_v24, 1  ;;  %4348 = vmatpush.msra.mxu1 %v3627_v10  ;;  %v3357_v23 = vrot.slane %v6596_v24, 2  ;;  %v6670_v10 = vld [vmem:[%s6358_s22 + $0xd8] sm:$0xff] }
 0x221   : >> { %4353 = vmatpush.msra.mxu3 %v3626_v37  ;;  %3780 = vmatpush.msra.mxu0 %v3626_v37 }
 0x222   : >> { %4351 = vmatpush.msra.mxu1 %v3626_v37  ;;  %v6674_v37 = vld [vmem:[%s6358_s22 + $0x130] sm:$0xff] }
 0x225   : >> { %3415 = vrot.lane.b32.xlu0 %v3334_v8, %s4538_s23  ;;  %3435 = vrot.lane.b32.xlu1 %v3354_v61, %s4538_s23  ;;  %v3128_v8 = vrot.slane %v6592_v17, 1  ;;  %v3625_v61 = vld [vmem:[%s7166_s3 + $0x8] sm:$0xff] }
 0x226   : >> { %4355 = vmatpush.msra.mxu2 %v3625_v61  ;;  %4356 = vmatpush.msra.mxu3 %v3625_v61 }
 0x227   : >> { %3250 = vrot.lane.b32.xlu2 %v3169_v13, %s4539_s24  ;;  %v3129_v25 = vsel %vm1397_vm0, %v3126_v12, %v3128_v8  ;;  %v3624_v13 = vld [vmem:[%s7166_s3] sm:$0xff]  ;;  %3781 = vmatpush.msra.mxu0 %v3625_v61  ;;  %v3172_v12 = vrot.slane %v6620_v5, 1 }
 0x228   : >> { %4358 = vmatpush.msra.mxu2 %v3624_v13  ;;  %4359 = vmatpush.msra.mxu3 %v3624_v13 }
 0x229   : >> { %4354 = vmatpush.msra.mxu1 %v3625_v61  ;;  %3782 = vmatpush.msra.mxu0 %v3624_v13  ;;  %v3383_v61 = vrot.slane %v6670_v10, 2 }
 0x22b   : >> { %4357 = vmatpush.msra.mxu1 %v3624_v13 }
 0x22d   : >> { %3272 = vrot.lane.b32.xlu0 %v3191_v19, %s4539_s24  ;;  %3459 = vrot.lane.b32.xlu1 %v3378_v38, %s4538_s23  ;;  %v3149_v19 = vsel %vm1397_vm0, %v3146_v55, %v3148_v42  ;;  %v3338_v38 = vsel %vm2148_vm1, %v3335_v47, %v3337_v1  ;;  %v3194_v55 = vrot.slane %v6623_v18, 1  ;;  %v6641_v47 = vld [vmem:[%s6358_s22 + $0x28] sm:$0xff] }
 0x22e   : >> { %v3339_v39 = vrot.slane %v6641_v47, 2 }
 0x22f   : >> { %3481 = vrot.lane.b32.xlu2 %v3400_v26, %s4538_s23  ;;  %v3358_v26 = vsel %vm2148_vm1, %v3355_v21, %v3357_v23  ;;  %v3403_v21 = vrot.slane %v6623_v18, 2 }
 0x231   : >> { %v3404_v52 = vsel %vm2148_vm1, %v3401_v6, %v3403_v21  ;;  %v3340_v6 = vsel %vm2148_vm1, %v3337_v1, %v3339_v39 }
 0x235   : >> { %3208 = vrot.lane.b32.xlu0 %v3127_v29, %s4539_s24  ;;  %3228 = vrot.lane.b32.xlu1 %v3147_v9, %s4539_s24  ;;  %v3173_v29 = vsel %vm1397_vm0, %v3170_v36, %v3172_v12  ;;  %v3195_v9 = vsel %vm1397_vm0, %v3192_v4, %v3194_v55  ;;  %v3130_v36 = vrot.slane %v6641_v47, 1 }
 0x237   : >> { %3417 = vrot.lane.b32.xlu2 %v3336_v35, %s4538_s23  ;;  %v3382_v35 = vsel %vm2148_vm1, %v3379_v58, %v3381_v3  ;;  %v3131_v22 = vsel %vm1397_vm0, %v3128_v8, %v3130_v36  ;;  %v3196_v8 = vrot.slane %v6674_v37, 1 }
 0x23d   : >> { %3437 = vrot.lane.b32.xlu0 %v3356_v2, %s4538_s23  ;;  %3252 = vrot.lane.b32.xlu1 %v3171_v27, %s4539_s24  ;;  %v6658_v2 = vld [vmem:[%s6358_s22 + $0x78] sm:$0xff] }
 0x23e   : >> { %v3150_v27 = vrot.slane %v6658_v2, 1  ;;  %v3359_v40 = vrot.slane %v6658_v2, 2 }
 0x23f   : >> { %3274 = vrot.lane.b32.xlu2 %v3193_v59, %s4539_s24 }
 0x240   : >> { %v3151_v58 = vsel %vm1397_vm0, %v3148_v42, %v3150_v27  ;;  %v3360_v59 = vsel %vm2148_vm1, %v3357_v23, %v3359_v40  ;;  %v3384_v23 = vsel %vm2148_vm1, %v3381_v3, %v3383_v61 }
 0x245   : >> { %3461 = vrot.lane.b32.xlu0 %v3380_v57, %s4538_s23  ;;  %3483 = vrot.lane.b32.xlu1 %v3402_v53, %s4538_s23  ;;  %v3174_v57 = vrot.slane %v6670_v10, 1 }
 0x247   : >> { %3210 = vrot.lane.b32.xlu2 %v3129_v25, %s4539_s24  ;;  %v3175_v25 = vsel %vm1397_vm0, %v3172_v12, %v3174_v57  ;;  %v3405_v12 = vrot.slane %v6674_v37, 2 }
 0x24d   : >> { %3230 = vrot.lane.b32.xlu0 %v3149_v19, %s4539_s24  ;;  %3419 = vrot.lane.b32.xlu1 %v3338_v38, %s4538_s23  ;;  %v3197_v38 = vsel %vm1397_vm0, %v3194_v55, %v3196_v8 }
 0x24f   : >> { %3439 = vrot.lane.b32.xlu2 %v3358_v26, %s4538_s23  ;;  %v6692_v26 = vld [vmem:[%s6358_s22 + $0x30] sm:$0xff] }
 0x250   : >> { %v3132_v55 = vrot.slane %v6692_v26, 1 }
 0x251   : >> { %v6644_v32 = vpop.permute.xlu2 %3246 }
 0x255   : >> { %3254 = vrot.lane.b32.xlu0 %v3173_v29, %s4539_s24  ;;  %3276 = vrot.lane.b32.xlu1 %v3195_v9, %s4539_s24  ;;  %v6695_v29 = vld [vmem:[%s6358_s22 + $0x80] sm:$0xff] }
 0x257   : >> { %3463 = vrot.lane.b32.xlu2 %v3382_v35, %s4538_s23  ;;  %v3152_v35 = vrot.slane %v6695_v29, 1 }
 0x259   : >> { %v3269_v4 = vpop.permute.xlu2 %3268 }
 0x25d   : >> { %3485 = vrot.lane.b32.xlu0 %v3404_v52, %s4538_s23  ;;  %3212 = vrot.lane.b32.xlu1 %v3131_v22, %s4539_s24  ;;  %v3406_v22 = vsel %vm2148_vm1, %v3403_v21, %v3405_v12 }
 0x25f   : >> { %3232 = vrot.lane.b32.xlu2 %v3151_v58, %s4539_s24 }
 0x261   : >> { %v3205_v53 = vpop.permute.xlu2 %3204 }
 0x265   : >> { %3421 = vrot.lane.b32.xlu0 %v3340_v6, %s4538_s23  ;;  %3441 = vrot.lane.b32.xlu1 %v3360_v59, %s4538_s23  ;;  %v3133_v59 = vsel %vm1397_vm0, %v3130_v36, %v3132_v55 }
 0x267   : >> { %v3454_v42 = vpop.permute.xlu1 %3453  ;;  %v3245_v1 = vpop.permute.xlu0 %3244  ;;  %3256 = vrot.lane.b32.xlu2 %v3175_v25, %s4539_s24  ;;  %v3341_v25 = vrot.slane %v6692_v26, 2 }
 0x268   : >> { %v3559_v13 = vsel %vm2902_vm2, %v6361_v15, %v3245_v1  ;;  %v6713_v1 = vld [vmem:[%s6358_s22 + $0xe0] sm:$0xff] }
 0x269   : >> { %v3602_v19 = vsel %vm3581_vm4, %v3559_v13, %v3454_v42  ;;  %v3434_v9 = vpop.permute.xlu2 %3433  ;;  %v3153_v42 = vsel %vm1397_vm0, %v3150_v27, %v3152_v35  ;;  %v3361_v13 = vrot.slane %v6695_v29, 2  ;;  %v3176_v36 = vrot.slane %v6713_v1, 1 }
 0x26a   : >> { %4300 = vmatmul.msk.f32.vlgmr.msra.gmra.mxu2 %vm3640_vm5, %v3602_v19  ;;  %v3560_v27 = vsel %vm2902_vm2, %v6364_v51, %v6644_v32  ;;  %v3571_v19 = vsel %vm2902_vm2, %v6374_v14, %v3269_v4  ;;  %v6735_v32 = vld [vmem:[%s6358_s22 + $0x138] sm:$0xff] }
 0x26b   : >> { %v3177_v51 = vsel %vm1397_vm0, %v3174_v57, %v3176_v36  ;;  %v3198_v14 = vrot.slane %v6735_v32, 1  ;;  %v3539_v57 = vsel %vm2902_vm2, %v6412_v45, %v3205_v53  ;;  %v6759_v53 = vld [vmem:[%s6358_s22 + $0x38] sm:$0xff] }
 0x26d   : >> { %3278 = vrot.lane.b32.xlu0 %v3197_v38, %s4539_s24  ;;  %3465 = vrot.lane.b32.xlu1 %v3384_v23, %s4538_s23 }
 0x26f   : >> { %v3476_v52 = vpop.permute.xlu1 %3475  ;;  %v3267_v3 = vpop.permute.xlu0 %3266  ;;  %3487 = vrot.lane.b32.xlu2 %v3406_v22, %s4538_s23 }
 0x270   : >> { %v3570_v58 = vsel %vm2902_vm2, %v6371_v43, %v3267_v3 }
 0x271   : >> { %v3613_v6 = vsel %vm3581_vm4, %v3570_v58, %v3476_v52  ;;  %v3458_v21 = vpop.permute.xlu2 %3457  ;;  %v3342_v52 = vsel %vm2148_vm1, %v3339_v39, %v3341_v25  ;;  %v3362_v58 = vsel %vm2148_vm1, %v3359_v40, %v3361_v13  ;;  %v3385_v39 = vrot.slane %v6713_v1, 2 }
 0x272   : >> { %4311 = vmatmul.msk.f32.vlgmr.msra.gmra.mxu3 %vm3640_vm5, %v3613_v6  ;;  %v3407_v40 = vrot.slane %v6735_v32, 2 }
 0x274   : >> { %v3408_v45 = vsel %vm2148_vm1, %v3405_v12, %v3407_v40 }
 0x275   : >> { %3214 = vrot.lane.b32.xlu0 %v3133_v59, %s4539_s24  ;;  %3234 = vrot.lane.b32.xlu1 %v3153_v42, %s4539_s24  ;;  %v3199_v42 = vsel %vm1397_vm0, %v3196_v8, %v3198_v14  ;;  %v6763_v8 = vld [vmem:[%s6358_s22 + $0x88] sm:$0xff] }
 0x277   : >> { %v3478_v38 = vpop.permute.xlu1 %3477  ;;  %v3456_v23 = vpop.permute.xlu0 %3455  ;;  %3423 = vrot.lane.b32.xlu2 %v3342_v52, %s4538_s23  ;;  %v3134_v52 = vrot.slane %v6759_v53, 1 }
 0x278   : >> { %v3603_v3 = vsel %vm3581_vm4, %v3560_v27, %v3456_v23  ;;  %v3614_v22 = vsel %vm3581_vm4, %v3571_v19, %v3478_v38  ;;  %v3386_v23 = vsel %vm2148_vm1, %v3383_v61, %v3385_v39  ;;  %v3154_v61 = vrot.slane %v6763_v8, 1 }
 0x279   : >> { %4301 = vmatmul.msk.f32.gmra.mxu2 %vm3640_vm5, %v3603_v3  ;;  %v3227_v4 = vpop.permute.xlu2 %3226  ;;  %v3343_v3 = vrot.slane %v6759_v53, 2 }
 0x27a   : >> { %4312 = vmatmul.msk.f32.gmra.mxu3 %vm3640_vm5, %v3614_v22 }
 0x27d   : >> { %3443 = vrot.lane.b32.xlu0 %v3362_v58, %s4538_s23  ;;  %3258 = vrot.lane.b32.xlu1 %v3177_v51, %s4539_s24  ;;  %v3135_v58 = vsel %vm1397_vm0, %v3132_v55, %v3134_v52  ;;  %v6786_v55 = vld [vmem:[%s6358_s22 + $0x140] sm:$0xff] }
 0x27f   : >> { %v3225_v6 = vpop.permute.xlu0 %3224  ;;  %v3414_v59 = vpop.permute.xlu1 %3413  ;;  %3280 = vrot.lane.b32.xlu2 %v3199_v42, %s4539_s24  ;;  %v6783_v42 = vld [vmem:[%s6358_s22 + $0xe8] sm:$0xff] }
 0x280   : >> { %v3549_v27 = vsel %vm2902_vm2, %v6419_v33, %v3225_v6  ;;  %v3582_v19 = vsel %vm3581_vm4, %v3539_v57, %v3414_v59  ;;  %v3155_v6 = vsel %vm1397_vm0, %v3152_v35, %v3154_v61  ;;  %v3344_v59 = vsel %vm2148_vm1, %v3341_v25, %v3343_v3 }
 0x281   : >> { %4280 = vmatmul.msk.f32.vlgmr.msra.gmra.mxu0 %vm3640_vm5, %v3582_v19  ;;  %v3592_v38 = vsel %vm3581_vm4, %v3549_v27, %v3434_v9  ;;  %v3251_v9 = vpop.permute.xlu2 %3250  ;;  %v3178_v35 = vrot.slane %v6783_v42, 1  ;;  %v3200_v25 = vrot.slane %v6786_v55, 1 }
 0x282   : >> { %4290 = vmatmul.msk.f32.vlgmr.msra.gmra.mxu1 %vm3640_vm5, %v3592_v38 }
 0x285   : >> { %3467 = vrot.lane.b32.xlu0 %v3386_v23, %s4538_s23  ;;  %3489 = vrot.lane.b32.xlu1 %v3408_v45, %s4538_s23 }
 0x287   : >> { %v3249_v12 = vpop.permute.xlu0 %3248  ;;  %v3271_v22 = vpop.permute.xlu1 %3270  ;;  %3216 = vrot.lane.b32.xlu2 %v3135_v58, %s4539_s24  ;;  %v3387_v58 = vrot.slane %v6783_v42, 2 }
 0x288   : >> { %v3561_v51 = vsel %vm2902_vm2, %v6389_v56, %v3249_v12  ;;  %v3363_v56 = vrot.slane %v6763_v8, 2  ;;  %v3572_v27 = vsel %vm2902_vm2, %v6400_v62, %v3271_v22  ;;  %v3179_v62 = vsel %vm1397_vm0, %v3176_v36, %v3178_v35  ;;  %v6804_v22 = vld [vmem:[%s6358_s22 + $0x40] sm:$0xff] }
 0x289   : >> { %v3604_v57 = vsel %vm3581_vm4, %v3561_v51, %v3458_v21  ;;  %v3482_v21 = vpop.permute.xlu2 %3481  ;;  %v3201_v12 = vsel %vm1397_vm0, %v3198_v14, %v3200_v25  ;;  %v3136_v36 = vrot.slane %v6804_v22, 1  ;;  %v3550_v14 = vsel %vm2902_vm2, %v6422_v0, %v3227_v4  ;;  %v6827_v4 = vld [vmem:[%s6358_s22 + $0x90] sm:$0xff] }
 0x28a   : >> { %4302 = vmatmul.msk.f32.gmra.mxu2 %vm3640_vm5, %v3604_v57  ;;  %v3364_v23 = vsel %vm2148_vm1, %v3361_v13, %v3363_v56  ;;  %v3409_v57 = vrot.slane %v6786_v55, 2 }
 0x28b   : >> { %v3137_v0 = vsel %vm1397_vm0, %v3134_v52, %v3136_v36  ;;  %v3562_v52 = vsel %vm2902_vm2, %v6439_v48, %v3251_v9  ;;  %v6849_v9 = vld [vmem:[%s6358_s22 + $0xf0] sm:$0xff] }
 0x28d   : >> { %3236 = vrot.lane.b32.xlu0 %v3155_v6, %s4539_s24  ;;  %3425 = vrot.lane.b32.xlu1 %v3344_v59, %s4538_s23 }
 0x28f   : >> { %v3480_v19 = vpop.permute.xlu0 %3479  ;;  %v3207_v38 = vpop.permute.xlu1 %3206  ;;  %3445 = vrot.lane.b32.xlu2 %v3364_v23, %s4538_s23 }
 0x290   : >> { %v3615_v45 = vsel %vm3581_vm4, %v3572_v27, %v3480_v19  ;;  %v3540_v13 = vsel %vm2902_vm2, %v6415_v11, %v3207_v38  ;;  %v3388_v27 = vsel %vm2148_vm1, %v3385_v39, %v3387_v58  ;;  %v3410_v11 = vsel %vm2148_vm1, %v3407_v40, %v3409_v57 }
 0x291   : >> { %4313 = vmatmul.msk.f32.gmra.mxu3 %vm3640_vm5, %v3615_v45  ;;  %v3418_v51 = vpop.permute.xlu2 %3417  ;;  %v3156_v39 = vrot.slane %v6827_v4, 1  ;;  %v3345_v45 = vrot.slane %v6804_v22, 2  ;;  %v3365_v40 = vrot.slane %v6827_v4, 2 }
 0x293   : >> { %v3366_v48 = vsel %vm2148_vm1, %v3363_v56, %v3365_v40 }
 0x295   : >> { %3260 = vrot.lane.b32.xlu0 %v3179_v62, %s4539_s24  ;;  %3282 = vrot.lane.b32.xlu1 %v3201_v12, %s4539_s24 }
 0x297   : >> { %v3416_v6 = vpop.permute.xlu0 %3415  ;;  %v3436_v59 = vpop.permute.xlu1 %3435  ;;  %3469 = vrot.lane.b32.xlu2 %v3388_v27, %s4538_s23  ;;  %v3346_v27 = vsel %vm2148_vm1, %v3343_v3, %v3345_v45  ;;  %v3389_v3 = vrot.slane %v6849_v9, 2 }
 0x298   : >> { %v3583_v19 = vsel %vm3581_vm4, %v3540_v13, %v3416_v6  ;;  %v3593_v23 = vsel %vm3581_vm4, %v3550_v14, %v3436_v59  ;;  %v3157_v13 = vsel %vm1397_vm0, %v3154_v61, %v3156_v39  ;;  %v6853_v61 = vld [vmem:[%s6358_s22 + $0x148] sm:$0x3f] }
 0x299   : >> { %4281 = vmatmul.msk.f32.gmra.mxu0 %vm3640_vm5, %v3583_v19  ;;  %4291 = vmatmul.msk.f32.gmra.mxu1 %vm3640_vm5, %v3593_v23  ;;  %v3275_v38 = vpop.permute.xlu2 %3274 }
 0x29d   : >> { %3491 = vrot.lane.b32.xlu0 %v3410_v11, %s4538_s23  ;;  %3218 = vrot.lane.b32.xlu1 %v3137_v0, %s4539_s24 }
 0x29f   : >> { %v3273_v62 = vpop.permute.xlu0 %3272  ;;  %v3460_v12 = vpop.permute.xlu1 %3459  ;;  %3238 = vrot.lane.b32.xlu2 %v3157_v13, %s4539_s24  ;;  %v6869_v13 = vld [vmem:[%s6358_s22 + $0x48] sm:$0xff] }
 0x2a0   : >> { %v3573_v14 = vsel %vm2902_vm2, %v6442_v31, %v3273_v62  ;;  %v3605_v6 = vsel %vm3581_vm4, %v3562_v52, %v3460_v12  ;;  %v3180_v31 = vrot.slane %v6849_v9, 1  ;;  %v3390_v12 = vsel %vm2148_vm1, %v3387_v58, %v3389_v3 }
 0x2a1   : >> { %4303 = vmatmul.msk.f32.gmra.mxu2 %vm3640_vm5, %v3605_v6  ;;  %v3616_v59 = vsel %vm3581_vm4, %v3573_v14, %v3482_v21  ;;  %v3211_v19 = vpop.permute.xlu2 %3210  ;;  %v3202_v21 = vrot.slane %v6853_v61, 1  ;;  %v6872_v14 = vld [vmem:[%s6358_s22 + $0x98] sm:$0xff]  ;;  %v3411_v6 = vrot.slane %v6853_v61, 2  ;;  %s4159_s22 = smul.u32 88, %s4532_s20  ;;  %s3034_s20 = sadd.s32 1, %s4532_s20  }
 0x2a2   : >> { %4314 = vmatmul.msk.f32.gmra.mxu3 %vm3640_vm5, %v3616_v59  ;;  %v3181_v11 = vsel %vm1397_vm0, %v3178_v35, %v3180_v31  ;;  %v3158_v58 = vrot.slane %v6872_v14, 1  ;;  %p3031_p7 = scmp.ge.s32.totalorder %s3034_s20, 3  }
 0x2a3   : >> { %v3203_v62 = vsel %vm1397_vm0, %v3200_v25, %v3202_v21  ;;  %v3138_v25 = vrot.slane %v6869_v13, 1 }
 0x2a5   : >> { %3427 = vrot.lane.b32.xlu0 %v3346_v27, %s4538_s23  ;;  %3447 = vrot.lane.b32.xlu1 %v3366_v48, %s4538_s23  ;;  %v3412_v27 = vsel %vm2148_vm1, %v3409_v57, %v3411_v6  ;;  %v3367_v57 = vrot.slane %v6872_v14, 2 }
 0x2a7   : >> { %v3209_v56 = vpop.permute.xlu0 %3208  ;;  %v3229_v23 = vpop.permute.xlu1 %3228  ;;  %3262 = vrot.lane.b32.xlu2 %v3181_v11, %s4539_s24 }
 0x2a8   : >> { %v3541_v0 = vsel %vm2902_vm2, %v6457_v50, %v3209_v56  ;;  %v3551_v50 = vsel %vm2902_vm2, %v6468_v46, %v3229_v23  ;;  %v3139_v46 = vsel %vm1397_vm0, %v3136_v36, %v3138_v25  ;;  %v3159_v56 = vsel %vm1397_vm0, %v3156_v39, %v3158_v58 }
 0x2a9   : >> { %v3584_v52 = vsel %vm3581_vm4, %v3541_v0, %v3418_v51  ;;  %v3440_v35 = vpop.permute.xlu2 %3439  ;;  %v3347_v23 = vrot.slane %v6869_v13, 2 }
 0x2aa   : >> { %4282 = vmatmul.msk.f32.gmra.mxu0 %vm3640_vm5, %v3584_v52  ;;  %v3574_v52 = vsel %vm2902_vm2, %v6484_v20, %v3275_v38  ;;  %v3542_v38 = vsel %vm2902_vm2, %v6500_v60, %v3211_v19 }
 0x2ab   : >> { %v3348_v39 = vsel %vm2148_vm1, %v3345_v45, %v3347_v23 }
 0x2ad   : >> { %3284 = vrot.lane.b32.xlu0 %v3203_v62, %s4539_s24  ;;  %3471 = vrot.lane.b32.xlu1 %v3390_v12, %s4538_s23 }
 0x2af   : >> { %v3438_v51 = vpop.permute.xlu0 %3437  ;;  %v3253_v59 = vpop.permute.xlu1 %3252  ;;  %3493 = vrot.lane.b32.xlu2 %v3412_v27, %s4538_s23 }
 0x2b0   : >> { %v3594_v48 = vsel %vm3581_vm4, %v3551_v50, %v3438_v51  ;;  %v3563_v0 = vsel %vm2902_vm2, %v6480_v41, %v3253_v59  ;;  %v3368_v41 = vsel %vm2148_vm1, %v3365_v40, %v3367_v57  ;;  %v3183_v51 = vsel %vm1397_vm0, %v3180_v31, %v3182_v7 }
 0x2b1   : >> { %4292 = vmatmul.msk.f32.gmra.mxu1 %vm3640_vm5, %v3594_v48  ;;  %v3464_v11 = vpop.permute.xlu2 %3463  ;;  %v3392_v31 = vsel %vm2148_vm1, %v3389_v3, %v3391_v63  ;;  %v3141_v48 = vsel %vm1397_vm0, %v3138_v25, %v3140_v16  ;;  %v3161_v63 = vsel %vm1397_vm0, %v3158_v58, %v3160_v28  ;;  %v3370_v28 = vsel %vm2148_vm1, %v3367_v57, %v3369_v30 }
 0x2b5   : >> { %3220 = vrot.lane.b32.xlu0 %v3139_v46, %s4539_s24  ;;  %3240 = vrot.lane.b32.xlu1 %v3159_v56, %s4539_s24 }
 0x2b7   : >> { %v3462_v36 = vpop.permute.xlu0 %3461  ;;  %v3484_v62 = vpop.permute.xlu1 %3483  ;;  %3429 = vrot.lane.b32.xlu2 %v3348_v39, %s4538_s23 }
 0x2b8   : >> { %v3606_v12 = vsel %vm3581_vm4, %v3563_v0, %v3462_v36  ;;  %v3617_v50 = vsel %vm3581_vm4, %v3574_v52, %v3484_v62 }
 0x2b9   : >> { %4304 = vmatmul.msk.f32.gmra.mxu2 %vm3640_vm5, %v3606_v12  ;;  %4315 = vmatmul.msk.f32.gmra.mxu3 %vm3640_vm5, %v3617_v50  ;;  %v3233_v20 = vpop.permute.xlu2 %3232  ;;  %v6967_v12 = vld [vmem:[#allocation8] ss:$0 sm:$0xff] }
 0x2ba   : >> { %v3553_v25 = vsel %vm2902_vm2, %v6596_v24, %v3233_v20 }
 0x2bd   : >> { %3449 = vrot.lane.b32.xlu0 %v3368_v41, %s4538_s23  ;;  %3264 = vrot.lane.b32.xlu1 %v3183_v51, %s4539_s24 }
 0x2bf   : >> { %v3231_v45 = vpop.permute.xlu0 %3230  ;;  %v3420_v59 = vpop.permute.xlu1 %3419  ;;  %3286 = vrot.lane.b32.xlu2 %v3202_v21, %s4539_s24  ;;  %v3350_v21 = vsel %vm2148_vm1, %v3347_v23, %v3349_v44 }
 0x2c0   : >> { %v3552_v27 = vsel %vm2902_vm2, %v6503_v49, %v3231_v45  ;;  %v3585_v40 = vsel %vm3581_vm4, %v3542_v38, %v3420_v59 }
 0x2c1   : >> { %4283 = vmatmul.msk.f32.gmra.mxu0 %vm3640_vm5, %v3585_v40  ;;  %v3595_v7 = vsel %vm3581_vm4, %v3552_v27, %v3440_v35  ;;  %v3257_v60 = vpop.permute.xlu2 %3256 }
 0x2c2   : >> { %4293 = vmatmul.msk.f32.gmra.mxu1 %vm3640_vm5, %v3595_v7  ;;  %v3565_v23 = vsel %vm2902_vm2, %v6620_v5, %v3257_v60 }
 0x2c5   : >> { %3473 = vrot.lane.b32.xlu0 %v3392_v31, %s4538_s23  ;;  %3495 = vrot.lane.b32.xlu1 %v3411_v6, %s4538_s23 }
 0x2c7   : >> { %v3255_v49 = vpop.permute.xlu0 %3254  ;;  %v3277_v19 = vpop.permute.xlu1 %3276  ;;  %3222 = vrot.lane.b32.xlu2 %v3141_v48, %s4539_s24 }
 0x2c8   : >> { %v3564_v35 = vsel %vm2902_vm2, %v6527_v54, %v3255_v49  ;;  %v3575_v16 = vsel %vm2902_vm2, %v6556_v34, %v3277_v19 }
 0x2c9   : >> { %v3607_v43 = vsel %vm3581_vm4, %v3564_v35, %v3464_v11  ;;  %v3488_v3 = vpop.permute.xlu2 %3487 }
 0x2ca   : >> { %4305 = vmatmul.msk.f32.gmra.mxu2 %vm3640_vm5, %v3607_v43 }
 0x2cd   : >> { %3242 = vrot.lane.b32.xlu0 %v3161_v63, %s4539_s24  ;;  %3431 = vrot.lane.b32.xlu1 %v3350_v21, %s4538_s23  ;;  %s7103_s24 = scalar_lea.vmem %s4618_s19, %s4159_s22 }
 0x2cf   : >> { %v3486_v54 = vpop.permute.xlu0 %3485  ;;  %v3213_v6 = vpop.permute.xlu1 %3212  ;;  %3451 = vrot.lane.b32.xlu2 %v3370_v28, %s4538_s23 }
 0x2d0   : >> { %v3618_v33 = vsel %vm3581_vm4, %v3575_v16, %v3486_v54  ;;  %v3543_v34 = vsel %vm2902_vm2, %v6592_v17, %v3213_v6 }
 0x2d1   : >> { %4316 = vmatmul.msk.f32.gmra.mxu3 %vm3640_vm5, %v3618_v33  ;;  %v3424_v44 = vpop.permute.xlu2 %3423 }
 0x2d7   : >> { %v3422_v58 = vpop.permute.xlu0 %3421  ;;  %v3442_v46 = vpop.permute.xlu1 %3441 }
 0x2d8   : >> { %v3586_v56 = vsel %vm3581_vm4, %v3543_v34, %v3422_v58  ;;  %v3596_v15 = vsel %vm3581_vm4, %v3553_v25, %v3442_v46 }
 0x2d9   : >> { %4284 = vmatmul.msk.f32.gmra.mxu0 %vm3640_vm5, %v3586_v56  ;;  %4294 = vmatmul.msk.f32.gmra.mxu1 %vm3640_vm5, %v3596_v15  ;;  %v3281_v30 = vpop.permute.xlu2 %3280 }
 0x2df   : >> { %v3279_v11 = vpop.permute.xlu0 %3278  ;;  %v3466_v0 = vpop.permute.xlu1 %3465 }
 0x2e0   : >> { %v3576_v17 = vsel %vm2902_vm2, %v6623_v18, %v3279_v11  ;;  %v3608_v24 = vsel %vm3581_vm4, %v3565_v23, %v3466_v0 }
 0x2e1   : >> { %4306 = vmatmul.msk.f32.gmra.mxu2 %vm3640_vm5, %v3608_v24  ;;  %v3619_v57 = vsel %vm3581_vm4, %v3576_v17, %v3488_v3  ;;  %v3217_v52 = vpop.permute.xlu2 %3216 }
 0x2e2   : >> { %4317 = vmatmul.msk.f32.gmra.mxu3 %vm3640_vm5, %v3619_v57  ;;  %v3545_v21 = vsel %vm2902_vm2, %v6692_v26, %v3217_v52 }
 0x2e7   : >> { %v3215_v36 = vpop.permute.xlu0 %3214  ;;  %v3235_v62 = vpop.permute.xlu1 %3234 }
 0x2e8   : >> { %v3544_v39 = vsel %vm2902_vm2, %v6641_v47, %v3215_v36  ;;  %v3554_v50 = vsel %vm2902_vm2, %v6658_v2, %v3235_v62  ;;  %v3577_v2 = vsel %vm2902_vm2, %v6674_v37, %v3281_v30 }
 0x2e9   : >> { %v3587_v5 = vsel %vm3581_vm4, %v3544_v39, %v3424_v44  ;;  %v3446_v18 = vpop.permute.xlu2 %3445 }
 0x2ea   : >> { %4285 = vmatmul.msk.f32.gmra.mxu0 %vm3640_vm5, %v3587_v5 }
 0x2ed   : >> { %v3844_v41 = vpop.f32.mrf.mxu2 }
 0x2ee   : >> { %v3845_v51 = vadd.f32 %v6967_v12, %v3844_v41 }
 0x2ef   : >> { %v3444_v20 = vpop.permute.xlu0 %3443  ;;  %v3259_v38 = vpop.permute.xlu1 %3258 }
 0x2f0   : >> { %v3930_v45 = vmax.f32 %v3845_v51, 0.0  ;;  %v3597_v59 = vsel %vm3581_vm4, %v3554_v50, %v3444_v20  ;;  %v3566_v47 = vsel %vm2902_vm2, %v6670_v10, %v3259_v38 }
 0x2f1   : >> { %4295 = vmatmul.msk.f32.gmra.mxu1 %vm3640_vm5, %v3597_v59  ;;  %v3470_v7 = vpop.permute.xlu2 %3469 }
 0x2f2   : >> { %3972 = vst.msk [vmem:[#allocation3 + $0xa0] sm:$0xff] %vm3581_vm4, %v3930_v45 }
 0x2f5   : >> { %v3877_v27 = vpop.f32.mrf.mxu3 }
 0x2f6   : >> { %v3878_v40 = vadd.f32 %v6967_v12, %v3877_v27 }
 0x2f7   : >> { %v3468_v31 = vpop.permute.xlu0 %3467  ;;  %v3490_v60 = vpop.permute.xlu1 %3489 }
 0x2f8   : >> { %v3941_v49 = vmax.f32 %v3878_v40, 0.0  ;;  %v3609_v19 = vsel %vm3581_vm4, %v3566_v47, %v3468_v31  ;;  %v3620_v48 = vsel %vm3581_vm4, %v3577_v2, %v3490_v60 }
 0x2f9   : >> { %4307 = vmatmul.msk.f32.gmra.mxu2 %vm3640_vm5, %v3609_v19  ;;  %4318 = vmatmul.msk.f32.gmra.mxu3 %vm3640_vm5, %v3620_v48  ;;  %v3239_v46 = vpop.permute.xlu2 %3238 }
 0x2fa   : >> { %3983 = vst.msk [vmem:[#allocation3 + $0xf8] sm:$0xff] %vm3581_vm4, %v3941_v49  ;;  %v3556_v41 = vsel %vm2902_vm2, %v6763_v8, %v3239_v46 }
 0x2fc   : >> { %v3847_v10 = vpop.f32.mrf.mxu2 }
 0x2fd   : >> { %v3848_v35 = vadd.f32 %v6967_v12, %v3847_v10  ;;  %v3880_v43 = vpop.f32.mrf.mxu3 }
 0x2fe   : >> { %v3881_v63 = vadd.f32 %v6967_v12, %v3880_v43  ;;  %v3784_v37 = vpop.f32.mrf.mxu0 }
 0x2ff   : >> { %v3931_v3 = vmax.f32 %v3848_v35, 0.0  ;;  %v3785_v16 = vadd.f32 %v6967_v12, %v3784_v37  ;;  %v3237_v54 = vpop.permute.xlu0 %3236  ;;  %v3426_v6 = vpop.permute.xlu1 %3425 }
 0x300   : >> { %v3942_v28 = vmax.f32 %v3881_v63, 0.0  ;;  %v3555_v33 = vsel %vm2902_vm2, %v6695_v29, %v3237_v54  ;;  %v3814_v44 = vpop.f32.mrf.mxu1  ;;  %v3588_v34 = vsel %vm3581_vm4, %v3545_v21, %v3426_v6 }
 0x301   : >> { %3973 = vst.msk [vmem:[#allocation3 + $0xa8] sm:$0xff] %vm3581_vm4, %v3931_v3  ;;  %v3910_v25 = vmax.f32 %v3785_v16, 0.0  ;;  %v3815_v58 = vadd.f32 %v6967_v12, %v3814_v44  ;;  %4286 = vmatmul.msk.f32.gmra.mxu0 %vm3640_vm5, %v3588_v34  ;;  %v3598_v26 = vsel %vm3581_vm4, %v3555_v33, %v3446_v18  ;;  %v3263_v11 = vpop.permute.xlu2 %3262 }
 0x302   : >> { %3984 = vst.msk [vmem:[#allocation3 + $0x100] sm:$0xff] %vm3581_vm4, %v3942_v28  ;;  %4296 = vmatmul.msk.f32.gmra.mxu1 %vm3640_vm5, %v3598_v26  ;;  %v3568_v8 = vsel %vm2902_vm2, %v6783_v42, %v3263_v11 }
 0x303   : >> { %3952 = vst.msk [vmem:[#allocation3] sm:$0xff] %vm3581_vm4, %v3910_v25  ;;  %v3920_v29 = vmax.f32 %v3815_v58, 0.0 }
 0x305   : >> { %3962 = vst.msk [vmem:[#allocation3 + $0x50] sm:$0xff] %vm3581_vm4, %v3920_v29 }
 0x307   : >> { %v3261_v56 = vpop.permute.xlu0 %3260  ;;  %v3283_v15 = vpop.permute.xlu1 %3282 }
 0x308   : >> { %v3567_v30 = vsel %vm2902_vm2, %v6713_v1, %v3261_v56  ;;  %v3578_v0 = vsel %vm2902_vm2, %v6735_v32, %v3283_v15 }
 0x309   : >> { %v3610_v23 = vsel %vm3581_vm4, %v3567_v30, %v3470_v7  ;;  %v3494_v18 = vpop.permute.xlu2 %3493 }
 0x30a   : >> { %4308 = vmatmul.msk.f32.gmra.mxu2 %vm3640_vm5, %v3610_v23 }
 0x30d   : >> { %v3850_v17 = vpop.f32.mrf.mxu2 }
 0x30e   : >> { %v3851_v24 = vadd.f32 %v6967_v12, %v3850_v17 }
 0x30f   : >> { %v3492_v57 = vpop.permute.xlu0 %3491  ;;  %v3219_v52 = vpop.permute.xlu1 %3218 }
 0x310   : >> { %v3932_v36 = vmax.f32 %v3851_v24, 0.0  ;;  %v3621_v62 = vsel %vm3581_vm4, %v3578_v0, %v3492_v57  ;;  %v3546_v39 = vsel %vm2902_vm2, %v6759_v53, %v3219_v52 }
 0x311   : >> { %4319 = vmatmul.msk.f32.gmra.mxu3 %vm3640_vm5, %v3621_v62  ;;  %v3430_v49 = vpop.permute.xlu2 %3429 }
 0x312   : >> { %3974 = vst.msk [vmem:[#allocation3 + $0xb0] sm:$0xff] %vm3581_vm4, %v3932_v36 }
 0x314   : >> { %v3883_v1 = vpop.f32.mrf.mxu3 }
 0x315   : >> { %v3884_v5 = vadd.f32 %v6967_v12, %v3883_v1 }
 0x316   : >> { %v3787_v32 = vpop.f32.mrf.mxu0  ;;  %v3817_v50 = vpop.f32.mrf.mxu1 }
 0x317   : >> { %v3943_v51 = vmax.f32 %v3884_v5, 0.0  ;;  %v3788_v20 = vadd.f32 %v6967_v12, %v3787_v32  ;;  %v3818_v38 = vadd.f32 %v6967_v12, %v3817_v50  ;;  %v3428_v45 = vpop.permute.xlu0 %3427  ;;  %v3448_v59 = vpop.permute.xlu1 %3447 }
 0x318   : >> { %v3589_v47 = vsel %vm3581_vm4, %v3546_v39, %v3428_v45  ;;  %v3599_v27 = vsel %vm3581_vm4, %v3556_v41, %v3448_v59 }
 0x319   : >> { %3985 = vst.msk [vmem:[#allocation3 + $0x108] sm:$0xff] %vm3581_vm4, %v3943_v51  ;;  %v3911_v53 = vmax.f32 %v3788_v20, 0.0  ;;  %v3921_v40 = vmax.f32 %v3818_v38, 0.0  ;;  %4287 = vmatmul.msk.f32.gmra.mxu0 %vm3640_vm5, %v3589_v47  ;;  %4297 = vmatmul.msk.f32.gmra.mxu1 %vm3640_vm5, %v3599_v27  ;;  %v3287_v6 = vpop.permute.xlu2 %3286 }
 0x31a   : >> { %v3580_v30 = vsel %vm2902_vm2, %v6853_v61, %v3287_v6 }
 0x31b   : >> { %3953 = vst.msk [vmem:[#allocation3 + $0x8] sm:$0xff] %vm3581_vm4, %v3911_v53 }
 0x31c   : >> { %3963 = vst.msk [vmem:[#allocation3 + $0x58] sm:$0xff] %vm3581_vm4, %v3921_v40 }
 0x31f   : >> { %v3285_v7 = vpop.permute.xlu0 %3284  ;;  %v3472_v2 = vpop.permute.xlu1 %3471 }
 0x320   : >> { %v3579_v31 = vsel %vm2902_vm2, %v6786_v55, %v3285_v7  ;;  %v3611_v60 = vsel %vm3581_vm4, %v3568_v8, %v3472_v2 }
 0x321   : >> { %4309 = vmatmul.msk.f32.gmra.mxu2 %vm3640_vm5, %v3611_v60  ;;  %v3622_v19 = vsel %vm3581_vm4, %v3579_v31, %v3494_v18 }
 0x322   : >> { %4320 = vmatmul.msk.f32.gmra.mxu3 %vm3640_vm5, %v3622_v19 }
 0x324   : >> { %v3853_v48 = vpop.f32.mrf.mxu2 }
 0x325   : >> { %v3854_v10 = vadd.f32 %v6967_v12, %v3853_v48  ;;  %v3886_v35 = vpop.f32.mrf.mxu3 }
 0x326   : >> { %v3887_v42 = vadd.f32 %v6967_v12, %v3886_v35 }
 0x327   : >> { %v3933_v43 = vmax.f32 %v3854_v10, 0.0  ;;  %v3221_v63 = vpop.permute.xlu0 %3220  ;;  %v3241_v37 = vpop.permute.xlu1 %3240 }
 0x328   : >> { %v3944_v21 = vmax.f32 %v3887_v42, 0.0  ;;  %v3547_v55 = vsel %vm2902_vm2, %v6804_v22, %v3221_v63  ;;  %v3790_v3 = vpop.f32.mrf.mxu0  ;;  %v3557_v33 = vsel %vm2902_vm2, %v6827_v4, %v3241_v37  ;;  %v3223_v4 = vpop.permute.xlu2 %3222 }
 0x329   : >> { %3975 = vst.msk [vmem:[#allocation3 + $0xb8] sm:$0xff] %vm3581_vm4, %v3933_v43  ;;  %v3791_v16 = vadd.f32 %v6967_v12, %v3790_v3  ;;  %v3590_v54 = vsel %vm3581_vm4, %v3547_v55, %v3430_v49  ;;  %v3548_v61 = vsel %vm2902_vm2, %v6869_v13, %v3223_v4 }
 0x32a   : >> { %3986 = vst.msk [vmem:[#allocation3 + $0x110] sm:$0xff] %vm3581_vm4, %v3944_v21  ;;  %4288 = vmatmul.msk.f32.gmra.mxu0 %vm3640_vm5, %v3590_v54 }
 0x32b   : >> { %v3912_v28 = vmax.f32 %v3791_v16, 0.0 }
 0x32d   : >> { %3954 = vst.msk [vmem:[#allocation3 + $0x10] sm:$0xff] %vm3581_vm4, %v3912_v28 }
 0x32e   : >> { %v3820_v44 = vpop.f32.mrf.mxu1 }
 0x32f   : >> { %v3821_v22 = vadd.f32 %v6967_v12, %v3820_v44  ;;  %v3450_v34 = vpop.permute.xlu0 %3449  ;;  %v3265_v25 = vpop.permute.xlu1 %3264 }
 0x330   : >> { %v3600_v58 = vsel %vm3581_vm4, %v3557_v33, %v3450_v34  ;;  %v4049_v26 = vld [vmem:[#allocation3 + $0xa2] ss:$4 sm:$0xff]  ;;  %v4071_v46 = vld [vmem:[#allocation3 + $0xa3] ss:$4 sm:$0xff]  ;;  %v3569_v15 = vsel %vm2902_vm2, %v6849_v9, %v3265_v25  ;;  %v3452_v62 = vpop.permute.xlu2 %3451 }
 0x331   : >> { %v3922_v29 = vmax.f32 %v3821_v22, 0.0  ;;  %4298 = vmatmul.msk.f32.gmra.mxu1 %vm3640_vm5, %v3600_v58  ;;  %v4098_v56 = vmax.f32 %v4049_v26, %v4071_v46 }
 0x333   : >> { %3964 = vst.msk [vmem:[#allocation3 + $0x60] sm:$0xff] %vm3581_vm4, %v3922_v29  ;;  %4125 = vrot.lane.b32.xlu2 %v4098_v56, %s4538_s23 }
 0x337   : >> { %v3474_v23 = vpop.permute.xlu0 %3473  ;;  %v3496_v11 = vpop.permute.xlu1 %3495 }
 0x338   : >> { %v3612_v0 = vsel %vm3581_vm4, %v3569_v15, %v3474_v23  ;;  %v3623_v17 = vsel %vm3581_vm4, %v3580_v30, %v3496_v11 }
 0x339   : >> { %4310 = vmatmul.msk.f32.gmra.mxu2 %vm3640_vm5, %v3612_v0  ;;  %4321 = vmatmul.msk.f32.gmra.mxu3 %vm3640_vm5, %v3623_v17 }
 0x33c   : >> { %v3856_v24 = vpop.f32.mrf.mxu2  ;;  %v3889_v57 = vpop.f32.mrf.mxu3 }
 0x33d   : >> { %v3857_v52 = vadd.f32 %v6967_v12, %v3856_v24  ;;  %v3890_v36 = vadd.f32 %v6967_v12, %v3889_v57  ;;  %v4005_v57 = vld [vmem:[#allocation3 + $0xa0] ss:$4 sm:$0xff] }
 0x33e   : >> { %v3793_v9 = vpop.f32.mrf.mxu0 }
 0x33f   : >> { %v3934_v1 = vmax.f32 %v3857_v52, 0.0  ;;  %v3945_v39 = vmax.f32 %v3890_v36, 0.0  ;;  %v3794_v5 = vadd.f32 %v6967_v12, %v3793_v9  ;;  %v3243_v18 = vpop.permute.xlu0 %3242  ;;  %v3432_v32 = vpop.permute.xlu1 %3431  ;;  %v4027_v52 = vld [vmem:[#allocation3 + $0xa1] ss:$4 sm:$0xff] }
 0x340   : >> { %v3558_v50 = vsel %vm2902_vm2, %v6872_v14, %v3243_v18  ;;  %v3823_v41 = vpop.f32.mrf.mxu1  ;;  %v3591_v51 = vsel %vm3581_vm4, %v3548_v61, %v3432_v32  ;;  %v4087_v36 = vmax.f32 %v4005_v57, %v4027_v52 }
 0x341   : >> { %3976 = vst.msk [vmem:[#allocation3 + $0xc0] sm:$0xff] %vm3581_vm4, %v3934_v1  ;;  %v3913_v20 = vmax.f32 %v3794_v5, 0.0  ;;  %v3824_v38 = vadd.f32 %v6967_v12, %v3823_v41  ;;  %4289 = vmatmul.msk.f32.gmra.mxu0 %vm3640_vm5, %v3591_v51  ;;  %v3601_v13 = vsel %vm3581_vm4, %v3558_v50, %v3452_v62 }
 0x342   : >> { %3987 = vst.msk [vmem:[#allocation3 + $0x118] sm:$0xff] %vm3581_vm4, %v3945_v39  ;;  %4299 = vmatmul.msk.f32.gmra.mxu1 %vm3640_vm5, %v3601_v13 }
 0x343   : >> { %3955 = vst.msk [vmem:[#allocation3 + $0x18] sm:$0xff] %vm3581_vm4, %v3913_v20  ;;  %v3923_v45 = vmax.f32 %v3824_v38, 0.0 }
 0x345   : >> { %3965 = vst.msk [vmem:[#allocation3 + $0x68] sm:$0xff] %vm3581_vm4, %v3923_v45 }
 0x34a   : >> { %v4039_v14 = vld [vmem:[#allocation3 + $0x2] ss:$4 sm:$0xff]  ;;  %v4061_v59 = vld [vmem:[#allocation3 + $0x3] ss:$4 sm:$0xff] }
 0x34b   : >> { %v4093_v47 = vmax.f32 %v4039_v14, %v4061_v59 }
 0x34d   : >> { %4115 = vrot.lane.b32.xlu0 %v4093_v47, %s4538_s23  ;;  %v3859_v27 = vpop.f32.mrf.mxu2 }
 0x34e   : >> { %v3860_v53 = vadd.f32 %v6967_v12, %v3859_v27 }
 0x350   : >> { %v3935_v40 = vmax.f32 %v3860_v53, 0.0 }
 0x352   : >> { %3977 = vst.msk [vmem:[#allocation3 + $0xc8] sm:$0xff] %vm3581_vm4, %v3935_v40 }
 0x354   : >> { %v3892_v8 = vpop.f32.mrf.mxu3 }
 0x355   : >> { %v3893_v7 = vadd.f32 %v6967_v12, %v3892_v8 }
 0x356   : >> { %v3796_v2 = vpop.f32.mrf.mxu0  ;;  %v3826_v31 = vpop.f32.mrf.mxu1 }
 0x357   : >> { %v3946_v60 = vmax.f32 %v3893_v7, 0.0  ;;  %v3797_v49 = vadd.f32 %v6967_v12, %v3796_v2  ;;  %v3827_v19 = vadd.f32 %v6967_v12, %v3826_v31 }
 0x359   : >> { %3988 = vst.msk [vmem:[#allocation3 + $0x120] sm:$0xff] %vm3581_vm4, %v3946_v60  ;;  %v3914_v48 = vmax.f32 %v3797_v49, 0.0  ;;  %v3924_v10 = vmax.f32 %v3827_v19, 0.0 }
 0x35b   : >> { %3956 = vst.msk [vmem:[#allocation3 + $0x20] sm:$0xff] %vm3581_vm4, %v3914_v48 }
 0x35c   : >> { %3966 = vst.msk [vmem:[#allocation3 + $0x70] sm:$0xff] %vm3581_vm4, %v3924_v10 }
 0x364   : >> { %v3862_v35 = vpop.f32.mrf.mxu2 }
 0x365   : >> { %v3863_v42 = vadd.f32 %v6967_v12, %v3862_v35  ;;  %v3895_v43 = vpop.f32.mrf.mxu3 }
 0x366   : >> { %v3896_v63 = vadd.f32 %v6967_v12, %v3895_v43  ;;  %v3995_v43 = vld [vmem:[#allocation3] ss:$4 sm:$0xff] }
 0x367   : >> { %v3936_v37 = vmax.f32 %v3863_v42, 0.0  ;;  %v3799_v21 = vpop.f32.mrf.mxu0 }
 0x368   : >> { %v3947_v55 = vmax.f32 %v3896_v63, 0.0  ;;  %v3800_v3 = vadd.f32 %v6967_v12, %v3799_v21  ;;  %v4017_v63 = vld [vmem:[#allocation3 + $0x1] ss:$4 sm:$0xff] }
 0x369   : >> { %3978 = vst.msk [vmem:[#allocation3 + $0xd0] sm:$0xff] %vm3581_vm4, %v3936_v37 }
 0x36a   : >> { %3989 = vst.msk [vmem:[#allocation3 + $0x128] sm:$0xff] %vm3581_vm4, %v3947_v55  ;;  %v3915_v16 = vmax.f32 %v3800_v3, 0.0 }
 0x36c   : >> { %3957 = vst.msk [vmem:[#allocation3 + $0x28] sm:$0xff] %vm3581_vm4, %v3915_v16 }
 0x36e   : >> { %v3829_v54 = vpop.f32.mrf.mxu1 }
 0x36f   : >> { %v3830_v6 = vadd.f32 %v6967_v12, %v3829_v54  ;;  %v4082_v54 = vmax.f32 %v3995_v43, %v4017_v63 }
 0x371   : >> { %v3925_v28 = vmax.f32 %v3830_v6, 0.0 }
 0x373   : >> { %3967 = vst.msk [vmem:[#allocation3 + $0x78] sm:$0xff] %vm3581_vm4, %v3925_v28 }
 0x37a   : >> { %v4045_v33 = vld [vmem:[#allocation3 + $0x62] ss:$4 sm:$0xff]  ;;  %v4067_v44 = vld [vmem:[#allocation3 + $0x63] ss:$4 sm:$0xff] }
 0x37b   : >> { %v4096_v22 = vmax.f32 %v4045_v33, %v4067_v44 }
 0x37c   : >> { %v3865_v34 = vpop.f32.mrf.mxu2  ;;  %v3898_v25 = vpop.f32.mrf.mxu3 }
 0x37d   : >> { %v3866_v58 = vadd.f32 %v6967_v12, %v3865_v34  ;;  %v3899_v26 = vadd.f32 %v6967_v12, %v3898_v25  ;;  %4121 = vrot.lane.b32.xlu0 %v4096_v22, %s4538_s23 }
 0x37e   : >> { %v3802_v46 = vpop.f32.mrf.mxu0 }
 0x37f   : >> { %v3937_v29 = vmax.f32 %v3866_v58, 0.0  ;;  %v3948_v56 = vmax.f32 %v3899_v26, 0.0  ;;  %v3803_v4 = vadd.f32 %v6967_v12, %v3802_v46  ;;  %v3832_v15 = vpop.f32.mrf.mxu1 }
 0x380   : >> { %v3833_v30 = vadd.f32 %v6967_v12, %v3832_v15 }
 0x381   : >> { %3979 = vst.msk [vmem:[#allocation3 + $0xd8] sm:$0xff] %vm3581_vm4, %v3937_v29  ;;  %v3916_v23 = vmax.f32 %v3803_v4, 0.0 }
 0x382   : >> { %3990 = vst.msk [vmem:[#allocation3 + $0x130] sm:$0xff] %vm3581_vm4, %v3948_v56  ;;  %v3926_v11 = vmax.f32 %v3833_v30, 0.0  ;;  %v4055_v30 = vld [vmem:[#allocation3 + $0x102] ss:$4 sm:$0xff] }
 0x383   : >> { %3958 = vst.msk [vmem:[#allocation3 + $0x30] sm:$0xff] %vm3581_vm4, %v3916_v23  ;;  %v4077_v23 = vld [vmem:[#allocation3 + $0x103] ss:$4 sm:$0xff] }
 0x384   : >> { %3968 = vst.msk [vmem:[#allocation3 + $0x80] sm:$0xff] %vm3581_vm4, %v3926_v11 }
 0x388   : >> { %v4051_v0 = vld [vmem:[#allocation3 + $0xc2] ss:$4 sm:$0xff]  ;;  %v4073_v17 = vld [vmem:[#allocation3 + $0xc3] ss:$4 sm:$0xff] }
 0x389   : >> { %v4099_v24 = vmax.f32 %v4051_v0, %v4073_v17  ;;  %v4101_v17 = vmax.f32 %v4055_v30, %v4077_v23 }
 0x38b   : >> { %4127 = vrot.lane.b32.xlu0 %v4099_v24, %s4538_s23 }
 0x38d   : >> { %v3868_v9 = vpop.f32.mrf.mxu2  ;;  %v4126_v62 = vpop.permute.xlu2 %4125 }
 0x38e   : >> { %v3869_v61 = vadd.f32 %v6967_v12, %v3868_v9  ;;  %v4153_v1 = vsel %vm3581_vm4, %v4087_v36, %v4126_v62  ;;  %v4001_v9 = vld [vmem:[#allocation3 + $0x60] ss:$4 sm:$0xff]  ;;  %v4023_v62 = vld [vmem:[#allocation3 + $0x61] ss:$4 sm:$0xff] }
 0x38f   : >> { %4166 = vst [vmem:[%s7103_s24 + $0x28] sm:$0xff] %v4153_v1 }
 0x390   : >> { %v3938_v39 = vmax.f32 %v3869_v61, 0.0  ;;  %v4085_v61 = vmax.f32 %v4001_v9, %v4023_v62 }
 0x392   : >> { %3980 = vst.msk [vmem:[#allocation3 + $0xe0] sm:$0xff] %vm3581_vm4, %v3938_v39 }
 0x394   : >> { %v3901_v5 = vpop.f32.mrf.mxu3 }
 0x395   : >> { %v3902_v18 = vadd.f32 %v6967_v12, %v3901_v5  ;;  %v4007_v5 = vld [vmem:[#allocation3 + $0xc0] ss:$4 sm:$0xff] }
 0x396   : >> { %v3805_v32 = vpop.f32.mrf.mxu0  ;;  %v3835_v50 = vpop.f32.mrf.mxu1 }
 0x397   : >> { %v3949_v41 = vmax.f32 %v3902_v18, 0.0  ;;  %v3806_v51 = vadd.f32 %v6967_v12, %v3805_v32  ;;  %v3836_v20 = vadd.f32 %v6967_v12, %v3835_v50  ;;  %v4029_v18 = vld [vmem:[#allocation3 + $0xc1] ss:$4 sm:$0xff] }
 0x398   : >> { %v4088_v32 = vmax.f32 %v4007_v5, %v4029_v18 }
 0x399   : >> { %3991 = vst.msk [vmem:[#allocation3 + $0x138] sm:$0xff] %vm3581_vm4, %v3949_v41  ;;  %v3917_v38 = vmax.f32 %v3806_v51, 0.0  ;;  %v3927_v13 = vmax.f32 %v3836_v20, 0.0 }
 0x39b   : >> { %3959 = vst.msk [vmem:[#allocation3 + $0x38] sm:$0xff] %vm3581_vm4, %v3917_v38 }
 0x39c   : >> { %3969 = vst.msk [vmem:[#allocation3 + $0x88] sm:$0xff] %vm3581_vm4, %v3927_v13 }
 0x3a0   : >> { %v4057_v45 = vld [vmem:[#allocation3 + $0x122] ss:$4 sm:$0xff]  ;;  %v4079_v14 = vld [vmem:[#allocation3 + $0x123] ss:$4 sm:$0xff]  ;;  %v4013_v51 = vld [vmem:[#allocation3 + $0x120] ss:$4 sm:$0xff] }
 0x3a1   : >> { %v4102_v59 = vmax.f32 %v4057_v45, %v4079_v14  ;;  %v4035_v20 = vld [vmem:[#allocation3 + $0x121] ss:$4 sm:$0xff] }
 0x3a2   : >> { %v4041_v47 = vld [vmem:[#allocation3 + $0x22] ss:$4 sm:$0xff]  ;;  %v4063_v27 = vld [vmem:[#allocation3 + $0x23] ss:$4 sm:$0xff]  ;;  %v3997_v38 = vld [vmem:[#allocation3 + $0x20] ss:$4 sm:$0xff]  ;;  %v4091_v45 = vmax.f32 %v4013_v51, %v4035_v20 }
 0x3a3   : >> { %4133 = vrot.lane.b32.xlu0 %v4102_v59, %s4538_s23  ;;  %v4094_v53 = vmax.f32 %v4041_v47, %v4063_v27  ;;  %v4019_v13 = vld [vmem:[#allocation3 + $0x21] ss:$4 sm:$0xff] }
 0x3a4   : >> { %v3871_v40 = vpop.f32.mrf.mxu2  ;;  %v4083_v47 = vmax.f32 %v3997_v38, %v4019_v13 }
 0x3a5   : >> { %v3872_v8 = vadd.f32 %v6967_v12, %v3871_v40  ;;  %4117 = vrot.lane.b32.xlu1 %v4094_v53, %s4538_s23  ;;  %v3904_v7 = vpop.f32.mrf.mxu3 }
 0x3a6   : >> { %v3905_v2 = vadd.f32 %v6967_v12, %v3904_v7 }
 0x3a7   : >> { %v3939_v31 = vmax.f32 %v3872_v8, 0.0  ;;  %v3808_v60 = vpop.f32.mrf.mxu0 }
 0x3a8   : >> { %v3950_v49 = vmax.f32 %v3905_v2, 0.0  ;;  %v3809_v19 = vadd.f32 %v6967_v12, %v3808_v60  ;;  %v4011_v60 = vld [vmem:[#allocation3 + $0x100] ss:$4 sm:$0xff] }
 0x3a9   : >> { %3981 = vst.msk [vmem:[#allocation3 + $0xe8] sm:$0xff] %vm3581_vm4, %v3939_v31 }
 0x3aa   : >> { %3992 = vst.msk [vmem:[#allocation3 + $0x140] sm:$0xff] %vm3581_vm4, %v3950_v49  ;;  %v3918_v48 = vmax.f32 %v3809_v19, 0.0  ;;  %v4033_v49 = vld [vmem:[#allocation3 + $0x101] ss:$4 sm:$0xff] }
 0x3ab   : >> { %v4090_v19 = vmax.f32 %v4011_v60, %v4033_v49 }
 0x3ac   : >> { %3960 = vst.msk [vmem:[#allocation3 + $0x40] sm:$0xff] %vm3581_vm4, %v3918_v48 }
 0x3ae   : >> { %v3838_v10 = vpop.f32.mrf.mxu1 }
 0x3af   : >> { %v3839_v35 = vadd.f32 %v6967_v12, %v3838_v10 }
 0x3b1   : >> { %v3928_v42 = vmax.f32 %v3839_v35, 0.0 }
 0x3b3   : >> { %3970 = vst.msk [vmem:[#allocation3 + $0x90] sm:$0xff] %vm3581_vm4, %v3928_v42 }
 0x3bc   : >> { %v3874_v37 = vpop.f32.mrf.mxu2  ;;  %v3907_v21 = vpop.f32.mrf.mxu3 }
 0x3bd   : >> { %v3875_v55 = vadd.f32 %v6967_v12, %v3874_v37  ;;  %v3908_v3 = vadd.f32 %v6967_v12, %v3907_v21 }
 0x3be   : >> { %v3811_v16 = vpop.f32.mrf.mxu0 }
 0x3bf   : >> { %v3940_v6 = vmax.f32 %v3875_v55, 0.0  ;;  %v3951_v28 = vmax.f32 %v3908_v3, 0.0  ;;  %v3812_v33 = vadd.f32 %v6967_v12, %v3811_v16  ;;  %v4116_v44 = vpop.permute.xlu0 %4115  ;;  %v3841_v22 = vpop.f32.mrf.mxu1 }
 0x3c0   : >> { %v3842_v34 = vadd.f32 %v6967_v12, %v3841_v22  ;;  %v4148_v58 = vsel %vm3581_vm4, %v4082_v54, %v4116_v44 }
 0x3c1   : >> { %3982 = vst.msk [vmem:[#allocation3 + $0xf0] sm:$0xff] %vm3581_vm4, %v3940_v6  ;;  %v3919_v25 = vmax.f32 %v3812_v33, 0.0 }
 0x3c2   : >> { %3994 = vst.msk [vmem:[#allocation3 + $0x148] sm:$0xf] %vm3993_vm6, %v3951_v28  ;;  %v3929_v26 = vmax.f32 %v3842_v34, 0.0 }
 0x3c3   : >> { %3961 = vst.msk [vmem:[#allocation3 + $0x48] sm:$0xff] %vm3581_vm4, %v3919_v25 }
 0x3c4   : >> { %4161 = vst [vmem:[%s7103_s24] sm:$0xff] %v4148_v58 }
 0x3c5   : >> { %3971 = vst.msk [vmem:[#allocation3 + $0x98] sm:$0xff] %vm3581_vm4, %v3929_v26 }
 0x3c8   : >> { %v4053_v11 = vld [vmem:[#allocation3 + $0xe2] ss:$4 sm:$0xff]  ;;  %v4075_v0 = vld [vmem:[#allocation3 + $0xe3] ss:$4 sm:$0xff]  ;;  %v4009_v21 = vld [vmem:[#allocation3 + $0xe0] ss:$4 sm:$0xff] }
 0x3c9   : >> { %v4100_v24 = vmax.f32 %v4053_v11, %v4075_v0  ;;  %v4059_v57 = vld [vmem:[#allocation3 + $0x142] ss:$4 sm:$0x7]  ;;  %v4081_v52 = vld [vmem:[#allocation3 + $0x143] ss:$4 sm:$0x7] }
 0x3ca   : >> { %v4043_v46 = vld [vmem:[#allocation3 + $0x42] ss:$4 sm:$0xff]  ;;  %v4065_v29 = vld [vmem:[#allocation3 + $0x43] ss:$4 sm:$0xff]  ;;  %v4103_v36 = vmax.f32 %v4059_v57, %v4081_v52  ;;  %v3999_v40 = vld [vmem:[#allocation3 + $0x40] ss:$4 sm:$0xff] }
 0x3cb   : >> { %v4095_v56 = vmax.f32 %v4043_v46, %v4065_v29  ;;  %v4021_v8 = vld [vmem:[#allocation3 + $0x41] ss:$4 sm:$0xff]  ;;  %v4015_v6 = vld [vmem:[#allocation3 + $0x140] ss:$4 sm:$0x7] }
 0x3cc   : >> { %v4047_v4 = vld [vmem:[#allocation3 + $0x82] ss:$4 sm:$0xff]  ;;  %v4069_v15 = vld [vmem:[#allocation3 + $0x83] ss:$4 sm:$0xff]  ;;  %v4084_v7 = vmax.f32 %v3999_v40, %v4021_v8  ;;  %v4003_v35 = vld [vmem:[#allocation3 + $0x80] ss:$4 sm:$0xff] }
 0x3cd   : >> { %4119 = vrot.lane.b32.xlu2 %v4095_v56, %s4538_s23  ;;  %v4097_v12 = vmax.f32 %v4047_v4, %v4069_v15  ;;  %v4025_v42 = vld [vmem:[#allocation3 + $0x81] ss:$4 sm:$0xff] }
 0x3ce   : >> { %v4086_v43 = vmax.f32 %v4003_v35, %v4025_v42  ;;  %v4031_v55 = vld [vmem:[#allocation3 + $0xe1] ss:$4 sm:$0xff] }
 0x3cf   : >> { %4123 = vrot.lane.b32.xlu1 %v4097_v12, %s4538_s23  ;;  %v4089_v3 = vmax.f32 %v4009_v21, %v4031_v55  ;;  %v4037_v28 = vld [vmem:[#allocation3 + $0x141] ss:$4 sm:$0x7] }
 0x3d0   : >> { %v4092_v33 = vmax.f32 %v4015_v6, %v4037_v28 }
 0x3d5   : >> { %4131 = vrot.lane.b32.xlu2 %v4101_v17, %s4538_s23 }
 0x3d7   : >> { %4129 = vrot.lane.b32.xlu1 %v4100_v24, %s4538_s23 }
 0x3df   : >> { %4135 = vrot.lane.b32.xlu1 %v4103_v36, %s4538_s23 }
 0x3ef   : >> { %v4122_v1 = vpop.permute.xlu0 %4121 }
 0x3f0   : >> { %v4151_v39 = vsel %vm3581_vm4, %v4085_v61, %v4122_v1 }
 0x3f1   : >> { %4164 = vst [vmem:[%s7103_s24 + $0x18] sm:$0xff] %v4151_v39 }
 0x3fd   : >> { %v4128_v50 = vpop.permute.xlu0 %4127 }
 0x3fe   : >> { %v4154_v41 = vsel %vm3581_vm4, %v4088_v32, %v4128_v50 }
 0x3ff   : >> { %4167 = vst [vmem:[%s7103_s24 + $0x30] sm:$0xff] %v4154_v41 }
 0x415   : >> { %v4134_v14 = vpop.permute.xlu0 %4133 }
 0x416   : >> { %v4157_v59 = vsel %vm3581_vm4, %v4091_v45, %v4134_v14 }
 0x417   : >> { %4170 = vst [vmem:[%s7103_s24 + $0x48] sm:$0xff] %v4157_v59  ;;  %v4118_v27 = vpop.permute.xlu1 %4117 }
 0x418   : >> { %v4149_v53 = vsel %vm3581_vm4, %v4083_v47, %v4118_v27 }
 0x419   : >> { %4162 = vst [vmem:[%s7103_s24 + $0x8] sm:$0xff] %v4149_v53 }
 0x427   : >> { %v4120_v2 = vpop.permute.xlu2 %4119 }
 0x428   : >> { %v4150_v31 = vsel %vm3581_vm4, %v4084_v7, %v4120_v2 }
 0x429   : >> { %4163 = vst [vmem:[%s7103_s24 + $0x10] sm:$0xff] %v4150_v31 }
 0x42f   : >> { %v4132_v48 = vpop.permute.xlu2 %4131 }
 0x430   : >> { %v4156_v10 = vsel %vm3581_vm4, %v4090_v19, %v4132_v48 }
 0x431   : >> { %4169 = vst [vmem:[%s7103_s24 + $0x40] sm:$0xff] %v4156_v10 }
 0x441   : >> { %v4124_v63 = vpop.permute.xlu1 %4123 }
 0x442   : >> { %v4152_v37 = vsel %vm3581_vm4, %v4086_v43, %v4124_v63 }
 0x443   : >> { %4165 = vst [vmem:[%s7103_s24 + $0x20] sm:$0xff] %v4152_v37 }
 0x449   : >> { %v4130_v16 = vpop.permute.xlu1 %4129 }
 0x44a   : >> { %v4155_v54 = vsel %vm3581_vm4, %v4089_v3, %v4130_v16 }
 0x44b   : >> { %4168 = vst [vmem:[%s7103_s24 + $0x38] sm:$0xff] %v4155_v54 }
 0x44f   : > { %3033 = sbr.rel (!%p3031_p7) target bundleno = 491 (0x1eb), region = 135 }
 0x451   : >> { %v4136_v44 = vpop.permute.xlu1 %4135 }
 0x452   : >> { %v4158_v22 = vsel %vm3581_vm4, %v4092_v33, %v4136_v44 }
 0x453   : >> { %4171 = vst [vmem:[%s7103_s24 + $0x50] sm:$0x7] %v4158_v22 }
 0x454 PF: > { %s17_s18 = sadd.s32 1, %s4528_s18  }
 0x455   : > { %p14_p8 = scmp.ge.s32.totalorder %s17_s18, 4  }
 0x457   :  { %16 = sbr.rel (!%p14_p8) target bundleno = 2 (0x2), region = 146 }
 0x45c   :  { %4193 = vsyncpa [#allocation5], 1 }
 0x45d   :  { %4195 = vsyncpa [#allocation5 + $0x1], 1 }
 0x45e   :  { %4196 = vsyncpa [#allocation7], 1 }

// kernel: cnn_forward.3
= control target key start
LH: loop header
LB: loop body
LE: loop exit
PB: predicated region body
PF: predicated region fallthrough
CT: control target
= control target key end

     0   :  { %s5371_s0 = inlined_call_operand.vmem [shape: f32[2,31872], index: 0, kind: input, shape index: {}]   ;;  %s5372_s1 = inlined_call_operand.hbm [shape: f32[31872,128], index: 1, kind: input, shape index: {}]   ;;  %s5373_s2 = inlined_call_operand.hbm [shape: f32[1,128], index: 2, kind: input, shape index: {}]   ;;  %s5374_s3 = inlined_call_operand.vmem [shape: f32[128,1], index: 3, kind: input, shape index: {}]   ;;  %s5375_s4 = inlined_call_operand.<no memory space> [shape: f32[1,1], index: 4, kind: input, shape index: {}]   ;;  %s5376_s5 = inlined_call_operand.vmem [shape: f32[2,1], index: 5, kind: output, shape index: {}]  }
   0x1   :  { %v10_v0 = vstv %s5375_s4 }
   0x2   :  { %11 = vst [vmem:[#allocation3] sm:$0x1] %v10_v0 }
   0x3   :  { %12 = vsyncpa [#allocation5], 0 }
   0x4   :  { %14 = vsyncpa [#allocation5 + $0x1], 0 }
   0x5   :  { %15 = vsyncpa [#allocation7], 0  ;;  %s3819_s20 = smov 0   ;;  %s3821_s21 = smov 0  }
   0x6   :  { %s3823_s22 = smov 0   ;;  %s3825_s23 = smov 0  }
   0x7 LB: > { %s3838_s4 = sadd.s32 4294967295, %s3780_s23   ;;  %s3841_s24 = sadd.s32 1, %s3780_s23   ;;  %s3780_s23 = sphi %s3825_s23, %s5384_s23   ;;  %s3776_s22 = sphi %s3823_s22, %s5383_s22   ;;  %s3772_s21 = sphi %s3821_s21, %s5382_s21   ;;  %s3768_s20 = sphi %s3819_s20, %s5381_s20  }
   0x8   : > { %s51_s25 = ssub.s32 %s3780_s23, %s3841_s24  ;;  %s54_s26 = sadd.s32 1, %s3776_s22 }
   0x9   : > { %p52_p0 = scmp.eq.s32.totalorder %s51_s25, 0  ;;  %p61_p1 = scmp.ne.s32.totalorder %s3776_s22, %s3772_s21 }
   0xa   : > { %p62_p2 = scmp.eq.s32.totalorder %s3780_s23, 0  ;;  %p67_p3 = scmp.ne.s32.totalorder %s3772_s21, %s3768_s20 }
   0xb   : > { %s3851_s27 = scalar_select %p52_p0, %s3776_s22, %s54_s26  }
   0xc   : > { %p3853_p4 = por %p62_p2, %p61_p1  ;;  %p68_p5 = scmp.eq.s32.totalorder %s3838_s4, 0 }
   0xd   : > { %p3613_p6 = scmp.ge.s32.totalorder %s3780_s23, 1  ;;  %p162_p7 = scmp.lt.s32.totalorder %s3780_s23, 4 }
   0xe   : > { %p3862_p8 = por %p68_p5, %p67_p3  ;;  %p3614_p9 = scmp.ne.s32.totalorder %s3838_s4, 0 }
   0xf   : > { %p3867_p10 = pnand %p3613_p6, %p162_p7  ;;  %s174_s8 = sshll.u32 %s5373_s2, 4  ;;  %s175_s8 = int_to_ptr.hbm [resolvable:$true] %s174_s8 }
  0x10   : > { %s3782_s9 = smov [#allocation6]   ;;  %p3642_p13 = scmp.lt.s32.totalorder %s3780_s23, 3 }
  0x11   : > { %p3633_p11 = pneg %p3867_p10  ;;  %s176_s10 = sshll.u32 %s3782_s9, 4  ;;  %s177_s10 = int_to_ptr.vmem [resolvable:$true] %s176_s10 }
  0x12   : > { %s202_s11 = sand.u32 1, %s3776_s22   ;;  %s3624_s12 = smul.u32 10624, %s3780_s23 }
  0x13   : > { %p3634_p12 = pnand %p3633_p11, %p68_p5  ;;  %p3883_p0 = pnand %p3642_p13, %p3853_p4 }
  0x14   : > { %s3625_s14 = smul.u32 10624, %s202_s11  ;;  %s211_s17 = scalar_lea.hbm %s5372_s1, %s3624_s12 }
  0x15   : > { %3636 = dma.hbm_to_vmem [thread:$0]  (!%p3634_p12), %s175_s8, 16, %s177_s10, [#allocation7]  }
  0x16   : > { %s212_s18 = sshll.u32 %s211_s17, 4  ;;  %s206_s19 = scalar_lea.vmem [#allocation4], %s3625_s14  ;;  %s213_s18 = int_to_ptr.hbm [resolvable:$true] %s212_s18 }
  0x17   : > { %s214_s20 = sshll.u32 %s206_s19, 4  ;;  %s203_s25 = scalar_lea.sflag [#allocation5], %s202_s11  ;;  %s215_s20 = int_to_ptr.vmem [resolvable:$true] %s214_s20 }
  0x18   : > { %s3712_s26 = sshra.s32 %s213_s18, 4  ;;  %p3716_p2 = pneg %p3883_p0  ;;  %s3713_s26 = int_to_ptr.hbm [resolvable:$true] %s3712_s26 }
  0x19   : > { %s3714_s23 = scalar_lea.hbm %s3713_s26, 10624  ;;  %s3719_s7 = scalar_lea.hbm %s5372_s1, 31872 }
  0x1a   : > { %p3715_p1 = scmp.ne.s32.totalorder %s3713_s26, %s3714_s23  ;;  %p3720_p6 = scmp.lt.s32.totalorder %s3713_s26, %s5372_s1 }
  0x1b   : > { %p3721_p7 = scmp.lt.s32.totalorder %s3719_s7, %s3714_s23 }
  0x1c   : > { %p3717_p3 = pnand %p3716_p2, %p3715_p1 }
  0x1d   : > { %p3722_p11 = por %p3721_p7, %p3720_p6 }
  0x1e   : > { %p3718_p4 = pneg %p3717_p3 }
  0x20   : > { %p3723_p12 = pnand %p3722_p11, %p3718_p4 }
  0x22   : > { %3726 = shalt.err (!%p3723_p12)
}
  0x23   : > { %s3783_s10 = smov 128   ;;  %s3784_s11 = smov 8  }
  0x24   : > { %3640 = dma.hbm_to_vmem [thread:$0]  (!%p3883_p0), %s213_s18, 169984, %s215_s20, %s203_s25, %s3783_s10, %s3783_s10, %s3784_s11  }
  0x25   : > { %226 = sbr.rel (%p3867_p10) target bundleno = 1065 (0x429), region = 40  ;;  %s228_s12 = sand.u32 (!%p3867_p10), 1, %s3772_s21  }
  0x26   : > { %s3626_s14 = smul.u32 (!%p3867_p10), 10624, %s228_s12  ;;  %s229_s15 = scalar_lea.sflag (!%p3867_p10), [#allocation5], %s228_s12 }
  0x28   : > { %s3903_s16 = scalar_lea.vmem (!%p3867_p10), [#allocation4], %s3626_s14 }
  0x2a   : > { %3759 = dma.done.wait (%p3862_p8), %s229_s15, 169984  }
  0x2b   : > { %3761 = vsyncadd (%p3862_p8), %s229_s15, 4294797312 }
  0x2c   : > { %3763 = dma.done.wait (%p68_p5), [#allocation7], 16  }
  0x2d   : > { %3765 = vsyncadd (%p68_p5), [#allocation7], 4294967280  ;;  %s265_s30 = smul.u32 83, %s3838_s4 }
  0x2f   : > { %p266_p10 = scmp.lt.s32.totalorder %s265_s30, 248  ;;  %275 = sbr.rel (%p3614_p9) target bundleno = 54 (0x36), region = 52 }
  0x31   : > { %s5386_s30 = smov (!%p266_p10, %s265_s30), 248 }
  0x32   : > { %s3619_s13 = sshll.u32 %s5386_s30, 1 }
  0x33   : > { %s3917_s19 = scalar_lea.vmem %s5371_s0, %s3619_s13 }
  0x34   : > { %v3785_v1 = vmov 0.0  }
  0x35   : > { %276 = vst [vmem:[#allocation2] sm:$0x3] %v3785_v1 }
  0x36 PF: > { %v314_v2 = vld [vmem:[%s3903_s16 + $0x78] sm:$0xff]  ;;  %v313_v4 = vld [vmem:[%s3903_s16 + $0x70] sm:$0xff]  ;;  %v312_v8 = vld [vmem:[%s3903_s16 + $0x68] sm:$0xff]  ;;  %p3621_p5 = scmp.ne.s32.totalorder %s3838_s4, 2 }
  0x37   : > { %v346_v3 = vld [vmem:[%s3903_s16 + $0x178] sm:$0xff]  ;;  %1836 = vmatpush.msra.mxu0 %v314_v2  ;;  %v345_v6 = vld [vmem:[%s3903_s16 + $0x170] sm:$0xff]  ;;  %v344_v10 = vld [vmem:[%s3903_s16 + $0x168] sm:$0xff] }
  0x38   : > { %1876 = vmatpush.msra.mxu2 %v346_v3  ;;  %v330_v5 = vld [vmem:[%s3903_s16 + $0xf8] sm:$0xff]  ;;  %v329_v9 = vld [vmem:[%s3903_s16 + $0xf0] sm:$0xff]  ;;  %v328_v12 = vld [vmem:[%s3903_s16 + $0xe8] sm:$0xff] }
  0x39   : > { %v362_v7 = vld [vmem:[%s3903_s16 + $0x1f8] sm:$0xff]  ;;  %1856 = vmatpush.msra.mxu1 %v330_v5  ;;  %1837 = vmatpush.msra.mxu0 %v313_v4  ;;  %v361_v11 = vld [vmem:[%s3903_s16 + $0x1f0] sm:$0xff]  ;;  %v311_v13 = vld [vmem:[%s3903_s16 + $0x60] sm:$0xff] }
  0x3a   : > { %1896 = vmatpush.msra.mxu3 %v362_v7  ;;  %1877 = vmatpush.msra.mxu2 %v345_v6  ;;  %v343_v14 = vld [vmem:[%s3903_s16 + $0x160] sm:$0xff]  ;;  %v360_v15 = vld [vmem:[%s3903_s16 + $0x1e8] sm:$0xff]  ;;  %v310_v18 = vld [vmem:[%s3903_s16 + $0x58] sm:$0xff] }
  0x3b   : > { %1857 = vmatpush.msra.mxu1 %v329_v9  ;;  %1838 = vmatpush.msra.mxu0 %v312_v8  ;;  %v327_v16 = vld [vmem:[%s3903_s16 + $0xe0] sm:$0xff]  ;;  %v342_v19 = vld [vmem:[%s3903_s16 + $0x158] sm:$0xff]  ;;  %v309_v22 = vld [vmem:[%s3903_s16 + $0x50] sm:$0xff] }
  0x3c   : > { %1897 = vmatpush.msra.mxu3 %v361_v11  ;;  %1878 = vmatpush.msra.mxu2 %v344_v10  ;;  %v359_v17 = vld [vmem:[%s3903_s16 + $0x1e0] sm:$0xff]  ;;  %v326_v20 = vld [vmem:[%s3903_s16 + $0xd8] sm:$0xff]  ;;  %v341_v23 = vld [vmem:[%s3903_s16 + $0x150] sm:$0xff] }
  0x3d   : > { %1858 = vmatpush.msra.mxu1 %v328_v12  ;;  %1839 = vmatpush.msra.mxu0 %v311_v13  ;;  %v358_v21 = vld [vmem:[%s3903_s16 + $0x1d8] sm:$0xff]  ;;  %v325_v24 = vld [vmem:[%s3903_s16 + $0xd0] sm:$0xff]  ;;  %v308_v26 = vld [vmem:[%s3903_s16 + $0x48] sm:$0xff] }
  0x3e   : > { %1898 = vmatpush.msra.mxu3 %v360_v15  ;;  %1879 = vmatpush.msra.mxu2 %v343_v14  ;;  %v357_v25 = vld [vmem:[%s3903_s16 + $0x1d0] sm:$0xff]  ;;  %v340_v27 = vld [vmem:[%s3903_s16 + $0x148] sm:$0xff]  ;;  %v307_v30 = vld [vmem:[%s3903_s16 + $0x40] sm:$0xff] }
  0x3f   : > { %1859 = vmatpush.msra.mxu1 %v327_v16  ;;  %1840 = vmatpush.msra.mxu0 %v310_v18  ;;  %v324_v28 = vld [vmem:[%s3903_s16 + $0xc8] sm:$0xff]  ;;  %v339_v31 = vld [vmem:[%s3903_s16 + $0x140] sm:$0xff]  ;;  %v306_v34 = vld [vmem:[%s3903_s16 + $0x38] sm:$0xff] }
  0x40   : > { %1899 = vmatpush.msra.mxu3 %v359_v17  ;;  %1880 = vmatpush.msra.mxu2 %v342_v19  ;;  %v356_v29 = vld [vmem:[%s3903_s16 + $0x1c8] sm:$0xff]  ;;  %v323_v32 = vld [vmem:[%s3903_s16 + $0xc0] sm:$0xff]  ;;  %v338_v35 = vld [vmem:[%s3903_s16 + $0x138] sm:$0xff] }
  0x41   : > { %1860 = vmatpush.msra.mxu1 %v326_v20  ;;  %1841 = vmatpush.msra.mxu0 %v309_v22  ;;  %v355_v33 = vld [vmem:[%s3903_s16 + $0x1c0] sm:$0xff]  ;;  %v322_v36 = vld [vmem:[%s3903_s16 + $0xb8] sm:$0xff]  ;;  %v305_v38 = vld [vmem:[%s3903_s16 + $0x30] sm:$0xff] }
  0x42   : > { %1900 = vmatpush.msra.mxu3 %v358_v21  ;;  %1881 = vmatpush.msra.mxu2 %v341_v23  ;;  %v354_v37 = vld [vmem:[%s3903_s16 + $0x1b8] sm:$0xff]  ;;  %v337_v39 = vld [vmem:[%s3903_s16 + $0x130] sm:$0xff]  ;;  %v304_v42 = vld [vmem:[%s3903_s16 + $0x28] sm:$0xff] }
  0x43   : > { %1861 = vmatpush.msra.mxu1 %v325_v24  ;;  %1842 = vmatpush.msra.mxu0 %v308_v26  ;;  %v321_v40 = vld [vmem:[%s3903_s16 + $0xb0] sm:$0xff]  ;;  %v336_v43 = vld [vmem:[%s3903_s16 + $0x128] sm:$0xff]  ;;  %v303_v46 = vld [vmem:[%s3903_s16 + $0x20] sm:$0xff] }
  0x44   : > { %1901 = vmatpush.msra.mxu3 %v357_v25  ;;  %1882 = vmatpush.msra.mxu2 %v340_v27  ;;  %v353_v41 = vld [vmem:[%s3903_s16 + $0x1b0] sm:$0xff]  ;;  %v320_v44 = vld [vmem:[%s3903_s16 + $0xa8] sm:$0xff]  ;;  %v335_v47 = vld [vmem:[%s3903_s16 + $0x120] sm:$0xff] }
  0x45   : > { %1862 = vmatpush.msra.mxu1 %v324_v28  ;;  %1843 = vmatpush.msra.mxu0 %v307_v30  ;;  %v352_v45 = vld [vmem:[%s3903_s16 + $0x1a8] sm:$0xff]  ;;  %v319_v48 = vld [vmem:[%s3903_s16 + $0xa0] sm:$0xff]  ;;  %v302_v50 = vld [vmem:[%s3903_s16 + $0x18] sm:$0xff] }
  0x46   : > { %1902 = vmatpush.msra.mxu3 %v356_v29  ;;  %1883 = vmatpush.msra.mxu2 %v339_v31  ;;  %v351_v49 = vld [vmem:[%s3903_s16 + $0x1a0] sm:$0xff]  ;;  %v334_v51 = vld [vmem:[%s3903_s16 + $0x118] sm:$0xff]  ;;  %v301_v54 = vld [vmem:[%s3903_s16 + $0x10] sm:$0xff] }
  0x47   : > { %1863 = vmatpush.msra.mxu1 %v323_v32  ;;  %1844 = vmatpush.msra.mxu0 %v306_v34  ;;  %v318_v52 = vld [vmem:[%s3903_s16 + $0x98] sm:$0xff]  ;;  %v333_v55 = vld [vmem:[%s3903_s16 + $0x110] sm:$0xff]  ;;  %v300_v58 = vld [vmem:[%s3903_s16 + $0x8] sm:$0xff] }
  0x48   : > { %1903 = vmatpush.msra.mxu3 %v355_v33  ;;  %1884 = vmatpush.msra.mxu2 %v338_v35  ;;  %v350_v53 = vld [vmem:[%s3903_s16 + $0x198] sm:$0xff]  ;;  %v317_v56 = vld [vmem:[%s3903_s16 + $0x90] sm:$0xff]  ;;  %v332_v59 = vld [vmem:[%s3903_s16 + $0x108] sm:$0xff] }
  0x49   : > { %1864 = vmatpush.msra.mxu1 %v322_v36  ;;  %1845 = vmatpush.msra.mxu0 %v305_v38  ;;  %v349_v57 = vld [vmem:[%s3903_s16 + $0x190] sm:$0xff]  ;;  %v316_v60 = vld [vmem:[%s3903_s16 + $0x88] sm:$0xff]  ;;  %v299_v62 = vld [vmem:[%s3903_s16] sm:$0xff] }
  0x4a   : > { %1904 = vmatpush.msra.mxu3 %v354_v37  ;;  %1885 = vmatpush.msra.mxu2 %v337_v39  ;;  %v348_v61 = vld [vmem:[%s3903_s16 + $0x188] sm:$0xff]  ;;  %v331_v63 = vld [vmem:[%s3903_s16 + $0x100] sm:$0xff]  ;;  %v378_v0 = vld [vmem:[%s3903_s16 + $0x278] sm:$0xff] }
  0x4b   : > { %1865 = vmatpush.msra.mxu1 %v321_v40  ;;  %1846 = vmatpush.msra.mxu0 %v304_v42  ;;  %v410_v1 = vld [vmem:[%s3903_s16 + $0x378] sm:$0xff]  ;;  %v315_v2 = vld [vmem:[%s3903_s16 + $0x80] sm:$0xff]  ;;  %v377_v4 = vld [vmem:[%s3903_s16 + $0x270] sm:$0xff] }
  0x4c   : > { %1905 = vmatpush.msra.mxu3 %v353_v41  ;;  %1886 = vmatpush.msra.mxu2 %v336_v43  ;;  %v347_v3 = vld [vmem:[%s3903_s16 + $0x180] sm:$0xff]  ;;  %v394_v5 = vld [vmem:[%s3903_s16 + $0x2f8] sm:$0xff]  ;;  %v409_v6 = vld [vmem:[%s3903_s16 + $0x370] sm:$0xff] }
  0x4d   : > { %1866 = vmatpush.msra.mxu1 %v320_v44  ;;  %1847 = vmatpush.msra.mxu0 %v303_v46  ;;  %v426_v7 = vld [vmem:[%s3903_s16 + $0x3f8] sm:$0xff]  ;;  %v376_v8 = vld [vmem:[%s3903_s16 + $0x268] sm:$0xff]  ;;  %v393_v9 = vld [vmem:[%s3903_s16 + $0x2f0] sm:$0xff] }
  0x4e   : > { %1906 = vmatpush.msra.mxu3 %v352_v45  ;;  %1887 = vmatpush.msra.mxu2 %v335_v47  ;;  %v408_v10 = vld [vmem:[%s3903_s16 + $0x368] sm:$0xff]  ;;  %v425_v11 = vld [vmem:[%s3903_s16 + $0x3f0] sm:$0xff]  ;;  %v375_v12 = vld [vmem:[%s3903_s16 + $0x260] sm:$0xff] }
  0x4f   : > { %1867 = vmatpush.msra.mxu1 %v319_v48  ;;  %1848 = vmatpush.msra.mxu0 %v302_v50  ;;  %v392_v13 = vld [vmem:[%s3903_s16 + $0x2e8] sm:$0xff]  ;;  %v407_v14 = vld [vmem:[%s3903_s16 + $0x360] sm:$0xff]  ;;  %v374_v16 = vld [vmem:[%s3903_s16 + $0x258] sm:$0xff] }
  0x50   : > { %1907 = vmatpush.msra.mxu3 %v351_v49  ;;  %1888 = vmatpush.msra.mxu2 %v334_v51  ;;  %v424_v15 = vld [vmem:[%s3903_s16 + $0x3e8] sm:$0xff]  ;;  %v391_v17 = vld [vmem:[%s3903_s16 + $0x2e0] sm:$0xff]  ;;  %v406_v18 = vld [vmem:[%s3903_s16 + $0x358] sm:$0xff] }
  0x51   : > { %1868 = vmatpush.msra.mxu1 %v318_v52  ;;  %1849 = vmatpush.msra.mxu0 %v301_v54  ;;  %v423_v19 = vld [vmem:[%s3903_s16 + $0x3e0] sm:$0xff]  ;;  %v373_v20 = vld [vmem:[%s3903_s16 + $0x250] sm:$0xff]  ;;  %v390_v21 = vld [vmem:[%s3903_s16 + $0x2d8] sm:$0xff] }
  0x52   : > { %1908 = vmatpush.msra.mxu3 %v350_v53  ;;  %1889 = vmatpush.msra.mxu2 %v333_v55  ;;  %v405_v22 = vld [vmem:[%s3903_s16 + $0x350] sm:$0xff]  ;;  %v422_v23 = vld [vmem:[%s3903_s16 + $0x3d8] sm:$0xff]  ;;  %v372_v25 = vld [vmem:[%s3903_s16 + $0x248] sm:$0xff] }
  0x53   : > { %1869 = vmatpush.msra.mxu1 %v317_v56  ;;  %1850 = vmatpush.msra.mxu0 %v300_v58  ;;  %v278_v24 = vld [vmem:[%s3917_s19] sm:$0xff]  ;;  %v404_v27 = vld [vmem:[%s3903_s16 + $0x348] sm:$0xff]  ;;  %v371_v29 = vld [vmem:[%s3903_s16 + $0x240] sm:$0xff] }
  0x54   : > { %1909 = vmatpush.msra.mxu3 %v349_v57  ;;  %1890 = vmatpush.msra.mxu2 %v332_v59  ;;  %v389_v26 = vld [vmem:[%s3903_s16 + $0x2d0] sm:$0xff]  ;;  %1648 = vst [vmem:[#allocation1] ss:$4 sm:$0xff] %v278_v24  ;;  %v388_v30 = vld [vmem:[%s3903_s16 + $0x2c8] sm:$0xff]  ;;  %v403_v31 = vld [vmem:[%s3903_s16 + $0x340] sm:$0xff] }
  0x55   : > { %1870 = vmatpush.msra.mxu1 %v316_v60  ;;  %1851 = vmatpush.msra.mxu0 %v299_v62  ;;  %v421_v28 = vld [vmem:[%s3903_s16 + $0x3d0] sm:$0xff]  ;;  %v420_v32 = vld [vmem:[%s3903_s16 + $0x3c8] sm:$0xff]  ;;  %v370_v33 = vld [vmem:[%s3903_s16 + $0x238] sm:$0xff] }
  0x56   : > { %1910 = vmatpush.msra.mxu3 %v348_v61  ;;  %1891 = vmatpush.msra.mxu2 %v331_v63  ;;  %v387_v34 = vld [vmem:[%s3903_s16 + $0x2c0] sm:$0xff]  ;;  %v402_v35 = vld [vmem:[%s3903_s16 + $0x338] sm:$0xff]  ;;  %v369_v38 = vld [vmem:[%s3903_s16 + $0x230] sm:$0xff] }
  0x57   : > { %1916 = vmatpush.msrb.mxu0 %v378_v0  ;;  %1871 = vmatpush.msra.mxu1 %v315_v2  ;;  %v419_v36 = vld [vmem:[%s3903_s16 + $0x3c0] sm:$0xff]  ;;  %v386_v39 = vld [vmem:[%s3903_s16 + $0x2b8] sm:$0xff]  ;;  %v401_v40 = vld [vmem:[%s3903_s16 + $0x330] sm:$0xff] }
  0x58   : > { %1956 = vmatpush.msrb.mxu2 %v410_v1  ;;  %1911 = vmatpush.msra.mxu3 %v347_v3  ;;  %v279_v37 = vld [vmem:[%s3917_s19 + $0x8] sm:$0xff]  ;;  %v368_v42 = vld [vmem:[%s3903_s16 + $0x228] sm:$0xff]  ;;  %v385_v43 = vld [vmem:[%s3903_s16 + $0x2b0] sm:$0xff] }
  0x59   : > { %1917 = vmatpush.msrb.mxu0 %v377_v4  ;;  %1936 = vmatpush.msrb.mxu1 %v394_v5  ;;  %1650 = vst [vmem:[#allocation1 + $0x20] ss:$4 sm:$0xff] %v279_v37  ;;  %v418_v41 = vld [vmem:[%s3903_s16 + $0x3b8] sm:$0xff]  ;;  %v400_v44 = vld [vmem:[%s3903_s16 + $0x328] sm:$0xff]  ;;  %v417_v45 = vld [vmem:[%s3903_s16 + $0x3b0] sm:$0xff] }
  0x5a   : > { %1957 = vmatpush.msrb.mxu2 %v409_v6  ;;  %1976 = vmatpush.msrb.mxu3 %v426_v7  ;;  %v367_v46 = vld [vmem:[%s3903_s16 + $0x220] sm:$0xff]  ;;  %v384_v47 = vld [vmem:[%s3903_s16 + $0x2a8] sm:$0xff]  ;;  %v366_v50 = vld [vmem:[%s3903_s16 + $0x218] sm:$0xff] }
  0x5b   : > { %1918 = vmatpush.msrb.mxu0 %v376_v8  ;;  %1937 = vmatpush.msrb.mxu1 %v393_v9  ;;  %v399_v48 = vld [vmem:[%s3903_s16 + $0x320] sm:$0xff]  ;;  %v416_v49 = vld [vmem:[%s3903_s16 + $0x3a8] sm:$0xff]  ;;  %v398_v52 = vld [vmem:[%s3903_s16 + $0x318] sm:$0xff] }
  0x5c   : > { %1958 = vmatpush.msrb.mxu2 %v408_v10  ;;  %1977 = vmatpush.msrb.mxu3 %v425_v11  ;;  %v383_v51 = vld [vmem:[%s3903_s16 + $0x2a0] sm:$0xff]  ;;  %v365_v54 = vld [vmem:[%s3903_s16 + $0x210] sm:$0xff]  ;;  %v382_v55 = vld [vmem:[%s3903_s16 + $0x298] sm:$0xff] }
  0x5d   : > { %1919 = vmatpush.msrb.mxu0 %v375_v12  ;;  %1938 = vmatpush.msrb.mxu1 %v392_v13  ;;  %v415_v53 = vld [vmem:[%s3903_s16 + $0x3a0] sm:$0xff]  ;;  %v281_v56 = vld [vmem:[%s3917_s19 + $0x18] sm:$0xff]  ;;  %v414_v62 = vld [vmem:[%s3903_s16 + $0x398] sm:$0xff] }
  0x5e   : > { %1959 = vmatpush.msrb.mxu2 %v407_v14  ;;  %1978 = vmatpush.msrb.mxu3 %v424_v15  ;;  %v397_v61 = vld [vmem:[%s3903_s16 + $0x310] sm:$0xff]  ;;  %v364_v63 = vld [vmem:[%s3903_s16 + $0x208] sm:$0xff]  ;;  %v363_v4 = vld [vmem:[%s3903_s16 + $0x200] sm:$0xff] }
  0x5f   : > { %1920 = vmatpush.msrb.mxu0 %v374_v16  ;;  %1939 = vmatpush.msrb.mxu1 %v391_v17  ;;  %v381_v0 = vld [vmem:[%s3903_s16 + $0x290] sm:$0xff]  ;;  %v396_v1 = vld [vmem:[%s3903_s16 + $0x308] sm:$0xff]  ;;  %v395_v6 = vld [vmem:[%s3903_s16 + $0x300] sm:$0xff] }
  0x60   : > { %1960 = vmatpush.msrb.mxu2 %v406_v18  ;;  %1979 = vmatpush.msrb.mxu3 %v423_v19  ;;  %v4040_v57 = vld.sshfl [vmem:[#allocation1 + $0x30] sm:$0xff pattern:$0x73625140]  ;;  %v4042_v58 = vld.sshfl [vmem:[#allocation1 + $0x20] sm:$0xff pattern:$0x73625140] }
  0x61   : > { %1921 = vmatpush.msrb.mxu0 %v373_v20  ;;  %1940 = vmatpush.msrb.mxu1 %v390_v21  ;;  %v4044_v59 = vld.sshfl [vmem:[#allocation1 + $0x38] sm:$0xff pattern:$0x73625140]  ;;  %v4046_v60 = vld.sshfl [vmem:[#allocation1 + $0x28] sm:$0xff pattern:$0x73625140] }
  0x62   : > { %1961 = vmatpush.msrb.mxu2 %v405_v22  ;;  %1980 = vmatpush.msrb.mxu3 %v422_v23  ;;  %1660 = vst [vmem:[#allocation1 + $0x20] ss:$4 sm:$0xff] %v281_v56  ;;  %v413_v2 = vld [vmem:[%s3903_s16 + $0x390] sm:$0xff]  ;;  %v1653_v3 = vld.sshfl [vmem:[#allocation1 + $0x10] sm:$0xff pattern:$0x73625140] }
  0x63   : > { %1922 = vmatpush.msrb.mxu0 %v372_v25  ;;  %1941 = vmatpush.msrb.mxu1 %v389_v26  ;;  %v380_v5 = vld [vmem:[%s3903_s16 + $0x288] sm:$0xff]  ;;  %v1651_v8 = vld.sshfl [vmem:[#allocation1] sm:$0xff pattern:$0x73625140]  ;;  %v379_v12 = vld [vmem:[%s3903_s16 + $0x280] sm:$0xff] }
  0x64   : > { %1962 = vmatpush.msrb.mxu2 %v404_v27  ;;  %1981 = vmatpush.msrb.mxu3 %v421_v28  ;;  %v412_v7 = vld [vmem:[%s3903_s16 + $0x388] sm:$0xff]  ;;  %v442_v10 = vld [vmem:[%s3903_s16 + $0x478] sm:$0xff]  ;;  %v411_v13 = vld [vmem:[%s3903_s16 + $0x380] sm:$0xff] }
  0x65   : > { %1923 = vmatpush.msrb.mxu0 %v371_v29  ;;  %1942 = vmatpush.msrb.mxu1 %v388_v30  ;;  %v1654_v9 = vld.sshfl [vmem:[#allocation1 + $0x18] sm:$0xff pattern:$0x73625140]  ;;  %v474_v11 = vld [vmem:[%s3903_s16 + $0x578] sm:$0xff]  ;;  %v280_v23 = vld [vmem:[%s3917_s19 + $0x10] sm:$0xff] }
  0x66   : > { %1963 = vmatpush.msrb.mxu2 %v403_v31  ;;  %1982 = vmatpush.msrb.mxu3 %v420_v32  ;;  %v1652_v14 = vld.sshfl [vmem:[#allocation1 + $0x8] sm:$0xff pattern:$0x73625140]  ;;  %v441_v15 = vld [vmem:[%s3903_s16 + $0x470] sm:$0xff]  ;;  %v440_v19 = vld [vmem:[%s3903_s16 + $0x468] sm:$0xff] }
  0x67   : > { %1924 = vmatpush.msrb.mxu0 %v370_v33  ;;  %1943 = vmatpush.msrb.mxu1 %v387_v34  ;;  %v458_v16 = vld [vmem:[%s3903_s16 + $0x4f8] sm:$0xff]  ;;  %v473_v17 = vld [vmem:[%s3903_s16 + $0x570] sm:$0xff]  ;;  %v472_v21 = vld [vmem:[%s3903_s16 + $0x568] sm:$0xff]  ;;  %1659 = vst [vmem:[#allocation1] ss:$4 sm:$0xff] %v280_v23 }
  0x68   : > { %1964 = vmatpush.msrb.mxu2 %v402_v35  ;;  %1983 = vmatpush.msrb.mxu3 %v419_v36  ;;  %v490_v18 = vld [vmem:[%s3903_s16 + $0x5f8] sm:$0xff]  ;;  %v457_v20 = vld [vmem:[%s3903_s16 + $0x4f0] sm:$0xff]  ;;  %v439_v24 = vld [vmem:[%s3903_s16 + $0x460] sm:$0xff] }
  0x69   : > { %1925 = vmatpush.msrb.mxu0 %v369_v38  ;;  %1944 = vmatpush.msrb.mxu1 %v386_v39  ;;  %v489_v22 = vld [vmem:[%s3903_s16 + $0x5f0] sm:$0xff]  ;;  %v456_v25 = vld [vmem:[%s3903_s16 + $0x4e8] sm:$0xff]  ;;  %v471_v26 = vld [vmem:[%s3903_s16 + $0x560] sm:$0xff] }
  0x6a   : > { %1965 = vmatpush.msrb.mxu2 %v401_v40  ;;  %1984 = vmatpush.msrb.mxu3 %v418_v41  ;;  %v488_v27 = vld [vmem:[%s3903_s16 + $0x5e8] sm:$0xff]  ;;  %v438_v28 = vld [vmem:[%s3903_s16 + $0x458] sm:$0xff]  ;;  %v455_v29 = vld [vmem:[%s3903_s16 + $0x4e0] sm:$0xff] }
  0x6b   : > { %1926 = vmatpush.msrb.mxu0 %v368_v42  ;;  %1945 = vmatpush.msrb.mxu1 %v385_v43  ;;  %v470_v30 = vld [vmem:[%s3903_s16 + $0x558] sm:$0xff]  ;;  %v487_v31 = vld [vmem:[%s3903_s16 + $0x5e0] sm:$0xff]  ;;  %v437_v32 = vld [vmem:[%s3903_s16 + $0x450] sm:$0xff] }
  0x6c   : > { %1966 = vmatpush.msrb.mxu2 %v400_v44  ;;  %1985 = vmatpush.msrb.mxu3 %v417_v45  ;;  %v454_v33 = vld [vmem:[%s3903_s16 + $0x4d8] sm:$0xff]  ;;  %v469_v34 = vld [vmem:[%s3903_s16 + $0x550] sm:$0xff]  ;;  %v436_v36 = vld [vmem:[%s3903_s16 + $0x448] sm:$0xff] }
  0x6d   : > { %1927 = vmatpush.msrb.mxu0 %v367_v46  ;;  %1946 = vmatpush.msrb.mxu1 %v384_v47  ;;  %v486_v35 = vld [vmem:[%s3903_s16 + $0x5d8] sm:$0xff]  ;;  %v453_v37 = vld [vmem:[%s3903_s16 + $0x4d0] sm:$0xff]  ;;  %v468_v43 = vld [vmem:[%s3903_s16 + $0x548] sm:$0xff] }
  0x6e   : > { %1967 = vmatpush.msrb.mxu2 %v399_v48  ;;  %1986 = vmatpush.msrb.mxu3 %v416_v49  ;;  %v282_v38 = vld [vmem:[%s3917_s19 + $0x20] sm:$0xff]  ;;  %v4091_v40 = vld.sshfl [vmem:[#allocation1 + $0x10] sm:$0xff pattern:$0x73625140] }
  0x6f   : > { %1928 = vmatpush.msrb.mxu0 %v366_v50  ;;  %1947 = vmatpush.msrb.mxu1 %v383_v51  ;;  %v4089_v39 = vld.sshfl [vmem:[#allocation1] sm:$0xff pattern:$0x73625140]  ;;  %v4094_v41 = vld.sshfl [vmem:[#allocation1 + $0x8] sm:$0xff pattern:$0x73625140] }
  0x70   : > { %1968 = vmatpush.msrb.mxu2 %v398_v52  ;;  %1987 = vmatpush.msrb.mxu3 %v415_v53  ;;  %v4096_v42 = vld.sshfl [vmem:[#allocation1 + $0x18] sm:$0xff pattern:$0x73625140]  ;;  %v435_v45 = vld [vmem:[%s3903_s16 + $0x440] sm:$0xff]  ;;  %v434_v49 = vld [vmem:[%s3903_s16 + $0x438] sm:$0xff] }
  0x71   : > { %1929 = vmatpush.msrb.mxu0 %v365_v54  ;;  %1948 = vmatpush.msrb.mxu1 %v382_v55  ;;  %v485_v44 = vld [vmem:[%s3903_s16 + $0x5d0] sm:$0xff]  ;;  %1669 = vst [vmem:[#allocation1] ss:$4 sm:$0xff] %v282_v38  ;;  %v452_v46 = vld [vmem:[%s3903_s16 + $0x4c8] sm:$0xff]  ;;  %v467_v47 = vld [vmem:[%s3903_s16 + $0x540] sm:$0xff] }
  0x72   : > { %1969 = vmatpush.msrb.mxu2 %v397_v61  ;;  %1988 = vmatpush.msrb.mxu3 %v414_v62  ;;  %v484_v48 = vld [vmem:[%s3903_s16 + $0x5c8] sm:$0xff]  ;;  %v451_v50 = vld [vmem:[%s3903_s16 + $0x4c0] sm:$0xff]  ;;  %v466_v51 = vld [vmem:[%s3903_s16 + $0x538] sm:$0xff] }
  0x73   : > { %1930 = vmatpush.msrb.mxu0 %v364_v63  ;;  %1949 = vmatpush.msrb.mxu1 %v381_v0  ;;  %v483_v52 = vld [vmem:[%s3903_s16 + $0x5c0] sm:$0xff]  ;;  %v433_v53 = vld [vmem:[%s3903_s16 + $0x430] sm:$0xff]  ;;  %v450_v54 = vld [vmem:[%s3903_s16 + $0x4b8] sm:$0xff] }
  0x74   : > { %1970 = vmatpush.msrb.mxu2 %v396_v1  ;;  %1989 = vmatpush.msrb.mxu3 %v413_v2  ;;  %v465_v55 = vld [vmem:[%s3903_s16 + $0x530] sm:$0xff]  ;;  %v482_v56 = vld [vmem:[%s3903_s16 + $0x5b8] sm:$0xff]  ;;  %v431_v61 = vld [vmem:[%s3903_s16 + $0x420] sm:$0xff] }
  0x75   : > { %1892 = vmatmul.f32.vlgmr.msra.gmra.mxu2 %v1653_v3  ;;  %1931 = vmatpush.msrb.mxu0 %v363_v4  ;;  %v448_v62 = vld [vmem:[%s3903_s16 + $0x4a8] sm:$0xff]  ;;  %v463_v63 = vld [vmem:[%s3903_s16 + $0x520] sm:$0xff]  ;;  %v430_v1 = vld [vmem:[%s3903_s16 + $0x418] sm:$0xff] }
  0x76   : > { %1950 = vmatpush.msrb.mxu1 %v380_v5  ;;  %1971 = vmatpush.msrb.mxu2 %v395_v6  ;;  %v480_v0 = vld [vmem:[%s3903_s16 + $0x5a8] sm:$0xff]  ;;  %v447_v2 = vld [vmem:[%s3903_s16 + $0x4a0] sm:$0xff]  ;;  %v462_v3 = vld [vmem:[%s3903_s16 + $0x518] sm:$0xff] }
  0x77   : > { %1990 = vmatpush.msrb.mxu3 %v412_v7  ;;  %1852 = vmatmul.f32.vlgmr.msra.gmra.mxu0 %v1651_v8  ;;  %v479_v4 = vld [vmem:[%s3903_s16 + $0x5a0] sm:$0xff]  ;;  %v429_v5 = vld [vmem:[%s3903_s16 + $0x410] sm:$0xff]  ;;  %v446_v6 = vld [vmem:[%s3903_s16 + $0x498] sm:$0xff] }
  0x78   : > { %1912 = vmatmul.f32.vlgmr.msra.gmra.mxu3 %v1654_v9  ;;  %1996 = vmatpush.msra.mxu0 %v442_v10  ;;  %v461_v7 = vld [vmem:[%s3903_s16 + $0x510] sm:$0xff]  ;;  %v478_v8 = vld [vmem:[%s3903_s16 + $0x598] sm:$0xff]  ;;  %v428_v9 = vld [vmem:[%s3903_s16 + $0x408] sm:$0xff] }
  0x79   : > { %2036 = vmatpush.msra.mxu2 %v474_v11  ;;  %1951 = vmatpush.msrb.mxu1 %v379_v12  ;;  %v445_v10 = vld [vmem:[%s3903_s16 + $0x490] sm:$0xff]  ;;  %v460_v11 = vld [vmem:[%s3903_s16 + $0x508] sm:$0xff]  ;;  %v502_v38 = vld [vmem:[%s3903_s16 + $0x658] sm:$0xff] }
  0x7a   : > { %1991 = vmatpush.msrb.mxu3 %v411_v13  ;;  %1872 = vmatmul.f32.vlgmr.msra.gmra.mxu1 %v1652_v14  ;;  %v477_v12 = vld [vmem:[%s3903_s16 + $0x590] sm:$0xff]  ;;  %v427_v13 = vld [vmem:[%s3903_s16 + $0x400] sm:$0xff]  ;;  %v444_v14 = vld [vmem:[%s3903_s16 + $0x488] sm:$0xff] }
  0x7b   : > { %1997 = vmatpush.msra.mxu0 %v441_v15  ;;  %2016 = vmatpush.msra.mxu1 %v458_v16  ;;  %v459_v15 = vld [vmem:[%s3903_s16 + $0x500] sm:$0xff]  ;;  %v476_v16 = vld [vmem:[%s3903_s16 + $0x588] sm:$0xff]  ;;  %v537_v23 = vld [vmem:[%s3903_s16 + $0x770] sm:$0xff] }
  0x7c   : > { %2037 = vmatpush.msra.mxu2 %v473_v17  ;;  %2056 = vmatpush.msra.mxu3 %v490_v18  ;;  %v506_v17 = vld [vmem:[%s3903_s16 + $0x678] sm:$0xff] }
  0x7d   : > { %1998 = vmatpush.msra.mxu0 %v440_v19  ;;  %2017 = vmatpush.msra.mxu1 %v457_v20  ;;  %v538_v18 = vld [vmem:[%s3903_s16 + $0x778] sm:$0xff]  ;;  %v443_v19 = vld [vmem:[%s3903_s16 + $0x480] sm:$0xff] }
  0x7e   : > { %2038 = vmatpush.msra.mxu2 %v472_v21  ;;  %2057 = vmatpush.msra.mxu3 %v489_v22  ;;  %v475_v20 = vld [vmem:[%s3903_s16 + $0x580] sm:$0xff]  ;;  %v505_v21 = vld [vmem:[%s3903_s16 + $0x670] sm:$0xff]  ;;  %v522_v22 = vld [vmem:[%s3903_s16 + $0x6f8] sm:$0xff] }
  0x7f   : > { %1972 = vmatmul.f32.vlgmr.msrb.gmra.mxu2 %v4040_v57  ;;  %1999 = vmatpush.msra.mxu0 %v439_v24  ;;  %v432_v57 = vld [vmem:[%s3903_s16 + $0x428] sm:$0xff]  ;;  %v554_v24 = vld [vmem:[%s3903_s16 + $0x7f8] sm:$0xff] }
  0x80   : > { %2018 = vmatpush.msra.mxu1 %v456_v25  ;;  %2039 = vmatpush.msra.mxu2 %v471_v26  ;;  %v504_v25 = vld [vmem:[%s3903_s16 + $0x668] sm:$0xff]  ;;  %v521_v26 = vld [vmem:[%s3903_s16 + $0x6f0] sm:$0xff] }
  0x81   : > { %2058 = vmatpush.msra.mxu3 %v488_v27  ;;  %1932 = vmatmul.f32.vlgmr.msrb.gmra.mxu0 %v4042_v58  ;;  %v449_v58 = vld [vmem:[%s3903_s16 + $0x4b0] sm:$0xff]  ;;  %v536_v27 = vld [vmem:[%s3903_s16 + $0x768] sm:$0xff] }
  0x82   : > { %1992 = vmatmul.f32.vlgmr.msrb.gmra.mxu3 %v4044_v59  ;;  %2000 = vmatpush.msra.mxu0 %v438_v28  ;;  %v464_v59 = vld [vmem:[%s3903_s16 + $0x528] sm:$0xff]  ;;  %v553_v28 = vld [vmem:[%s3903_s16 + $0x7f0] sm:$0xff] }
  0x83   : > { %2019 = vmatpush.msra.mxu1 %v455_v29  ;;  %2040 = vmatpush.msra.mxu2 %v470_v30  ;;  %v503_v29 = vld [vmem:[%s3903_s16 + $0x660] sm:$0xff]  ;;  %v4153_v30 = vld.sshfl [vmem:[#allocation1 + $0x20] sm:$0xff pattern:$0x73625140] }
  0x84   : > { %2059 = vmatpush.msra.mxu3 %v487_v31  ;;  %1952 = vmatmul.f32.vlgmr.msrb.gmra.mxu1 %v4046_v60  ;;  %v481_v60 = vld [vmem:[%s3903_s16 + $0x5b0] sm:$0xff]  ;;  %v4155_v31 = vld.sshfl [vmem:[#allocation1 + $0x30] sm:$0xff pattern:$0x73625140] }
  0x85   : > { %2001 = vmatpush.msra.mxu0 %v437_v32  ;;  %2020 = vmatpush.msra.mxu1 %v454_v33  ;;  %v4157_v32 = vld.sshfl [vmem:[#allocation1 + $0x28] sm:$0xff pattern:$0x73625140]  ;;  %v520_v33 = vld [vmem:[%s3903_s16 + $0x6e8] sm:$0xff] }
  0x86   : > { %2041 = vmatpush.msra.mxu2 %v469_v34  ;;  %2060 = vmatpush.msra.mxu3 %v486_v35  ;;  %v283_v34 = vld [vmem:[%s3917_s19 + $0x28] sm:$0xff]  ;;  %v4161_v35 = vld.sshfl [vmem:[#allocation1 + $0x38] sm:$0xff pattern:$0x73625140] }
  0x87   : > { %2002 = vmatpush.msra.mxu0 %v436_v36  ;;  %2021 = vmatpush.msra.mxu1 %v453_v37  ;;  %v535_v36 = vld [vmem:[%s3903_s16 + $0x760] sm:$0xff]  ;;  %v552_v37 = vld [vmem:[%s3903_s16 + $0x7e8] sm:$0xff]  ;;  %1670 = vst [vmem:[#allocation1 + $0x20] ss:$4 sm:$0xff] %v283_v34  ;;  %v617_v34 = vld [vmem:[%s3903_s16 + $0x9f0] sm:$0xff] }
  0x88   : > { %2042 = vmatpush.msra.mxu2 %v468_v43  ;;  %2061 = vmatpush.msra.mxu3 %v485_v44  ;;  %v518_v43 = vld [vmem:[%s3903_s16 + $0x6d8] sm:$0xff]  ;;  %v533_v44 = vld [vmem:[%s3903_s16 + $0x750] sm:$0xff] }
  0x89   : > { %2003 = vmatpush.msra.mxu0 %v435_v45  ;;  %2022 = vmatpush.msra.mxu1 %v452_v46  ;;  %v550_v45 = vld [vmem:[%s3903_s16 + $0x7d8] sm:$0xff]  ;;  %v500_v46 = vld [vmem:[%s3903_s16 + $0x648] sm:$0xff] }
  0x8a   : > { %2043 = vmatpush.msra.mxu2 %v467_v47  ;;  %2062 = vmatpush.msra.mxu3 %v484_v48  ;;  %v517_v47 = vld [vmem:[%s3903_s16 + $0x6d0] sm:$0xff]  ;;  %v532_v48 = vld [vmem:[%s3903_s16 + $0x748] sm:$0xff] }
  0x8b   : > { %2004 = vmatpush.msra.mxu0 %v434_v49  ;;  %2023 = vmatpush.msra.mxu1 %v451_v50  ;;  %v549_v49 = vld [vmem:[%s3903_s16 + $0x7d0] sm:$0xff]  ;;  %v499_v50 = vld [vmem:[%s3903_s16 + $0x640] sm:$0xff] }
  0x8c   : > { %2044 = vmatpush.msra.mxu2 %v466_v51  ;;  %2063 = vmatpush.msra.mxu3 %v483_v52  ;;  %v516_v51 = vld [vmem:[%s3903_s16 + $0x6c8] sm:$0xff]  ;;  %v531_v52 = vld [vmem:[%s3903_s16 + $0x740] sm:$0xff] }
  0x8d   : > { %2005 = vmatpush.msra.mxu0 %v433_v53  ;;  %2024 = vmatpush.msra.mxu1 %v450_v54  ;;  %v548_v53 = vld [vmem:[%s3903_s16 + $0x7c8] sm:$0xff]  ;;  %v498_v54 = vld [vmem:[%s3903_s16 + $0x638] sm:$0xff] }
  0x8e   : > { %2045 = vmatpush.msra.mxu2 %v465_v55  ;;  %2064 = vmatpush.msra.mxu3 %v482_v56  ;;  %v515_v55 = vld [vmem:[%s3903_s16 + $0x6c0] sm:$0xff]  ;;  %v530_v56 = vld [vmem:[%s3903_s16 + $0x738] sm:$0xff] }
  0x8f   : > { %2006 = vmatpush.msra.mxu0 %v432_v57  ;;  %2025 = vmatpush.msra.mxu1 %v449_v58  ;;  %v547_v57 = vld [vmem:[%s3903_s16 + $0x7c0] sm:$0xff]  ;;  %v497_v58 = vld [vmem:[%s3903_s16 + $0x630] sm:$0xff] }
  0x90   : > { %2046 = vmatpush.msra.mxu2 %v464_v59  ;;  %2065 = vmatpush.msra.mxu3 %v481_v60  ;;  %v514_v59 = vld [vmem:[%s3903_s16 + $0x6b8] sm:$0xff]  ;;  %v529_v60 = vld [vmem:[%s3903_s16 + $0x730] sm:$0xff] }
  0x91   : > { %2007 = vmatpush.msra.mxu0 %v431_v61  ;;  %2026 = vmatpush.msra.mxu1 %v448_v62  ;;  %v546_v61 = vld [vmem:[%s3903_s16 + $0x7b8] sm:$0xff]  ;;  %v496_v62 = vld [vmem:[%s3903_s16 + $0x628] sm:$0xff] }
  0x92   : > { %2047 = vmatpush.msra.mxu2 %v463_v63  ;;  %2066 = vmatpush.msra.mxu3 %v480_v0  ;;  %v513_v63 = vld [vmem:[%s3903_s16 + $0x6b0] sm:$0xff]  ;;  %v528_v0 = vld [vmem:[%s3903_s16 + $0x728] sm:$0xff] }
  0x93   : > { %2008 = vmatpush.msra.mxu0 %v430_v1  ;;  %2027 = vmatpush.msra.mxu1 %v447_v2  ;;  %v545_v1 = vld [vmem:[%s3903_s16 + $0x7b0] sm:$0xff]  ;;  %v495_v2 = vld [vmem:[%s3903_s16 + $0x620] sm:$0xff] }
  0x94   : > { %2048 = vmatpush.msra.mxu2 %v462_v3  ;;  %2067 = vmatpush.msra.mxu3 %v479_v4  ;;  %v512_v3 = vld [vmem:[%s3903_s16 + $0x6a8] sm:$0xff]  ;;  %v527_v4 = vld [vmem:[%s3903_s16 + $0x720] sm:$0xff] }
  0x95   : > { %2009 = vmatpush.msra.mxu0 %v429_v5  ;;  %2028 = vmatpush.msra.mxu1 %v446_v6  ;;  %v544_v5 = vld [vmem:[%s3903_s16 + $0x7a8] sm:$0xff]  ;;  %v494_v6 = vld [vmem:[%s3903_s16 + $0x618] sm:$0xff] }
  0x96   : > { %2049 = vmatpush.msra.mxu2 %v461_v7  ;;  %2068 = vmatpush.msra.mxu3 %v478_v8  ;;  %v511_v7 = vld [vmem:[%s3903_s16 + $0x6a0] sm:$0xff]  ;;  %v526_v8 = vld [vmem:[%s3903_s16 + $0x718] sm:$0xff] }
  0x97   : > { %2010 = vmatpush.msra.mxu0 %v428_v9  ;;  %2029 = vmatpush.msra.mxu1 %v445_v10  ;;  %v543_v9 = vld [vmem:[%s3903_s16 + $0x7a0] sm:$0xff]  ;;  %v493_v10 = vld [vmem:[%s3903_s16 + $0x610] sm:$0xff] }
  0x98   : > { %2050 = vmatpush.msra.mxu2 %v460_v11  ;;  %2069 = vmatpush.msra.mxu3 %v477_v12  ;;  %v510_v11 = vld [vmem:[%s3903_s16 + $0x698] sm:$0xff]  ;;  %v525_v12 = vld [vmem:[%s3903_s16 + $0x710] sm:$0xff] }
  0x99   : > { %2011 = vmatpush.msra.mxu0 %v427_v13  ;;  %2030 = vmatpush.msra.mxu1 %v444_v14  ;;  %v542_v13 = vld [vmem:[%s3903_s16 + $0x798] sm:$0xff]  ;;  %v492_v14 = vld [vmem:[%s3903_s16 + $0x608] sm:$0xff] }
  0x9a   : > { %2051 = vmatpush.msra.mxu2 %v459_v15  ;;  %2070 = vmatpush.msra.mxu3 %v476_v16  ;;  %v509_v15 = vld [vmem:[%s3903_s16 + $0x690] sm:$0xff]  ;;  %v524_v16 = vld [vmem:[%s3903_s16 + $0x708] sm:$0xff] }
  0x9b   : > { %2012 = vmatmul.f32.vlgmr.msra.gmra.mxu0 %v4089_v39  ;;  %2052 = vmatmul.f32.vlgmr.msra.gmra.mxu2 %v4091_v40  ;;  %v519_v39 = vld [vmem:[%s3903_s16 + $0x6e0] sm:$0xff]  ;;  %v534_v40 = vld [vmem:[%s3903_s16 + $0x758] sm:$0xff] }
  0x9c   : > { %2076 = vmatpush.msrb.mxu0 %v506_v17  ;;  %2116 = vmatpush.msrb.mxu2 %v538_v18  ;;  %v541_v17 = vld [vmem:[%s3903_s16 + $0x790] sm:$0xff]  ;;  %v491_v18 = vld [vmem:[%s3903_s16 + $0x600] sm:$0xff] }
  0x9d   : > { %2031 = vmatpush.msra.mxu1 %v443_v19  ;;  %2071 = vmatpush.msra.mxu3 %v475_v20  ;;  %v508_v19 = vld [vmem:[%s3903_s16 + $0x688] sm:$0xff]  ;;  %v523_v20 = vld [vmem:[%s3903_s16 + $0x700] sm:$0xff] }
  0x9e   : > { %2032 = vmatmul.f32.vlgmr.msra.gmra.mxu1 %v4094_v41  ;;  %2072 = vmatmul.f32.vlgmr.msra.gmra.mxu3 %v4096_v42  ;;  %v551_v41 = vld [vmem:[%s3903_s16 + $0x7e0] sm:$0xff]  ;;  %v501_v42 = vld [vmem:[%s3903_s16 + $0x650] sm:$0xff] }
  0x9f   : > { %2077 = vmatpush.msrb.mxu0 %v505_v21  ;;  %2096 = vmatpush.msrb.mxu1 %v522_v22  ;;  %v540_v21 = vld [vmem:[%s3903_s16 + $0x788] sm:$0xff]  ;;  %v570_v22 = vld [vmem:[%s3903_s16 + $0x878] sm:$0xff] }
  0xa0   : > { %2117 = vmatpush.msrb.mxu2 %v537_v23  ;;  %2136 = vmatpush.msrb.mxu3 %v554_v24  ;;  %v602_v23 = vld [vmem:[%s3903_s16 + $0x978] sm:$0xff]  ;;  %v507_v24 = vld [vmem:[%s3903_s16 + $0x680] sm:$0xff] }
  0xa1   : > { %2078 = vmatpush.msrb.mxu0 %v504_v25  ;;  %2097 = vmatpush.msrb.mxu1 %v521_v26  ;;  %v539_v25 = vld [vmem:[%s3903_s16 + $0x780] sm:$0xff]  ;;  %v569_v26 = vld [vmem:[%s3903_s16 + $0x870] sm:$0xff] }
  0xa2   : > { %2118 = vmatpush.msrb.mxu2 %v536_v27  ;;  %2137 = vmatpush.msrb.mxu3 %v553_v28  ;;  %v586_v27 = vld [vmem:[%s3903_s16 + $0x8f8] sm:$0xff]  ;;  %v601_v28 = vld [vmem:[%s3903_s16 + $0x970] sm:$0xff] }
  0xa3   : > { %2079 = vmatpush.msrb.mxu0 %v503_v29  ;;  %2098 = vmatpush.msrb.mxu1 %v520_v33  ;;  %v618_v29 = vld [vmem:[%s3903_s16 + $0x9f8] sm:$0xff]  ;;  %v600_v33 = vld [vmem:[%s3903_s16 + $0x968] sm:$0xff] }
  0xa4   : > { %2119 = vmatpush.msrb.mxu2 %v535_v36  ;;  %2138 = vmatpush.msrb.mxu3 %v552_v37  ;;  %v567_v36 = vld [vmem:[%s3903_s16 + $0x860] sm:$0xff]  ;;  %v584_v37 = vld [vmem:[%s3903_s16 + $0x8e8] sm:$0xff] }
  0xa5   : > { %2080 = vmatpush.msrb.mxu0 %v502_v38  ;;  %2099 = vmatpush.msrb.mxu1 %v519_v39  ;;  %v566_v38 = vld [vmem:[%s3903_s16 + $0x858] sm:$0xff]  ;;  %v583_v39 = vld [vmem:[%s3903_s16 + $0x8e0] sm:$0xff] }
  0xa6   : > { %2120 = vmatpush.msrb.mxu2 %v534_v40  ;;  %2139 = vmatpush.msrb.mxu3 %v551_v41  ;;  %v598_v40 = vld [vmem:[%s3903_s16 + $0x958] sm:$0xff]  ;;  %v615_v41 = vld [vmem:[%s3903_s16 + $0x9e0] sm:$0xff] }
  0xa7   : > { %2081 = vmatpush.msrb.mxu0 %v501_v42  ;;  %2100 = vmatpush.msrb.mxu1 %v518_v43  ;;  %v565_v42 = vld [vmem:[%s3903_s16 + $0x850] sm:$0xff]  ;;  %v582_v43 = vld [vmem:[%s3903_s16 + $0x8d8] sm:$0xff] }
  0xa8   : > { %2121 = vmatpush.msrb.mxu2 %v533_v44  ;;  %2140 = vmatpush.msrb.mxu3 %v550_v45  ;;  %v597_v44 = vld [vmem:[%s3903_s16 + $0x950] sm:$0xff]  ;;  %v614_v45 = vld [vmem:[%s3903_s16 + $0x9d8] sm:$0xff] }
  0xa9   : > { %2082 = vmatpush.msrb.mxu0 %v500_v46  ;;  %2101 = vmatpush.msrb.mxu1 %v517_v47  ;;  %v564_v46 = vld [vmem:[%s3903_s16 + $0x848] sm:$0xff]  ;;  %v581_v47 = vld [vmem:[%s3903_s16 + $0x8d0] sm:$0xff] }
  0xaa   : > { %2122 = vmatpush.msrb.mxu2 %v532_v48  ;;  %2141 = vmatpush.msrb.mxu3 %v549_v49  ;;  %v596_v48 = vld [vmem:[%s3903_s16 + $0x948] sm:$0xff]  ;;  %v613_v49 = vld [vmem:[%s3903_s16 + $0x9d0] sm:$0xff] }
  0xab   : > { %2083 = vmatpush.msrb.mxu0 %v499_v50  ;;  %2102 = vmatpush.msrb.mxu1 %v516_v51  ;;  %v563_v50 = vld [vmem:[%s3903_s16 + $0x840] sm:$0xff]  ;;  %v580_v51 = vld [vmem:[%s3903_s16 + $0x8c8] sm:$0xff] }
  0xac   : > { %2123 = vmatpush.msrb.mxu2 %v531_v52  ;;  %2142 = vmatpush.msrb.mxu3 %v548_v53  ;;  %v595_v52 = vld [vmem:[%s3903_s16 + $0x940] sm:$0xff]  ;;  %v612_v53 = vld [vmem:[%s3903_s16 + $0x9c8] sm:$0xff] }
  0xad   : > { %2084 = vmatpush.msrb.mxu0 %v498_v54  ;;  %2103 = vmatpush.msrb.mxu1 %v515_v55  ;;  %v562_v54 = vld [vmem:[%s3903_s16 + $0x838] sm:$0xff]  ;;  %v579_v55 = vld [vmem:[%s3903_s16 + $0x8c0] sm:$0xff] }
  0xae   : > { %2124 = vmatpush.msrb.mxu2 %v530_v56  ;;  %2143 = vmatpush.msrb.mxu3 %v547_v57  ;;  %v594_v56 = vld [vmem:[%s3903_s16 + $0x938] sm:$0xff]  ;;  %v611_v57 = vld [vmem:[%s3903_s16 + $0x9c0] sm:$0xff] }
  0xaf   : > { %2085 = vmatpush.msrb.mxu0 %v497_v58  ;;  %2104 = vmatpush.msrb.mxu1 %v514_v59  ;;  %v561_v58 = vld [vmem:[%s3903_s16 + $0x830] sm:$0xff]  ;;  %v578_v59 = vld [vmem:[%s3903_s16 + $0x8b8] sm:$0xff] }
  0xb0   : > { %2125 = vmatpush.msrb.mxu2 %v529_v60  ;;  %2144 = vmatpush.msrb.mxu3 %v546_v61  ;;  %v593_v60 = vld [vmem:[%s3903_s16 + $0x930] sm:$0xff]  ;;  %v610_v61 = vld [vmem:[%s3903_s16 + $0x9b8] sm:$0xff] }
  0xb1   : > { %2086 = vmatpush.msrb.mxu0 %v496_v62  ;;  %2105 = vmatpush.msrb.mxu1 %v513_v63  ;;  %v560_v62 = vld [vmem:[%s3903_s16 + $0x828] sm:$0xff]  ;;  %v577_v63 = vld [vmem:[%s3903_s16 + $0x8b0] sm:$0xff] }
  0xb2   : > { %2126 = vmatpush.msrb.mxu2 %v528_v0  ;;  %2145 = vmatpush.msrb.mxu3 %v545_v1  ;;  %v592_v0 = vld [vmem:[%s3903_s16 + $0x928] sm:$0xff]  ;;  %v609_v1 = vld [vmem:[%s3903_s16 + $0x9b0] sm:$0xff] }
  0xb3   : > { %2087 = vmatpush.msrb.mxu0 %v495_v2  ;;  %2106 = vmatpush.msrb.mxu1 %v512_v3  ;;  %v559_v2 = vld [vmem:[%s3903_s16 + $0x820] sm:$0xff]  ;;  %v576_v3 = vld [vmem:[%s3903_s16 + $0x8a8] sm:$0xff] }
  0xb4   : > { %2127 = vmatpush.msrb.mxu2 %v527_v4  ;;  %2146 = vmatpush.msrb.mxu3 %v544_v5  ;;  %v591_v4 = vld [vmem:[%s3903_s16 + $0x920] sm:$0xff]  ;;  %v608_v5 = vld [vmem:[%s3903_s16 + $0x9a8] sm:$0xff] }
  0xb5   : > { %2088 = vmatpush.msrb.mxu0 %v494_v6  ;;  %2107 = vmatpush.msrb.mxu1 %v511_v7  ;;  %v558_v6 = vld [vmem:[%s3903_s16 + $0x818] sm:$0xff]  ;;  %v575_v7 = vld [vmem:[%s3903_s16 + $0x8a0] sm:$0xff] }
  0xb6   : > { %2128 = vmatpush.msrb.mxu2 %v526_v8  ;;  %2147 = vmatpush.msrb.mxu3 %v543_v9  ;;  %v590_v8 = vld [vmem:[%s3903_s16 + $0x918] sm:$0xff]  ;;  %v607_v9 = vld [vmem:[%s3903_s16 + $0x9a0] sm:$0xff] }
  0xb7   : > { %2089 = vmatpush.msrb.mxu0 %v493_v10  ;;  %2108 = vmatpush.msrb.mxu1 %v510_v11  ;;  %v557_v10 = vld [vmem:[%s3903_s16 + $0x810] sm:$0xff]  ;;  %v574_v11 = vld [vmem:[%s3903_s16 + $0x898] sm:$0xff] }
  0xb8   : > { %2129 = vmatpush.msrb.mxu2 %v525_v12  ;;  %2148 = vmatpush.msrb.mxu3 %v542_v13  ;;  %v589_v12 = vld [vmem:[%s3903_s16 + $0x910] sm:$0xff]  ;;  %v606_v13 = vld [vmem:[%s3903_s16 + $0x998] sm:$0xff] }
  0xb9   : > { %2090 = vmatpush.msrb.mxu0 %v492_v14  ;;  %2109 = vmatpush.msrb.mxu1 %v509_v15  ;;  %v556_v14 = vld [vmem:[%s3903_s16 + $0x808] sm:$0xff]  ;;  %v573_v15 = vld [vmem:[%s3903_s16 + $0x890] sm:$0xff] }
  0xba   : > { %2130 = vmatpush.msrb.mxu2 %v524_v16  ;;  %2149 = vmatpush.msrb.mxu3 %v541_v17  ;;  %v588_v16 = vld [vmem:[%s3903_s16 + $0x908] sm:$0xff]  ;;  %v605_v17 = vld [vmem:[%s3903_s16 + $0x990] sm:$0xff] }
  0xbb   : > { %2091 = vmatpush.msrb.mxu0 %v491_v18  ;;  %2110 = vmatpush.msrb.mxu1 %v508_v19  ;;  %v555_v18 = vld [vmem:[%s3903_s16 + $0x800] sm:$0xff]  ;;  %v572_v19 = vld [vmem:[%s3903_s16 + $0x888] sm:$0xff] }
  0xbc   : > { %2131 = vmatpush.msrb.mxu2 %v523_v20  ;;  %2150 = vmatpush.msrb.mxu3 %v540_v21  ;;  %v587_v20 = vld [vmem:[%s3903_s16 + $0x900] sm:$0xff]  ;;  %v604_v21 = vld [vmem:[%s3903_s16 + $0x988] sm:$0xff] }
  0xbd   : > { %2092 = vmatmul.f32.vlgmr.msrb.gmra.mxu0 %v4153_v30  ;;  %2132 = vmatmul.f32.vlgmr.msrb.gmra.mxu2 %v4155_v31  ;;  %v568_v30 = vld [vmem:[%s3903_s16 + $0x868] sm:$0xff]  ;;  %v585_v31 = vld [vmem:[%s3903_s16 + $0x8f0] sm:$0xff] }
  0xbe   : > { %2156 = vmatpush.msra.mxu0 %v570_v22  ;;  %2196 = vmatpush.msra.mxu2 %v602_v23  ;;  %v1671_v22 = vld.sshfl [vmem:[#allocation1] sm:$0xff pattern:$0x73625140]  ;;  %v1673_v23 = vld.sshfl [vmem:[#allocation1 + $0x10] sm:$0xff pattern:$0x73625140] }
  0xbf   : > { %2111 = vmatpush.msrb.mxu1 %v507_v24  ;;  %2151 = vmatpush.msrb.mxu3 %v539_v25  ;;  %v634_v24 = vld [vmem:[%s3903_s16 + $0xa78] sm:$0xff] }
  0xc0   : > { %2112 = vmatmul.f32.vlgmr.msrb.gmra.mxu1 %v4157_v32  ;;  %2152 = vmatmul.f32.vlgmr.msrb.gmra.mxu3 %v4161_v35  ;;  %v599_v32 = vld [vmem:[%s3903_s16 + $0x960] sm:$0xff]  ;;  %v616_v35 = vld [vmem:[%s3903_s16 + $0x9e8] sm:$0xff]  ;;  %v666_v25 = vld [vmem:[%s3903_s16 + $0xb78] sm:$0xff] }
  0xc1   : > { %2157 = vmatpush.msra.mxu0 %v569_v26  ;;  %2176 = vmatpush.msra.mxu1 %v586_v27  ;;  %v571_v26 = vld [vmem:[%s3903_s16 + $0x880] sm:$0xff] }
  0xc2   : > { %2197 = vmatpush.msra.mxu2 %v601_v28  ;;  %2216 = vmatpush.msra.mxu3 %v618_v29  ;;  %v603_v27 = vld [vmem:[%s3903_s16 + $0x980] sm:$0xff]  ;;  %v1674_v29 = vld.sshfl [vmem:[#allocation1 + $0x18] sm:$0xff pattern:$0x73625140] }
  0xc3   : > { %2158 = vmatpush.msra.mxu0 %v568_v30  ;;  %2177 = vmatpush.msra.mxu1 %v585_v31  ;;  %v1672_v28 = vld.sshfl [vmem:[#allocation1 + $0x8] sm:$0xff pattern:$0x73625140]  ;;  %v633_v30 = vld [vmem:[%s3903_s16 + $0xa70] sm:$0xff] }
  0xc4   : > { %2198 = vmatpush.msra.mxu2 %v600_v33  ;;  %2217 = vmatpush.msra.mxu3 %v617_v34  ;;  %v650_v31 = vld [vmem:[%s3903_s16 + $0xaf8] sm:$0xff]  ;;  %v665_v33 = vld [vmem:[%s3903_s16 + $0xb70] sm:$0xff] }
  0xc5   : > { %2159 = vmatpush.msra.mxu0 %v567_v36  ;;  %2178 = vmatpush.msra.mxu1 %v584_v37  ;;  %v682_v34 = vld [vmem:[%s3903_s16 + $0xbf8] sm:$0xff]  ;;  %v632_v36 = vld [vmem:[%s3903_s16 + $0xa68] sm:$0xff]  ;;  %v649_v37 = vld [vmem:[%s3903_s16 + $0xaf0] sm:$0xff] }
  0xc6   : > { %2199 = vmatpush.msra.mxu2 %v599_v32  ;;  %2218 = vmatpush.msra.mxu3 %v616_v35  ;;  %v664_v32 = vld [vmem:[%s3903_s16 + $0xb68] sm:$0xff]  ;;  %v681_v35 = vld [vmem:[%s3903_s16 + $0xbf0] sm:$0xff] }
  0xc7   : > { %2160 = vmatpush.msra.mxu0 %v566_v38  ;;  %2179 = vmatpush.msra.mxu1 %v583_v39  ;;  %v631_v38 = vld [vmem:[%s3903_s16 + $0xa60] sm:$0xff]  ;;  %v648_v39 = vld [vmem:[%s3903_s16 + $0xae8] sm:$0xff] }
  0xc8   : > { %2200 = vmatpush.msra.mxu2 %v598_v40  ;;  %2219 = vmatpush.msra.mxu3 %v615_v41  ;;  %v663_v40 = vld [vmem:[%s3903_s16 + $0xb60] sm:$0xff]  ;;  %v680_v41 = vld [vmem:[%s3903_s16 + $0xbe8] sm:$0xff] }
  0xc9   : > { %2161 = vmatpush.msra.mxu0 %v565_v42  ;;  %2180 = vmatpush.msra.mxu1 %v582_v43  ;;  %v630_v42 = vld [vmem:[%s3903_s16 + $0xa58] sm:$0xff]  ;;  %v647_v43 = vld [vmem:[%s3903_s16 + $0xae0] sm:$0xff] }
  0xca   : > { %2201 = vmatpush.msra.mxu2 %v597_v44  ;;  %2220 = vmatpush.msra.mxu3 %v614_v45  ;;  %v662_v44 = vld [vmem:[%s3903_s16 + $0xb58] sm:$0xff]  ;;  %v679_v45 = vld [vmem:[%s3903_s16 + $0xbe0] sm:$0xff] }
  0xcb   : > { %2162 = vmatpush.msra.mxu0 %v564_v46  ;;  %2181 = vmatpush.msra.mxu1 %v581_v47  ;;  %v629_v46 = vld [vmem:[%s3903_s16 + $0xa50] sm:$0xff]  ;;  %v646_v47 = vld [vmem:[%s3903_s16 + $0xad8] sm:$0xff] }
  0xcc   : > { %2202 = vmatpush.msra.mxu2 %v596_v48  ;;  %2221 = vmatpush.msra.mxu3 %v613_v49  ;;  %v661_v48 = vld [vmem:[%s3903_s16 + $0xb50] sm:$0xff]  ;;  %v678_v49 = vld [vmem:[%s3903_s16 + $0xbd8] sm:$0xff] }
  0xcd   : > { %2163 = vmatpush.msra.mxu0 %v563_v50  ;;  %2182 = vmatpush.msra.mxu1 %v580_v51  ;;  %v628_v50 = vld [vmem:[%s3903_s16 + $0xa48] sm:$0xff]  ;;  %v645_v51 = vld [vmem:[%s3903_s16 + $0xad0] sm:$0xff] }
  0xce   : > { %2203 = vmatpush.msra.mxu2 %v595_v52  ;;  %2222 = vmatpush.msra.mxu3 %v612_v53  ;;  %v660_v52 = vld [vmem:[%s3903_s16 + $0xb48] sm:$0xff]  ;;  %v677_v53 = vld [vmem:[%s3903_s16 + $0xbd0] sm:$0xff] }
  0xcf   : > { %2164 = vmatpush.msra.mxu0 %v562_v54  ;;  %2183 = vmatpush.msra.mxu1 %v579_v55  ;;  %v627_v54 = vld [vmem:[%s3903_s16 + $0xa40] sm:$0xff]  ;;  %v644_v55 = vld [vmem:[%s3903_s16 + $0xac8] sm:$0xff] }
  0xd0   : > { %2204 = vmatpush.msra.mxu2 %v594_v56  ;;  %2223 = vmatpush.msra.mxu3 %v611_v57  ;;  %v659_v56 = vld [vmem:[%s3903_s16 + $0xb40] sm:$0xff]  ;;  %v676_v57 = vld [vmem:[%s3903_s16 + $0xbc8] sm:$0xff] }
  0xd1   : > { %2165 = vmatpush.msra.mxu0 %v561_v58  ;;  %2184 = vmatpush.msra.mxu1 %v578_v59  ;;  %v626_v58 = vld [vmem:[%s3903_s16 + $0xa38] sm:$0xff]  ;;  %v643_v59 = vld [vmem:[%s3903_s16 + $0xac0] sm:$0xff] }
  0xd2   : > { %2205 = vmatpush.msra.mxu2 %v593_v60  ;;  %2224 = vmatpush.msra.mxu3 %v610_v61  ;;  %v658_v60 = vld [vmem:[%s3903_s16 + $0xb38] sm:$0xff]  ;;  %v675_v61 = vld [vmem:[%s3903_s16 + $0xbc0] sm:$0xff] }
  0xd3   : > { %2166 = vmatpush.msra.mxu0 %v560_v62  ;;  %2185 = vmatpush.msra.mxu1 %v577_v63  ;;  %v625_v62 = vld [vmem:[%s3903_s16 + $0xa30] sm:$0xff]  ;;  %v642_v63 = vld [vmem:[%s3903_s16 + $0xab8] sm:$0xff] }
  0xd4   : > { %2206 = vmatpush.msra.mxu2 %v592_v0  ;;  %2225 = vmatpush.msra.mxu3 %v609_v1  ;;  %v657_v0 = vld [vmem:[%s3903_s16 + $0xb30] sm:$0xff]  ;;  %v674_v1 = vld [vmem:[%s3903_s16 + $0xbb8] sm:$0xff] }
  0xd5   : > { %2167 = vmatpush.msra.mxu0 %v559_v2  ;;  %2186 = vmatpush.msra.mxu1 %v576_v3  ;;  %v624_v2 = vld [vmem:[%s3903_s16 + $0xa28] sm:$0xff]  ;;  %v641_v3 = vld [vmem:[%s3903_s16 + $0xab0] sm:$0xff] }
  0xd6   : > { %2207 = vmatpush.msra.mxu2 %v591_v4  ;;  %2226 = vmatpush.msra.mxu3 %v608_v5  ;;  %v656_v4 = vld [vmem:[%s3903_s16 + $0xb28] sm:$0xff]  ;;  %v673_v5 = vld [vmem:[%s3903_s16 + $0xbb0] sm:$0xff] }
  0xd7   : > { %2168 = vmatpush.msra.mxu0 %v558_v6  ;;  %2187 = vmatpush.msra.mxu1 %v575_v7  ;;  %v623_v6 = vld [vmem:[%s3903_s16 + $0xa20] sm:$0xff]  ;;  %v640_v7 = vld [vmem:[%s3903_s16 + $0xaa8] sm:$0xff] }
  0xd8   : > { %2208 = vmatpush.msra.mxu2 %v590_v8  ;;  %2227 = vmatpush.msra.mxu3 %v607_v9  ;;  %v655_v8 = vld [vmem:[%s3903_s16 + $0xb20] sm:$0xff]  ;;  %v672_v9 = vld [vmem:[%s3903_s16 + $0xba8] sm:$0xff] }
  0xd9   : > { %2169 = vmatpush.msra.mxu0 %v557_v10  ;;  %2188 = vmatpush.msra.mxu1 %v574_v11  ;;  %v622_v10 = vld [vmem:[%s3903_s16 + $0xa18] sm:$0xff]  ;;  %v639_v11 = vld [vmem:[%s3903_s16 + $0xaa0] sm:$0xff] }
  0xda   : > { %2209 = vmatpush.msra.mxu2 %v589_v12  ;;  %2228 = vmatpush.msra.mxu3 %v606_v13  ;;  %v654_v12 = vld [vmem:[%s3903_s16 + $0xb18] sm:$0xff]  ;;  %v671_v13 = vld [vmem:[%s3903_s16 + $0xba0] sm:$0xff] }
  0xdb   : > { %2170 = vmatpush.msra.mxu0 %v556_v14  ;;  %2189 = vmatpush.msra.mxu1 %v573_v15  ;;  %v621_v14 = vld [vmem:[%s3903_s16 + $0xa10] sm:$0xff]  ;;  %v638_v15 = vld [vmem:[%s3903_s16 + $0xa98] sm:$0xff] }
  0xdc   : > { %2210 = vmatpush.msra.mxu2 %v588_v16  ;;  %2229 = vmatpush.msra.mxu3 %v605_v17  ;;  %v653_v16 = vld [vmem:[%s3903_s16 + $0xb10] sm:$0xff]  ;;  %v670_v17 = vld [vmem:[%s3903_s16 + $0xb98] sm:$0xff] }
  0xdd   : > { %2171 = vmatpush.msra.mxu0 %v555_v18  ;;  %2190 = vmatpush.msra.mxu1 %v572_v19  ;;  %v620_v18 = vld [vmem:[%s3903_s16 + $0xa08] sm:$0xff]  ;;  %v637_v19 = vld [vmem:[%s3903_s16 + $0xa90] sm:$0xff] }
  0xde   : > { %2211 = vmatpush.msra.mxu2 %v587_v20  ;;  %2230 = vmatpush.msra.mxu3 %v604_v21  ;;  %v284_v20 = vld [vmem:[%s3917_s19 + $0x30] sm:$0xff] }
  0xdf   : > { %2172 = vmatmul.f32.vlgmr.msra.gmra.mxu0 %v1671_v22  ;;  %2212 = vmatmul.f32.vlgmr.msra.gmra.mxu2 %v1673_v23  ;;  %v652_v21 = vld [vmem:[%s3903_s16 + $0xb08] sm:$0xff]  ;;  %v669_v22 = vld [vmem:[%s3903_s16 + $0xb90] sm:$0xff]  ;;  %1679 = vst [vmem:[#allocation1] ss:$4 sm:$0xff] %v284_v20  ;;  %v619_v23 = vld [vmem:[%s3903_s16 + $0xa00] sm:$0xff] }
  0xe0   : > { %2236 = vmatpush.msrb.mxu0 %v634_v24  ;;  %2276 = vmatpush.msrb.mxu2 %v666_v25  ;;  %v636_v24 = vld [vmem:[%s3903_s16 + $0xa88] sm:$0xff]  ;;  %v651_v25 = vld [vmem:[%s3903_s16 + $0xb00] sm:$0xff]  ;;  %v702_v20 = vld [vmem:[%s3903_s16 + $0xc98] sm:$0xff] }
  0xe1   : > { %2191 = vmatpush.msra.mxu1 %v571_v26  ;;  %2231 = vmatpush.msra.mxu3 %v603_v27  ;;  %v668_v26 = vld [vmem:[%s3903_s16 + $0xb88] sm:$0xff]  ;;  %v1675_v27 = vld.sshfl [vmem:[#allocation1 + $0x20] sm:$0xff pattern:$0x73625140] }
  0xe2   : > { %2192 = vmatmul.f32.vlgmr.msra.gmra.mxu1 %v1672_v28  ;;  %2232 = vmatmul.f32.vlgmr.msra.gmra.mxu3 %v1674_v29  ;;  %v1677_v28 = vld.sshfl [vmem:[#allocation1 + $0x30] sm:$0xff pattern:$0x73625140]  ;;  %v698_v29 = vld [vmem:[%s3903_s16 + $0xc78] sm:$0xff] }
  0xe3   : > { %2237 = vmatpush.msrb.mxu0 %v633_v30  ;;  %2256 = vmatpush.msrb.mxu1 %v650_v31  ;;  %v730_v30 = vld [vmem:[%s3903_s16 + $0xd78] sm:$0xff]  ;;  %v635_v31 = vld [vmem:[%s3903_s16 + $0xa80] sm:$0xff] }
  0xe4   : > { %2277 = vmatpush.msrb.mxu2 %v665_v33  ;;  %2296 = vmatpush.msrb.mxu3 %v682_v34  ;;  %v667_v33 = vld [vmem:[%s3903_s16 + $0xb80] sm:$0xff] }
  0xe5   : > { %2238 = vmatpush.msrb.mxu0 %v632_v36  ;;  %2257 = vmatpush.msrb.mxu1 %v649_v37  ;;  %v1676_v34 = vld.sshfl [vmem:[#allocation1 + $0x28] sm:$0xff pattern:$0x73625140]  ;;  %v1678_v36 = vld.sshfl [vmem:[#allocation1 + $0x38] sm:$0xff pattern:$0x73625140] }
  0xe6   : > { %2278 = vmatpush.msrb.mxu2 %v664_v32  ;;  %2297 = vmatpush.msrb.mxu3 %v681_v35  ;;  %v697_v37 = vld [vmem:[%s3903_s16 + $0xc70] sm:$0xff]  ;;  %v714_v32 = vld [vmem:[%s3903_s16 + $0xcf8] sm:$0xff] }
  0xe7   : > { %2239 = vmatpush.msrb.mxu0 %v631_v38  ;;  %2258 = vmatpush.msrb.mxu1 %v648_v39  ;;  %v729_v35 = vld [vmem:[%s3903_s16 + $0xd70] sm:$0xff]  ;;  %v746_v38 = vld [vmem:[%s3903_s16 + $0xdf8] sm:$0xff]  ;;  %v696_v39 = vld [vmem:[%s3903_s16 + $0xc68] sm:$0xff] }
  0xe8   : > { %2279 = vmatpush.msrb.mxu2 %v663_v40  ;;  %2298 = vmatpush.msrb.mxu3 %v680_v41  ;;  %v713_v40 = vld [vmem:[%s3903_s16 + $0xcf0] sm:$0xff]  ;;  %v728_v41 = vld [vmem:[%s3903_s16 + $0xd68] sm:$0xff] }
  0xe9   : > { %2240 = vmatpush.msrb.mxu0 %v630_v42  ;;  %2259 = vmatpush.msrb.mxu1 %v647_v43  ;;  %v745_v42 = vld [vmem:[%s3903_s16 + $0xdf0] sm:$0xff]  ;;  %v695_v43 = vld [vmem:[%s3903_s16 + $0xc60] sm:$0xff] }
  0xea   : > { %2280 = vmatpush.msrb.mxu2 %v662_v44  ;;  %2299 = vmatpush.msrb.mxu3 %v679_v45  ;;  %v712_v44 = vld [vmem:[%s3903_s16 + $0xce8] sm:$0xff]  ;;  %v727_v45 = vld [vmem:[%s3903_s16 + $0xd60] sm:$0xff] }
  0xeb   : > { %2241 = vmatpush.msrb.mxu0 %v629_v46  ;;  %2260 = vmatpush.msrb.mxu1 %v646_v47  ;;  %v744_v46 = vld [vmem:[%s3903_s16 + $0xde8] sm:$0xff]  ;;  %v694_v47 = vld [vmem:[%s3903_s16 + $0xc58] sm:$0xff] }
  0xec   : > { %2281 = vmatpush.msrb.mxu2 %v661_v48  ;;  %2300 = vmatpush.msrb.mxu3 %v678_v49  ;;  %v711_v48 = vld [vmem:[%s3903_s16 + $0xce0] sm:$0xff]  ;;  %v726_v49 = vld [vmem:[%s3903_s16 + $0xd58] sm:$0xff] }
  0xed   : > { %2242 = vmatpush.msrb.mxu0 %v628_v50  ;;  %2261 = vmatpush.msrb.mxu1 %v645_v51  ;;  %v743_v50 = vld [vmem:[%s3903_s16 + $0xde0] sm:$0xff]  ;;  %v693_v51 = vld [vmem:[%s3903_s16 + $0xc50] sm:$0xff] }
  0xee   : > { %2282 = vmatpush.msrb.mxu2 %v660_v52  ;;  %2301 = vmatpush.msrb.mxu3 %v677_v53  ;;  %v710_v52 = vld [vmem:[%s3903_s16 + $0xcd8] sm:$0xff]  ;;  %v725_v53 = vld [vmem:[%s3903_s16 + $0xd50] sm:$0xff] }
  0xef   : > { %2243 = vmatpush.msrb.mxu0 %v627_v54  ;;  %2262 = vmatpush.msrb.mxu1 %v644_v55  ;;  %v742_v54 = vld [vmem:[%s3903_s16 + $0xdd8] sm:$0xff]  ;;  %v692_v55 = vld [vmem:[%s3903_s16 + $0xc48] sm:$0xff] }
  0xf0   : > { %2283 = vmatpush.msrb.mxu2 %v659_v56  ;;  %2302 = vmatpush.msrb.mxu3 %v676_v57  ;;  %v709_v56 = vld [vmem:[%s3903_s16 + $0xcd0] sm:$0xff]  ;;  %v724_v57 = vld [vmem:[%s3903_s16 + $0xd48] sm:$0xff] }
  0xf1   : > { %2244 = vmatpush.msrb.mxu0 %v626_v58  ;;  %2263 = vmatpush.msrb.mxu1 %v643_v59  ;;  %v741_v58 = vld [vmem:[%s3903_s16 + $0xdd0] sm:$0xff]  ;;  %v691_v59 = vld [vmem:[%s3903_s16 + $0xc40] sm:$0xff] }
  0xf2   : > { %2284 = vmatpush.msrb.mxu2 %v658_v60  ;;  %2303 = vmatpush.msrb.mxu3 %v675_v61  ;;  %v708_v60 = vld [vmem:[%s3903_s16 + $0xcc8] sm:$0xff]  ;;  %v723_v61 = vld [vmem:[%s3903_s16 + $0xd40] sm:$0xff] }
  0xf3   : > { %2245 = vmatpush.msrb.mxu0 %v625_v62  ;;  %2264 = vmatpush.msrb.mxu1 %v642_v63  ;;  %v740_v62 = vld [vmem:[%s3903_s16 + $0xdc8] sm:$0xff]  ;;  %v690_v63 = vld [vmem:[%s3903_s16 + $0xc38] sm:$0xff] }
  0xf4   : > { %2285 = vmatpush.msrb.mxu2 %v657_v0  ;;  %2304 = vmatpush.msrb.mxu3 %v674_v1  ;;  %v707_v0 = vld [vmem:[%s3903_s16 + $0xcc0] sm:$0xff]  ;;  %v722_v1 = vld [vmem:[%s3903_s16 + $0xd38] sm:$0xff] }
  0xf5   : > { %2246 = vmatpush.msrb.mxu0 %v624_v2  ;;  %2265 = vmatpush.msrb.mxu1 %v641_v3  ;;  %v739_v2 = vld [vmem:[%s3903_s16 + $0xdc0] sm:$0xff]  ;;  %v689_v3 = vld [vmem:[%s3903_s16 + $0xc30] sm:$0xff] }
  0xf6   : > { %2286 = vmatpush.msrb.mxu2 %v656_v4  ;;  %2305 = vmatpush.msrb.mxu3 %v673_v5  ;;  %v706_v4 = vld [vmem:[%s3903_s16 + $0xcb8] sm:$0xff]  ;;  %v721_v5 = vld [vmem:[%s3903_s16 + $0xd30] sm:$0xff] }
  0xf7   : > { %2247 = vmatpush.msrb.mxu0 %v623_v6  ;;  %2266 = vmatpush.msrb.mxu1 %v640_v7  ;;  %v738_v6 = vld [vmem:[%s3903_s16 + $0xdb8] sm:$0xff]  ;;  %v688_v7 = vld [vmem:[%s3903_s16 + $0xc28] sm:$0xff] }
  0xf8   : > { %2287 = vmatpush.msrb.mxu2 %v655_v8  ;;  %2306 = vmatpush.msrb.mxu3 %v672_v9  ;;  %v705_v8 = vld [vmem:[%s3903_s16 + $0xcb0] sm:$0xff]  ;;  %v720_v9 = vld [vmem:[%s3903_s16 + $0xd28] sm:$0xff] }
  0xf9   : > { %2248 = vmatpush.msrb.mxu0 %v622_v10  ;;  %2267 = vmatpush.msrb.mxu1 %v639_v11  ;;  %v737_v10 = vld [vmem:[%s3903_s16 + $0xdb0] sm:$0xff]  ;;  %v687_v11 = vld [vmem:[%s3903_s16 + $0xc20] sm:$0xff] }
  0xfa   : > { %2288 = vmatpush.msrb.mxu2 %v654_v12  ;;  %2307 = vmatpush.msrb.mxu3 %v671_v13  ;;  %v704_v12 = vld [vmem:[%s3903_s16 + $0xca8] sm:$0xff]  ;;  %v719_v13 = vld [vmem:[%s3903_s16 + $0xd20] sm:$0xff] }
  0xfb   : > { %2249 = vmatpush.msrb.mxu0 %v621_v14  ;;  %2268 = vmatpush.msrb.mxu1 %v638_v15  ;;  %v736_v14 = vld [vmem:[%s3903_s16 + $0xda8] sm:$0xff]  ;;  %v686_v15 = vld [vmem:[%s3903_s16 + $0xc18] sm:$0xff] }
  0xfc   : > { %2289 = vmatpush.msrb.mxu2 %v653_v16  ;;  %2308 = vmatpush.msrb.mxu3 %v670_v17  ;;  %v703_v16 = vld [vmem:[%s3903_s16 + $0xca0] sm:$0xff]  ;;  %v718_v17 = vld [vmem:[%s3903_s16 + $0xd18] sm:$0xff] }
  0xfd   : > { %2250 = vmatpush.msrb.mxu0 %v620_v18  ;;  %2269 = vmatpush.msrb.mxu1 %v637_v19  ;;  %v735_v18 = vld [vmem:[%s3903_s16 + $0xda0] sm:$0xff]  ;;  %v685_v19 = vld [vmem:[%s3903_s16 + $0xc10] sm:$0xff] }
  0xfe   : > { %2290 = vmatpush.msrb.mxu2 %v652_v21  ;;  %2309 = vmatpush.msrb.mxu3 %v669_v22  ;;  %v717_v21 = vld [vmem:[%s3903_s16 + $0xd10] sm:$0xff]  ;;  %v734_v22 = vld [vmem:[%s3903_s16 + $0xd98] sm:$0xff] }
  0xff   : > { %2251 = vmatpush.msrb.mxu0 %v619_v23  ;;  %2270 = vmatpush.msrb.mxu1 %v636_v24  ;;  %v684_v23 = vld [vmem:[%s3903_s16 + $0xc08] sm:$0xff]  ;;  %v701_v24 = vld [vmem:[%s3903_s16 + $0xc90] sm:$0xff] }
 0x100   : > { %2291 = vmatpush.msrb.mxu2 %v651_v25  ;;  %2310 = vmatpush.msrb.mxu3 %v668_v26  ;;  %v285_v25 = vld [vmem:[%s3917_s19 + $0x38] sm:$0xff] }
 0x101   : > { %2252 = vmatmul.f32.vlgmr.msrb.gmra.mxu0 %v1675_v27  ;;  %2292 = vmatmul.f32.vlgmr.msrb.gmra.mxu2 %v1677_v28  ;;  %v716_v26 = vld [vmem:[%s3903_s16 + $0xd08] sm:$0xff]  ;;  %v733_v27 = vld [vmem:[%s3903_s16 + $0xd90] sm:$0xff]  ;;  %1680 = vst [vmem:[#allocation1 + $0x20] ss:$4 sm:$0xff] %v285_v25  ;;  %v683_v28 = vld [vmem:[%s3903_s16 + $0xc00] sm:$0xff] }
 0x102   : > { %2316 = vmatpush.msra.mxu0 %v698_v29  ;;  %2356 = vmatpush.msra.mxu2 %v730_v30  ;;  %v700_v29 = vld [vmem:[%s3903_s16 + $0xc88] sm:$0xff]  ;;  %v715_v30 = vld [vmem:[%s3903_s16 + $0xd00] sm:$0xff]  ;;  %v766_v25 = vld [vmem:[%s3903_s16 + $0xe98] sm:$0xff] }
 0x103   : > { %2271 = vmatpush.msrb.mxu1 %v635_v31  ;;  %2311 = vmatpush.msrb.mxu3 %v667_v33  ;;  %v732_v31 = vld [vmem:[%s3903_s16 + $0xd88] sm:$0xff]  ;;  %v1681_v33 = vld.sshfl [vmem:[#allocation1] sm:$0xff pattern:$0x73625140] }
 0x104   : > { %2272 = vmatmul.f32.vlgmr.msrb.gmra.mxu1 %v1676_v34  ;;  %2312 = vmatmul.f32.vlgmr.msrb.gmra.mxu3 %v1678_v36  ;;  %v1683_v34 = vld.sshfl [vmem:[#allocation1 + $0x10] sm:$0xff pattern:$0x73625140]  ;;  %v762_v36 = vld [vmem:[%s3903_s16 + $0xe78] sm:$0xff] }
 0x105   : > { %2317 = vmatpush.msra.mxu0 %v697_v37  ;;  %2336 = vmatpush.msra.mxu1 %v714_v32  ;;  %v794_v37 = vld [vmem:[%s3903_s16 + $0xf78] sm:$0xff]  ;;  %v699_v32 = vld [vmem:[%s3903_s16 + $0xc80] sm:$0xff] }
 0x106   : > { %2357 = vmatpush.msra.mxu2 %v729_v35  ;;  %2376 = vmatpush.msra.mxu3 %v746_v38  ;;  %v731_v35 = vld [vmem:[%s3903_s16 + $0xd80] sm:$0xff] }
 0x107   : > { %2318 = vmatpush.msra.mxu0 %v696_v39  ;;  %2337 = vmatpush.msra.mxu1 %v713_v40  ;;  %v1682_v38 = vld.sshfl [vmem:[#allocation1 + $0x8] sm:$0xff pattern:$0x73625140]  ;;  %v1684_v39 = vld.sshfl [vmem:[#allocation1 + $0x18] sm:$0xff pattern:$0x73625140] }
 0x108   : > { %2358 = vmatpush.msra.mxu2 %v728_v41  ;;  %2377 = vmatpush.msra.mxu3 %v745_v42  ;;  %v761_v40 = vld [vmem:[%s3903_s16 + $0xe70] sm:$0xff]  ;;  %v778_v41 = vld [vmem:[%s3903_s16 + $0xef8] sm:$0xff] }
 0x109   : > { %2319 = vmatpush.msra.mxu0 %v695_v43  ;;  %2338 = vmatpush.msra.mxu1 %v712_v44  ;;  %v793_v42 = vld [vmem:[%s3903_s16 + $0xf70] sm:$0xff]  ;;  %v810_v43 = vld [vmem:[%s3903_s16 + $0xff8] sm:$0xff]  ;;  %v760_v44 = vld [vmem:[%s3903_s16 + $0xe68] sm:$0xff] }
 0x10a   : > { %2359 = vmatpush.msra.mxu2 %v727_v45  ;;  %2378 = vmatpush.msra.mxu3 %v744_v46  ;;  %v777_v45 = vld [vmem:[%s3903_s16 + $0xef0] sm:$0xff]  ;;  %v792_v46 = vld [vmem:[%s3903_s16 + $0xf68] sm:$0xff] }
 0x10b   : > { %2320 = vmatpush.msra.mxu0 %v694_v47  ;;  %2339 = vmatpush.msra.mxu1 %v711_v48  ;;  %v809_v47 = vld [vmem:[%s3903_s16 + $0xff0] sm:$0xff]  ;;  %v759_v48 = vld [vmem:[%s3903_s16 + $0xe60] sm:$0xff] }
 0x10c   : > { %2360 = vmatpush.msra.mxu2 %v726_v49  ;;  %2379 = vmatpush.msra.mxu3 %v743_v50  ;;  %v776_v49 = vld [vmem:[%s3903_s16 + $0xee8] sm:$0xff]  ;;  %v791_v50 = vld [vmem:[%s3903_s16 + $0xf60] sm:$0xff] }
 0x10d   : > { %2321 = vmatpush.msra.mxu0 %v693_v51  ;;  %2340 = vmatpush.msra.mxu1 %v710_v52  ;;  %v808_v51 = vld [vmem:[%s3903_s16 + $0xfe8] sm:$0xff]  ;;  %v758_v52 = vld [vmem:[%s3903_s16 + $0xe58] sm:$0xff] }
 0x10e   : > { %2361 = vmatpush.msra.mxu2 %v725_v53  ;;  %2380 = vmatpush.msra.mxu3 %v742_v54  ;;  %v775_v53 = vld [vmem:[%s3903_s16 + $0xee0] sm:$0xff]  ;;  %v790_v54 = vld [vmem:[%s3903_s16 + $0xf58] sm:$0xff] }
 0x10f   : > { %2322 = vmatpush.msra.mxu0 %v692_v55  ;;  %2341 = vmatpush.msra.mxu1 %v709_v56  ;;  %v807_v55 = vld [vmem:[%s3903_s16 + $0xfe0] sm:$0xff]  ;;  %v757_v56 = vld [vmem:[%s3903_s16 + $0xe50] sm:$0xff] }
 0x110   : > { %2362 = vmatpush.msra.mxu2 %v724_v57  ;;  %2381 = vmatpush.msra.mxu3 %v741_v58  ;;  %v774_v57 = vld [vmem:[%s3903_s16 + $0xed8] sm:$0xff]  ;;  %v789_v58 = vld [vmem:[%s3903_s16 + $0xf50] sm:$0xff] }
 0x111   : > { %2323 = vmatpush.msra.mxu0 %v691_v59  ;;  %2342 = vmatpush.msra.mxu1 %v708_v60  ;;  %v806_v59 = vld [vmem:[%s3903_s16 + $0xfd8] sm:$0xff]  ;;  %v756_v60 = vld [vmem:[%s3903_s16 + $0xe48] sm:$0xff] }
 0x112   : > { %2363 = vmatpush.msra.mxu2 %v723_v61  ;;  %2382 = vmatpush.msra.mxu3 %v740_v62  ;;  %v773_v61 = vld [vmem:[%s3903_s16 + $0xed0] sm:$0xff]  ;;  %v788_v62 = vld [vmem:[%s3903_s16 + $0xf48] sm:$0xff] }
 0x113   : > { %2324 = vmatpush.msra.mxu0 %v690_v63  ;;  %2343 = vmatpush.msra.mxu1 %v707_v0  ;;  %v805_v63 = vld [vmem:[%s3903_s16 + $0xfd0] sm:$0xff]  ;;  %v755_v0 = vld [vmem:[%s3903_s16 + $0xe40] sm:$0xff] }
 0x114   : > { %2364 = vmatpush.msra.mxu2 %v722_v1  ;;  %2383 = vmatpush.msra.mxu3 %v739_v2  ;;  %v772_v1 = vld [vmem:[%s3903_s16 + $0xec8] sm:$0xff]  ;;  %v787_v2 = vld [vmem:[%s3903_s16 + $0xf40] sm:$0xff] }
 0x115   : > { %2325 = vmatpush.msra.mxu0 %v689_v3  ;;  %2344 = vmatpush.msra.mxu1 %v706_v4  ;;  %v804_v3 = vld [vmem:[%s3903_s16 + $0xfc8] sm:$0xff]  ;;  %v754_v4 = vld [vmem:[%s3903_s16 + $0xe38] sm:$0xff] }
 0x116   : > { %2365 = vmatpush.msra.mxu2 %v721_v5  ;;  %2384 = vmatpush.msra.mxu3 %v738_v6  ;;  %v771_v5 = vld [vmem:[%s3903_s16 + $0xec0] sm:$0xff]  ;;  %v786_v6 = vld [vmem:[%s3903_s16 + $0xf38] sm:$0xff] }
 0x117   : > { %2326 = vmatpush.msra.mxu0 %v688_v7  ;;  %2345 = vmatpush.msra.mxu1 %v705_v8  ;;  %v803_v7 = vld [vmem:[%s3903_s16 + $0xfc0] sm:$0xff]  ;;  %v753_v8 = vld [vmem:[%s3903_s16 + $0xe30] sm:$0xff] }
 0x118   : > { %2366 = vmatpush.msra.mxu2 %v720_v9  ;;  %2385 = vmatpush.msra.mxu3 %v737_v10  ;;  %v770_v9 = vld [vmem:[%s3903_s16 + $0xeb8] sm:$0xff]  ;;  %v785_v10 = vld [vmem:[%s3903_s16 + $0xf30] sm:$0xff] }
 0x119   : > { %2327 = vmatpush.msra.mxu0 %v687_v11  ;;  %2346 = vmatpush.msra.mxu1 %v704_v12  ;;  %v802_v11 = vld [vmem:[%s3903_s16 + $0xfb8] sm:$0xff]  ;;  %v752_v12 = vld [vmem:[%s3903_s16 + $0xe28] sm:$0xff] }
 0x11a   : > { %2367 = vmatpush.msra.mxu2 %v719_v13  ;;  %2386 = vmatpush.msra.mxu3 %v736_v14  ;;  %v769_v13 = vld [vmem:[%s3903_s16 + $0xeb0] sm:$0xff]  ;;  %v784_v14 = vld [vmem:[%s3903_s16 + $0xf28] sm:$0xff] }
 0x11b   : > { %2328 = vmatpush.msra.mxu0 %v686_v15  ;;  %2347 = vmatpush.msra.mxu1 %v703_v16  ;;  %v801_v15 = vld [vmem:[%s3903_s16 + $0xfb0] sm:$0xff]  ;;  %v751_v16 = vld [vmem:[%s3903_s16 + $0xe20] sm:$0xff] }
 0x11c   : > { %2368 = vmatpush.msra.mxu2 %v718_v17  ;;  %2387 = vmatpush.msra.mxu3 %v735_v18  ;;  %v768_v17 = vld [vmem:[%s3903_s16 + $0xea8] sm:$0xff]  ;;  %v783_v18 = vld [vmem:[%s3903_s16 + $0xf20] sm:$0xff] }
 0x11d   : > { %2329 = vmatpush.msra.mxu0 %v685_v19  ;;  %2348 = vmatpush.msra.mxu1 %v702_v20  ;;  %v800_v19 = vld [vmem:[%s3903_s16 + $0xfa8] sm:$0xff]  ;;  %v750_v20 = vld [vmem:[%s3903_s16 + $0xe18] sm:$0xff] }
 0x11e   : > { %2369 = vmatpush.msra.mxu2 %v717_v21  ;;  %2388 = vmatpush.msra.mxu3 %v734_v22  ;;  %v767_v21 = vld [vmem:[%s3903_s16 + $0xea0] sm:$0xff]  ;;  %v782_v22 = vld [vmem:[%s3903_s16 + $0xf18] sm:$0xff] }
 0x11f   : > { %2330 = vmatpush.msra.mxu0 %v684_v23  ;;  %2349 = vmatpush.msra.mxu1 %v701_v24  ;;  %v799_v23 = vld [vmem:[%s3903_s16 + $0xfa0] sm:$0xff]  ;;  %v749_v24 = vld [vmem:[%s3903_s16 + $0xe10] sm:$0xff] }
 0x120   : > { %2370 = vmatpush.msra.mxu2 %v716_v26  ;;  %2389 = vmatpush.msra.mxu3 %v733_v27  ;;  %v781_v26 = vld [vmem:[%s3903_s16 + $0xf10] sm:$0xff]  ;;  %v798_v27 = vld [vmem:[%s3903_s16 + $0xf98] sm:$0xff] }
 0x121   : > { %2331 = vmatpush.msra.mxu0 %v683_v28  ;;  %2350 = vmatpush.msra.mxu1 %v700_v29  ;;  %v748_v28 = vld [vmem:[%s3903_s16 + $0xe08] sm:$0xff]  ;;  %v765_v29 = vld [vmem:[%s3903_s16 + $0xe90] sm:$0xff] }
 0x122   : > { %2371 = vmatpush.msra.mxu2 %v715_v30  ;;  %2390 = vmatpush.msra.mxu3 %v732_v31  ;;  %v286_v30 = vld [vmem:[%s3917_s19 + $0x40] sm:$0xff]  ;;  %v780_v31 = vld [vmem:[%s3903_s16 + $0xf08] sm:$0xff] }
 0x123   : > { %2332 = vmatmul.f32.vlgmr.msra.gmra.mxu0 %v1681_v33  ;;  %2372 = vmatmul.f32.vlgmr.msra.gmra.mxu2 %v1683_v34  ;;  %v797_v33 = vld [vmem:[%s3903_s16 + $0xf90] sm:$0xff]  ;;  %1689 = vst [vmem:[#allocation1] ss:$4 sm:$0xff] %v286_v30  ;;  %v747_v34 = vld [vmem:[%s3903_s16 + $0xe00] sm:$0xff]  ;;  %v830_v30 = vld [vmem:[%s3903_s16 + $0x1098] sm:$0xff] }
 0x124   : > { %2396 = vmatpush.msrb.mxu0 %v762_v36  ;;  %2436 = vmatpush.msrb.mxu2 %v794_v37  ;;  %v764_v36 = vld [vmem:[%s3903_s16 + $0xe88] sm:$0xff]  ;;  %v779_v37 = vld [vmem:[%s3903_s16 + $0xf00] sm:$0xff] }
 0x125   : > { %2351 = vmatpush.msra.mxu1 %v699_v32  ;;  %2391 = vmatpush.msra.mxu3 %v731_v35  ;;  %v796_v32 = vld [vmem:[%s3903_s16 + $0xf88] sm:$0xff]  ;;  %v1685_v35 = vld.sshfl [vmem:[#allocation1 + $0x20] sm:$0xff pattern:$0x73625140] }
 0x126   : > { %2352 = vmatmul.f32.vlgmr.msra.gmra.mxu1 %v1682_v38  ;;  %2392 = vmatmul.f32.vlgmr.msra.gmra.mxu3 %v1684_v39  ;;  %v1687_v38 = vld.sshfl [vmem:[#allocation1 + $0x30] sm:$0xff pattern:$0x73625140]  ;;  %v826_v39 = vld [vmem:[%s3903_s16 + $0x1078] sm:$0xff] }
 0x127   : > { %2397 = vmatpush.msrb.mxu0 %v761_v40  ;;  %2416 = vmatpush.msrb.mxu1 %v778_v41  ;;  %v858_v40 = vld [vmem:[%s3903_s16 + $0x1178] sm:$0xff]  ;;  %v763_v41 = vld [vmem:[%s3903_s16 + $0xe80] sm:$0xff] }
 0x128   : > { %2437 = vmatpush.msrb.mxu2 %v793_v42  ;;  %2456 = vmatpush.msrb.mxu3 %v810_v43  ;;  %v795_v42 = vld [vmem:[%s3903_s16 + $0xf80] sm:$0xff] }
 0x129   : > { %2398 = vmatpush.msrb.mxu0 %v760_v44  ;;  %2417 = vmatpush.msrb.mxu1 %v777_v45  ;;  %v1686_v43 = vld.sshfl [vmem:[#allocation1 + $0x28] sm:$0xff pattern:$0x73625140]  ;;  %v1688_v44 = vld.sshfl [vmem:[#allocation1 + $0x38] sm:$0xff pattern:$0x73625140] }
 0x12a   : > { %2438 = vmatpush.msrb.mxu2 %v792_v46  ;;  %2457 = vmatpush.msrb.mxu3 %v809_v47  ;;  %v825_v45 = vld [vmem:[%s3903_s16 + $0x1070] sm:$0xff]  ;;  %v842_v46 = vld [vmem:[%s3903_s16 + $0x10f8] sm:$0xff] }
 0x12b   : > { %2399 = vmatpush.msrb.mxu0 %v759_v48  ;;  %2418 = vmatpush.msrb.mxu1 %v776_v49  ;;  %v857_v47 = vld [vmem:[%s3903_s16 + $0x1170] sm:$0xff]  ;;  %v874_v48 = vld [vmem:[%s3903_s16 + $0x11f8] sm:$0xff]  ;;  %v824_v49 = vld [vmem:[%s3903_s16 + $0x1068] sm:$0xff] }
 0x12c   : > { %2439 = vmatpush.msrb.mxu2 %v791_v50  ;;  %2458 = vmatpush.msrb.mxu3 %v808_v51  ;;  %v841_v50 = vld [vmem:[%s3903_s16 + $0x10f0] sm:$0xff]  ;;  %v856_v51 = vld [vmem:[%s3903_s16 + $0x1168] sm:$0xff] }
 0x12d   : > { %2400 = vmatpush.msrb.mxu0 %v758_v52  ;;  %2419 = vmatpush.msrb.mxu1 %v775_v53  ;;  %v873_v52 = vld [vmem:[%s3903_s16 + $0x11f0] sm:$0xff]  ;;  %v823_v53 = vld [vmem:[%s3903_s16 + $0x1060] sm:$0xff] }
 0x12e   : > { %2440 = vmatpush.msrb.mxu2 %v790_v54  ;;  %2459 = vmatpush.msrb.mxu3 %v807_v55  ;;  %v840_v54 = vld [vmem:[%s3903_s16 + $0x10e8] sm:$0xff]  ;;  %v855_v55 = vld [vmem:[%s3903_s16 + $0x1160] sm:$0xff] }
 0x12f   : > { %2401 = vmatpush.msrb.mxu0 %v757_v56  ;;  %2420 = vmatpush.msrb.mxu1 %v774_v57  ;;  %v872_v56 = vld [vmem:[%s3903_s16 + $0x11e8] sm:$0xff]  ;;  %v822_v57 = vld [vmem:[%s3903_s16 + $0x1058] sm:$0xff] }
 0x130   : > { %2441 = vmatpush.msrb.mxu2 %v789_v58  ;;  %2460 = vmatpush.msrb.mxu3 %v806_v59  ;;  %v839_v58 = vld [vmem:[%s3903_s16 + $0x10e0] sm:$0xff]  ;;  %v854_v59 = vld [vmem:[%s3903_s16 + $0x1158] sm:$0xff] }
 0x131   : > { %2402 = vmatpush.msrb.mxu0 %v756_v60  ;;  %2421 = vmatpush.msrb.mxu1 %v773_v61  ;;  %v871_v60 = vld [vmem:[%s3903_s16 + $0x11e0] sm:$0xff]  ;;  %v821_v61 = vld [vmem:[%s3903_s16 + $0x1050] sm:$0xff] }
 0x132   : > { %2442 = vmatpush.msrb.mxu2 %v788_v62  ;;  %2461 = vmatpush.msrb.mxu3 %v805_v63  ;;  %v838_v62 = vld [vmem:[%s3903_s16 + $0x10d8] sm:$0xff]  ;;  %v853_v63 = vld [vmem:[%s3903_s16 + $0x1150] sm:$0xff] }
 0x133   : > { %2403 = vmatpush.msrb.mxu0 %v755_v0  ;;  %2422 = vmatpush.msrb.mxu1 %v772_v1  ;;  %v870_v0 = vld [vmem:[%s3903_s16 + $0x11d8] sm:$0xff]  ;;  %v820_v1 = vld [vmem:[%s3903_s16 + $0x1048] sm:$0xff] }
 0x134   : > { %2443 = vmatpush.msrb.mxu2 %v787_v2  ;;  %2462 = vmatpush.msrb.mxu3 %v804_v3  ;;  %v837_v2 = vld [vmem:[%s3903_s16 + $0x10d0] sm:$0xff]  ;;  %v852_v3 = vld [vmem:[%s3903_s16 + $0x1148] sm:$0xff] }
 0x135   : > { %2404 = vmatpush.msrb.mxu0 %v754_v4  ;;  %2423 = vmatpush.msrb.mxu1 %v771_v5  ;;  %v869_v4 = vld [vmem:[%s3903_s16 + $0x11d0] sm:$0xff]  ;;  %v819_v5 = vld [vmem:[%s3903_s16 + $0x1040] sm:$0xff] }
 0x136   : > { %2444 = vmatpush.msrb.mxu2 %v786_v6  ;;  %2463 = vmatpush.msrb.mxu3 %v803_v7  ;;  %v836_v6 = vld [vmem:[%s3903_s16 + $0x10c8] sm:$0xff]  ;;  %v851_v7 = vld [vmem:[%s3903_s16 + $0x1140] sm:$0xff] }
 0x137   : > { %2405 = vmatpush.msrb.mxu0 %v753_v8  ;;  %2424 = vmatpush.msrb.mxu1 %v770_v9  ;;  %v868_v8 = vld [vmem:[%s3903_s16 + $0x11c8] sm:$0xff]  ;;  %v818_v9 = vld [vmem:[%s3903_s16 + $0x1038] sm:$0xff] }
 0x138   : > { %2445 = vmatpush.msrb.mxu2 %v785_v10  ;;  %2464 = vmatpush.msrb.mxu3 %v802_v11  ;;  %v835_v10 = vld [vmem:[%s3903_s16 + $0x10c0] sm:$0xff]  ;;  %v850_v11 = vld [vmem:[%s3903_s16 + $0x1138] sm:$0xff] }
 0x139   : > { %2406 = vmatpush.msrb.mxu0 %v752_v12  ;;  %2425 = vmatpush.msrb.mxu1 %v769_v13  ;;  %v867_v12 = vld [vmem:[%s3903_s16 + $0x11c0] sm:$0xff]  ;;  %v817_v13 = vld [vmem:[%s3903_s16 + $0x1030] sm:$0xff] }
 0x13a   : > { %2446 = vmatpush.msrb.mxu2 %v784_v14  ;;  %2465 = vmatpush.msrb.mxu3 %v801_v15  ;;  %v834_v14 = vld [vmem:[%s3903_s16 + $0x10b8] sm:$0xff]  ;;  %v849_v15 = vld [vmem:[%s3903_s16 + $0x1130] sm:$0xff] }
 0x13b   : > { %2407 = vmatpush.msrb.mxu0 %v751_v16  ;;  %2426 = vmatpush.msrb.mxu1 %v768_v17  ;;  %v866_v16 = vld [vmem:[%s3903_s16 + $0x11b8] sm:$0xff]  ;;  %v816_v17 = vld [vmem:[%s3903_s16 + $0x1028] sm:$0xff] }
 0x13c   : > { %2447 = vmatpush.msrb.mxu2 %v783_v18  ;;  %2466 = vmatpush.msrb.mxu3 %v800_v19  ;;  %v833_v18 = vld [vmem:[%s3903_s16 + $0x10b0] sm:$0xff]  ;;  %v848_v19 = vld [vmem:[%s3903_s16 + $0x1128] sm:$0xff] }
 0x13d   : > { %2408 = vmatpush.msrb.mxu0 %v750_v20  ;;  %2427 = vmatpush.msrb.mxu1 %v767_v21  ;;  %v865_v20 = vld [vmem:[%s3903_s16 + $0x11b0] sm:$0xff]  ;;  %v815_v21 = vld [vmem:[%s3903_s16 + $0x1020] sm:$0xff] }
 0x13e   : > { %2448 = vmatpush.msrb.mxu2 %v782_v22  ;;  %2467 = vmatpush.msrb.mxu3 %v799_v23  ;;  %v832_v22 = vld [vmem:[%s3903_s16 + $0x10a8] sm:$0xff]  ;;  %v847_v23 = vld [vmem:[%s3903_s16 + $0x1120] sm:$0xff] }
 0x13f   : > { %2409 = vmatpush.msrb.mxu0 %v749_v24  ;;  %2428 = vmatpush.msrb.mxu1 %v766_v25  ;;  %v864_v24 = vld [vmem:[%s3903_s16 + $0x11a8] sm:$0xff]  ;;  %v814_v25 = vld [vmem:[%s3903_s16 + $0x1018] sm:$0xff] }
 0x140   : > { %2449 = vmatpush.msrb.mxu2 %v781_v26  ;;  %2468 = vmatpush.msrb.mxu3 %v798_v27  ;;  %v831_v26 = vld [vmem:[%s3903_s16 + $0x10a0] sm:$0xff]  ;;  %v846_v27 = vld [vmem:[%s3903_s16 + $0x1118] sm:$0xff] }
 0x141   : > { %2410 = vmatpush.msrb.mxu0 %v748_v28  ;;  %2429 = vmatpush.msrb.mxu1 %v765_v29  ;;  %v863_v28 = vld [vmem:[%s3903_s16 + $0x11a0] sm:$0xff]  ;;  %v813_v29 = vld [vmem:[%s3903_s16 + $0x1010] sm:$0xff] }
 0x142   : > { %2450 = vmatpush.msrb.mxu2 %v780_v31  ;;  %2469 = vmatpush.msrb.mxu3 %v797_v33  ;;  %v845_v31 = vld [vmem:[%s3903_s16 + $0x1110] sm:$0xff]  ;;  %v862_v33 = vld [vmem:[%s3903_s16 + $0x1198] sm:$0xff] }
 0x143   : > { %2411 = vmatpush.msrb.mxu0 %v747_v34  ;;  %2430 = vmatpush.msrb.mxu1 %v764_v36  ;;  %v812_v34 = vld [vmem:[%s3903_s16 + $0x1008] sm:$0xff]  ;;  %v829_v36 = vld [vmem:[%s3903_s16 + $0x1090] sm:$0xff] }
 0x144   : > { %2451 = vmatpush.msrb.mxu2 %v779_v37  ;;  %2470 = vmatpush.msrb.mxu3 %v796_v32  ;;  %v287_v37 = vld [vmem:[%s3917_s19 + $0x48] sm:$0xff]  ;;  %v844_v32 = vld [vmem:[%s3903_s16 + $0x1108] sm:$0xff] }
 0x145   : > { %2412 = vmatmul.f32.vlgmr.msrb.gmra.mxu0 %v1685_v35  ;;  %2452 = vmatmul.f32.vlgmr.msrb.gmra.mxu2 %v1687_v38  ;;  %v861_v35 = vld [vmem:[%s3903_s16 + $0x1190] sm:$0xff]  ;;  %1690 = vst [vmem:[#allocation1 + $0x20] ss:$4 sm:$0xff] %v287_v37  ;;  %v811_v38 = vld [vmem:[%s3903_s16 + $0x1000] sm:$0xff]  ;;  %v894_v37 = vld [vmem:[%s3903_s16 + $0x1298] sm:$0xff] }
 0x146   : > { %2476 = vmatpush.msra.mxu0 %v826_v39  ;;  %2516 = vmatpush.msra.mxu2 %v858_v40  ;;  %v828_v39 = vld [vmem:[%s3903_s16 + $0x1088] sm:$0xff]  ;;  %v843_v40 = vld [vmem:[%s3903_s16 + $0x1100] sm:$0xff] }
 0x147   : > { %2431 = vmatpush.msrb.mxu1 %v763_v41  ;;  %2471 = vmatpush.msrb.mxu3 %v795_v42  ;;  %v860_v41 = vld [vmem:[%s3903_s16 + $0x1188] sm:$0xff]  ;;  %v1691_v42 = vld.sshfl [vmem:[#allocation1] sm:$0xff pattern:$0x73625140] }
 0x148   : > { %2432 = vmatmul.f32.vlgmr.msrb.gmra.mxu1 %v1686_v43  ;;  %2472 = vmatmul.f32.vlgmr.msrb.gmra.mxu3 %v1688_v44  ;;  %v1693_v43 = vld.sshfl [vmem:[#allocation1 + $0x10] sm:$0xff pattern:$0x73625140]  ;;  %v890_v44 = vld [vmem:[%s3903_s16 + $0x1278] sm:$0xff] }
 0x149   : > { %2477 = vmatpush.msra.mxu0 %v825_v45  ;;  %2496 = vmatpush.msra.mxu1 %v842_v46  ;;  %v922_v45 = vld [vmem:[%s3903_s16 + $0x1378] sm:$0xff]  ;;  %v827_v46 = vld [vmem:[%s3903_s16 + $0x1080] sm:$0xff] }
 0x14a   : > { %2517 = vmatpush.msra.mxu2 %v857_v47  ;;  %2536 = vmatpush.msra.mxu3 %v874_v48  ;;  %v859_v47 = vld [vmem:[%s3903_s16 + $0x1180] sm:$0xff] }
 0x14b   : > { %2478 = vmatpush.msra.mxu0 %v824_v49  ;;  %2497 = vmatpush.msra.mxu1 %v841_v50  ;;  %v1692_v48 = vld.sshfl [vmem:[#allocation1 + $0x8] sm:$0xff pattern:$0x73625140]  ;;  %v1694_v49 = vld.sshfl [vmem:[#allocation1 + $0x18] sm:$0xff pattern:$0x73625140] }
 0x14c   : > { %2518 = vmatpush.msra.mxu2 %v856_v51  ;;  %2537 = vmatpush.msra.mxu3 %v873_v52  ;;  %v889_v50 = vld [vmem:[%s3903_s16 + $0x1270] sm:$0xff]  ;;  %v906_v51 = vld [vmem:[%s3903_s16 + $0x12f8] sm:$0xff] }
 0x14d   : > { %2479 = vmatpush.msra.mxu0 %v823_v53  ;;  %2498 = vmatpush.msra.mxu1 %v840_v54  ;;  %v921_v52 = vld [vmem:[%s3903_s16 + $0x1370] sm:$0xff]  ;;  %v938_v53 = vld [vmem:[%s3903_s16 + $0x13f8] sm:$0xff]  ;;  %v888_v54 = vld [vmem:[%s3903_s16 + $0x1268] sm:$0xff] }
 0x14e   : > { %2519 = vmatpush.msra.mxu2 %v855_v55  ;;  %2538 = vmatpush.msra.mxu3 %v872_v56  ;;  %v905_v55 = vld [vmem:[%s3903_s16 + $0x12f0] sm:$0xff]  ;;  %v920_v56 = vld [vmem:[%s3903_s16 + $0x1368] sm:$0xff] }
 0x14f   : > { %2480 = vmatpush.msra.mxu0 %v822_v57  ;;  %2499 = vmatpush.msra.mxu1 %v839_v58  ;;  %v937_v57 = vld [vmem:[%s3903_s16 + $0x13f0] sm:$0xff]  ;;  %v887_v58 = vld [vmem:[%s3903_s16 + $0x1260] sm:$0xff] }
 0x150   : > { %2520 = vmatpush.msra.mxu2 %v854_v59  ;;  %2539 = vmatpush.msra.mxu3 %v871_v60  ;;  %v904_v59 = vld [vmem:[%s3903_s16 + $0x12e8] sm:$0xff]  ;;  %v919_v60 = vld [vmem:[%s3903_s16 + $0x1360] sm:$0xff] }
 0x151   : > { %2481 = vmatpush.msra.mxu0 %v821_v61  ;;  %2500 = vmatpush.msra.mxu1 %v838_v62  ;;  %v936_v61 = vld [vmem:[%s3903_s16 + $0x13e8] sm:$0xff]  ;;  %v886_v62 = vld [vmem:[%s3903_s16 + $0x1258] sm:$0xff] }
 0x152   : > { %2521 = vmatpush.msra.mxu2 %v853_v63  ;;  %2540 = vmatpush.msra.mxu3 %v870_v0  ;;  %v903_v63 = vld [vmem:[%s3903_s16 + $0x12e0] sm:$0xff]  ;;  %v918_v0 = vld [vmem:[%s3903_s16 + $0x1358] sm:$0xff] }
 0x153   : > { %2482 = vmatpush.msra.mxu0 %v820_v1  ;;  %2501 = vmatpush.msra.mxu1 %v837_v2  ;;  %v935_v1 = vld [vmem:[%s3903_s16 + $0x13e0] sm:$0xff]  ;;  %v885_v2 = vld [vmem:[%s3903_s16 + $0x1250] sm:$0xff] }
 0x154   : > { %2522 = vmatpush.msra.mxu2 %v852_v3  ;;  %2541 = vmatpush.msra.mxu3 %v869_v4  ;;  %v902_v3 = vld [vmem:[%s3903_s16 + $0x12d8] sm:$0xff]  ;;  %v917_v4 = vld [vmem:[%s3903_s16 + $0x1350] sm:$0xff] }
 0x155   : > { %2483 = vmatpush.msra.mxu0 %v819_v5  ;;  %2502 = vmatpush.msra.mxu1 %v836_v6  ;;  %v934_v5 = vld [vmem:[%s3903_s16 + $0x13d8] sm:$0xff]  ;;  %v884_v6 = vld [vmem:[%s3903_s16 + $0x1248] sm:$0xff] }
 0x156   : > { %2523 = vmatpush.msra.mxu2 %v851_v7  ;;  %2542 = vmatpush.msra.mxu3 %v868_v8  ;;  %v901_v7 = vld [vmem:[%s3903_s16 + $0x12d0] sm:$0xff]  ;;  %v916_v8 = vld [vmem:[%s3903_s16 + $0x1348] sm:$0xff] }
 0x157   : > { %2484 = vmatpush.msra.mxu0 %v818_v9  ;;  %2503 = vmatpush.msra.mxu1 %v835_v10  ;;  %v933_v9 = vld [vmem:[%s3903_s16 + $0x13d0] sm:$0xff]  ;;  %v883_v10 = vld [vmem:[%s3903_s16 + $0x1240] sm:$0xff] }
 0x158   : > { %2524 = vmatpush.msra.mxu2 %v850_v11  ;;  %2543 = vmatpush.msra.mxu3 %v867_v12  ;;  %v900_v11 = vld [vmem:[%s3903_s16 + $0x12c8] sm:$0xff]  ;;  %v915_v12 = vld [vmem:[%s3903_s16 + $0x1340] sm:$0xff] }
 0x159   : > { %2485 = vmatpush.msra.mxu0 %v817_v13  ;;  %2504 = vmatpush.msra.mxu1 %v834_v14  ;;  %v932_v13 = vld [vmem:[%s3903_s16 + $0x13c8] sm:$0xff]  ;;  %v882_v14 = vld [vmem:[%s3903_s16 + $0x1238] sm:$0xff] }
 0x15a   : > { %2525 = vmatpush.msra.mxu2 %v849_v15  ;;  %2544 = vmatpush.msra.mxu3 %v866_v16  ;;  %v899_v15 = vld [vmem:[%s3903_s16 + $0x12c0] sm:$0xff]  ;;  %v914_v16 = vld [vmem:[%s3903_s16 + $0x1338] sm:$0xff] }
 0x15b   : > { %2486 = vmatpush.msra.mxu0 %v816_v17  ;;  %2505 = vmatpush.msra.mxu1 %v833_v18  ;;  %v931_v17 = vld [vmem:[%s3903_s16 + $0x13c0] sm:$0xff]  ;;  %v881_v18 = vld [vmem:[%s3903_s16 + $0x1230] sm:$0xff] }
 0x15c   : > { %2526 = vmatpush.msra.mxu2 %v848_v19  ;;  %2545 = vmatpush.msra.mxu3 %v865_v20  ;;  %v898_v19 = vld [vmem:[%s3903_s16 + $0x12b8] sm:$0xff]  ;;  %v913_v20 = vld [vmem:[%s3903_s16 + $0x1330] sm:$0xff] }
 0x15d   : > { %2487 = vmatpush.msra.mxu0 %v815_v21  ;;  %2506 = vmatpush.msra.mxu1 %v832_v22  ;;  %v930_v21 = vld [vmem:[%s3903_s16 + $0x13b8] sm:$0xff]  ;;  %v880_v22 = vld [vmem:[%s3903_s16 + $0x1228] sm:$0xff] }
 0x15e   : > { %2527 = vmatpush.msra.mxu2 %v847_v23  ;;  %2546 = vmatpush.msra.mxu3 %v864_v24  ;;  %v897_v23 = vld [vmem:[%s3903_s16 + $0x12b0] sm:$0xff]  ;;  %v912_v24 = vld [vmem:[%s3903_s16 + $0x1328] sm:$0xff] }
 0x15f   : > { %2488 = vmatpush.msra.mxu0 %v814_v25  ;;  %2507 = vmatpush.msra.mxu1 %v831_v26  ;;  %v929_v25 = vld [vmem:[%s3903_s16 + $0x13b0] sm:$0xff]  ;;  %v879_v26 = vld [vmem:[%s3903_s16 + $0x1220] sm:$0xff] }
 0x160   : > { %2528 = vmatpush.msra.mxu2 %v846_v27  ;;  %2547 = vmatpush.msra.mxu3 %v863_v28  ;;  %v896_v27 = vld [vmem:[%s3903_s16 + $0x12a8] sm:$0xff]  ;;  %v911_v28 = vld [vmem:[%s3903_s16 + $0x1320] sm:$0xff] }
 0x161   : > { %2489 = vmatpush.msra.mxu0 %v813_v29  ;;  %2508 = vmatpush.msra.mxu1 %v830_v30  ;;  %v928_v29 = vld [vmem:[%s3903_s16 + $0x13a8] sm:$0xff]  ;;  %v878_v30 = vld [vmem:[%s3903_s16 + $0x1218] sm:$0xff] }
 0x162   : > { %2529 = vmatpush.msra.mxu2 %v845_v31  ;;  %2548 = vmatpush.msra.mxu3 %v862_v33  ;;  %v895_v31 = vld [vmem:[%s3903_s16 + $0x12a0] sm:$0xff]  ;;  %v910_v33 = vld [vmem:[%s3903_s16 + $0x1318] sm:$0xff] }
 0x163   : > { %2490 = vmatpush.msra.mxu0 %v812_v34  ;;  %2509 = vmatpush.msra.mxu1 %v829_v36  ;;  %v927_v34 = vld [vmem:[%s3903_s16 + $0x13a0] sm:$0xff]  ;;  %v877_v36 = vld [vmem:[%s3903_s16 + $0x1210] sm:$0xff] }
 0x164   : > { %2530 = vmatpush.msra.mxu2 %v844_v32  ;;  %2549 = vmatpush.msra.mxu3 %v861_v35  ;;  %v909_v32 = vld [vmem:[%s3903_s16 + $0x1310] sm:$0xff]  ;;  %v926_v35 = vld [vmem:[%s3903_s16 + $0x1398] sm:$0xff] }
 0x165   : > { %2491 = vmatpush.msra.mxu0 %v811_v38  ;;  %2510 = vmatpush.msra.mxu1 %v828_v39  ;;  %v876_v38 = vld [vmem:[%s3903_s16 + $0x1208] sm:$0xff]  ;;  %v893_v39 = vld [vmem:[%s3903_s16 + $0x1290] sm:$0xff] }
 0x166   : > { %2531 = vmatpush.msra.mxu2 %v843_v40  ;;  %2550 = vmatpush.msra.mxu3 %v860_v41  ;;  %v288_v40 = vld [vmem:[%s3917_s19 + $0x50] sm:$0xff] }
 0x167   : > { %2492 = vmatmul.f32.vlgmr.msra.gmra.mxu0 %v1691_v42  ;;  %2532 = vmatmul.f32.vlgmr.msra.gmra.mxu2 %v1693_v43  ;;  %v908_v41 = vld [vmem:[%s3903_s16 + $0x1308] sm:$0xff]  ;;  %v925_v42 = vld [vmem:[%s3903_s16 + $0x1390] sm:$0xff]  ;;  %1699 = vst [vmem:[#allocation1] ss:$4 sm:$0xff] %v288_v40  ;;  %v875_v43 = vld [vmem:[%s3903_s16 + $0x1200] sm:$0xff] }
 0x168   : > { %2556 = vmatpush.msrb.mxu0 %v890_v44  ;;  %2596 = vmatpush.msrb.mxu2 %v922_v45  ;;  %v892_v44 = vld [vmem:[%s3903_s16 + $0x1288] sm:$0xff]  ;;  %v907_v45 = vld [vmem:[%s3903_s16 + $0x1300] sm:$0xff]  ;;  %v958_v40 = vld [vmem:[%s3903_s16 + $0x1498] sm:$0xff] }
 0x169   : > { %2511 = vmatpush.msra.mxu1 %v827_v46  ;;  %2551 = vmatpush.msra.mxu3 %v859_v47  ;;  %v924_v46 = vld [vmem:[%s3903_s16 + $0x1388] sm:$0xff]  ;;  %v1695_v47 = vld.sshfl [vmem:[#allocation1 + $0x20] sm:$0xff pattern:$0x73625140] }
 0x16a   : > { %2512 = vmatmul.f32.vlgmr.msra.gmra.mxu1 %v1692_v48  ;;  %2552 = vmatmul.f32.vlgmr.msra.gmra.mxu3 %v1694_v49  ;;  %v1697_v48 = vld.sshfl [vmem:[#allocation1 + $0x30] sm:$0xff pattern:$0x73625140]  ;;  %v954_v49 = vld [vmem:[%s3903_s16 + $0x1478] sm:$0xff] }
 0x16b   : > { %2557 = vmatpush.msrb.mxu0 %v889_v50  ;;  %2576 = vmatpush.msrb.mxu1 %v906_v51  ;;  %v986_v50 = vld [vmem:[%s3903_s16 + $0x1578] sm:$0xff]  ;;  %v891_v51 = vld [vmem:[%s3903_s16 + $0x1280] sm:$0xff] }
 0x16c   : > { %2597 = vmatpush.msrb.mxu2 %v921_v52  ;;  %2616 = vmatpush.msrb.mxu3 %v938_v53  ;;  %v923_v52 = vld [vmem:[%s3903_s16 + $0x1380] sm:$0xff] }
 0x16d   : > { %2558 = vmatpush.msrb.mxu0 %v888_v54  ;;  %2577 = vmatpush.msrb.mxu1 %v905_v55  ;;  %v1696_v53 = vld.sshfl [vmem:[#allocation1 + $0x28] sm:$0xff pattern:$0x73625140]  ;;  %v1698_v54 = vld.sshfl [vmem:[#allocation1 + $0x38] sm:$0xff pattern:$0x73625140] }
 0x16e   : > { %2598 = vmatpush.msrb.mxu2 %v920_v56  ;;  %2617 = vmatpush.msrb.mxu3 %v937_v57  ;;  %v953_v55 = vld [vmem:[%s3903_s16 + $0x1470] sm:$0xff]  ;;  %v970_v56 = vld [vmem:[%s3903_s16 + $0x14f8] sm:$0xff] }
 0x16f   : > { %2559 = vmatpush.msrb.mxu0 %v887_v58  ;;  %2578 = vmatpush.msrb.mxu1 %v904_v59  ;;  %v985_v57 = vld [vmem:[%s3903_s16 + $0x1570] sm:$0xff]  ;;  %v1002_v58 = vld [vmem:[%s3903_s16 + $0x15f8] sm:$0xff]  ;;  %v952_v59 = vld [vmem:[%s3903_s16 + $0x1468] sm:$0xff] }
 0x170   : > { %2599 = vmatpush.msrb.mxu2 %v919_v60  ;;  %2618 = vmatpush.msrb.mxu3 %v936_v61  ;;  %v969_v60 = vld [vmem:[%s3903_s16 + $0x14f0] sm:$0xff]  ;;  %v984_v61 = vld [vmem:[%s3903_s16 + $0x1568] sm:$0xff] }
 0x171   : > { %2560 = vmatpush.msrb.mxu0 %v886_v62  ;;  %2579 = vmatpush.msrb.mxu1 %v903_v63  ;;  %v1001_v62 = vld [vmem:[%s3903_s16 + $0x15f0] sm:$0xff]  ;;  %v951_v63 = vld [vmem:[%s3903_s16 + $0x1460] sm:$0xff] }
 0x172   : > { %2600 = vmatpush.msrb.mxu2 %v918_v0  ;;  %2619 = vmatpush.msrb.mxu3 %v935_v1  ;;  %v968_v0 = vld [vmem:[%s3903_s16 + $0x14e8] sm:$0xff]  ;;  %v983_v1 = vld [vmem:[%s3903_s16 + $0x1560] sm:$0xff] }
 0x173   : > { %2561 = vmatpush.msrb.mxu0 %v885_v2  ;;  %2580 = vmatpush.msrb.mxu1 %v902_v3  ;;  %v1000_v2 = vld [vmem:[%s3903_s16 + $0x15e8] sm:$0xff]  ;;  %v950_v3 = vld [vmem:[%s3903_s16 + $0x1458] sm:$0xff] }
 0x174   : > { %2601 = vmatpush.msrb.mxu2 %v917_v4  ;;  %2620 = vmatpush.msrb.mxu3 %v934_v5  ;;  %v967_v4 = vld [vmem:[%s3903_s16 + $0x14e0] sm:$0xff]  ;;  %v982_v5 = vld [vmem:[%s3903_s16 + $0x1558] sm:$0xff] }
 0x175   : > { %2562 = vmatpush.msrb.mxu0 %v884_v6  ;;  %2581 = vmatpush.msrb.mxu1 %v901_v7  ;;  %v999_v6 = vld [vmem:[%s3903_s16 + $0x15e0] sm:$0xff]  ;;  %v949_v7 = vld [vmem:[%s3903_s16 + $0x1450] sm:$0xff] }
 0x176   : > { %2602 = vmatpush.msrb.mxu2 %v916_v8  ;;  %2621 = vmatpush.msrb.mxu3 %v933_v9  ;;  %v966_v8 = vld [vmem:[%s3903_s16 + $0x14d8] sm:$0xff]  ;;  %v981_v9 = vld [vmem:[%s3903_s16 + $0x1550] sm:$0xff] }
 0x177   : > { %2563 = vmatpush.msrb.mxu0 %v883_v10  ;;  %2582 = vmatpush.msrb.mxu1 %v900_v11  ;;  %v998_v10 = vld [vmem:[%s3903_s16 + $0x15d8] sm:$0xff]  ;;  %v948_v11 = vld [vmem:[%s3903_s16 + $0x1448] sm:$0xff] }
 0x178   : > { %2603 = vmatpush.msrb.mxu2 %v915_v12  ;;  %2622 = vmatpush.msrb.mxu3 %v932_v13  ;;  %v965_v12 = vld [vmem:[%s3903_s16 + $0x14d0] sm:$0xff]  ;;  %v980_v13 = vld [vmem:[%s3903_s16 + $0x1548] sm:$0xff] }
 0x179   : > { %2564 = vmatpush.msrb.mxu0 %v882_v14  ;;  %2583 = vmatpush.msrb.mxu1 %v899_v15  ;;  %v997_v14 = vld [vmem:[%s3903_s16 + $0x15d0] sm:$0xff]  ;;  %v947_v15 = vld [vmem:[%s3903_s16 + $0x1440] sm:$0xff] }
 0x17a   : > { %2604 = vmatpush.msrb.mxu2 %v914_v16  ;;  %2623 = vmatpush.msrb.mxu3 %v931_v17  ;;  %v964_v16 = vld [vmem:[%s3903_s16 + $0x14c8] sm:$0xff]  ;;  %v979_v17 = vld [vmem:[%s3903_s16 + $0x1540] sm:$0xff] }
 0x17b   : > { %2565 = vmatpush.msrb.mxu0 %v881_v18  ;;  %2584 = vmatpush.msrb.mxu1 %v898_v19  ;;  %v996_v18 = vld [vmem:[%s3903_s16 + $0x15c8] sm:$0xff]  ;;  %v946_v19 = vld [vmem:[%s3903_s16 + $0x1438] sm:$0xff] }
 0x17c   : > { %2605 = vmatpush.msrb.mxu2 %v913_v20  ;;  %2624 = vmatpush.msrb.mxu3 %v930_v21  ;;  %v963_v20 = vld [vmem:[%s3903_s16 + $0x14c0] sm:$0xff]  ;;  %v978_v21 = vld [vmem:[%s3903_s16 + $0x1538] sm:$0xff] }
 0x17d   : > { %2566 = vmatpush.msrb.mxu0 %v880_v22  ;;  %2585 = vmatpush.msrb.mxu1 %v897_v23  ;;  %v995_v22 = vld [vmem:[%s3903_s16 + $0x15c0] sm:$0xff]  ;;  %v945_v23 = vld [vmem:[%s3903_s16 + $0x1430] sm:$0xff] }
 0x17e   : > { %2606 = vmatpush.msrb.mxu2 %v912_v24  ;;  %2625 = vmatpush.msrb.mxu3 %v929_v25  ;;  %v962_v24 = vld [vmem:[%s3903_s16 + $0x14b8] sm:$0xff]  ;;  %v977_v25 = vld [vmem:[%s3903_s16 + $0x1530] sm:$0xff] }
 0x17f   : > { %2567 = vmatpush.msrb.mxu0 %v879_v26  ;;  %2586 = vmatpush.msrb.mxu1 %v896_v27  ;;  %v994_v26 = vld [vmem:[%s3903_s16 + $0x15b8] sm:$0xff]  ;;  %v944_v27 = vld [vmem:[%s3903_s16 + $0x1428] sm:$0xff] }
 0x180   : > { %2607 = vmatpush.msrb.mxu2 %v911_v28  ;;  %2626 = vmatpush.msrb.mxu3 %v928_v29  ;;  %v961_v28 = vld [vmem:[%s3903_s16 + $0x14b0] sm:$0xff]  ;;  %v976_v29 = vld [vmem:[%s3903_s16 + $0x1528] sm:$0xff] }
 0x181   : > { %2568 = vmatpush.msrb.mxu0 %v878_v30  ;;  %2587 = vmatpush.msrb.mxu1 %v895_v31  ;;  %v993_v30 = vld [vmem:[%s3903_s16 + $0x15b0] sm:$0xff]  ;;  %v943_v31 = vld [vmem:[%s3903_s16 + $0x1420] sm:$0xff] }
 0x182   : > { %2608 = vmatpush.msrb.mxu2 %v910_v33  ;;  %2627 = vmatpush.msrb.mxu3 %v927_v34  ;;  %v960_v33 = vld [vmem:[%s3903_s16 + $0x14a8] sm:$0xff]  ;;  %v975_v34 = vld [vmem:[%s3903_s16 + $0x1520] sm:$0xff] }
 0x183   : > { %2569 = vmatpush.msrb.mxu0 %v877_v36  ;;  %2588 = vmatpush.msrb.mxu1 %v894_v37  ;;  %v992_v36 = vld [vmem:[%s3903_s16 + $0x15a8] sm:$0xff]  ;;  %v942_v37 = vld [vmem:[%s3903_s16 + $0x1418] sm:$0xff] }
 0x184   : > { %2609 = vmatpush.msrb.mxu2 %v909_v32  ;;  %2628 = vmatpush.msrb.mxu3 %v926_v35  ;;  %v959_v32 = vld [vmem:[%s3903_s16 + $0x14a0] sm:$0xff]  ;;  %v974_v35 = vld [vmem:[%s3903_s16 + $0x1518] sm:$0xff] }
 0x185   : > { %2570 = vmatpush.msrb.mxu0 %v876_v38  ;;  %2589 = vmatpush.msrb.mxu1 %v893_v39  ;;  %v991_v38 = vld [vmem:[%s3903_s16 + $0x15a0] sm:$0xff]  ;;  %v941_v39 = vld [vmem:[%s3903_s16 + $0x1410] sm:$0xff] }
 0x186   : > { %2610 = vmatpush.msrb.mxu2 %v908_v41  ;;  %2629 = vmatpush.msrb.mxu3 %v925_v42  ;;  %v973_v41 = vld [vmem:[%s3903_s16 + $0x1510] sm:$0xff]  ;;  %v990_v42 = vld [vmem:[%s3903_s16 + $0x1598] sm:$0xff] }
 0x187   : > { %2571 = vmatpush.msrb.mxu0 %v875_v43  ;;  %2590 = vmatpush.msrb.mxu1 %v892_v44  ;;  %v940_v43 = vld [vmem:[%s3903_s16 + $0x1408] sm:$0xff]  ;;  %v957_v44 = vld [vmem:[%s3903_s16 + $0x1490] sm:$0xff] }
 0x188   : > { %2611 = vmatpush.msrb.mxu2 %v907_v45  ;;  %2630 = vmatpush.msrb.mxu3 %v924_v46  ;;  %v289_v45 = vld [vmem:[%s3917_s19 + $0x58] sm:$0xff] }
 0x189   : > { %2572 = vmatmul.f32.vlgmr.msrb.gmra.mxu0 %v1695_v47  ;;  %2612 = vmatmul.f32.vlgmr.msrb.gmra.mxu2 %v1697_v48  ;;  %v972_v46 = vld [vmem:[%s3903_s16 + $0x1508] sm:$0xff]  ;;  %v989_v47 = vld [vmem:[%s3903_s16 + $0x1590] sm:$0xff]  ;;  %1700 = vst [vmem:[#allocation1 + $0x20] ss:$4 sm:$0xff] %v289_v45  ;;  %v939_v48 = vld [vmem:[%s3903_s16 + $0x1400] sm:$0xff] }
 0x18a   : > { %2636 = vmatpush.msra.mxu0 %v954_v49  ;;  %2676 = vmatpush.msra.mxu2 %v986_v50  ;;  %v956_v49 = vld [vmem:[%s3903_s16 + $0x1488] sm:$0xff]  ;;  %v971_v50 = vld [vmem:[%s3903_s16 + $0x1500] sm:$0xff]  ;;  %v1022_v45 = vld [vmem:[%s3903_s16 + $0x1698] sm:$0xff] }
 0x18b   : > { %2591 = vmatpush.msrb.mxu1 %v891_v51  ;;  %2631 = vmatpush.msrb.mxu3 %v923_v52  ;;  %v988_v51 = vld [vmem:[%s3903_s16 + $0x1588] sm:$0xff]  ;;  %v1701_v52 = vld.sshfl [vmem:[#allocation1] sm:$0xff pattern:$0x73625140] }
 0x18c   : > { %2592 = vmatmul.f32.vlgmr.msrb.gmra.mxu1 %v1696_v53  ;;  %2632 = vmatmul.f32.vlgmr.msrb.gmra.mxu3 %v1698_v54  ;;  %v1703_v53 = vld.sshfl [vmem:[#allocation1 + $0x10] sm:$0xff pattern:$0x73625140]  ;;  %v1018_v54 = vld [vmem:[%s3903_s16 + $0x1678] sm:$0xff] }
 0x18d   : > { %2637 = vmatpush.msra.mxu0 %v953_v55  ;;  %2656 = vmatpush.msra.mxu1 %v970_v56  ;;  %v1050_v55 = vld [vmem:[%s3903_s16 + $0x1778] sm:$0xff]  ;;  %v955_v56 = vld [vmem:[%s3903_s16 + $0x1480] sm:$0xff] }
 0x18e   : > { %2677 = vmatpush.msra.mxu2 %v985_v57  ;;  %2696 = vmatpush.msra.mxu3 %v1002_v58  ;;  %v987_v57 = vld [vmem:[%s3903_s16 + $0x1580] sm:$0xff] }
 0x18f   : > { %2638 = vmatpush.msra.mxu0 %v952_v59  ;;  %2657 = vmatpush.msra.mxu1 %v969_v60  ;;  %v1702_v58 = vld.sshfl [vmem:[#allocation1 + $0x8] sm:$0xff pattern:$0x73625140]  ;;  %v1704_v59 = vld.sshfl [vmem:[#allocation1 + $0x18] sm:$0xff pattern:$0x73625140] }
 0x190   : > { %2678 = vmatpush.msra.mxu2 %v984_v61  ;;  %2697 = vmatpush.msra.mxu3 %v1001_v62  ;;  %v1017_v60 = vld [vmem:[%s3903_s16 + $0x1670] sm:$0xff]  ;;  %v1034_v61 = vld [vmem:[%s3903_s16 + $0x16f8] sm:$0xff] }
 0x191   : > { %2639 = vmatpush.msra.mxu0 %v951_v63  ;;  %2658 = vmatpush.msra.mxu1 %v968_v0  ;;  %v1049_v62 = vld [vmem:[%s3903_s16 + $0x1770] sm:$0xff]  ;;  %v1066_v63 = vld [vmem:[%s3903_s16 + $0x17f8] sm:$0xff]  ;;  %v1016_v0 = vld [vmem:[%s3903_s16 + $0x1668] sm:$0xff] }
 0x192   : > { %2679 = vmatpush.msra.mxu2 %v983_v1  ;;  %2698 = vmatpush.msra.mxu3 %v1000_v2  ;;  %v1033_v1 = vld [vmem:[%s3903_s16 + $0x16f0] sm:$0xff]  ;;  %v1048_v2 = vld [vmem:[%s3903_s16 + $0x1768] sm:$0xff] }
 0x193   : > { %2640 = vmatpush.msra.mxu0 %v950_v3  ;;  %2659 = vmatpush.msra.mxu1 %v967_v4  ;;  %v1065_v3 = vld [vmem:[%s3903_s16 + $0x17f0] sm:$0xff]  ;;  %v1015_v4 = vld [vmem:[%s3903_s16 + $0x1660] sm:$0xff] }
 0x194   : > { %2680 = vmatpush.msra.mxu2 %v982_v5  ;;  %2699 = vmatpush.msra.mxu3 %v999_v6  ;;  %v1032_v5 = vld [vmem:[%s3903_s16 + $0x16e8] sm:$0xff]  ;;  %v1047_v6 = vld [vmem:[%s3903_s16 + $0x1760] sm:$0xff] }
 0x195   : > { %2641 = vmatpush.msra.mxu0 %v949_v7  ;;  %2660 = vmatpush.msra.mxu1 %v966_v8  ;;  %v1064_v7 = vld [vmem:[%s3903_s16 + $0x17e8] sm:$0xff]  ;;  %v1014_v8 = vld [vmem:[%s3903_s16 + $0x1658] sm:$0xff] }
 0x196   : > { %2681 = vmatpush.msra.mxu2 %v981_v9  ;;  %2700 = vmatpush.msra.mxu3 %v998_v10  ;;  %v1031_v9 = vld [vmem:[%s3903_s16 + $0x16e0] sm:$0xff]  ;;  %v1046_v10 = vld [vmem:[%s3903_s16 + $0x1758] sm:$0xff] }
 0x197   : > { %2642 = vmatpush.msra.mxu0 %v948_v11  ;;  %2661 = vmatpush.msra.mxu1 %v965_v12  ;;  %v1063_v11 = vld [vmem:[%s3903_s16 + $0x17e0] sm:$0xff]  ;;  %v1013_v12 = vld [vmem:[%s3903_s16 + $0x1650] sm:$0xff] }
 0x198   : > { %2682 = vmatpush.msra.mxu2 %v980_v13  ;;  %2701 = vmatpush.msra.mxu3 %v997_v14  ;;  %v1030_v13 = vld [vmem:[%s3903_s16 + $0x16d8] sm:$0xff]  ;;  %v1045_v14 = vld [vmem:[%s3903_s16 + $0x1750] sm:$0xff] }
 0x199   : > { %2643 = vmatpush.msra.mxu0 %v947_v15  ;;  %2662 = vmatpush.msra.mxu1 %v964_v16  ;;  %v1062_v15 = vld [vmem:[%s3903_s16 + $0x17d8] sm:$0xff]  ;;  %v1012_v16 = vld [vmem:[%s3903_s16 + $0x1648] sm:$0xff] }
 0x19a   : > { %2683 = vmatpush.msra.mxu2 %v979_v17  ;;  %2702 = vmatpush.msra.mxu3 %v996_v18  ;;  %v1029_v17 = vld [vmem:[%s3903_s16 + $0x16d0] sm:$0xff]  ;;  %v1044_v18 = vld [vmem:[%s3903_s16 + $0x1748] sm:$0xff] }
 0x19b   : > { %2644 = vmatpush.msra.mxu0 %v946_v19  ;;  %2663 = vmatpush.msra.mxu1 %v963_v20  ;;  %v1061_v19 = vld [vmem:[%s3903_s16 + $0x17d0] sm:$0xff]  ;;  %v1011_v20 = vld [vmem:[%s3903_s16 + $0x1640] sm:$0xff] }
 0x19c   : > { %2684 = vmatpush.msra.mxu2 %v978_v21  ;;  %2703 = vmatpush.msra.mxu3 %v995_v22  ;;  %v1028_v21 = vld [vmem:[%s3903_s16 + $0x16c8] sm:$0xff]  ;;  %v1043_v22 = vld [vmem:[%s3903_s16 + $0x1740] sm:$0xff] }
 0x19d   : > { %2645 = vmatpush.msra.mxu0 %v945_v23  ;;  %2664 = vmatpush.msra.mxu1 %v962_v24  ;;  %v1060_v23 = vld [vmem:[%s3903_s16 + $0x17c8] sm:$0xff]  ;;  %v1010_v24 = vld [vmem:[%s3903_s16 + $0x1638] sm:$0xff] }
 0x19e   : > { %2685 = vmatpush.msra.mxu2 %v977_v25  ;;  %2704 = vmatpush.msra.mxu3 %v994_v26  ;;  %v1027_v25 = vld [vmem:[%s3903_s16 + $0x16c0] sm:$0xff]  ;;  %v1042_v26 = vld [vmem:[%s3903_s16 + $0x1738] sm:$0xff] }
 0x19f   : > { %2646 = vmatpush.msra.mxu0 %v944_v27  ;;  %2665 = vmatpush.msra.mxu1 %v961_v28  ;;  %v1059_v27 = vld [vmem:[%s3903_s16 + $0x17c0] sm:$0xff]  ;;  %v1009_v28 = vld [vmem:[%s3903_s16 + $0x1630] sm:$0xff] }
 0x1a0   : > { %2686 = vmatpush.msra.mxu2 %v976_v29  ;;  %2705 = vmatpush.msra.mxu3 %v993_v30  ;;  %v1026_v29 = vld [vmem:[%s3903_s16 + $0x16b8] sm:$0xff]  ;;  %v1041_v30 = vld [vmem:[%s3903_s16 + $0x1730] sm:$0xff] }
 0x1a1   : > { %2647 = vmatpush.msra.mxu0 %v943_v31  ;;  %2666 = vmatpush.msra.mxu1 %v960_v33  ;;  %v1058_v31 = vld [vmem:[%s3903_s16 + $0x17b8] sm:$0xff]  ;;  %v1008_v33 = vld [vmem:[%s3903_s16 + $0x1628] sm:$0xff] }
 0x1a2   : > { %2687 = vmatpush.msra.mxu2 %v975_v34  ;;  %2706 = vmatpush.msra.mxu3 %v992_v36  ;;  %v1025_v34 = vld [vmem:[%s3903_s16 + $0x16b0] sm:$0xff]  ;;  %v1040_v36 = vld [vmem:[%s3903_s16 + $0x1728] sm:$0xff] }
 0x1a3   : > { %2648 = vmatpush.msra.mxu0 %v942_v37  ;;  %2667 = vmatpush.msra.mxu1 %v959_v32  ;;  %v1057_v37 = vld [vmem:[%s3903_s16 + $0x17b0] sm:$0xff]  ;;  %v1007_v32 = vld [vmem:[%s3903_s16 + $0x1620] sm:$0xff] }
 0x1a4   : > { %2688 = vmatpush.msra.mxu2 %v974_v35  ;;  %2707 = vmatpush.msra.mxu3 %v991_v38  ;;  %v1024_v35 = vld [vmem:[%s3903_s16 + $0x16a8] sm:$0xff]  ;;  %v1039_v38 = vld [vmem:[%s3903_s16 + $0x1720] sm:$0xff] }
 0x1a5   : > { %2649 = vmatpush.msra.mxu0 %v941_v39  ;;  %2668 = vmatpush.msra.mxu1 %v958_v40  ;;  %v1056_v39 = vld [vmem:[%s3903_s16 + $0x17a8] sm:$0xff]  ;;  %v1006_v40 = vld [vmem:[%s3903_s16 + $0x1618] sm:$0xff] }
 0x1a6   : > { %2689 = vmatpush.msra.mxu2 %v973_v41  ;;  %2708 = vmatpush.msra.mxu3 %v990_v42  ;;  %v1023_v41 = vld [vmem:[%s3903_s16 + $0x16a0] sm:$0xff]  ;;  %v1038_v42 = vld [vmem:[%s3903_s16 + $0x1718] sm:$0xff] }
 0x1a7   : > { %2650 = vmatpush.msra.mxu0 %v940_v43  ;;  %2669 = vmatpush.msra.mxu1 %v957_v44  ;;  %v1055_v43 = vld [vmem:[%s3903_s16 + $0x17a0] sm:$0xff]  ;;  %v1005_v44 = vld [vmem:[%s3903_s16 + $0x1610] sm:$0xff] }
 0x1a8   : > { %2690 = vmatpush.msra.mxu2 %v972_v46  ;;  %2709 = vmatpush.msra.mxu3 %v989_v47  ;;  %v1037_v46 = vld [vmem:[%s3903_s16 + $0x1710] sm:$0xff]  ;;  %v1054_v47 = vld [vmem:[%s3903_s16 + $0x1798] sm:$0xff] }
 0x1a9   : > { %2651 = vmatpush.msra.mxu0 %v939_v48  ;;  %2670 = vmatpush.msra.mxu1 %v956_v49  ;;  %v1004_v48 = vld [vmem:[%s3903_s16 + $0x1608] sm:$0xff]  ;;  %v1021_v49 = vld [vmem:[%s3903_s16 + $0x1690] sm:$0xff] }
 0x1aa   : > { %2691 = vmatpush.msra.mxu2 %v971_v50  ;;  %2710 = vmatpush.msra.mxu3 %v988_v51  ;;  %v290_v50 = vld [vmem:[%s3917_s19 + $0x60] sm:$0xff]  ;;  %v1036_v51 = vld [vmem:[%s3903_s16 + $0x1708] sm:$0xff] }
 0x1ab   : > { %2652 = vmatmul.f32.vlgmr.msra.gmra.mxu0 %v1701_v52  ;;  %2692 = vmatmul.f32.vlgmr.msra.gmra.mxu2 %v1703_v53  ;;  %v1053_v52 = vld [vmem:[%s3903_s16 + $0x1790] sm:$0xff]  ;;  %1709 = vst [vmem:[#allocation1] ss:$4 sm:$0xff] %v290_v50  ;;  %v1003_v53 = vld [vmem:[%s3903_s16 + $0x1600] sm:$0xff]  ;;  %v1086_v50 = vld [vmem:[%s3903_s16 + $0x1898] sm:$0xff] }
 0x1ac   : > { %2716 = vmatpush.msrb.mxu0 %v1018_v54  ;;  %2756 = vmatpush.msrb.mxu2 %v1050_v55  ;;  %v1020_v54 = vld [vmem:[%s3903_s16 + $0x1688] sm:$0xff]  ;;  %v1035_v55 = vld [vmem:[%s3903_s16 + $0x1700] sm:$0xff] }
 0x1ad   : > { %2671 = vmatpush.msra.mxu1 %v955_v56  ;;  %2711 = vmatpush.msra.mxu3 %v987_v57  ;;  %v1052_v56 = vld [vmem:[%s3903_s16 + $0x1788] sm:$0xff]  ;;  %v1705_v57 = vld.sshfl [vmem:[#allocation1 + $0x20] sm:$0xff pattern:$0x73625140] }
 0x1ae   : > { %2672 = vmatmul.f32.vlgmr.msra.gmra.mxu1 %v1702_v58  ;;  %2712 = vmatmul.f32.vlgmr.msra.gmra.mxu3 %v1704_v59  ;;  %v1707_v58 = vld.sshfl [vmem:[#allocation1 + $0x30] sm:$0xff pattern:$0x73625140]  ;;  %v1082_v59 = vld [vmem:[%s3903_s16 + $0x1878] sm:$0xff] }
 0x1af   : > { %2717 = vmatpush.msrb.mxu0 %v1017_v60  ;;  %2736 = vmatpush.msrb.mxu1 %v1034_v61  ;;  %v1114_v60 = vld [vmem:[%s3903_s16 + $0x1978] sm:$0xff]  ;;  %v1019_v61 = vld [vmem:[%s3903_s16 + $0x1680] sm:$0xff] }
 0x1b0   : > { %2757 = vmatpush.msrb.mxu2 %v1049_v62  ;;  %2776 = vmatpush.msrb.mxu3 %v1066_v63  ;;  %v1051_v62 = vld [vmem:[%s3903_s16 + $0x1780] sm:$0xff] }
 0x1b1   : > { %2718 = vmatpush.msrb.mxu0 %v1016_v0  ;;  %2737 = vmatpush.msrb.mxu1 %v1033_v1  ;;  %v1706_v63 = vld.sshfl [vmem:[#allocation1 + $0x28] sm:$0xff pattern:$0x73625140]  ;;  %v1708_v0 = vld.sshfl [vmem:[#allocation1 + $0x38] sm:$0xff pattern:$0x73625140] }
 0x1b2   : > { %2758 = vmatpush.msrb.mxu2 %v1048_v2  ;;  %2777 = vmatpush.msrb.mxu3 %v1065_v3  ;;  %v1081_v1 = vld [vmem:[%s3903_s16 + $0x1870] sm:$0xff]  ;;  %v1098_v2 = vld [vmem:[%s3903_s16 + $0x18f8] sm:$0xff] }
 0x1b3   : > { %2719 = vmatpush.msrb.mxu0 %v1015_v4  ;;  %2738 = vmatpush.msrb.mxu1 %v1032_v5  ;;  %v1113_v3 = vld [vmem:[%s3903_s16 + $0x1970] sm:$0xff]  ;;  %v1130_v4 = vld [vmem:[%s3903_s16 + $0x19f8] sm:$0xff]  ;;  %v1080_v5 = vld [vmem:[%s3903_s16 + $0x1868] sm:$0xff] }
 0x1b4   : > { %2759 = vmatpush.msrb.mxu2 %v1047_v6  ;;  %2778 = vmatpush.msrb.mxu3 %v1064_v7  ;;  %v1097_v6 = vld [vmem:[%s3903_s16 + $0x18f0] sm:$0xff]  ;;  %v1112_v7 = vld [vmem:[%s3903_s16 + $0x1968] sm:$0xff] }
 0x1b5   : > { %2720 = vmatpush.msrb.mxu0 %v1014_v8  ;;  %2739 = vmatpush.msrb.mxu1 %v1031_v9  ;;  %v1129_v8 = vld [vmem:[%s3903_s16 + $0x19f0] sm:$0xff]  ;;  %v1079_v9 = vld [vmem:[%s3903_s16 + $0x1860] sm:$0xff] }
 0x1b6   : > { %2760 = vmatpush.msrb.mxu2 %v1046_v10  ;;  %2779 = vmatpush.msrb.mxu3 %v1063_v11  ;;  %v1096_v10 = vld [vmem:[%s3903_s16 + $0x18e8] sm:$0xff]  ;;  %v1111_v11 = vld [vmem:[%s3903_s16 + $0x1960] sm:$0xff] }
 0x1b7   : > { %2721 = vmatpush.msrb.mxu0 %v1013_v12  ;;  %2740 = vmatpush.msrb.mxu1 %v1030_v13  ;;  %v1128_v12 = vld [vmem:[%s3903_s16 + $0x19e8] sm:$0xff]  ;;  %v1078_v13 = vld [vmem:[%s3903_s16 + $0x1858] sm:$0xff] }
 0x1b8   : > { %2761 = vmatpush.msrb.mxu2 %v1045_v14  ;;  %2780 = vmatpush.msrb.mxu3 %v1062_v15  ;;  %v1095_v14 = vld [vmem:[%s3903_s16 + $0x18e0] sm:$0xff]  ;;  %v1110_v15 = vld [vmem:[%s3903_s16 + $0x1958] sm:$0xff] }
 0x1b9   : > { %2722 = vmatpush.msrb.mxu0 %v1012_v16  ;;  %2741 = vmatpush.msrb.mxu1 %v1029_v17  ;;  %v1127_v16 = vld [vmem:[%s3903_s16 + $0x19e0] sm:$0xff]  ;;  %v1077_v17 = vld [vmem:[%s3903_s16 + $0x1850] sm:$0xff] }
 0x1ba   : > { %2762 = vmatpush.msrb.mxu2 %v1044_v18  ;;  %2781 = vmatpush.msrb.mxu3 %v1061_v19  ;;  %v1094_v18 = vld [vmem:[%s3903_s16 + $0x18d8] sm:$0xff]  ;;  %v1109_v19 = vld [vmem:[%s3903_s16 + $0x1950] sm:$0xff] }
 0x1bb   : > { %2723 = vmatpush.msrb.mxu0 %v1011_v20  ;;  %2742 = vmatpush.msrb.mxu1 %v1028_v21  ;;  %v1126_v20 = vld [vmem:[%s3903_s16 + $0x19d8] sm:$0xff]  ;;  %v1076_v21 = vld [vmem:[%s3903_s16 + $0x1848] sm:$0xff] }
 0x1bc   : > { %2763 = vmatpush.msrb.mxu2 %v1043_v22  ;;  %2782 = vmatpush.msrb.mxu3 %v1060_v23  ;;  %v1093_v22 = vld [vmem:[%s3903_s16 + $0x18d0] sm:$0xff]  ;;  %v1108_v23 = vld [vmem:[%s3903_s16 + $0x1948] sm:$0xff] }
 0x1bd   : > { %2724 = vmatpush.msrb.mxu0 %v1010_v24  ;;  %2743 = vmatpush.msrb.mxu1 %v1027_v25  ;;  %v1125_v24 = vld [vmem:[%s3903_s16 + $0x19d0] sm:$0xff]  ;;  %v1075_v25 = vld [vmem:[%s3903_s16 + $0x1840] sm:$0xff] }
 0x1be   : > { %2764 = vmatpush.msrb.mxu2 %v1042_v26  ;;  %2783 = vmatpush.msrb.mxu3 %v1059_v27  ;;  %v1092_v26 = vld [vmem:[%s3903_s16 + $0x18c8] sm:$0xff]  ;;  %v1107_v27 = vld [vmem:[%s3903_s16 + $0x1940] sm:$0xff] }
 0x1bf   : > { %2725 = vmatpush.msrb.mxu0 %v1009_v28  ;;  %2744 = vmatpush.msrb.mxu1 %v1026_v29  ;;  %v1124_v28 = vld [vmem:[%s3903_s16 + $0x19c8] sm:$0xff]  ;;  %v1074_v29 = vld [vmem:[%s3903_s16 + $0x1838] sm:$0xff] }
 0x1c0   : > { %2765 = vmatpush.msrb.mxu2 %v1041_v30  ;;  %2784 = vmatpush.msrb.mxu3 %v1058_v31  ;;  %v1091_v30 = vld [vmem:[%s3903_s16 + $0x18c0] sm:$0xff]  ;;  %v1106_v31 = vld [vmem:[%s3903_s16 + $0x1938] sm:$0xff] }
 0x1c1   : > { %2726 = vmatpush.msrb.mxu0 %v1008_v33  ;;  %2745 = vmatpush.msrb.mxu1 %v1025_v34  ;;  %v1123_v33 = vld [vmem:[%s3903_s16 + $0x19c0] sm:$0xff]  ;;  %v1073_v34 = vld [vmem:[%s3903_s16 + $0x1830] sm:$0xff] }
 0x1c2   : > { %2766 = vmatpush.msrb.mxu2 %v1040_v36  ;;  %2785 = vmatpush.msrb.mxu3 %v1057_v37  ;;  %v1090_v36 = vld [vmem:[%s3903_s16 + $0x18b8] sm:$0xff]  ;;  %v1105_v37 = vld [vmem:[%s3903_s16 + $0x1930] sm:$0xff] }
 0x1c3   : > { %2727 = vmatpush.msrb.mxu0 %v1007_v32  ;;  %2746 = vmatpush.msrb.mxu1 %v1024_v35  ;;  %v1122_v32 = vld [vmem:[%s3903_s16 + $0x19b8] sm:$0xff]  ;;  %v1072_v35 = vld [vmem:[%s3903_s16 + $0x1828] sm:$0xff] }
 0x1c4   : > { %2767 = vmatpush.msrb.mxu2 %v1039_v38  ;;  %2786 = vmatpush.msrb.mxu3 %v1056_v39  ;;  %v1089_v38 = vld [vmem:[%s3903_s16 + $0x18b0] sm:$0xff]  ;;  %v1104_v39 = vld [vmem:[%s3903_s16 + $0x1928] sm:$0xff] }
 0x1c5   : > { %2728 = vmatpush.msrb.mxu0 %v1006_v40  ;;  %2747 = vmatpush.msrb.mxu1 %v1023_v41  ;;  %v1121_v40 = vld [vmem:[%s3903_s16 + $0x19b0] sm:$0xff]  ;;  %v1071_v41 = vld [vmem:[%s3903_s16 + $0x1820] sm:$0xff] }
 0x1c6   : > { %2768 = vmatpush.msrb.mxu2 %v1038_v42  ;;  %2787 = vmatpush.msrb.mxu3 %v1055_v43  ;;  %v1088_v42 = vld [vmem:[%s3903_s16 + $0x18a8] sm:$0xff]  ;;  %v1103_v43 = vld [vmem:[%s3903_s16 + $0x1920] sm:$0xff] }
 0x1c7   : > { %2729 = vmatpush.msrb.mxu0 %v1005_v44  ;;  %2748 = vmatpush.msrb.mxu1 %v1022_v45  ;;  %v1120_v44 = vld [vmem:[%s3903_s16 + $0x19a8] sm:$0xff]  ;;  %v1070_v45 = vld [vmem:[%s3903_s16 + $0x1818] sm:$0xff] }
 0x1c8   : > { %2769 = vmatpush.msrb.mxu2 %v1037_v46  ;;  %2788 = vmatpush.msrb.mxu3 %v1054_v47  ;;  %v1087_v46 = vld [vmem:[%s3903_s16 + $0x18a0] sm:$0xff]  ;;  %v1102_v47 = vld [vmem:[%s3903_s16 + $0x1918] sm:$0xff] }
 0x1c9   : > { %2730 = vmatpush.msrb.mxu0 %v1004_v48  ;;  %2749 = vmatpush.msrb.mxu1 %v1021_v49  ;;  %v1119_v48 = vld [vmem:[%s3903_s16 + $0x19a0] sm:$0xff]  ;;  %v1069_v49 = vld [vmem:[%s3903_s16 + $0x1810] sm:$0xff] }
 0x1ca   : > { %2770 = vmatpush.msrb.mxu2 %v1036_v51  ;;  %2789 = vmatpush.msrb.mxu3 %v1053_v52  ;;  %v1101_v51 = vld [vmem:[%s3903_s16 + $0x1910] sm:$0xff]  ;;  %v1118_v52 = vld [vmem:[%s3903_s16 + $0x1998] sm:$0xff] }
 0x1cb   : > { %2731 = vmatpush.msrb.mxu0 %v1003_v53  ;;  %2750 = vmatpush.msrb.mxu1 %v1020_v54  ;;  %v1068_v53 = vld [vmem:[%s3903_s16 + $0x1808] sm:$0xff]  ;;  %v1085_v54 = vld [vmem:[%s3903_s16 + $0x1890] sm:$0xff] }
 0x1cc   : > { %2771 = vmatpush.msrb.mxu2 %v1035_v55  ;;  %2790 = vmatpush.msrb.mxu3 %v1052_v56  ;;  %v291_v55 = vld [vmem:[%s3917_s19 + $0x68] sm:$0xff]  ;;  %v1100_v56 = vld [vmem:[%s3903_s16 + $0x1908] sm:$0xff] }
 0x1cd   : > { %2732 = vmatmul.f32.vlgmr.msrb.gmra.mxu0 %v1705_v57  ;;  %2772 = vmatmul.f32.vlgmr.msrb.gmra.mxu2 %v1707_v58  ;;  %v1117_v57 = vld [vmem:[%s3903_s16 + $0x1990] sm:$0xff]  ;;  %1710 = vst [vmem:[#allocation1 + $0x20] ss:$4 sm:$0xff] %v291_v55  ;;  %v1067_v58 = vld [vmem:[%s3903_s16 + $0x1800] sm:$0xff]  ;;  %v1150_v55 = vld [vmem:[%s3903_s16 + $0x1a98] sm:$0xff] }
 0x1ce   : > { %2796 = vmatpush.msra.mxu0 %v1082_v59  ;;  %2836 = vmatpush.msra.mxu2 %v1114_v60  ;;  %v1084_v59 = vld [vmem:[%s3903_s16 + $0x1888] sm:$0xff]  ;;  %v1099_v60 = vld [vmem:[%s3903_s16 + $0x1900] sm:$0xff] }
 0x1cf   : > { %2751 = vmatpush.msrb.mxu1 %v1019_v61  ;;  %2791 = vmatpush.msrb.mxu3 %v1051_v62  ;;  %v1116_v61 = vld [vmem:[%s3903_s16 + $0x1988] sm:$0xff]  ;;  %v1711_v62 = vld.sshfl [vmem:[#allocation1] sm:$0xff pattern:$0x73625140] }
 0x1d0   : > { %2752 = vmatmul.f32.vlgmr.msrb.gmra.mxu1 %v1706_v63  ;;  %2792 = vmatmul.f32.vlgmr.msrb.gmra.mxu3 %v1708_v0  ;;  %v1713_v63 = vld.sshfl [vmem:[#allocation1 + $0x10] sm:$0xff pattern:$0x73625140]  ;;  %v1146_v0 = vld [vmem:[%s3903_s16 + $0x1a78] sm:$0xff] }
 0x1d1   : > { %2797 = vmatpush.msra.mxu0 %v1081_v1  ;;  %2816 = vmatpush.msra.mxu1 %v1098_v2  ;;  %v1178_v1 = vld [vmem:[%s3903_s16 + $0x1b78] sm:$0xff]  ;;  %v1083_v2 = vld [vmem:[%s3903_s16 + $0x1880] sm:$0xff] }
 0x1d2   : > { %2837 = vmatpush.msra.mxu2 %v1113_v3  ;;  %2856 = vmatpush.msra.mxu3 %v1130_v4  ;;  %v1115_v3 = vld [vmem:[%s3903_s16 + $0x1980] sm:$0xff] }
 0x1d3   : > { %2798 = vmatpush.msra.mxu0 %v1080_v5  ;;  %2817 = vmatpush.msra.mxu1 %v1097_v6  ;;  %v1712_v4 = vld.sshfl [vmem:[#allocation1 + $0x8] sm:$0xff pattern:$0x73625140]  ;;  %v1714_v5 = vld.sshfl [vmem:[#allocation1 + $0x18] sm:$0xff pattern:$0x73625140] }
 0x1d4   : > { %2838 = vmatpush.msra.mxu2 %v1112_v7  ;;  %2857 = vmatpush.msra.mxu3 %v1129_v8  ;;  %v1145_v6 = vld [vmem:[%s3903_s16 + $0x1a70] sm:$0xff]  ;;  %v1162_v7 = vld [vmem:[%s3903_s16 + $0x1af8] sm:$0xff] }
 0x1d5   : > { %2799 = vmatpush.msra.mxu0 %v1079_v9  ;;  %2818 = vmatpush.msra.mxu1 %v1096_v10  ;;  %v1177_v8 = vld [vmem:[%s3903_s16 + $0x1b70] sm:$0xff]  ;;  %v1194_v9 = vld [vmem:[%s3903_s16 + $0x1bf8] sm:$0xff]  ;;  %v1144_v10 = vld [vmem:[%s3903_s16 + $0x1a68] sm:$0xff] }
 0x1d6   : > { %2839 = vmatpush.msra.mxu2 %v1111_v11  ;;  %2858 = vmatpush.msra.mxu3 %v1128_v12  ;;  %v1161_v11 = vld [vmem:[%s3903_s16 + $0x1af0] sm:$0xff]  ;;  %v1176_v12 = vld [vmem:[%s3903_s16 + $0x1b68] sm:$0xff] }
 0x1d7   : > { %2800 = vmatpush.msra.mxu0 %v1078_v13  ;;  %2819 = vmatpush.msra.mxu1 %v1095_v14  ;;  %v1193_v13 = vld [vmem:[%s3903_s16 + $0x1bf0] sm:$0xff]  ;;  %v1143_v14 = vld [vmem:[%s3903_s16 + $0x1a60] sm:$0xff] }
 0x1d8   : > { %2840 = vmatpush.msra.mxu2 %v1110_v15  ;;  %2859 = vmatpush.msra.mxu3 %v1127_v16  ;;  %v1160_v15 = vld [vmem:[%s3903_s16 + $0x1ae8] sm:$0xff]  ;;  %v1175_v16 = vld [vmem:[%s3903_s16 + $0x1b60] sm:$0xff] }
 0x1d9   : > { %2801 = vmatpush.msra.mxu0 %v1077_v17  ;;  %2820 = vmatpush.msra.mxu1 %v1094_v18  ;;  %v1192_v17 = vld [vmem:[%s3903_s16 + $0x1be8] sm:$0xff]  ;;  %v1142_v18 = vld [vmem:[%s3903_s16 + $0x1a58] sm:$0xff] }
 0x1da   : > { %2841 = vmatpush.msra.mxu2 %v1109_v19  ;;  %2860 = vmatpush.msra.mxu3 %v1126_v20  ;;  %v1159_v19 = vld [vmem:[%s3903_s16 + $0x1ae0] sm:$0xff]  ;;  %v1174_v20 = vld [vmem:[%s3903_s16 + $0x1b58] sm:$0xff] }
 0x1db   : > { %2802 = vmatpush.msra.mxu0 %v1076_v21  ;;  %2821 = vmatpush.msra.mxu1 %v1093_v22  ;;  %v1191_v21 = vld [vmem:[%s3903_s16 + $0x1be0] sm:$0xff]  ;;  %v1141_v22 = vld [vmem:[%s3903_s16 + $0x1a50] sm:$0xff] }
 0x1dc   : > { %2842 = vmatpush.msra.mxu2 %v1108_v23  ;;  %2861 = vmatpush.msra.mxu3 %v1125_v24  ;;  %v1158_v23 = vld [vmem:[%s3903_s16 + $0x1ad8] sm:$0xff]  ;;  %v1173_v24 = vld [vmem:[%s3903_s16 + $0x1b50] sm:$0xff] }
 0x1dd   : > { %2803 = vmatpush.msra.mxu0 %v1075_v25  ;;  %2822 = vmatpush.msra.mxu1 %v1092_v26  ;;  %v1190_v25 = vld [vmem:[%s3903_s16 + $0x1bd8] sm:$0xff]  ;;  %v1140_v26 = vld [vmem:[%s3903_s16 + $0x1a48] sm:$0xff] }
 0x1de   : > { %2843 = vmatpush.msra.mxu2 %v1107_v27  ;;  %2862 = vmatpush.msra.mxu3 %v1124_v28  ;;  %v1157_v27 = vld [vmem:[%s3903_s16 + $0x1ad0] sm:$0xff]  ;;  %v1172_v28 = vld [vmem:[%s3903_s16 + $0x1b48] sm:$0xff] }
 0x1df   : > { %2804 = vmatpush.msra.mxu0 %v1074_v29  ;;  %2823 = vmatpush.msra.mxu1 %v1091_v30  ;;  %v1189_v29 = vld [vmem:[%s3903_s16 + $0x1bd0] sm:$0xff]  ;;  %v1139_v30 = vld [vmem:[%s3903_s16 + $0x1a40] sm:$0xff] }
 0x1e0   : > { %2844 = vmatpush.msra.mxu2 %v1106_v31  ;;  %2863 = vmatpush.msra.mxu3 %v1123_v33  ;;  %v1156_v31 = vld [vmem:[%s3903_s16 + $0x1ac8] sm:$0xff]  ;;  %v1171_v33 = vld [vmem:[%s3903_s16 + $0x1b40] sm:$0xff] }
 0x1e1   : > { %2805 = vmatpush.msra.mxu0 %v1073_v34  ;;  %2824 = vmatpush.msra.mxu1 %v1090_v36  ;;  %v1188_v34 = vld [vmem:[%s3903_s16 + $0x1bc8] sm:$0xff]  ;;  %v1138_v36 = vld [vmem:[%s3903_s16 + $0x1a38] sm:$0xff] }
 0x1e2   : > { %2845 = vmatpush.msra.mxu2 %v1105_v37  ;;  %2864 = vmatpush.msra.mxu3 %v1122_v32  ;;  %v1155_v37 = vld [vmem:[%s3903_s16 + $0x1ac0] sm:$0xff]  ;;  %v1170_v32 = vld [vmem:[%s3903_s16 + $0x1b38] sm:$0xff] }
 0x1e3   : > { %2806 = vmatpush.msra.mxu0 %v1072_v35  ;;  %2825 = vmatpush.msra.mxu1 %v1089_v38  ;;  %v1187_v35 = vld [vmem:[%s3903_s16 + $0x1bc0] sm:$0xff]  ;;  %v1137_v38 = vld [vmem:[%s3903_s16 + $0x1a30] sm:$0xff] }
 0x1e4   : > { %2846 = vmatpush.msra.mxu2 %v1104_v39  ;;  %2865 = vmatpush.msra.mxu3 %v1121_v40  ;;  %v1154_v39 = vld [vmem:[%s3903_s16 + $0x1ab8] sm:$0xff]  ;;  %v1169_v40 = vld [vmem:[%s3903_s16 + $0x1b30] sm:$0xff] }
 0x1e5   : > { %2807 = vmatpush.msra.mxu0 %v1071_v41  ;;  %2826 = vmatpush.msra.mxu1 %v1088_v42  ;;  %v1186_v41 = vld [vmem:[%s3903_s16 + $0x1bb8] sm:$0xff]  ;;  %v1136_v42 = vld [vmem:[%s3903_s16 + $0x1a28] sm:$0xff] }
 0x1e6   : > { %2847 = vmatpush.msra.mxu2 %v1103_v43  ;;  %2866 = vmatpush.msra.mxu3 %v1120_v44  ;;  %v1153_v43 = vld [vmem:[%s3903_s16 + $0x1ab0] sm:$0xff]  ;;  %v1168_v44 = vld [vmem:[%s3903_s16 + $0x1b28] sm:$0xff] }
 0x1e7   : > { %2808 = vmatpush.msra.mxu0 %v1070_v45  ;;  %2827 = vmatpush.msra.mxu1 %v1087_v46  ;;  %v1185_v45 = vld [vmem:[%s3903_s16 + $0x1bb0] sm:$0xff]  ;;  %v1135_v46 = vld [vmem:[%s3903_s16 + $0x1a20] sm:$0xff] }
 0x1e8   : > { %2848 = vmatpush.msra.mxu2 %v1102_v47  ;;  %2867 = vmatpush.msra.mxu3 %v1119_v48  ;;  %v1152_v47 = vld [vmem:[%s3903_s16 + $0x1aa8] sm:$0xff]  ;;  %v1167_v48 = vld [vmem:[%s3903_s16 + $0x1b20] sm:$0xff] }
 0x1e9   : > { %2809 = vmatpush.msra.mxu0 %v1069_v49  ;;  %2828 = vmatpush.msra.mxu1 %v1086_v50  ;;  %v1184_v49 = vld [vmem:[%s3903_s16 + $0x1ba8] sm:$0xff]  ;;  %v1134_v50 = vld [vmem:[%s3903_s16 + $0x1a18] sm:$0xff] }
 0x1ea   : > { %2849 = vmatpush.msra.mxu2 %v1101_v51  ;;  %2868 = vmatpush.msra.mxu3 %v1118_v52  ;;  %v1151_v51 = vld [vmem:[%s3903_s16 + $0x1aa0] sm:$0xff]  ;;  %v1166_v52 = vld [vmem:[%s3903_s16 + $0x1b18] sm:$0xff] }
 0x1eb   : > { %2810 = vmatpush.msra.mxu0 %v1068_v53  ;;  %2829 = vmatpush.msra.mxu1 %v1085_v54  ;;  %v1183_v53 = vld [vmem:[%s3903_s16 + $0x1ba0] sm:$0xff]  ;;  %v1133_v54 = vld [vmem:[%s3903_s16 + $0x1a10] sm:$0xff] }
 0x1ec   : > { %2850 = vmatpush.msra.mxu2 %v1100_v56  ;;  %2869 = vmatpush.msra.mxu3 %v1117_v57  ;;  %v1165_v56 = vld [vmem:[%s3903_s16 + $0x1b10] sm:$0xff]  ;;  %v1182_v57 = vld [vmem:[%s3903_s16 + $0x1b98] sm:$0xff] }
 0x1ed   : > { %2811 = vmatpush.msra.mxu0 %v1067_v58  ;;  %2830 = vmatpush.msra.mxu1 %v1084_v59  ;;  %v1132_v58 = vld [vmem:[%s3903_s16 + $0x1a08] sm:$0xff]  ;;  %v1149_v59 = vld [vmem:[%s3903_s16 + $0x1a90] sm:$0xff] }
 0x1ee   : > { %2851 = vmatpush.msra.mxu2 %v1099_v60  ;;  %2870 = vmatpush.msra.mxu3 %v1116_v61  ;;  %v292_v60 = vld [vmem:[%s3917_s19 + $0x70] sm:$0xff] }
 0x1ef   : > { %2812 = vmatmul.f32.vlgmr.msra.gmra.mxu0 %v1711_v62  ;;  %2852 = vmatmul.f32.vlgmr.msra.gmra.mxu2 %v1713_v63  ;;  %v1164_v61 = vld [vmem:[%s3903_s16 + $0x1b08] sm:$0xff]  ;;  %v1181_v62 = vld [vmem:[%s3903_s16 + $0x1b90] sm:$0xff]  ;;  %1719 = vst [vmem:[#allocation1] ss:$4 sm:$0xff] %v292_v60  ;;  %v1131_v63 = vld [vmem:[%s3903_s16 + $0x1a00] sm:$0xff] }
 0x1f0   : > { %2876 = vmatpush.msrb.mxu0 %v1146_v0  ;;  %2916 = vmatpush.msrb.mxu2 %v1178_v1  ;;  %v1148_v0 = vld [vmem:[%s3903_s16 + $0x1a88] sm:$0xff]  ;;  %v1163_v1 = vld [vmem:[%s3903_s16 + $0x1b00] sm:$0xff]  ;;  %v1214_v60 = vld [vmem:[%s3903_s16 + $0x1c98] sm:$0xff] }
 0x1f1   : > { %2831 = vmatpush.msra.mxu1 %v1083_v2  ;;  %2871 = vmatpush.msra.mxu3 %v1115_v3  ;;  %v1180_v2 = vld [vmem:[%s3903_s16 + $0x1b88] sm:$0xff]  ;;  %v1715_v3 = vld.sshfl [vmem:[#allocation1 + $0x20] sm:$0xff pattern:$0x73625140] }
 0x1f2   : > { %2832 = vmatmul.f32.vlgmr.msra.gmra.mxu1 %v1712_v4  ;;  %2872 = vmatmul.f32.vlgmr.msra.gmra.mxu3 %v1714_v5  ;;  %v1717_v4 = vld.sshfl [vmem:[#allocation1 + $0x30] sm:$0xff pattern:$0x73625140]  ;;  %v1210_v5 = vld [vmem:[%s3903_s16 + $0x1c78] sm:$0xff] }
 0x1f3   : > { %2877 = vmatpush.msrb.mxu0 %v1145_v6  ;;  %2896 = vmatpush.msrb.mxu1 %v1162_v7  ;;  %v1242_v6 = vld [vmem:[%s3903_s16 + $0x1d78] sm:$0xff]  ;;  %v1147_v7 = vld [vmem:[%s3903_s16 + $0x1a80] sm:$0xff] }
 0x1f4   : > { %2917 = vmatpush.msrb.mxu2 %v1177_v8  ;;  %2936 = vmatpush.msrb.mxu3 %v1194_v9  ;;  %v1179_v8 = vld [vmem:[%s3903_s16 + $0x1b80] sm:$0xff] }
 0x1f5   : > { %2878 = vmatpush.msrb.mxu0 %v1144_v10  ;;  %2897 = vmatpush.msrb.mxu1 %v1161_v11  ;;  %v1716_v9 = vld.sshfl [vmem:[#allocation1 + $0x28] sm:$0xff pattern:$0x73625140]  ;;  %v1718_v10 = vld.sshfl [vmem:[#allocation1 + $0x38] sm:$0xff pattern:$0x73625140] }
 0x1f6   : > { %2918 = vmatpush.msrb.mxu2 %v1176_v12  ;;  %2937 = vmatpush.msrb.mxu3 %v1193_v13  ;;  %v1209_v11 = vld [vmem:[%s3903_s16 + $0x1c70] sm:$0xff]  ;;  %v1226_v12 = vld [vmem:[%s3903_s16 + $0x1cf8] sm:$0xff] }
 0x1f7   : > { %2879 = vmatpush.msrb.mxu0 %v1143_v14  ;;  %2898 = vmatpush.msrb.mxu1 %v1160_v15  ;;  %v1241_v13 = vld [vmem:[%s3903_s16 + $0x1d70] sm:$0xff]  ;;  %v1258_v14 = vld [vmem:[%s3903_s16 + $0x1df8] sm:$0xff]  ;;  %v1208_v15 = vld [vmem:[%s3903_s16 + $0x1c68] sm:$0xff] }
 0x1f8   : > { %2919 = vmatpush.msrb.mxu2 %v1175_v16  ;;  %2938 = vmatpush.msrb.mxu3 %v1192_v17  ;;  %v1225_v16 = vld [vmem:[%s3903_s16 + $0x1cf0] sm:$0xff]  ;;  %v1240_v17 = vld [vmem:[%s3903_s16 + $0x1d68] sm:$0xff] }
 0x1f9   : > { %2880 = vmatpush.msrb.mxu0 %v1142_v18  ;;  %2899 = vmatpush.msrb.mxu1 %v1159_v19  ;;  %v1257_v18 = vld [vmem:[%s3903_s16 + $0x1df0] sm:$0xff]  ;;  %v1207_v19 = vld [vmem:[%s3903_s16 + $0x1c60] sm:$0xff] }
 0x1fa   : > { %2920 = vmatpush.msrb.mxu2 %v1174_v20  ;;  %2939 = vmatpush.msrb.mxu3 %v1191_v21  ;;  %v1224_v20 = vld [vmem:[%s3903_s16 + $0x1ce8] sm:$0xff]  ;;  %v1239_v21 = vld [vmem:[%s3903_s16 + $0x1d60] sm:$0xff] }
 0x1fb   : > { %2881 = vmatpush.msrb.mxu0 %v1141_v22  ;;  %2900 = vmatpush.msrb.mxu1 %v1158_v23  ;;  %v1256_v22 = vld [vmem:[%s3903_s16 + $0x1de8] sm:$0xff]  ;;  %v1206_v23 = vld [vmem:[%s3903_s16 + $0x1c58] sm:$0xff] }
 0x1fc   : > { %2921 = vmatpush.msrb.mxu2 %v1173_v24  ;;  %2940 = vmatpush.msrb.mxu3 %v1190_v25  ;;  %v1223_v24 = vld [vmem:[%s3903_s16 + $0x1ce0] sm:$0xff]  ;;  %v1238_v25 = vld [vmem:[%s3903_s16 + $0x1d58] sm:$0xff] }
 0x1fd   : > { %2882 = vmatpush.msrb.mxu0 %v1140_v26  ;;  %2901 = vmatpush.msrb.mxu1 %v1157_v27  ;;  %v1255_v26 = vld [vmem:[%s3903_s16 + $0x1de0] sm:$0xff]  ;;  %v1205_v27 = vld [vmem:[%s3903_s16 + $0x1c50] sm:$0xff] }
 0x1fe   : > { %2922 = vmatpush.msrb.mxu2 %v1172_v28  ;;  %2941 = vmatpush.msrb.mxu3 %v1189_v29  ;;  %v1222_v28 = vld [vmem:[%s3903_s16 + $0x1cd8] sm:$0xff]  ;;  %v1237_v29 = vld [vmem:[%s3903_s16 + $0x1d50] sm:$0xff] }
 0x1ff   : > { %2883 = vmatpush.msrb.mxu0 %v1139_v30  ;;  %2902 = vmatpush.msrb.mxu1 %v1156_v31  ;;  %v1254_v30 = vld [vmem:[%s3903_s16 + $0x1dd8] sm:$0xff]  ;;  %v1204_v31 = vld [vmem:[%s3903_s16 + $0x1c48] sm:$0xff] }
 0x200   : > { %2923 = vmatpush.msrb.mxu2 %v1171_v33  ;;  %2942 = vmatpush.msrb.mxu3 %v1188_v34  ;;  %v1221_v33 = vld [vmem:[%s3903_s16 + $0x1cd0] sm:$0xff]  ;;  %v1236_v34 = vld [vmem:[%s3903_s16 + $0x1d48] sm:$0xff] }
 0x201   : > { %2884 = vmatpush.msrb.mxu0 %v1138_v36  ;;  %2903 = vmatpush.msrb.mxu1 %v1155_v37  ;;  %v1253_v36 = vld [vmem:[%s3903_s16 + $0x1dd0] sm:$0xff]  ;;  %v1203_v37 = vld [vmem:[%s3903_s16 + $0x1c40] sm:$0xff] }
 0x202   : > { %2924 = vmatpush.msrb.mxu2 %v1170_v32  ;;  %2943 = vmatpush.msrb.mxu3 %v1187_v35  ;;  %v1220_v32 = vld [vmem:[%s3903_s16 + $0x1cc8] sm:$0xff]  ;;  %v1235_v35 = vld [vmem:[%s3903_s16 + $0x1d40] sm:$0xff] }
 0x203   : > { %2885 = vmatpush.msrb.mxu0 %v1137_v38  ;;  %2904 = vmatpush.msrb.mxu1 %v1154_v39  ;;  %v1252_v38 = vld [vmem:[%s3903_s16 + $0x1dc8] sm:$0xff]  ;;  %v1202_v39 = vld [vmem:[%s3903_s16 + $0x1c38] sm:$0xff] }
 0x204   : > { %2925 = vmatpush.msrb.mxu2 %v1169_v40  ;;  %2944 = vmatpush.msrb.mxu3 %v1186_v41  ;;  %v1219_v40 = vld [vmem:[%s3903_s16 + $0x1cc0] sm:$0xff]  ;;  %v1234_v41 = vld [vmem:[%s3903_s16 + $0x1d38] sm:$0xff] }
 0x205   : > { %2886 = vmatpush.msrb.mxu0 %v1136_v42  ;;  %2905 = vmatpush.msrb.mxu1 %v1153_v43  ;;  %v1251_v42 = vld [vmem:[%s3903_s16 + $0x1dc0] sm:$0xff]  ;;  %v1201_v43 = vld [vmem:[%s3903_s16 + $0x1c30] sm:$0xff] }
 0x206   : > { %2926 = vmatpush.msrb.mxu2 %v1168_v44  ;;  %2945 = vmatpush.msrb.mxu3 %v1185_v45  ;;  %v1218_v44 = vld [vmem:[%s3903_s16 + $0x1cb8] sm:$0xff]  ;;  %v1233_v45 = vld [vmem:[%s3903_s16 + $0x1d30] sm:$0xff] }
 0x207   : > { %2887 = vmatpush.msrb.mxu0 %v1135_v46  ;;  %2906 = vmatpush.msrb.mxu1 %v1152_v47  ;;  %v1250_v46 = vld [vmem:[%s3903_s16 + $0x1db8] sm:$0xff]  ;;  %v1200_v47 = vld [vmem:[%s3903_s16 + $0x1c28] sm:$0xff] }
 0x208   : > { %2927 = vmatpush.msrb.mxu2 %v1167_v48  ;;  %2946 = vmatpush.msrb.mxu3 %v1184_v49  ;;  %v1217_v48 = vld [vmem:[%s3903_s16 + $0x1cb0] sm:$0xff]  ;;  %v1232_v49 = vld [vmem:[%s3903_s16 + $0x1d28] sm:$0xff] }
 0x209   : > { %2888 = vmatpush.msrb.mxu0 %v1134_v50  ;;  %2907 = vmatpush.msrb.mxu1 %v1151_v51  ;;  %v1249_v50 = vld [vmem:[%s3903_s16 + $0x1db0] sm:$0xff]  ;;  %v1199_v51 = vld [vmem:[%s3903_s16 + $0x1c20] sm:$0xff] }
 0x20a   : > { %2928 = vmatpush.msrb.mxu2 %v1166_v52  ;;  %2947 = vmatpush.msrb.mxu3 %v1183_v53  ;;  %v1216_v52 = vld [vmem:[%s3903_s16 + $0x1ca8] sm:$0xff]  ;;  %v1231_v53 = vld [vmem:[%s3903_s16 + $0x1d20] sm:$0xff] }
 0x20b   : > { %2889 = vmatpush.msrb.mxu0 %v1133_v54  ;;  %2908 = vmatpush.msrb.mxu1 %v1150_v55  ;;  %v1248_v54 = vld [vmem:[%s3903_s16 + $0x1da8] sm:$0xff]  ;;  %v1198_v55 = vld [vmem:[%s3903_s16 + $0x1c18] sm:$0xff] }
 0x20c   : > { %2929 = vmatpush.msrb.mxu2 %v1165_v56  ;;  %2948 = vmatpush.msrb.mxu3 %v1182_v57  ;;  %v1215_v56 = vld [vmem:[%s3903_s16 + $0x1ca0] sm:$0xff]  ;;  %v1230_v57 = vld [vmem:[%s3903_s16 + $0x1d18] sm:$0xff] }
 0x20d   : > { %2890 = vmatpush.msrb.mxu0 %v1132_v58  ;;  %2909 = vmatpush.msrb.mxu1 %v1149_v59  ;;  %v1247_v58 = vld [vmem:[%s3903_s16 + $0x1da0] sm:$0xff]  ;;  %v1197_v59 = vld [vmem:[%s3903_s16 + $0x1c10] sm:$0xff] }
 0x20e   : > { %2930 = vmatpush.msrb.mxu2 %v1164_v61  ;;  %2949 = vmatpush.msrb.mxu3 %v1181_v62  ;;  %v1229_v61 = vld [vmem:[%s3903_s16 + $0x1d10] sm:$0xff]  ;;  %v1246_v62 = vld [vmem:[%s3903_s16 + $0x1d98] sm:$0xff] }
 0x20f   : > { %2891 = vmatpush.msrb.mxu0 %v1131_v63  ;;  %2910 = vmatpush.msrb.mxu1 %v1148_v0  ;;  %v1196_v63 = vld [vmem:[%s3903_s16 + $0x1c08] sm:$0xff]  ;;  %v1213_v0 = vld [vmem:[%s3903_s16 + $0x1c90] sm:$0xff] }
 0x210   : > { %2931 = vmatpush.msrb.mxu2 %v1163_v1  ;;  %2950 = vmatpush.msrb.mxu3 %v1180_v2  ;;  %v293_v1 = vld [vmem:[%s3917_s19 + $0x78] sm:$0xff] }
 0x211   : > { %2892 = vmatmul.f32.vlgmr.msrb.gmra.mxu0 %v1715_v3  ;;  %2932 = vmatmul.f32.vlgmr.msrb.gmra.mxu2 %v1717_v4  ;;  %v1228_v2 = vld [vmem:[%s3903_s16 + $0x1d08] sm:$0xff]  ;;  %v1245_v3 = vld [vmem:[%s3903_s16 + $0x1d90] sm:$0xff]  ;;  %1720 = vst [vmem:[#allocation1 + $0x20] ss:$4 sm:$0xff] %v293_v1  ;;  %v1195_v4 = vld [vmem:[%s3903_s16 + $0x1c00] sm:$0xff] }
 0x212   : > { %2956 = vmatpush.msra.mxu0 %v1210_v5  ;;  %2996 = vmatpush.msra.mxu2 %v1242_v6  ;;  %v1212_v5 = vld [vmem:[%s3903_s16 + $0x1c88] sm:$0xff]  ;;  %v1227_v6 = vld [vmem:[%s3903_s16 + $0x1d00] sm:$0xff]  ;;  %v1278_v1 = vld [vmem:[%s3903_s16 + $0x1e98] sm:$0xff] }
 0x213   : > { %2911 = vmatpush.msrb.mxu1 %v1147_v7  ;;  %2951 = vmatpush.msrb.mxu3 %v1179_v8  ;;  %v1244_v7 = vld [vmem:[%s3903_s16 + $0x1d88] sm:$0xff]  ;;  %v1721_v8 = vld.sshfl [vmem:[#allocation1] sm:$0xff pattern:$0x73625140] }
 0x214   : > { %2912 = vmatmul.f32.vlgmr.msrb.gmra.mxu1 %v1716_v9  ;;  %2952 = vmatmul.f32.vlgmr.msrb.gmra.mxu3 %v1718_v10  ;;  %v1723_v9 = vld.sshfl [vmem:[#allocation1 + $0x10] sm:$0xff pattern:$0x73625140]  ;;  %v1274_v10 = vld [vmem:[%s3903_s16 + $0x1e78] sm:$0xff] }
 0x215   : > { %2957 = vmatpush.msra.mxu0 %v1209_v11  ;;  %2976 = vmatpush.msra.mxu1 %v1226_v12  ;;  %v1306_v11 = vld [vmem:[%s3903_s16 + $0x1f78] sm:$0xff]  ;;  %v1211_v12 = vld [vmem:[%s3903_s16 + $0x1c80] sm:$0xff] }
 0x216   : > { %2997 = vmatpush.msra.mxu2 %v1241_v13  ;;  %3016 = vmatpush.msra.mxu3 %v1258_v14  ;;  %v1243_v13 = vld [vmem:[%s3903_s16 + $0x1d80] sm:$0xff] }
 0x217   : > { %2958 = vmatpush.msra.mxu0 %v1208_v15  ;;  %2977 = vmatpush.msra.mxu1 %v1225_v16  ;;  %v1722_v14 = vld.sshfl [vmem:[#allocation1 + $0x8] sm:$0xff pattern:$0x73625140]  ;;  %v1724_v15 = vld.sshfl [vmem:[#allocation1 + $0x18] sm:$0xff pattern:$0x73625140] }
 0x218   : > { %2998 = vmatpush.msra.mxu2 %v1240_v17  ;;  %3017 = vmatpush.msra.mxu3 %v1257_v18  ;;  %v1273_v16 = vld [vmem:[%s3903_s16 + $0x1e70] sm:$0xff]  ;;  %v1290_v17 = vld [vmem:[%s3903_s16 + $0x1ef8] sm:$0xff] }
 0x219   : > { %2959 = vmatpush.msra.mxu0 %v1207_v19  ;;  %2978 = vmatpush.msra.mxu1 %v1224_v20  ;;  %v1305_v18 = vld [vmem:[%s3903_s16 + $0x1f70] sm:$0xff]  ;;  %v1322_v19 = vld [vmem:[%s3903_s16 + $0x1ff8] sm:$0xff]  ;;  %v1272_v20 = vld [vmem:[%s3903_s16 + $0x1e68] sm:$0xff] }
 0x21a   : > { %2999 = vmatpush.msra.mxu2 %v1239_v21  ;;  %3018 = vmatpush.msra.mxu3 %v1256_v22  ;;  %v1289_v21 = vld [vmem:[%s3903_s16 + $0x1ef0] sm:$0xff]  ;;  %v1304_v22 = vld [vmem:[%s3903_s16 + $0x1f68] sm:$0xff] }
 0x21b   : > { %2960 = vmatpush.msra.mxu0 %v1206_v23  ;;  %2979 = vmatpush.msra.mxu1 %v1223_v24  ;;  %v1321_v23 = vld [vmem:[%s3903_s16 + $0x1ff0] sm:$0xff]  ;;  %v1271_v24 = vld [vmem:[%s3903_s16 + $0x1e60] sm:$0xff] }
 0x21c   : > { %3000 = vmatpush.msra.mxu2 %v1238_v25  ;;  %3019 = vmatpush.msra.mxu3 %v1255_v26  ;;  %v1288_v25 = vld [vmem:[%s3903_s16 + $0x1ee8] sm:$0xff]  ;;  %v1303_v26 = vld [vmem:[%s3903_s16 + $0x1f60] sm:$0xff] }
 0x21d   : > { %2961 = vmatpush.msra.mxu0 %v1205_v27  ;;  %2980 = vmatpush.msra.mxu1 %v1222_v28  ;;  %v1320_v27 = vld [vmem:[%s3903_s16 + $0x1fe8] sm:$0xff]  ;;  %v1270_v28 = vld [vmem:[%s3903_s16 + $0x1e58] sm:$0xff] }
 0x21e   : > { %3001 = vmatpush.msra.mxu2 %v1237_v29  ;;  %3020 = vmatpush.msra.mxu3 %v1254_v30  ;;  %v1287_v29 = vld [vmem:[%s3903_s16 + $0x1ee0] sm:$0xff]  ;;  %v1302_v30 = vld [vmem:[%s3903_s16 + $0x1f58] sm:$0xff] }
 0x21f   : > { %2962 = vmatpush.msra.mxu0 %v1204_v31  ;;  %2981 = vmatpush.msra.mxu1 %v1221_v33  ;;  %v1319_v31 = vld [vmem:[%s3903_s16 + $0x1fe0] sm:$0xff]  ;;  %v1269_v33 = vld [vmem:[%s3903_s16 + $0x1e50] sm:$0xff] }
 0x220   : > { %3002 = vmatpush.msra.mxu2 %v1236_v34  ;;  %3021 = vmatpush.msra.mxu3 %v1253_v36  ;;  %v1286_v34 = vld [vmem:[%s3903_s16 + $0x1ed8] sm:$0xff]  ;;  %v1301_v36 = vld [vmem:[%s3903_s16 + $0x1f50] sm:$0xff] }
 0x221   : > { %2963 = vmatpush.msra.mxu0 %v1203_v37  ;;  %2982 = vmatpush.msra.mxu1 %v1220_v32  ;;  %v1318_v37 = vld [vmem:[%s3903_s16 + $0x1fd8] sm:$0xff]  ;;  %v1268_v32 = vld [vmem:[%s3903_s16 + $0x1e48] sm:$0xff] }
 0x222   : > { %3003 = vmatpush.msra.mxu2 %v1235_v35  ;;  %3022 = vmatpush.msra.mxu3 %v1252_v38  ;;  %v1285_v35 = vld [vmem:[%s3903_s16 + $0x1ed0] sm:$0xff]  ;;  %v1300_v38 = vld [vmem:[%s3903_s16 + $0x1f48] sm:$0xff] }
 0x223   : > { %2964 = vmatpush.msra.mxu0 %v1202_v39  ;;  %2983 = vmatpush.msra.mxu1 %v1219_v40  ;;  %v1317_v39 = vld [vmem:[%s3903_s16 + $0x1fd0] sm:$0xff]  ;;  %v1267_v40 = vld [vmem:[%s3903_s16 + $0x1e40] sm:$0xff] }
 0x224   : > { %3004 = vmatpush.msra.mxu2 %v1234_v41  ;;  %3023 = vmatpush.msra.mxu3 %v1251_v42  ;;  %v1284_v41 = vld [vmem:[%s3903_s16 + $0x1ec8] sm:$0xff]  ;;  %v1299_v42 = vld [vmem:[%s3903_s16 + $0x1f40] sm:$0xff] }
 0x225   : > { %2965 = vmatpush.msra.mxu0 %v1201_v43  ;;  %2984 = vmatpush.msra.mxu1 %v1218_v44  ;;  %v1316_v43 = vld [vmem:[%s3903_s16 + $0x1fc8] sm:$0xff]  ;;  %v1266_v44 = vld [vmem:[%s3903_s16 + $0x1e38] sm:$0xff] }
 0x226   : > { %3005 = vmatpush.msra.mxu2 %v1233_v45  ;;  %3024 = vmatpush.msra.mxu3 %v1250_v46  ;;  %v1283_v45 = vld [vmem:[%s3903_s16 + $0x1ec0] sm:$0xff]  ;;  %v1298_v46 = vld [vmem:[%s3903_s16 + $0x1f38] sm:$0xff] }
 0x227   : > { %2966 = vmatpush.msra.mxu0 %v1200_v47  ;;  %2985 = vmatpush.msra.mxu1 %v1217_v48  ;;  %v1315_v47 = vld [vmem:[%s3903_s16 + $0x1fc0] sm:$0xff]  ;;  %v1265_v48 = vld [vmem:[%s3903_s16 + $0x1e30] sm:$0xff] }
 0x228   : > { %3006 = vmatpush.msra.mxu2 %v1232_v49  ;;  %3025 = vmatpush.msra.mxu3 %v1249_v50  ;;  %v1282_v49 = vld [vmem:[%s3903_s16 + $0x1eb8] sm:$0xff]  ;;  %v1297_v50 = vld [vmem:[%s3903_s16 + $0x1f30] sm:$0xff] }
 0x229   : > { %2967 = vmatpush.msra.mxu0 %v1199_v51  ;;  %2986 = vmatpush.msra.mxu1 %v1216_v52  ;;  %v1314_v51 = vld [vmem:[%s3903_s16 + $0x1fb8] sm:$0xff]  ;;  %v1264_v52 = vld [vmem:[%s3903_s16 + $0x1e28] sm:$0xff] }
 0x22a   : > { %3007 = vmatpush.msra.mxu2 %v1231_v53  ;;  %3026 = vmatpush.msra.mxu3 %v1248_v54  ;;  %v1281_v53 = vld [vmem:[%s3903_s16 + $0x1eb0] sm:$0xff]  ;;  %v1296_v54 = vld [vmem:[%s3903_s16 + $0x1f28] sm:$0xff] }
 0x22b   : > { %2968 = vmatpush.msra.mxu0 %v1198_v55  ;;  %2987 = vmatpush.msra.mxu1 %v1215_v56  ;;  %v1313_v55 = vld [vmem:[%s3903_s16 + $0x1fb0] sm:$0xff]  ;;  %v1263_v56 = vld [vmem:[%s3903_s16 + $0x1e20] sm:$0xff] }
 0x22c   : > { %3008 = vmatpush.msra.mxu2 %v1230_v57  ;;  %3027 = vmatpush.msra.mxu3 %v1247_v58  ;;  %v1280_v57 = vld [vmem:[%s3903_s16 + $0x1ea8] sm:$0xff]  ;;  %v1295_v58 = vld [vmem:[%s3903_s16 + $0x1f20] sm:$0xff] }
 0x22d   : > { %2969 = vmatpush.msra.mxu0 %v1197_v59  ;;  %2988 = vmatpush.msra.mxu1 %v1214_v60  ;;  %v1312_v59 = vld [vmem:[%s3903_s16 + $0x1fa8] sm:$0xff]  ;;  %v1262_v60 = vld [vmem:[%s3903_s16 + $0x1e18] sm:$0xff] }
 0x22e   : > { %3009 = vmatpush.msra.mxu2 %v1229_v61  ;;  %3028 = vmatpush.msra.mxu3 %v1246_v62  ;;  %v1279_v61 = vld [vmem:[%s3903_s16 + $0x1ea0] sm:$0xff]  ;;  %v1294_v62 = vld [vmem:[%s3903_s16 + $0x1f18] sm:$0xff] }
 0x22f   : > { %2970 = vmatpush.msra.mxu0 %v1196_v63  ;;  %2989 = vmatpush.msra.mxu1 %v1213_v0  ;;  %v1311_v63 = vld [vmem:[%s3903_s16 + $0x1fa0] sm:$0xff]  ;;  %v1261_v0 = vld [vmem:[%s3903_s16 + $0x1e10] sm:$0xff] }
 0x230   : > { %3010 = vmatpush.msra.mxu2 %v1228_v2  ;;  %3029 = vmatpush.msra.mxu3 %v1245_v3  ;;  %v1293_v2 = vld [vmem:[%s3903_s16 + $0x1f10] sm:$0xff]  ;;  %v1310_v3 = vld [vmem:[%s3903_s16 + $0x1f98] sm:$0xff] }
 0x231   : > { %2971 = vmatpush.msra.mxu0 %v1195_v4  ;;  %2990 = vmatpush.msra.mxu1 %v1212_v5  ;;  %v1260_v4 = vld [vmem:[%s3903_s16 + $0x1e08] sm:$0xff]  ;;  %v1277_v5 = vld [vmem:[%s3903_s16 + $0x1e90] sm:$0xff] }
 0x232   : > { %3011 = vmatpush.msra.mxu2 %v1227_v6  ;;  %3030 = vmatpush.msra.mxu3 %v1244_v7  ;;  %v294_v6 = vld [vmem:[%s3917_s19 + $0x80] sm:$0xff]  ;;  %v1292_v7 = vld [vmem:[%s3903_s16 + $0x1f08] sm:$0xff] }
 0x233   : > { %2972 = vmatmul.f32.vlgmr.msra.gmra.mxu0 %v1721_v8  ;;  %3012 = vmatmul.f32.vlgmr.msra.gmra.mxu2 %v1723_v9  ;;  %v1309_v8 = vld [vmem:[%s3903_s16 + $0x1f90] sm:$0xff]  ;;  %1729 = vst [vmem:[#allocation1] ss:$4 sm:$0xff] %v294_v6  ;;  %v1259_v9 = vld [vmem:[%s3903_s16 + $0x1e00] sm:$0xff]  ;;  %v1342_v6 = vld [vmem:[%s3903_s16 + $0x2098] sm:$0xff] }
 0x234   : > { %3036 = vmatpush.msrb.mxu0 %v1274_v10  ;;  %3076 = vmatpush.msrb.mxu2 %v1306_v11  ;;  %v1276_v10 = vld [vmem:[%s3903_s16 + $0x1e88] sm:$0xff]  ;;  %v1291_v11 = vld [vmem:[%s3903_s16 + $0x1f00] sm:$0xff] }
 0x235   : > { %2991 = vmatpush.msra.mxu1 %v1211_v12  ;;  %3031 = vmatpush.msra.mxu3 %v1243_v13  ;;  %v1308_v12 = vld [vmem:[%s3903_s16 + $0x1f88] sm:$0xff]  ;;  %v1725_v13 = vld.sshfl [vmem:[#allocation1 + $0x20] sm:$0xff pattern:$0x73625140] }
 0x236   : > { %2992 = vmatmul.f32.vlgmr.msra.gmra.mxu1 %v1722_v14  ;;  %3032 = vmatmul.f32.vlgmr.msra.gmra.mxu3 %v1724_v15  ;;  %v1727_v14 = vld.sshfl [vmem:[#allocation1 + $0x30] sm:$0xff pattern:$0x73625140]  ;;  %v1338_v15 = vld [vmem:[%s3903_s16 + $0x2078] sm:$0xff] }
 0x237   : > { %3037 = vmatpush.msrb.mxu0 %v1273_v16  ;;  %3056 = vmatpush.msrb.mxu1 %v1290_v17  ;;  %v1370_v16 = vld [vmem:[%s3903_s16 + $0x2178] sm:$0xff]  ;;  %v1275_v17 = vld [vmem:[%s3903_s16 + $0x1e80] sm:$0xff] }
 0x238   : > { %3077 = vmatpush.msrb.mxu2 %v1305_v18  ;;  %3096 = vmatpush.msrb.mxu3 %v1322_v19  ;;  %v1307_v18 = vld [vmem:[%s3903_s16 + $0x1f80] sm:$0xff] }
 0x239   : > { %3038 = vmatpush.msrb.mxu0 %v1272_v20  ;;  %3057 = vmatpush.msrb.mxu1 %v1289_v21  ;;  %v1726_v19 = vld.sshfl [vmem:[#allocation1 + $0x28] sm:$0xff pattern:$0x73625140]  ;;  %v1728_v20 = vld.sshfl [vmem:[#allocation1 + $0x38] sm:$0xff pattern:$0x73625140] }
 0x23a   : > { %3078 = vmatpush.msrb.mxu2 %v1304_v22  ;;  %3097 = vmatpush.msrb.mxu3 %v1321_v23  ;;  %v1337_v21 = vld [vmem:[%s3903_s16 + $0x2070] sm:$0xff]  ;;  %v1354_v22 = vld [vmem:[%s3903_s16 + $0x20f8] sm:$0xff] }
 0x23b   : > { %3039 = vmatpush.msrb.mxu0 %v1271_v24  ;;  %3058 = vmatpush.msrb.mxu1 %v1288_v25  ;;  %v1369_v23 = vld [vmem:[%s3903_s16 + $0x2170] sm:$0xff]  ;;  %v1386_v24 = vld [vmem:[%s3903_s16 + $0x21f8] sm:$0xff]  ;;  %v1336_v25 = vld [vmem:[%s3903_s16 + $0x2068] sm:$0xff] }
 0x23c   : > { %3079 = vmatpush.msrb.mxu2 %v1303_v26  ;;  %3098 = vmatpush.msrb.mxu3 %v1320_v27  ;;  %v1353_v26 = vld [vmem:[%s3903_s16 + $0x20f0] sm:$0xff]  ;;  %v1368_v27 = vld [vmem:[%s3903_s16 + $0x2168] sm:$0xff] }
 0x23d   : > { %3040 = vmatpush.msrb.mxu0 %v1270_v28  ;;  %3059 = vmatpush.msrb.mxu1 %v1287_v29  ;;  %v1385_v28 = vld [vmem:[%s3903_s16 + $0x21f0] sm:$0xff]  ;;  %v1335_v29 = vld [vmem:[%s3903_s16 + $0x2060] sm:$0xff] }
 0x23e   : > { %3080 = vmatpush.msrb.mxu2 %v1302_v30  ;;  %3099 = vmatpush.msrb.mxu3 %v1319_v31  ;;  %v1352_v30 = vld [vmem:[%s3903_s16 + $0x20e8] sm:$0xff]  ;;  %v1367_v31 = vld [vmem:[%s3903_s16 + $0x2160] sm:$0xff] }
 0x23f   : > { %3041 = vmatpush.msrb.mxu0 %v1269_v33  ;;  %3060 = vmatpush.msrb.mxu1 %v1286_v34  ;;  %v1384_v33 = vld [vmem:[%s3903_s16 + $0x21e8] sm:$0xff]  ;;  %v1334_v34 = vld [vmem:[%s3903_s16 + $0x2058] sm:$0xff] }
 0x240   : > { %3081 = vmatpush.msrb.mxu2 %v1301_v36  ;;  %3100 = vmatpush.msrb.mxu3 %v1318_v37  ;;  %v1351_v36 = vld [vmem:[%s3903_s16 + $0x20e0] sm:$0xff]  ;;  %v1366_v37 = vld [vmem:[%s3903_s16 + $0x2158] sm:$0xff] }
 0x241   : > { %3042 = vmatpush.msrb.mxu0 %v1268_v32  ;;  %3061 = vmatpush.msrb.mxu1 %v1285_v35  ;;  %v1383_v32 = vld [vmem:[%s3903_s16 + $0x21e0] sm:$0xff]  ;;  %v1333_v35 = vld [vmem:[%s3903_s16 + $0x2050] sm:$0xff] }
 0x242   : > { %3082 = vmatpush.msrb.mxu2 %v1300_v38  ;;  %3101 = vmatpush.msrb.mxu3 %v1317_v39  ;;  %v1350_v38 = vld [vmem:[%s3903_s16 + $0x20d8] sm:$0xff]  ;;  %v1365_v39 = vld [vmem:[%s3903_s16 + $0x2150] sm:$0xff] }
 0x243   : > { %3043 = vmatpush.msrb.mxu0 %v1267_v40  ;;  %3062 = vmatpush.msrb.mxu1 %v1284_v41  ;;  %v1382_v40 = vld [vmem:[%s3903_s16 + $0x21d8] sm:$0xff]  ;;  %v1332_v41 = vld [vmem:[%s3903_s16 + $0x2048] sm:$0xff] }
 0x244   : > { %3083 = vmatpush.msrb.mxu2 %v1299_v42  ;;  %3102 = vmatpush.msrb.mxu3 %v1316_v43  ;;  %v1349_v42 = vld [vmem:[%s3903_s16 + $0x20d0] sm:$0xff]  ;;  %v1364_v43 = vld [vmem:[%s3903_s16 + $0x2148] sm:$0xff] }
 0x245   : > { %3044 = vmatpush.msrb.mxu0 %v1266_v44  ;;  %3063 = vmatpush.msrb.mxu1 %v1283_v45  ;;  %v1381_v44 = vld [vmem:[%s3903_s16 + $0x21d0] sm:$0xff]  ;;  %v1331_v45 = vld [vmem:[%s3903_s16 + $0x2040] sm:$0xff] }
 0x246   : > { %3084 = vmatpush.msrb.mxu2 %v1298_v46  ;;  %3103 = vmatpush.msrb.mxu3 %v1315_v47  ;;  %v1348_v46 = vld [vmem:[%s3903_s16 + $0x20c8] sm:$0xff]  ;;  %v1363_v47 = vld [vmem:[%s3903_s16 + $0x2140] sm:$0xff] }
 0x247   : > { %3045 = vmatpush.msrb.mxu0 %v1265_v48  ;;  %3064 = vmatpush.msrb.mxu1 %v1282_v49  ;;  %v1380_v48 = vld [vmem:[%s3903_s16 + $0x21c8] sm:$0xff]  ;;  %v1330_v49 = vld [vmem:[%s3903_s16 + $0x2038] sm:$0xff] }
 0x248   : > { %3085 = vmatpush.msrb.mxu2 %v1297_v50  ;;  %3104 = vmatpush.msrb.mxu3 %v1314_v51  ;;  %v1347_v50 = vld [vmem:[%s3903_s16 + $0x20c0] sm:$0xff]  ;;  %v1362_v51 = vld [vmem:[%s3903_s16 + $0x2138] sm:$0xff] }
 0x249   : > { %3046 = vmatpush.msrb.mxu0 %v1264_v52  ;;  %3065 = vmatpush.msrb.mxu1 %v1281_v53  ;;  %v1379_v52 = vld [vmem:[%s3903_s16 + $0x21c0] sm:$0xff]  ;;  %v1329_v53 = vld [vmem:[%s3903_s16 + $0x2030] sm:$0xff] }
 0x24a   : > { %3086 = vmatpush.msrb.mxu2 %v1296_v54  ;;  %3105 = vmatpush.msrb.mxu3 %v1313_v55  ;;  %v1346_v54 = vld [vmem:[%s3903_s16 + $0x20b8] sm:$0xff]  ;;  %v1361_v55 = vld [vmem:[%s3903_s16 + $0x2130] sm:$0xff] }
 0x24b   : > { %3047 = vmatpush.msrb.mxu0 %v1263_v56  ;;  %3066 = vmatpush.msrb.mxu1 %v1280_v57  ;;  %v1378_v56 = vld [vmem:[%s3903_s16 + $0x21b8] sm:$0xff]  ;;  %v1328_v57 = vld [vmem:[%s3903_s16 + $0x2028] sm:$0xff] }
 0x24c   : > { %3087 = vmatpush.msrb.mxu2 %v1295_v58  ;;  %3106 = vmatpush.msrb.mxu3 %v1312_v59  ;;  %v1345_v58 = vld [vmem:[%s3903_s16 + $0x20b0] sm:$0xff]  ;;  %v1360_v59 = vld [vmem:[%s3903_s16 + $0x2128] sm:$0xff] }
 0x24d   : > { %3048 = vmatpush.msrb.mxu0 %v1262_v60  ;;  %3067 = vmatpush.msrb.mxu1 %v1279_v61  ;;  %v1377_v60 = vld [vmem:[%s3903_s16 + $0x21b0] sm:$0xff]  ;;  %v1327_v61 = vld [vmem:[%s3903_s16 + $0x2020] sm:$0xff] }
 0x24e   : > { %3088 = vmatpush.msrb.mxu2 %v1294_v62  ;;  %3107 = vmatpush.msrb.mxu3 %v1311_v63  ;;  %v1344_v62 = vld [vmem:[%s3903_s16 + $0x20a8] sm:$0xff]  ;;  %v1359_v63 = vld [vmem:[%s3903_s16 + $0x2120] sm:$0xff] }
 0x24f   : > { %3049 = vmatpush.msrb.mxu0 %v1261_v0  ;;  %3068 = vmatpush.msrb.mxu1 %v1278_v1  ;;  %v1376_v0 = vld [vmem:[%s3903_s16 + $0x21a8] sm:$0xff]  ;;  %v1326_v1 = vld [vmem:[%s3903_s16 + $0x2018] sm:$0xff] }
 0x250   : > { %3089 = vmatpush.msrb.mxu2 %v1293_v2  ;;  %3108 = vmatpush.msrb.mxu3 %v1310_v3  ;;  %v1343_v2 = vld [vmem:[%s3903_s16 + $0x20a0] sm:$0xff]  ;;  %v1358_v3 = vld [vmem:[%s3903_s16 + $0x2118] sm:$0xff] }
 0x251   : > { %3050 = vmatpush.msrb.mxu0 %v1260_v4  ;;  %3069 = vmatpush.msrb.mxu1 %v1277_v5  ;;  %v1375_v4 = vld [vmem:[%s3903_s16 + $0x21a0] sm:$0xff]  ;;  %v1325_v5 = vld [vmem:[%s3903_s16 + $0x2010] sm:$0xff] }
 0x252   : > { %3090 = vmatpush.msrb.mxu2 %v1292_v7  ;;  %3109 = vmatpush.msrb.mxu3 %v1309_v8  ;;  %v1357_v7 = vld [vmem:[%s3903_s16 + $0x2110] sm:$0xff]  ;;  %v1374_v8 = vld [vmem:[%s3903_s16 + $0x2198] sm:$0xff] }
 0x253   : > { %3051 = vmatpush.msrb.mxu0 %v1259_v9  ;;  %3070 = vmatpush.msrb.mxu1 %v1276_v10  ;;  %v1324_v9 = vld [vmem:[%s3903_s16 + $0x2008] sm:$0xff]  ;;  %v1341_v10 = vld [vmem:[%s3903_s16 + $0x2090] sm:$0xff] }
 0x254   : > { %3091 = vmatpush.msrb.mxu2 %v1291_v11  ;;  %3110 = vmatpush.msrb.mxu3 %v1308_v12  ;;  %v295_v11 = vld [vmem:[%s3917_s19 + $0x88] sm:$0xff]  ;;  %v1356_v12 = vld [vmem:[%s3903_s16 + $0x2108] sm:$0xff] }
 0x255   : > { %3052 = vmatmul.f32.vlgmr.msrb.gmra.mxu0 %v1725_v13  ;;  %3092 = vmatmul.f32.vlgmr.msrb.gmra.mxu2 %v1727_v14  ;;  %v1373_v13 = vld [vmem:[%s3903_s16 + $0x2190] sm:$0xff]  ;;  %1730 = vst [vmem:[#allocation1 + $0x20] ss:$4 sm:$0xff] %v295_v11  ;;  %v1323_v14 = vld [vmem:[%s3903_s16 + $0x2000] sm:$0xff] }
 0x256   : > { %3116 = vmatpush.msra.mxu0 %v1338_v15  ;;  %3156 = vmatpush.msra.mxu2 %v1370_v16  ;;  %v1340_v15 = vld [vmem:[%s3903_s16 + $0x2088] sm:$0xff]  ;;  %v1355_v16 = vld [vmem:[%s3903_s16 + $0x2100] sm:$0xff] }
 0x257   : > { %3071 = vmatpush.msrb.mxu1 %v1275_v17  ;;  %3111 = vmatpush.msrb.mxu3 %v1307_v18  ;;  %v1372_v17 = vld [vmem:[%s3903_s16 + $0x2188] sm:$0xff]  ;;  %v1731_v18 = vld.sshfl [vmem:[#allocation1] sm:$0xff pattern:$0x73625140]  ;;  %v1407_v11 = vld [vmem:[%s3903_s16 + $0x22a0] sm:$0xff] }
 0x258   : > { %3072 = vmatmul.f32.vlgmr.msrb.gmra.mxu1 %v1726_v19  ;;  %3112 = vmatmul.f32.vlgmr.msrb.gmra.mxu3 %v1728_v20  ;;  %v1733_v19 = vld.sshfl [vmem:[#allocation1 + $0x10] sm:$0xff pattern:$0x73625140]  ;;  %v1402_v20 = vld [vmem:[%s3903_s16 + $0x2278] sm:$0xff] }
 0x259   : > { %3117 = vmatpush.msra.mxu0 %v1337_v21  ;;  %3136 = vmatpush.msra.mxu1 %v1354_v22  ;;  %v1434_v21 = vld [vmem:[%s3903_s16 + $0x2378] sm:$0xff]  ;;  %v1339_v22 = vld [vmem:[%s3903_s16 + $0x2080] sm:$0xff] }
 0x25a   : > { %3157 = vmatpush.msra.mxu2 %v1369_v23  ;;  %3176 = vmatpush.msra.mxu3 %v1386_v24  ;;  %v1371_v23 = vld [vmem:[%s3903_s16 + $0x2180] sm:$0xff] }
 0x25b   : > { %3118 = vmatpush.msra.mxu0 %v1336_v25  ;;  %3137 = vmatpush.msra.mxu1 %v1353_v26  ;;  %v1732_v24 = vld.sshfl [vmem:[#allocation1 + $0x8] sm:$0xff pattern:$0x73625140]  ;;  %v1734_v25 = vld.sshfl [vmem:[#allocation1 + $0x18] sm:$0xff pattern:$0x73625140] }
 0x25c   : > { %3158 = vmatpush.msra.mxu2 %v1368_v27  ;;  %3177 = vmatpush.msra.mxu3 %v1385_v28  ;;  %v1401_v26 = vld [vmem:[%s3903_s16 + $0x2270] sm:$0xff]  ;;  %v1418_v27 = vld [vmem:[%s3903_s16 + $0x22f8] sm:$0xff] }
 0x25d   : > { %3119 = vmatpush.msra.mxu0 %v1335_v29  ;;  %3138 = vmatpush.msra.mxu1 %v1352_v30  ;;  %v1433_v28 = vld [vmem:[%s3903_s16 + $0x2370] sm:$0xff]  ;;  %v1450_v29 = vld [vmem:[%s3903_s16 + $0x23f8] sm:$0xff]  ;;  %v1400_v30 = vld [vmem:[%s3903_s16 + $0x2268] sm:$0xff] }
 0x25e   : > { %3159 = vmatpush.msra.mxu2 %v1367_v31  ;;  %3178 = vmatpush.msra.mxu3 %v1384_v33  ;;  %v1417_v31 = vld [vmem:[%s3903_s16 + $0x22f0] sm:$0xff]  ;;  %v1432_v33 = vld [vmem:[%s3903_s16 + $0x2368] sm:$0xff] }
 0x25f   : > { %3120 = vmatpush.msra.mxu0 %v1334_v34  ;;  %3139 = vmatpush.msra.mxu1 %v1351_v36  ;;  %v1449_v34 = vld [vmem:[%s3903_s16 + $0x23f0] sm:$0xff]  ;;  %v1399_v36 = vld [vmem:[%s3903_s16 + $0x2260] sm:$0xff] }
 0x260   : > { %3160 = vmatpush.msra.mxu2 %v1366_v37  ;;  %3179 = vmatpush.msra.mxu3 %v1383_v32  ;;  %v1416_v37 = vld [vmem:[%s3903_s16 + $0x22e8] sm:$0xff]  ;;  %v1431_v32 = vld [vmem:[%s3903_s16 + $0x2360] sm:$0xff] }
 0x261   : > { %3121 = vmatpush.msra.mxu0 %v1333_v35  ;;  %3140 = vmatpush.msra.mxu1 %v1350_v38  ;;  %v1448_v35 = vld [vmem:[%s3903_s16 + $0x23e8] sm:$0xff]  ;;  %v1398_v38 = vld [vmem:[%s3903_s16 + $0x2258] sm:$0xff] }
 0x262   : > { %3161 = vmatpush.msra.mxu2 %v1365_v39  ;;  %3180 = vmatpush.msra.mxu3 %v1382_v40  ;;  %v1415_v39 = vld [vmem:[%s3903_s16 + $0x22e0] sm:$0xff]  ;;  %v1430_v40 = vld [vmem:[%s3903_s16 + $0x2358] sm:$0xff] }
 0x263   : > { %3122 = vmatpush.msra.mxu0 %v1332_v41  ;;  %3141 = vmatpush.msra.mxu1 %v1349_v42  ;;  %v1447_v41 = vld [vmem:[%s3903_s16 + $0x23e0] sm:$0xff]  ;;  %v1397_v42 = vld [vmem:[%s3903_s16 + $0x2250] sm:$0xff] }
 0x264   : > { %3162 = vmatpush.msra.mxu2 %v1364_v43  ;;  %3181 = vmatpush.msra.mxu3 %v1381_v44  ;;  %v1414_v43 = vld [vmem:[%s3903_s16 + $0x22d8] sm:$0xff]  ;;  %v1429_v44 = vld [vmem:[%s3903_s16 + $0x2350] sm:$0xff] }
 0x265   : > { %3123 = vmatpush.msra.mxu0 %v1331_v45  ;;  %3142 = vmatpush.msra.mxu1 %v1348_v46  ;;  %v1446_v45 = vld [vmem:[%s3903_s16 + $0x23d8] sm:$0xff]  ;;  %v1396_v46 = vld [vmem:[%s3903_s16 + $0x2248] sm:$0xff] }
 0x266   : > { %3163 = vmatpush.msra.mxu2 %v1363_v47  ;;  %3182 = vmatpush.msra.mxu3 %v1380_v48  ;;  %v1413_v47 = vld [vmem:[%s3903_s16 + $0x22d0] sm:$0xff]  ;;  %v1428_v48 = vld [vmem:[%s3903_s16 + $0x2348] sm:$0xff] }
 0x267   : > { %3124 = vmatpush.msra.mxu0 %v1330_v49  ;;  %3143 = vmatpush.msra.mxu1 %v1347_v50  ;;  %v1445_v49 = vld [vmem:[%s3903_s16 + $0x23d0] sm:$0xff]  ;;  %v1395_v50 = vld [vmem:[%s3903_s16 + $0x2240] sm:$0xff] }
 0x268   : > { %3164 = vmatpush.msra.mxu2 %v1362_v51  ;;  %3183 = vmatpush.msra.mxu3 %v1379_v52  ;;  %v1412_v51 = vld [vmem:[%s3903_s16 + $0x22c8] sm:$0xff]  ;;  %v1427_v52 = vld [vmem:[%s3903_s16 + $0x2340] sm:$0xff] }
 0x269   : > { %3125 = vmatpush.msra.mxu0 %v1329_v53  ;;  %3144 = vmatpush.msra.mxu1 %v1346_v54  ;;  %v1444_v53 = vld [vmem:[%s3903_s16 + $0x23c8] sm:$0xff]  ;;  %v1394_v54 = vld [vmem:[%s3903_s16 + $0x2238] sm:$0xff] }
 0x26a   : > { %3165 = vmatpush.msra.mxu2 %v1361_v55  ;;  %3184 = vmatpush.msra.mxu3 %v1378_v56  ;;  %v1411_v55 = vld [vmem:[%s3903_s16 + $0x22c0] sm:$0xff]  ;;  %v1426_v56 = vld [vmem:[%s3903_s16 + $0x2338] sm:$0xff] }
 0x26b   : > { %3126 = vmatpush.msra.mxu0 %v1328_v57  ;;  %3145 = vmatpush.msra.mxu1 %v1345_v58  ;;  %v1443_v57 = vld [vmem:[%s3903_s16 + $0x23c0] sm:$0xff]  ;;  %v1873_v58 = vpop.f32.mrf.mxu1 }
 0x26c   : > { %3166 = vmatpush.msra.mxu2 %v1360_v59  ;;  %3185 = vmatpush.msra.mxu3 %v1377_v60  ;;  %v1393_v59 = vld [vmem:[%s3903_s16 + $0x2230] sm:$0xff]  ;;  %v1410_v60 = vld [vmem:[%s3903_s16 + $0x22b8] sm:$0xff] }
 0x26d   : > { %3127 = vmatpush.msra.mxu0 %v1327_v61  ;;  %3146 = vmatpush.msra.mxu1 %v1344_v62  ;;  %v1425_v61 = vld [vmem:[%s3903_s16 + $0x2330] sm:$0xff]  ;;  %v1442_v62 = vld [vmem:[%s3903_s16 + $0x23b8] sm:$0xff] }
 0x26e   : > { %3167 = vmatpush.msra.mxu2 %v1359_v63  ;;  %3186 = vmatpush.msra.mxu3 %v1376_v0  ;;  %v1853_v63 = vpop.f32.mrf.mxu0  ;;  %v1392_v0 = vld [vmem:[%s3903_s16 + $0x2228] sm:$0xff] }
 0x26f   : > { %3128 = vmatpush.msra.mxu0 %v1326_v1  ;;  %3147 = vmatpush.msra.mxu1 %v1343_v2  ;;  %v1409_v1 = vld [vmem:[%s3903_s16 + $0x22b0] sm:$0xff]  ;;  %v1874_v2 = vadd.f32 %v1873_v58, %v1853_v63  ;;  %v1479_v58 = vld [vmem:[%s3903_s16 + $0x24e0] sm:$0xff]  ;;  %v1478_v63 = vld [vmem:[%s3903_s16 + $0x24d8] sm:$0xff] }
 0x270   : > { %3168 = vmatpush.msra.mxu2 %v1358_v3  ;;  %3187 = vmatpush.msra.mxu3 %v1375_v4  ;;  %v1424_v3 = vld [vmem:[%s3903_s16 + $0x2328] sm:$0xff]  ;;  %v1441_v4 = vld [vmem:[%s3903_s16 + $0x23b0] sm:$0xff] }
 0x271   : > { %3129 = vmatpush.msra.mxu0 %v1325_v5  ;;  %3148 = vmatpush.msra.mxu1 %v1342_v6  ;;  %v1893_v5 = vpop.f32.mrf.mxu2  ;;  %v1391_v6 = vld [vmem:[%s3903_s16 + $0x2220] sm:$0xff] }
 0x272   : > { %3169 = vmatpush.msra.mxu2 %v1357_v7  ;;  %3188 = vmatpush.msra.mxu3 %v1374_v8  ;;  %v1408_v7 = vld [vmem:[%s3903_s16 + $0x22a8] sm:$0xff]  ;;  %v1423_v8 = vld [vmem:[%s3903_s16 + $0x2320] sm:$0xff] }
 0x273   : > { %3130 = vmatpush.msra.mxu0 %v1324_v9  ;;  %3149 = vmatpush.msra.mxu1 %v1341_v10  ;;  %v1440_v9 = vld [vmem:[%s3903_s16 + $0x23a8] sm:$0xff]  ;;  %v1390_v10 = vld [vmem:[%s3903_s16 + $0x2218] sm:$0xff] }
 0x274   : > { %3170 = vmatpush.msra.mxu2 %v1356_v12  ;;  %3189 = vmatpush.msra.mxu3 %v1373_v13  ;;  %v1894_v12 = vadd.f32 %v1893_v5, %v1874_v2  ;;  %v1422_v13 = vld [vmem:[%s3903_s16 + $0x2318] sm:$0xff] }
 0x275   : > { %3131 = vmatpush.msra.mxu0 %v1323_v14  ;;  %3150 = vmatpush.msra.mxu1 %v1340_v15  ;;  %v1439_v14 = vld [vmem:[%s3903_s16 + $0x23a0] sm:$0xff]  ;;  %v1913_v15 = vpop.f32.mrf.mxu3  ;;  %v1510_v2 = vld [vmem:[%s3903_s16 + $0x25d8] sm:$0xff] }
 0x276   : > { %3171 = vmatpush.msra.mxu2 %v1355_v16  ;;  %3190 = vmatpush.msra.mxu3 %v1372_v17  ;;  %v1389_v16 = vld [vmem:[%s3903_s16 + $0x2210] sm:$0xff]  ;;  %v1406_v17 = vld [vmem:[%s3903_s16 + $0x2298] sm:$0xff] }
 0x277   : > { %3132 = vmatmul.f32.vlgmr.msra.gmra.mxu0 %v1731_v18  ;;  %3172 = vmatmul.f32.vlgmr.msra.gmra.mxu2 %v1733_v19  ;;  %v1421_v18 = vld [vmem:[%s3903_s16 + $0x2310] sm:$0xff]  ;;  %v1438_v19 = vld [vmem:[%s3903_s16 + $0x2398] sm:$0xff] }
 0x278   : > { %3196 = vmatpush.msrb.mxu0 %v1402_v20  ;;  %3236 = vmatpush.msrb.mxu2 %v1434_v21  ;;  %v1388_v20 = vld [vmem:[%s3903_s16 + $0x2208] sm:$0xff]  ;;  %v1405_v21 = vld [vmem:[%s3903_s16 + $0x2290] sm:$0xff] }
 0x279   : > { %3151 = vmatpush.msra.mxu1 %v1339_v22  ;;  %3191 = vmatpush.msra.mxu3 %v1371_v23  ;;  %v296_v22 = vld [vmem:[%s3917_s19 + $0x90] sm:$0xff]  ;;  %v1914_v23 = vadd.f32 %v1913_v15, %v1894_v12 }
 0x27a   : > { %3152 = vmatmul.f32.vlgmr.msra.gmra.mxu1 %v1732_v24  ;;  %3192 = vmatmul.f32.vlgmr.msra.gmra.mxu3 %v1734_v25  ;;  %v1420_v24 = vld [vmem:[%s3903_s16 + $0x2308] sm:$0xff]  ;;  %v1437_v25 = vld [vmem:[%s3903_s16 + $0x2390] sm:$0xff]  ;;  %1739 = vst [vmem:[#allocation1] ss:$4 sm:$0xff] %v296_v22  ;;  %v1475_v15 = vld [vmem:[%s3903_s16 + $0x24c0] sm:$0xff] }
 0x27b   : > { %3197 = vmatpush.msrb.mxu0 %v1401_v26  ;;  %3216 = vmatpush.msrb.mxu1 %v1418_v27  ;;  %v1933_v26 = vpop.f32.mrf.mxu0  ;;  %v1387_v27 = vld [vmem:[%s3903_s16 + $0x2200] sm:$0xff]  ;;  %v1508_v12 = vld [vmem:[%s3903_s16 + $0x25c8] sm:$0xff]  ;;  %v1489_v22 = vld [vmem:[%s3903_s16 + $0x2530] sm:$0xff] }
 0x27c   : > { %3237 = vmatpush.msrb.mxu2 %v1433_v28  ;;  %3256 = vmatpush.msrb.mxu3 %v1450_v29  ;;  %v1404_v28 = vld [vmem:[%s3903_s16 + $0x2288] sm:$0xff]  ;;  %v1419_v29 = vld [vmem:[%s3903_s16 + $0x2300] sm:$0xff] }
 0x27d   : > { %3198 = vmatpush.msrb.mxu0 %v1400_v30  ;;  %3217 = vmatpush.msrb.mxu1 %v1417_v31  ;;  %v1436_v30 = vld [vmem:[%s3903_s16 + $0x2388] sm:$0xff]  ;;  %v1735_v31 = vld.sshfl [vmem:[#allocation1 + $0x20] sm:$0xff pattern:$0x73625140] }
 0x27e   : > { %3238 = vmatpush.msrb.mxu2 %v1432_v33  ;;  %3257 = vmatpush.msrb.mxu3 %v1449_v34  ;;  %v1737_v33 = vld.sshfl [vmem:[#allocation1 + $0x30] sm:$0xff pattern:$0x73625140]  ;;  %v1934_v34 = vadd.f32 %v1933_v26, %v1914_v23  ;;  %v1506_v23 = vld [vmem:[%s3903_s16 + $0x25b8] sm:$0xff]  ;;  %v1473_v26 = vld [vmem:[%s3903_s16 + $0x24b0] sm:$0xff] }
 0x27f   : > { %3199 = vmatpush.msrb.mxu0 %v1399_v36  ;;  %3218 = vmatpush.msrb.mxu1 %v1416_v37  ;;  %v1466_v36 = vld [vmem:[%s3903_s16 + $0x2478] sm:$0xff] }
 0x280   : > { %3239 = vmatpush.msrb.mxu2 %v1431_v32  ;;  %3258 = vmatpush.msrb.mxu3 %v1448_v35  ;;  %v1498_v37 = vld [vmem:[%s3903_s16 + $0x2578] sm:$0xff]  ;;  %v1953_v32 = vpop.f32.mrf.mxu1  ;;  %v1403_v35 = vld [vmem:[%s3903_s16 + $0x2280] sm:$0xff] }
 0x281   : > { %3200 = vmatpush.msrb.mxu0 %v1398_v38  ;;  %3219 = vmatpush.msrb.mxu1 %v1415_v39  ;;  %v1435_v38 = vld [vmem:[%s3903_s16 + $0x2380] sm:$0xff] }
 0x282   : > { %3240 = vmatpush.msrb.mxu2 %v1430_v40  ;;  %3259 = vmatpush.msrb.mxu3 %v1447_v41  ;;  %v1736_v39 = vld.sshfl [vmem:[#allocation1 + $0x28] sm:$0xff pattern:$0x73625140]  ;;  %v1738_v40 = vld.sshfl [vmem:[#allocation1 + $0x38] sm:$0xff pattern:$0x73625140] }
 0x283   : > { %3201 = vmatpush.msrb.mxu0 %v1397_v42  ;;  %3220 = vmatpush.msrb.mxu1 %v1414_v43  ;;  %v1465_v41 = vld [vmem:[%s3903_s16 + $0x2470] sm:$0xff]  ;;  %v1482_v42 = vld [vmem:[%s3903_s16 + $0x24f8] sm:$0xff]  ;;  %v1954_v43 = vadd.f32 %v1953_v32, %v1934_v34  ;;  %v1487_v34 = vld [vmem:[%s3903_s16 + $0x2520] sm:$0xff] }
 0x284   : > { %3241 = vmatpush.msrb.mxu2 %v1429_v44  ;;  %3260 = vmatpush.msrb.mxu3 %v1446_v45  ;;  %v1497_v44 = vld [vmem:[%s3903_s16 + $0x2570] sm:$0xff]  ;;  %v1514_v45 = vld [vmem:[%s3903_s16 + $0x25f8] sm:$0xff]  ;;  %v1471_v32 = vld [vmem:[%s3903_s16 + $0x24a0] sm:$0xff] }
 0x285   : > { %3202 = vmatpush.msrb.mxu0 %v1396_v46  ;;  %3221 = vmatpush.msrb.mxu1 %v1413_v47  ;;  %v1973_v46 = vpop.f32.mrf.mxu2  ;;  %v1464_v47 = vld [vmem:[%s3903_s16 + $0x2468] sm:$0xff] }
 0x286   : > { %3242 = vmatpush.msrb.mxu2 %v1428_v48  ;;  %3261 = vmatpush.msrb.mxu3 %v1445_v49  ;;  %v1481_v48 = vld [vmem:[%s3903_s16 + $0x24f0] sm:$0xff]  ;;  %v1496_v49 = vld [vmem:[%s3903_s16 + $0x2568] sm:$0xff] }
 0x287   : > { %3203 = vmatpush.msrb.mxu0 %v1395_v50  ;;  %3222 = vmatpush.msrb.mxu1 %v1412_v51  ;;  %v1513_v50 = vld [vmem:[%s3903_s16 + $0x25f0] sm:$0xff]  ;;  %v1463_v51 = vld [vmem:[%s3903_s16 + $0x2460] sm:$0xff] }
 0x288   : > { %3243 = vmatpush.msrb.mxu2 %v1427_v52  ;;  %3262 = vmatpush.msrb.mxu3 %v1444_v53  ;;  %v1480_v52 = vld [vmem:[%s3903_s16 + $0x24e8] sm:$0xff]  ;;  %v1974_v53 = vadd.f32 %v1973_v46, %v1954_v43  ;;  %v1485_v43 = vld [vmem:[%s3903_s16 + $0x2510] sm:$0xff] }
 0x289   : > { %3204 = vmatpush.msrb.mxu0 %v1394_v54  ;;  %3223 = vmatpush.msrb.mxu1 %v1411_v55  ;;  %v1495_v54 = vld [vmem:[%s3903_s16 + $0x2560] sm:$0xff]  ;;  %v1512_v55 = vld [vmem:[%s3903_s16 + $0x25e8] sm:$0xff] }
 0x28a   : > { %3244 = vmatpush.msrb.mxu2 %v1426_v56  ;;  %3263 = vmatpush.msrb.mxu3 %v1443_v57  ;;  %v1993_v56 = vpop.f32.mrf.mxu3  ;;  %v1462_v57 = vld [vmem:[%s3903_s16 + $0x2458] sm:$0xff]  ;;  %v1452_v46 = vld [vmem:[%s3903_s16 + $0x2408] sm:$0xff] }
 0x28b   : > { %3205 = vmatpush.msrb.mxu0 %v1393_v59  ;;  %3224 = vmatpush.msrb.mxu1 %v1410_v60  ;;  %v1494_v59 = vld [vmem:[%s3903_s16 + $0x2558] sm:$0xff]  ;;  %v1511_v60 = vld [vmem:[%s3903_s16 + $0x25e0] sm:$0xff] }
 0x28c   : > { %3245 = vmatpush.msrb.mxu2 %v1425_v61  ;;  %3264 = vmatpush.msrb.mxu3 %v1442_v62  ;;  %v2013_v61 = vpop.f32.mrf.mxu0  ;;  %v1461_v62 = vld [vmem:[%s3903_s16 + $0x2450] sm:$0xff] }
 0x28d   : > { %3206 = vmatpush.msrb.mxu0 %v1392_v0  ;;  %3225 = vmatpush.msrb.mxu1 %v1409_v1  ;;  %v1994_v0 = vadd.f32 %v1993_v56, %v1974_v53  ;;  %v1493_v1 = vld [vmem:[%s3903_s16 + $0x2550] sm:$0xff]  ;;  %v1468_v53 = vld [vmem:[%s3903_s16 + $0x2488] sm:$0xff] }
 0x28e   : > { %3246 = vmatpush.msrb.mxu2 %v1424_v3  ;;  %3265 = vmatpush.msrb.mxu3 %v1441_v4  ;;  %v1460_v3 = vld [vmem:[%s3903_s16 + $0x2448] sm:$0xff]  ;;  %v1477_v4 = vld [vmem:[%s3903_s16 + $0x24d0] sm:$0xff] }
 0x28f   : > { %3207 = vmatpush.msrb.mxu0 %v1391_v6  ;;  %3226 = vmatpush.msrb.mxu1 %v1408_v7  ;;  %v2014_v5 = vadd.f32 %v2013_v61, %v1994_v0  ;;  %v1492_v6 = vld [vmem:[%s3903_s16 + $0x2548] sm:$0xff]  ;;  %v1509_v7 = vld [vmem:[%s3903_s16 + $0x25d0] sm:$0xff]  ;;  %v1562_v61 = vld [vmem:[%s3903_s16 + $0x2778] sm:$0xff] }
 0x290   : > { %3247 = vmatpush.msrb.mxu2 %v1423_v8  ;;  %3266 = vmatpush.msrb.mxu3 %v1440_v9  ;;  %v2033_v8 = vpop.f32.mrf.mxu1  ;;  %v1459_v9 = vld [vmem:[%s3903_s16 + $0x2440] sm:$0xff]  ;;  %v1500_v56 = vld [vmem:[%s3903_s16 + $0x2588] sm:$0xff] }
 0x291   : > { %3208 = vmatpush.msrb.mxu0 %v1390_v10  ;;  %3227 = vmatpush.msrb.mxu1 %v1407_v11  ;;  %v1476_v10 = vld [vmem:[%s3903_s16 + $0x24c8] sm:$0xff]  ;;  %v1491_v11 = vld [vmem:[%s3903_s16 + $0x2540] sm:$0xff] }
 0x292   : > { %3248 = vmatpush.msrb.mxu2 %v1422_v13  ;;  %3267 = vmatpush.msrb.mxu3 %v1439_v14  ;;  %v2053_v13 = vpop.f32.mrf.mxu2  ;;  %v1458_v14 = vld [vmem:[%s3903_s16 + $0x2438] sm:$0xff]  ;;  %v1499_v0 = vld [vmem:[%s3903_s16 + $0x2580] sm:$0xff] }
 0x293   : > { %3209 = vmatpush.msrb.mxu0 %v1389_v16  ;;  %3228 = vmatpush.msrb.mxu1 %v1406_v17  ;;  %v2034_v16 = vadd.f32 %v2033_v8, %v2014_v5  ;;  %v1490_v17 = vld [vmem:[%s3903_s16 + $0x2538] sm:$0xff] }
 0x294   : > { %3249 = vmatpush.msrb.mxu2 %v1421_v18  ;;  %3268 = vmatpush.msrb.mxu3 %v1438_v19  ;;  %v1507_v18 = vld [vmem:[%s3903_s16 + $0x25c0] sm:$0xff]  ;;  %v1457_v19 = vld [vmem:[%s3903_s16 + $0x2430] sm:$0xff]  ;;  %v1546_v5 = vld [vmem:[%s3903_s16 + $0x26f8] sm:$0xff] }
 0x295   : > { %3210 = vmatpush.msrb.mxu0 %v1388_v20  ;;  %3229 = vmatpush.msrb.mxu1 %v1405_v21  ;;  %v1474_v20 = vld [vmem:[%s3903_s16 + $0x24b8] sm:$0xff]  ;;  %v2054_v21 = vadd.f32 %v2053_v13, %v2034_v16  ;;  %v1577_v13 = vld [vmem:[%s3903_s16 + $0x27f0] sm:$0xff]  ;;  %v1544_v16 = vld [vmem:[%s3903_s16 + $0x26e8] sm:$0xff] }
 0x296   : > { %3250 = vmatpush.msrb.mxu2 %v1420_v24  ;;  %3269 = vmatpush.msrb.mxu3 %v1437_v25  ;;  %v2073_v24 = vpop.f32.mrf.mxu3  ;;  %v1456_v25 = vld [vmem:[%s3903_s16 + $0x2428] sm:$0xff]  ;;  %v1578_v8 = vld [vmem:[%s3903_s16 + $0x27f8] sm:$0xff] }
 0x297   : > { %3211 = vmatpush.msrb.mxu0 %v1387_v27  ;;  %3230 = vmatpush.msrb.mxu1 %v1404_v28  ;;  %v1488_v27 = vld [vmem:[%s3903_s16 + $0x2528] sm:$0xff]  ;;  %v1505_v28 = vld [vmem:[%s3903_s16 + $0x25b0] sm:$0xff] }
 0x298   : > { %3251 = vmatpush.msrb.mxu2 %v1419_v29  ;;  %3270 = vmatpush.msrb.mxu3 %v1436_v30  ;;  %v2093_v29 = vpop.f32.mrf.mxu0  ;;  %v1455_v30 = vld [vmem:[%s3903_s16 + $0x2420] sm:$0xff] }
 0x299   : > { %3212 = vmatmul.f32.vlgmr.msrb.gmra.mxu0 %v1735_v31  ;;  %3252 = vmatmul.f32.vlgmr.msrb.gmra.mxu2 %v1737_v33  ;;  %v1472_v31 = vld [vmem:[%s3903_s16 + $0x24a8] sm:$0xff]  ;;  %v2074_v33 = vadd.f32 %v2073_v24, %v2054_v21  ;;  %v1543_v21 = vld [vmem:[%s3903_s16 + $0x26e0] sm:$0xff] }
 0x29a   : > { %3276 = vmatpush.msra.mxu0 %v1466_v36  ;;  %3316 = vmatpush.msra.mxu2 %v1498_v37  ;;  %v1504_v36 = vld [vmem:[%s3903_s16 + $0x25a8] sm:$0xff]  ;;  %v1454_v37 = vld [vmem:[%s3903_s16 + $0x2418] sm:$0xff]  ;;  %v1575_v24 = vld [vmem:[%s3903_s16 + $0x27e0] sm:$0xff] }
 0x29b   : > { %3231 = vmatpush.msrb.mxu1 %v1403_v35  ;;  %3271 = vmatpush.msrb.mxu3 %v1435_v38  ;;  %v2094_v35 = vadd.f32 %v2093_v29, %v2074_v33  ;;  %v1486_v38 = vld [vmem:[%s3903_s16 + $0x2518] sm:$0xff]  ;;  %v1541_v33 = vld [vmem:[%s3903_s16 + $0x26d0] sm:$0xff] }
 0x29c   : > { %3232 = vmatmul.f32.vlgmr.msrb.gmra.mxu1 %v1736_v39  ;;  %3272 = vmatmul.f32.vlgmr.msrb.gmra.mxu3 %v1738_v40  ;;  %v1503_v39 = vld [vmem:[%s3903_s16 + $0x25a0] sm:$0xff]  ;;  %v2113_v40 = vpop.f32.mrf.mxu1  ;;  %v1574_v29 = vld [vmem:[%s3903_s16 + $0x27d8] sm:$0xff] }
 0x29d   : > { %3277 = vmatpush.msra.mxu0 %v1465_v41  ;;  %3296 = vmatpush.msra.mxu1 %v1482_v42  ;;  %v1453_v41 = vld [vmem:[%s3903_s16 + $0x2410] sm:$0xff]  ;;  %v1470_v42 = vld [vmem:[%s3903_s16 + $0x2498] sm:$0xff] }
 0x29e   : > { %3317 = vmatpush.msra.mxu2 %v1497_v44  ;;  %3336 = vmatpush.msra.mxu3 %v1514_v45  ;;  %v1502_v44 = vld [vmem:[%s3903_s16 + $0x2598] sm:$0xff]  ;;  %v2133_v45 = vpop.f32.mrf.mxu2 }
 0x29f   : > { %3278 = vmatpush.msra.mxu0 %v1464_v47  ;;  %3297 = vmatpush.msra.mxu1 %v1481_v48  ;;  %v1469_v47 = vld [vmem:[%s3903_s16 + $0x2490] sm:$0xff] }
 0x2a0   : > { %3318 = vmatpush.msra.mxu2 %v1496_v49  ;;  %3337 = vmatpush.msra.mxu3 %v1513_v50  ;;  %v297_v48 = vld [vmem:[%s3917_s19 + $0x98] sm:$0xff]  ;;  %v2114_v49 = vadd.f32 %v2113_v40, %v2094_v35 }
 0x2a1   : > { %3279 = vmatpush.msra.mxu0 %v1463_v51  ;;  %3298 = vmatpush.msra.mxu1 %v1480_v52  ;;  %v1484_v50 = vld [vmem:[%s3903_s16 + $0x2508] sm:$0xff]  ;;  %v1501_v51 = vld [vmem:[%s3903_s16 + $0x2590] sm:$0xff]  ;;  %1740 = vst [vmem:[#allocation1 + $0x20] ss:$4 sm:$0xff] %v297_v48  ;;  %v1451_v52 = vld [vmem:[%s3903_s16 + $0x2400] sm:$0xff] }
 0x2a2   : > { %3319 = vmatpush.msra.mxu2 %v1495_v54  ;;  %3338 = vmatpush.msra.mxu3 %v1512_v55  ;;  %v2134_v54 = vadd.f32 %v2133_v45, %v2114_v49  ;;  %v1483_v55 = vld [vmem:[%s3903_s16 + $0x2500] sm:$0xff]  ;;  %v1540_v35 = vld [vmem:[%s3903_s16 + $0x26c8] sm:$0xff]  ;;  %v1538_v48 = vld [vmem:[%s3903_s16 + $0x26b8] sm:$0xff] }
 0x2a3   : > { %3280 = vmatpush.msra.mxu0 %v1462_v57  ;;  %3299 = vmatpush.msra.mxu1 %v1479_v58  ;;  %v2153_v57 = vpop.f32.mrf.mxu3  ;;  %v1741_v58 = vld.sshfl [vmem:[#allocation1] sm:$0xff pattern:$0x73625140]  ;;  %v1572_v40 = vld [vmem:[%s3903_s16 + $0x27c8] sm:$0xff]  ;;  %v1571_v45 = vld [vmem:[%s3903_s16 + $0x27c0] sm:$0xff] }
 0x2a4   : > { %3320 = vmatpush.msra.mxu2 %v1494_v59  ;;  %3339 = vmatpush.msra.mxu3 %v1511_v60  ;;  %v1743_v59 = vld.sshfl [vmem:[#allocation1 + $0x10] sm:$0xff pattern:$0x73625140]  ;;  %v1530_v60 = vld [vmem:[%s3903_s16 + $0x2678] sm:$0xff] }
 0x2a5   : > { %3281 = vmatpush.msra.mxu0 %v1461_v62  ;;  %3300 = vmatpush.msra.mxu1 %v1478_v63  ;;  %v2173_v62 = vpop.f32.mrf.mxu0  ;;  %v1467_v63 = vld [vmem:[%s3903_s16 + $0x2480] sm:$0xff] }
 0x2a6   : > { %3321 = vmatpush.msra.mxu2 %v1493_v1  ;;  %3340 = vmatpush.msra.mxu3 %v1510_v2  ;;  %v2154_v1 = vadd.f32 %v2153_v57, %v2134_v54  ;;  %v1742_v2 = vld.sshfl [vmem:[#allocation1 + $0x8] sm:$0xff pattern:$0x73625140] }
 0x2a7   : > { %3282 = vmatpush.msra.mxu0 %v1460_v3  ;;  %3301 = vmatpush.msra.mxu1 %v1477_v4  ;;  %v1744_v3 = vld.sshfl [vmem:[#allocation1 + $0x18] sm:$0xff pattern:$0x73625140] }
 0x2a8   : > { %3322 = vmatpush.msra.mxu2 %v1492_v6  ;;  %3341 = vmatpush.msra.mxu3 %v1509_v7  ;;  %v1529_v4 = vld [vmem:[%s3903_s16 + $0x2670] sm:$0xff]  ;;  %v2174_v6 = vadd.f32 %v2173_v62, %v2154_v1 }
 0x2a9   : > { %3283 = vmatpush.msra.mxu0 %v1459_v9  ;;  %3302 = vmatpush.msra.mxu1 %v1476_v10  ;;  %v1561_v7 = vld [vmem:[%s3903_s16 + $0x2770] sm:$0xff]  ;;  %v2193_v9 = vpop.f32.mrf.mxu1  ;;  %v1528_v10 = vld [vmem:[%s3903_s16 + $0x2668] sm:$0xff] }
 0x2aa   : > { %3323 = vmatpush.msra.mxu2 %v1491_v11  ;;  %3342 = vmatpush.msra.mxu3 %v1508_v12  ;;  %v1545_v11 = vld [vmem:[%s3903_s16 + $0x26f0] sm:$0xff]  ;;  %v1560_v12 = vld [vmem:[%s3903_s16 + $0x2768] sm:$0xff] }
 0x2ab   : > { %3284 = vmatpush.msra.mxu0 %v1458_v14  ;;  %3303 = vmatpush.msra.mxu1 %v1475_v15  ;;  %v2213_v14 = vpop.f32.mrf.mxu2  ;;  %v1527_v15 = vld [vmem:[%s3903_s16 + $0x2660] sm:$0xff] }
 0x2ac   : > { %3324 = vmatpush.msra.mxu2 %v1490_v17  ;;  %3343 = vmatpush.msra.mxu3 %v1507_v18  ;;  %v2194_v17 = vadd.f32 %v2193_v9, %v2174_v6  ;;  %v1559_v18 = vld [vmem:[%s3903_s16 + $0x2760] sm:$0xff] }
 0x2ad   : > { %3285 = vmatpush.msra.mxu0 %v1457_v19  ;;  %3304 = vmatpush.msra.mxu1 %v1474_v20  ;;  %v1576_v19 = vld [vmem:[%s3903_s16 + $0x27e8] sm:$0xff]  ;;  %v1526_v20 = vld [vmem:[%s3903_s16 + $0x2658] sm:$0xff] }
 0x2ae   : > { %3325 = vmatpush.msra.mxu2 %v1489_v22  ;;  %3344 = vmatpush.msra.mxu3 %v1506_v23  ;;  %v2214_v22 = vadd.f32 %v2213_v14, %v2194_v17  ;;  %v1558_v23 = vld [vmem:[%s3903_s16 + $0x2758] sm:$0xff]  ;;  %v1565_v14 = vld [vmem:[%s3903_s16 + $0x2790] sm:$0xff]  ;;  %v1532_v17 = vld [vmem:[%s3903_s16 + $0x2688] sm:$0xff] }
 0x2af   : > { %3286 = vmatpush.msra.mxu0 %v1456_v25  ;;  %3305 = vmatpush.msra.mxu1 %v1473_v26  ;;  %v2233_v25 = vpop.f32.mrf.mxu3  ;;  %v1525_v26 = vld [vmem:[%s3903_s16 + $0x2650] sm:$0xff] }
 0x2b0   : > { %3326 = vmatpush.msra.mxu2 %v1488_v27  ;;  %3345 = vmatpush.msra.mxu3 %v1505_v28  ;;  %v1542_v27 = vld [vmem:[%s3903_s16 + $0x26d8] sm:$0xff]  ;;  %v1557_v28 = vld [vmem:[%s3903_s16 + $0x2750] sm:$0xff] }
 0x2b1   : > { %3287 = vmatpush.msra.mxu0 %v1455_v30  ;;  %3306 = vmatpush.msra.mxu1 %v1472_v31  ;;  %v2253_v30 = vpop.f32.mrf.mxu0  ;;  %v1524_v31 = vld [vmem:[%s3903_s16 + $0x2648] sm:$0xff] }
 0x2b2   : > { %3327 = vmatpush.msra.mxu2 %v1487_v34  ;;  %3346 = vmatpush.msra.mxu3 %v1504_v36  ;;  %v2234_v34 = vadd.f32 %v2233_v25, %v2214_v22  ;;  %v1556_v36 = vld [vmem:[%s3903_s16 + $0x2748] sm:$0xff]  ;;  %v1626_v25 = vld [vmem:[%s3903_s16 + $0x2978] sm:$0xff] }
 0x2b3   : > { %3288 = vmatpush.msra.mxu0 %v1454_v37  ;;  %3307 = vmatpush.msra.mxu1 %v1471_v32  ;;  %v1573_v37 = vld [vmem:[%s3903_s16 + $0x27d0] sm:$0xff]  ;;  %v1523_v32 = vld [vmem:[%s3903_s16 + $0x2640] sm:$0xff] }
 0x2b4   : > { %3328 = vmatpush.msra.mxu2 %v1486_v38  ;;  %3347 = vmatpush.msra.mxu3 %v1503_v39  ;;  %v2254_v38 = vadd.f32 %v2253_v30, %v2234_v34  ;;  %v1555_v39 = vld [vmem:[%s3903_s16 + $0x2740] sm:$0xff]  ;;  %v1748_v30 = vld.sshfl [vmem:[#allocation1 + $0x38] sm:$0xff pattern:$0x73625140]  ;;  %v1610_v34 = vld [vmem:[%s3903_s16 + $0x28f8] sm:$0xff] }
 0x2b5   : > { %3289 = vmatpush.msra.mxu0 %v1453_v41  ;;  %3308 = vmatpush.msra.mxu1 %v1470_v42  ;;  %v2273_v41 = vpop.f32.mrf.mxu1  ;;  %v1522_v42 = vld [vmem:[%s3903_s16 + $0x2638] sm:$0xff]  ;;  %v1747_v22 = vld.sshfl [vmem:[#allocation1 + $0x30] sm:$0xff pattern:$0x73625140] }
 0x2b6   : > { %3329 = vmatpush.msra.mxu2 %v1485_v43  ;;  %3348 = vmatpush.msra.mxu3 %v1502_v44  ;;  %v1539_v43 = vld [vmem:[%s3903_s16 + $0x26c0] sm:$0xff]  ;;  %v1554_v44 = vld [vmem:[%s3903_s16 + $0x2738] sm:$0xff]  ;;  %v2274_v49 = vadd.f32 %v2273_v41, %v2254_v38 }
 0x2b7   : > { %3290 = vmatpush.msra.mxu0 %v1452_v46  ;;  %3309 = vmatpush.msra.mxu1 %v1469_v47  ;;  %v2293_v46 = vpop.f32.mrf.mxu2  ;;  %v1521_v47 = vld [vmem:[%s3903_s16 + $0x2630] sm:$0xff]  ;;  %v2313_v57 = vpop.f32.mrf.mxu3  ;;  %v1591_v41 = vld [vmem:[%s3903_s16 + $0x2860] sm:$0xff] }
 0x2b8   : > { %3330 = vmatpush.msra.mxu2 %v1484_v50  ;;  %3349 = vmatpush.msra.mxu3 %v1501_v51  ;;  %v1553_v50 = vld [vmem:[%s3903_s16 + $0x2730] sm:$0xff]  ;;  %v1570_v51 = vld [vmem:[%s3903_s16 + $0x27b8] sm:$0xff]  ;;  %v2294_v54 = vadd.f32 %v2293_v46, %v2274_v49  ;;  %v1607_v46 = vld [vmem:[%s3903_s16 + $0x28e0] sm:$0xff] }
 0x2b9   : > { %3291 = vmatpush.msra.mxu0 %v1451_v52  ;;  %3310 = vmatpush.msra.mxu1 %v1468_v53  ;;  %v1520_v52 = vld [vmem:[%s3903_s16 + $0x2628] sm:$0xff]  ;;  %v1537_v53 = vld [vmem:[%s3903_s16 + $0x26b0] sm:$0xff]  ;;  %v2333_v62 = vpop.f32.mrf.mxu0 }
 0x2ba   : > { %3331 = vmatpush.msra.mxu2 %v1483_v55  ;;  %3350 = vmatpush.msra.mxu3 %v1500_v56  ;;  %v1552_v55 = vld [vmem:[%s3903_s16 + $0x2728] sm:$0xff]  ;;  %v1569_v56 = vld [vmem:[%s3903_s16 + $0x27b0] sm:$0xff]  ;;  %v2314_v1 = vadd.f32 %v2313_v57, %v2294_v54 }
 0x2bb   : > { %3292 = vmatmul.f32.vlgmr.msra.gmra.mxu0 %v1741_v58  ;;  %3332 = vmatmul.f32.vlgmr.msra.gmra.mxu2 %v1743_v59  ;;  %v1519_v58 = vld [vmem:[%s3903_s16 + $0x2620] sm:$0xff]  ;;  %v1536_v59 = vld [vmem:[%s3903_s16 + $0x26a8] sm:$0xff]  ;;  %v1589_v49 = vld [vmem:[%s3903_s16 + $0x2850] sm:$0xff] }
 0x2bc   : > { %3356 = vmatpush.msrb.mxu0 %v1530_v60  ;;  %3396 = vmatpush.msrb.mxu2 %v1562_v61  ;;  %v1551_v60 = vld [vmem:[%s3903_s16 + $0x2720] sm:$0xff]  ;;  %v1568_v61 = vld [vmem:[%s3903_s16 + $0x27a8] sm:$0xff]  ;;  %v2334_v6 = vadd.f32 %v2333_v62, %v2314_v1  ;;  %v1586_v62 = vld [vmem:[%s3903_s16 + $0x2838] sm:$0xff] }
 0x2bd   : > { %3311 = vmatpush.msra.mxu1 %v1467_v63  ;;  %3351 = vmatpush.msra.mxu3 %v1499_v0  ;;  %v1518_v63 = vld [vmem:[%s3903_s16 + $0x2618] sm:$0xff]  ;;  %v1535_v0 = vld [vmem:[%s3903_s16 + $0x26a0] sm:$0xff]  ;;  %v2353_v9 = vpop.f32.mrf.mxu1  ;;  %v1588_v54 = vld [vmem:[%s3903_s16 + $0x2848] sm:$0xff] }
 0x2be   : > { %3312 = vmatmul.f32.vlgmr.msra.gmra.mxu1 %v1742_v2  ;;  %3352 = vmatmul.f32.vlgmr.msra.gmra.mxu3 %v1744_v3  ;;  %v1550_v2 = vld [vmem:[%s3903_s16 + $0x2718] sm:$0xff]  ;;  %v1567_v3 = vld [vmem:[%s3903_s16 + $0x27a0] sm:$0xff] }
 0x2bf   : > { %3357 = vmatpush.msrb.mxu0 %v1529_v4  ;;  %3376 = vmatpush.msrb.mxu1 %v1546_v5  ;;  %v1517_v4 = vld [vmem:[%s3903_s16 + $0x2610] sm:$0xff]  ;;  %v1534_v5 = vld [vmem:[%s3903_s16 + $0x2698] sm:$0xff] }
 0x2c0   : > { %3397 = vmatpush.msrb.mxu2 %v1561_v7  ;;  %3416 = vmatpush.msrb.mxu3 %v1578_v8  ;;  %v1549_v7 = vld [vmem:[%s3903_s16 + $0x2710] sm:$0xff]  ;;  %v1566_v8 = vld [vmem:[%s3903_s16 + $0x2798] sm:$0xff] }
 0x2c1   : > { %3358 = vmatpush.msrb.mxu0 %v1528_v10  ;;  %3377 = vmatpush.msrb.mxu1 %v1545_v11  ;;  %v1516_v10 = vld [vmem:[%s3903_s16 + $0x2608] sm:$0xff]  ;;  %v1533_v11 = vld [vmem:[%s3903_s16 + $0x2690] sm:$0xff]  ;;  %v1618_v1 = vld [vmem:[%s3903_s16 + $0x2938] sm:$0xff] }
 0x2c2   : > { %3398 = vmatpush.msrb.mxu2 %v1560_v12  ;;  %3417 = vmatpush.msrb.mxu3 %v1577_v13  ;;  %v298_v12 = vld [vmem:[%s3917_s19 + $0xa0] sm:$0x3f]  ;;  %v1548_v13 = vld [vmem:[%s3903_s16 + $0x2708] sm:$0xff] }
 0x2c3   : > { %3359 = vmatpush.msrb.mxu0 %v1527_v15  ;;  %3378 = vmatpush.msrb.mxu1 %v1544_v16  ;;  %1749 = vst [vmem:[#allocation1] ss:$4 sm:$0xff] %v298_v12  ;;  %v2373_v15 = vpop.f32.mrf.mxu2  ;;  %v1515_v16 = vld [vmem:[%s3903_s16 + $0x2600] sm:$0xff]  ;;  %v1600_v12 = vld [vmem:[%s3903_s16 + $0x28a8] sm:$0xff] }
 0x2c4   : > { %3399 = vmatpush.msrb.mxu2 %v1559_v18  ;;  %3418 = vmatpush.msrb.mxu3 %v1576_v19  ;;  %v2354_v18 = vadd.f32 %v2353_v9, %v2334_v6  ;;  %v1547_v19 = vld [vmem:[%s3903_s16 + $0x2700] sm:$0xff] }
 0x2c5   : > { %3360 = vmatpush.msrb.mxu0 %v1526_v20  ;;  %3379 = vmatpush.msrb.mxu1 %v1543_v21  ;;  %v1564_v20 = vld [vmem:[%s3903_s16 + $0x2788] sm:$0xff]  ;;  %v1745_v21 = vld.sshfl [vmem:[#allocation1 + $0x20] sm:$0xff pattern:$0x73625140] }
 0x2c6   : > { %3400 = vmatpush.msrb.mxu2 %v1558_v23  ;;  %3419 = vmatpush.msrb.mxu3 %v1575_v24  ;;  %v2374_v23 = vadd.f32 %v2373_v15, %v2354_v18  ;;  %v1594_v24 = vld [vmem:[%s3903_s16 + $0x2878] sm:$0xff] }
 0x2c7   : > { %3361 = vmatpush.msrb.mxu0 %v1525_v26  ;;  %3380 = vmatpush.msrb.mxu1 %v1542_v27  ;;  %v2393_v26 = vpop.f32.mrf.mxu3  ;;  %v1531_v27 = vld [vmem:[%s3903_s16 + $0x2680] sm:$0xff]  ;;  %v1614_v18 = vld [vmem:[%s3903_s16 + $0x2918] sm:$0xff] }
 0x2c8   : > { %3401 = vmatpush.msrb.mxu2 %v1557_v28  ;;  %3420 = vmatpush.msrb.mxu3 %v1574_v29  ;;  %v1563_v28 = vld [vmem:[%s3903_s16 + $0x2780] sm:$0xff] }
 0x2c9   : > { %3362 = vmatpush.msrb.mxu0 %v1524_v31  ;;  %3381 = vmatpush.msrb.mxu1 %v1541_v33  ;;  %v1746_v29 = vld.sshfl [vmem:[#allocation1 + $0x28] sm:$0xff pattern:$0x73625140]  ;;  %v2413_v31 = vpop.f32.mrf.mxu0  ;;  %v1593_v33 = vld [vmem:[%s3903_s16 + $0x2870] sm:$0xff] }
 0x2ca   : > { %3402 = vmatpush.msrb.mxu2 %v1556_v36  ;;  %3421 = vmatpush.msrb.mxu3 %v1573_v37  ;;  %v2394_v36 = vadd.f32 %v2393_v26, %v2374_v23  ;;  %v1625_v37 = vld [vmem:[%s3903_s16 + $0x2970] sm:$0xff] }
 0x2cb   : > { %3363 = vmatpush.msrb.mxu0 %v1523_v32  ;;  %3382 = vmatpush.msrb.mxu1 %v1540_v35  ;;  %v1592_v32 = vld [vmem:[%s3903_s16 + $0x2868] sm:$0xff]  ;;  %v1609_v35 = vld [vmem:[%s3903_s16 + $0x28f0] sm:$0xff] }
 0x2cc   : > { %3403 = vmatpush.msrb.mxu2 %v1555_v39  ;;  %3422 = vmatpush.msrb.mxu3 %v1572_v40  ;;  %v2414_v38 = vadd.f32 %v2413_v31, %v2394_v36  ;;  %v1624_v39 = vld [vmem:[%s3903_s16 + $0x2968] sm:$0xff]  ;;  %v2433_v40 = vpop.f32.mrf.mxu1  ;;  %v1613_v23 = vld [vmem:[%s3903_s16 + $0x2910] sm:$0xff]  ;;  %v1611_v31 = vld [vmem:[%s3903_s16 + $0x2900] sm:$0xff] }
 0x2cd   : > { %3364 = vmatpush.msrb.mxu0 %v1522_v42  ;;  %3383 = vmatpush.msrb.mxu1 %v1539_v43  ;;  %v1608_v42 = vld [vmem:[%s3903_s16 + $0x28e8] sm:$0xff]  ;;  %v1623_v43 = vld [vmem:[%s3903_s16 + $0x2960] sm:$0xff] }
 0x2ce   : > { %3404 = vmatpush.msrb.mxu2 %v1554_v44  ;;  %3423 = vmatpush.msrb.mxu3 %v1571_v45  ;;  %v2453_v44 = vpop.f32.mrf.mxu2  ;;  %v1590_v45 = vld [vmem:[%s3903_s16 + $0x2858] sm:$0xff]  ;;  %v1752_v36 = vld.sshfl [vmem:[#allocation1 + $0x10] sm:$0xff pattern:$0x73625140] }
 0x2cf   : > { %3365 = vmatpush.msrb.mxu0 %v1521_v47  ;;  %3384 = vmatpush.msrb.mxu1 %v1538_v48  ;;  %v2434_v47 = vadd.f32 %v2433_v40, %v2414_v38  ;;  %v1622_v48 = vld [vmem:[%s3903_s16 + $0x2958] sm:$0xff] }
 0x2d0   : > { %3405 = vmatpush.msrb.mxu2 %v1553_v50  ;;  %3424 = vmatpush.msrb.mxu3 %v1570_v51  ;;  %v1606_v50 = vld [vmem:[%s3903_s16 + $0x28d8] sm:$0xff] }
 0x2d1   : > { %3366 = vmatpush.msrb.mxu0 %v1520_v52  ;;  %3385 = vmatpush.msrb.mxu1 %v1537_v53  ;;  %v2454_v51 = vadd.f32 %v2453_v44, %v2434_v47  ;;  %v1621_v52 = vld [vmem:[%s3903_s16 + $0x2950] sm:$0xff]  ;;  %v2473_v53 = vpop.f32.mrf.mxu3  ;;  %v2493_v57 = vpop.f32.mrf.mxu0 }
 0x2d2   : > { %3406 = vmatpush.msrb.mxu2 %v1552_v55  ;;  %3425 = vmatpush.msrb.mxu3 %v1569_v56  ;;  %v1605_v55 = vld [vmem:[%s3903_s16 + $0x28d0] sm:$0xff]  ;;  %v1620_v56 = vld [vmem:[%s3903_s16 + $0x2948] sm:$0xff] }
 0x2d3   : > { %3367 = vmatpush.msrb.mxu0 %v1519_v58  ;;  %3386 = vmatpush.msrb.mxu1 %v1536_v59  ;;  %v1587_v58 = vld [vmem:[%s3903_s16 + $0x2840] sm:$0xff]  ;;  %v1604_v59 = vld [vmem:[%s3903_s16 + $0x28c8] sm:$0xff] }
 0x2d4   : > { %3407 = vmatpush.msrb.mxu2 %v1551_v60  ;;  %3426 = vmatpush.msrb.mxu3 %v1568_v61  ;;  %v2474_v60 = vadd.f32 %v2473_v53, %v2454_v51  ;;  %v1619_v61 = vld [vmem:[%s3903_s16 + $0x2940] sm:$0xff] }
 0x2d5   : > { %3368 = vmatpush.msrb.mxu0 %v1518_v63  ;;  %3387 = vmatpush.msrb.mxu1 %v1535_v0  ;;  %v1603_v63 = vld [vmem:[%s3903_s16 + $0x28c0] sm:$0xff] }
 0x2d6   : > { %3408 = vmatpush.msrb.mxu2 %v1550_v2  ;;  %3427 = vmatpush.msrb.mxu3 %v1567_v3  ;;  %v2494_v0 = vadd.f32 %v2493_v57, %v2474_v60  ;;  %v2513_v2 = vpop.f32.mrf.mxu1  ;;  %v1585_v3 = vld [vmem:[%s3903_s16 + $0x2830] sm:$0xff]  ;;  %v2533_v6 = vpop.f32.mrf.mxu2 }
 0x2d7   : > { %3369 = vmatpush.msrb.mxu0 %v1517_v4  ;;  %3388 = vmatpush.msrb.mxu1 %v1534_v5  ;;  %v1602_v4 = vld [vmem:[%s3903_s16 + $0x28b8] sm:$0xff]  ;;  %v1617_v5 = vld [vmem:[%s3903_s16 + $0x2930] sm:$0xff] }
 0x2d8   : > { %3409 = vmatpush.msrb.mxu2 %v1549_v7  ;;  %3428 = vmatpush.msrb.mxu3 %v1566_v8  ;;  %v1584_v7 = vld [vmem:[%s3903_s16 + $0x2828] sm:$0xff]  ;;  %v1601_v8 = vld [vmem:[%s3903_s16 + $0x28b0] sm:$0xff]  ;;  %v2514_v9 = vadd.f32 %v2513_v2, %v2494_v0 }
 0x2d9   : > { %3370 = vmatpush.msrb.mxu0 %v1516_v10  ;;  %3389 = vmatpush.msrb.mxu1 %v1533_v11  ;;  %v1616_v10 = vld [vmem:[%s3903_s16 + $0x2928] sm:$0xff]  ;;  %v1583_v11 = vld [vmem:[%s3903_s16 + $0x2820] sm:$0xff]  ;;  %v2553_v15 = vpop.f32.mrf.mxu3 }
 0x2da   : > { %3410 = vmatpush.msrb.mxu2 %v1548_v13  ;;  %3429 = vmatpush.msrb.mxu3 %v1565_v14  ;;  %v2534_v13 = vadd.f32 %v2533_v6, %v2514_v9  ;;  %v1615_v14 = vld [vmem:[%s3903_s16 + $0x2920] sm:$0xff] }
 0x2db   : > { %3371 = vmatpush.msrb.mxu0 %v1515_v16  ;;  %3390 = vmatpush.msrb.mxu1 %v1532_v17  ;;  %v1582_v16 = vld [vmem:[%s3903_s16 + $0x2818] sm:$0xff]  ;;  %v1599_v17 = vld [vmem:[%s3903_s16 + $0x28a0] sm:$0xff] }
 0x2dc   : > { %3411 = vmatpush.msrb.mxu2 %v1547_v19  ;;  %3430 = vmatpush.msrb.mxu3 %v1564_v20  ;;  %v2573_v19 = vpop.f32.mrf.mxu0  ;;  %v1581_v20 = vld [vmem:[%s3903_s16 + $0x2810] sm:$0xff] }
 0x2dd   : > { %3372 = vmatmul.f32.vlgmr.msrb.gmra.mxu0 %v1745_v21  ;;  %3412 = vmatmul.f32.vlgmr.msrb.gmra.mxu2 %v1747_v22  ;;  %v1598_v21 = vld [vmem:[%s3903_s16 + $0x2898] sm:$0xff]  ;;  %v2554_v22 = vadd.f32 %v2553_v15, %v2534_v13 }
 0x2de   : > { %3436 = vmatpush.msra.mxu0 %v1594_v24  ;;  %3476 = vmatpush.msra.mxu2 %v1626_v25  ;;  %v1580_v24 = vld [vmem:[%s3903_s16 + $0x2808] sm:$0xff]  ;;  %v1597_v25 = vld [vmem:[%s3903_s16 + $0x2890] sm:$0xff] }
 0x2df   : > { %3391 = vmatpush.msrb.mxu1 %v1531_v27  ;;  %3431 = vmatpush.msrb.mxu3 %v1563_v28  ;;  %v2574_v26 = vadd.f32 %v2573_v19, %v2554_v22  ;;  %v1612_v27 = vld [vmem:[%s3903_s16 + $0x2908] sm:$0xff]  ;;  %v2593_v28 = vpop.f32.mrf.mxu1 }
 0x2e0   : > { %3392 = vmatmul.f32.vlgmr.msrb.gmra.mxu1 %v1746_v29  ;;  %3432 = vmatmul.f32.vlgmr.msrb.gmra.mxu3 %v1748_v30  ;;  %v1579_v29 = vld [vmem:[%s3903_s16 + $0x2800] sm:$0xff]  ;;  %v1596_v30 = vld [vmem:[%s3903_s16 + $0x2888] sm:$0xff] }
 0x2e1   : > { %3437 = vmatpush.msra.mxu0 %v1593_v33  ;;  %3456 = vmatpush.msra.mxu1 %v1610_v34  ;;  %v1750_v33 = vld.sshfl [vmem:[#allocation1] sm:$0xff pattern:$0x73625140]  ;;  %v2613_v34 = vpop.f32.mrf.mxu2 }
 0x2e2   : > { %3477 = vmatpush.msra.mxu2 %v1625_v37  ;;  %v1595_v37 = vld [vmem:[%s3903_s16 + $0x2880] sm:$0xff] }
 0x2e3   : > { %3438 = vmatpush.msra.mxu0 %v1592_v32  ;;  %3457 = vmatpush.msra.mxu1 %v1609_v35  ;;  %v2594_v32 = vadd.f32 %v2593_v28, %v2574_v26  ;;  %v1751_v35 = vld.sshfl [vmem:[#allocation1 + $0x8] sm:$0xff pattern:$0x73625140] }
 0x2e4   : > { %3478 = vmatpush.msra.mxu2 %v1624_v39  ;;  %v2633_v39 = vpop.f32.mrf.mxu3  ;;  %v2653_v40 = vpop.f32.mrf.mxu0 }
 0x2e5   : > { %3439 = vmatpush.msra.mxu0 %v1591_v41  ;;  %3458 = vmatpush.msra.mxu1 %v1608_v42  ;;  %v2614_v38 = vadd.f32 %v2613_v34, %v2594_v32 }
 0x2e6   : > { %3479 = vmatpush.msra.mxu2 %v1623_v43 }
 0x2e7   : > { %3440 = vmatpush.msra.mxu0 %v1590_v45  ;;  %3459 = vmatpush.msra.mxu1 %v1607_v46  ;;  %v2634_v41 = vadd.f32 %v2633_v39, %v2614_v38  ;;  %v2673_v43 = vpop.f32.mrf.mxu1 }
 0x2e8   : > { %3480 = vmatpush.msra.mxu2 %v1622_v48 }
 0x2e9   : > { %3441 = vmatpush.msra.mxu0 %v1589_v49  ;;  %3460 = vmatpush.msra.mxu1 %v1606_v50  ;;  %v2654_v42 = vadd.f32 %v2653_v40, %v2634_v41  ;;  %v2693_v44 = vpop.f32.mrf.mxu2 }
 0x2ea   : > { %3481 = vmatpush.msra.mxu2 %v1621_v52 }
 0x2eb   : > { %3442 = vmatpush.msra.mxu0 %v1588_v54  ;;  %3461 = vmatpush.msra.mxu1 %v1605_v55  ;;  %v2674_v45 = vadd.f32 %v2673_v43, %v2654_v42 }
 0x2ec   : > { %3482 = vmatpush.msra.mxu2 %v1620_v56  ;;  %v2713_v47 = vpop.f32.mrf.mxu3  ;;  %v2733_v48 = vpop.f32.mrf.mxu0 }
 0x2ed   : > { %3443 = vmatpush.msra.mxu0 %v1587_v58  ;;  %3462 = vmatpush.msra.mxu1 %v1604_v59  ;;  %v2694_v46 = vadd.f32 %v2693_v44, %v2674_v45 }
 0x2ee   : > { %3483 = vmatpush.msra.mxu2 %v1619_v61 }
 0x2ef   : > { %3444 = vmatpush.msra.mxu0 %v1586_v62  ;;  %3463 = vmatpush.msra.mxu1 %v1603_v63  ;;  %v2714_v49 = vadd.f32 %v2713_v47, %v2694_v46  ;;  %v2753_v51 = vpop.f32.mrf.mxu1 }
 0x2f0   : > { %3484 = vmatpush.msra.mxu2 %v1618_v1 }
 0x2f1   : > { %3445 = vmatpush.msra.mxu0 %v1585_v3  ;;  %3464 = vmatpush.msra.mxu1 %v1602_v4  ;;  %v2734_v50 = vadd.f32 %v2733_v48, %v2714_v49  ;;  %v2773_v52 = vpop.f32.mrf.mxu2 }
 0x2f2   : > { %3485 = vmatpush.msra.mxu2 %v1617_v5 }
 0x2f3   : > { %3446 = vmatpush.msra.mxu0 %v1584_v7  ;;  %3465 = vmatpush.msra.mxu1 %v1601_v8  ;;  %v2754_v53 = vadd.f32 %v2753_v51, %v2734_v50 }
 0x2f4   : > { %3486 = vmatpush.msra.mxu2 %v1616_v10  ;;  %v2793_v55 = vpop.f32.mrf.mxu3  ;;  %v2813_v56 = vpop.f32.mrf.mxu0 }
 0x2f5   : > { %3447 = vmatpush.msra.mxu0 %v1583_v11  ;;  %3466 = vmatpush.msra.mxu1 %v1600_v12  ;;  %v2774_v54 = vadd.f32 %v2773_v52, %v2754_v53 }
 0x2f6   : > { %3487 = vmatpush.msra.mxu2 %v1615_v14 }
 0x2f7   : > { %3448 = vmatpush.msra.mxu0 %v1582_v16  ;;  %3467 = vmatpush.msra.mxu1 %v1599_v17  ;;  %v2794_v57 = vadd.f32 %v2793_v55, %v2774_v54  ;;  %v2833_v59 = vpop.f32.mrf.mxu1 }
 0x2f8   : > { %3488 = vmatpush.msra.mxu2 %v1614_v18 }
 0x2f9   : > { %3449 = vmatpush.msra.mxu0 %v1581_v20  ;;  %3468 = vmatpush.msra.mxu1 %v1598_v21  ;;  %v2814_v58 = vadd.f32 %v2813_v56, %v2794_v57  ;;  %v2853_v60 = vpop.f32.mrf.mxu2 }
 0x2fa   : > { %3489 = vmatpush.msra.mxu2 %v1613_v23 }
 0x2fb   : > { %3450 = vmatpush.msra.mxu0 %v1580_v24  ;;  %3469 = vmatpush.msra.mxu1 %v1597_v25  ;;  %v2834_v61 = vadd.f32 %v2833_v59, %v2814_v58 }
 0x2fc   : > { %3490 = vmatpush.msra.mxu2 %v1612_v27  ;;  %v2873_v63 = vpop.f32.mrf.mxu3  ;;  %v2893_v0 = vpop.f32.mrf.mxu0 }
 0x2fd   : > { %3451 = vmatpush.msra.mxu0 %v1579_v29  ;;  %3470 = vmatpush.msra.mxu1 %v1596_v30  ;;  %v2854_v62 = vadd.f32 %v2853_v60, %v2834_v61  ;;  %v277_v61 = vld [vmem:[#allocation2] sm:$0x3] }
 0x2fe   : > { %3491 = vmatpush.msra.mxu2 %v1611_v31  ;;  %3452 = vmatmul.f32.vlgmr.msra.gmra.mxu0 %v1750_v33 }
 0x2ff   : > { %3492 = vmatmul.f32.vlgmr.msra.gmra.mxu2 %v1752_v36  ;;  %3471 = vmatpush.msra.mxu1 %v1595_v37  ;;  %v2874_v1 = vadd.f32 %v2873_v63, %v2854_v62  ;;  %v2913_v3 = vpop.f32.mrf.mxu1 }
 0x300   : > { %3472 = vmatmul.f32.vlgmr.msra.gmra.mxu1 %v1751_v35 }
 0x301   : > { %v2894_v2 = vadd.f32 %v2893_v0, %v2874_v1  ;;  %v2933_v4 = vpop.f32.mrf.mxu2 }
 0x303   : > { %v2914_v5 = vadd.f32 %v2913_v3, %v2894_v2 }
 0x304   : > { %v2953_v7 = vpop.f32.mrf.mxu3  ;;  %v2973_v8 = vpop.f32.mrf.mxu0 }
 0x305   : > { %v2934_v6 = vadd.f32 %v2933_v4, %v2914_v5 }
 0x307   : > { %v2954_v9 = vadd.f32 %v2953_v7, %v2934_v6  ;;  %v2993_v11 = vpop.f32.mrf.mxu1 }
 0x309   : > { %v2974_v10 = vadd.f32 %v2973_v8, %v2954_v9  ;;  %v3013_v12 = vpop.f32.mrf.mxu2 }
 0x30b   : > { %v2994_v13 = vadd.f32 %v2993_v11, %v2974_v10 }
 0x30c   : > { %v3033_v15 = vpop.f32.mrf.mxu3  ;;  %v3053_v16 = vpop.f32.mrf.mxu0 }
 0x30d   : > { %v3014_v14 = vadd.f32 %v3013_v12, %v2994_v13 }
 0x30f   : > { %v3034_v17 = vadd.f32 %v3033_v15, %v3014_v14  ;;  %v3073_v19 = vpop.f32.mrf.mxu1 }
 0x311   : > { %v3054_v18 = vadd.f32 %v3053_v16, %v3034_v17  ;;  %v3093_v20 = vpop.f32.mrf.mxu2 }
 0x313   : > { %v3074_v21 = vadd.f32 %v3073_v19, %v3054_v18 }
 0x314   : > { %v3113_v23 = vpop.f32.mrf.mxu3  ;;  %v3133_v24 = vpop.f32.mrf.mxu0 }
 0x315   : > { %v3094_v22 = vadd.f32 %v3093_v20, %v3074_v21 }
 0x317   : > { %v3114_v25 = vadd.f32 %v3113_v23, %v3094_v22  ;;  %v3153_v27 = vpop.f32.mrf.mxu1 }
 0x319   : > { %v3134_v26 = vadd.f32 %v3133_v24, %v3114_v25  ;;  %v3173_v28 = vpop.f32.mrf.mxu2 }
 0x31b   : > { %v3154_v29 = vadd.f32 %v3153_v27, %v3134_v26 }
 0x31c   : > { %v3193_v31 = vpop.f32.mrf.mxu3  ;;  %v3213_v33 = vpop.f32.mrf.mxu0 }
 0x31d   : > { %v3174_v30 = vadd.f32 %v3173_v28, %v3154_v29 }
 0x31f   : > { %v3194_v34 = vadd.f32 %v3193_v31, %v3174_v30  ;;  %v3233_v37 = vpop.f32.mrf.mxu1 }
 0x321   : > { %v3214_v36 = vadd.f32 %v3213_v33, %v3194_v34  ;;  %v3253_v32 = vpop.f32.mrf.mxu2 }
 0x323   : > { %v3234_v35 = vadd.f32 %v3233_v37, %v3214_v36 }
 0x324   : > { %v3273_v39 = vpop.f32.mrf.mxu3 }
 0x325   : > { %v3254_v38 = vadd.f32 %v3253_v32, %v3234_v35 }
 0x327   : > { %v3274_v41 = vadd.f32 %v3273_v39, %v3254_v38 }
 0x338   : > { %v3293_v40 = vpop.f32.mrf.mxu0 }
 0x339   : > { %v3294_v42 = vadd.f32 %v3293_v40, %v3274_v41 }
 0x33b   : > { %v3313_v43 = vpop.f32.mrf.mxu1 }
 0x33c   : > { %v3314_v45 = vadd.f32 %v3313_v43, %v3294_v42 }
 0x33e   : > { %v3333_v44 = vpop.f32.mrf.mxu2 }
 0x33f   : > { %v3334_v46 = vadd.f32 %v3333_v44, %v3314_v45 }
 0x341   : > { %v3353_v47 = vpop.f32.mrf.mxu3 }
 0x342   : > { %v3354_v49 = vadd.f32 %v3353_v47, %v3334_v46 }
 0x35a   : > { %v3373_v48 = vpop.f32.mrf.mxu0 }
 0x35b   : > { %v3374_v50 = vadd.f32 %v3373_v48, %v3354_v49 }
 0x35d   : > { %v3393_v51 = vpop.f32.mrf.mxu1 }
 0x35e   : > { %v3394_v53 = vadd.f32 %v3393_v51, %v3374_v50 }
 0x360   : > { %v3413_v52 = vpop.f32.mrf.mxu2 }
 0x361   : > { %v3414_v54 = vadd.f32 %v3413_v52, %v3394_v53 }
 0x363   : > { %v3433_v55 = vpop.f32.mrf.mxu3 }
 0x364   : > { %v3434_v56 = vadd.f32 %v3433_v55, %v3414_v54 }
 0x37b   : > { %v3453_v57 = vpop.f32.mrf.mxu0 }
 0x37c   : > { %v3454_v58 = vadd.f32 %v3453_v57, %v3434_v56 }
 0x37d   : > { %v3473_v59 = vpop.f32.mrf.mxu1 }
 0x37e   : > { %v3474_v60 = vadd.f32 %v3473_v59, %v3454_v58 }
 0x382   : > { %v3493_v62 = vpop.f32.mrf.mxu2 }
 0x383   : > { %v3494_v63 = vadd.f32 %v3493_v62, %v3474_v60  ;;  %3501 = sbr.rel (%p3621_p5) target bundleno = 1065 (0x429), region = 56 }
 0x385   : > { %v3496_v0 = vadd.f32 %v3494_v63, %v277_v61 }
 0x387   : > { %3497 = vst [vmem:[#allocation2] sm:$0x3] %v3496_v0 }
 0x388   : > { %v3524_v1 = vld [vmem:[%s5374_s3 + $0x78] sm:$0xff]  ;;  %v3523_v2 = vld [vmem:[%s5374_s3 + $0x70] sm:$0xff]  ;;  %v3522_v3 = vld [vmem:[%s5374_s3 + $0x68] sm:$0xff]  ;;  %vm3549_vm0 = vcmask 1024  }
 0x389   : > { %3529 = vmatpush.msra.mxu0 %v3524_v1  ;;  %v3521_v4 = vld [vmem:[%s5374_s3 + $0x60] sm:$0xff]  ;;  %v3520_v5 = vld [vmem:[%s5374_s3 + $0x58] sm:$0xff]  ;;  %v3519_v6 = vld [vmem:[%s5374_s3 + $0x50] sm:$0xff] }
 0x38a   : > { %v3518_v7 = vld [vmem:[%s5374_s3 + $0x48] sm:$0xff]  ;;  %v3517_v8 = vld [vmem:[%s5374_s3 + $0x40] sm:$0xff]  ;;  %v3516_v9 = vld [vmem:[%s5374_s3 + $0x38] sm:$0xff] }
 0x38b   : > { %3530 = vmatpush.msra.mxu0 %v3523_v2  ;;  %v3515_v10 = vld [vmem:[%s5374_s3 + $0x30] sm:$0xff]  ;;  %v3514_v11 = vld [vmem:[%s5374_s3 + $0x28] sm:$0xff]  ;;  %v3513_v12 = vld [vmem:[%s5374_s3 + $0x20] sm:$0xff] }
 0x38c   : > { %v3680_v13 = vld [vmem:[#allocation6] ss:$0 sm:$0xff]  ;;  %v3512_v15 = vld [vmem:[%s5374_s3 + $0x18] sm:$0xff]  ;;  %v3511_v16 = vld [vmem:[%s5374_s3 + $0x10] sm:$0xff] }
 0x38d   : > { %3531 = vmatpush.msra.mxu0 %v3522_v3  ;;  %v3510_v18 = vld [vmem:[%s5374_s3 + $0x8] sm:$0xff]  ;;  %v3509_v19 = vld [vmem:[%s5374_s3] sm:$0xff] }
 0x38e   : > { %v3502_v14 = vld [vmem:[#allocation2] sm:$0x3]  ;;  %v3681_v21 = vld [vmem:[#allocation3] ss:$0 sm:$0xff] }
 0x38f   : > { %3532 = vmatpush.msra.mxu0 %v3521_v4  ;;  %v3507_v17 = vadd.f32 %v3680_v13, %v3502_v14 }
 0x391   : > { %3533 = vmatpush.msra.mxu0 %v3520_v5  ;;  %v3508_v20 = vmax.f32 %v3507_v17, 0.0 }
 0x393   : > { %3534 = vmatpush.msra.mxu0 %v3519_v6 }
 0x395   : > { %3535 = vmatpush.msra.mxu0 %v3518_v7 }
 0x397   : > { %3536 = vmatpush.msra.mxu0 %v3517_v8 }
 0x399   : > { %3537 = vmatpush.msra.mxu0 %v3516_v9 }
 0x39b   : > { %3538 = vmatpush.msra.mxu0 %v3515_v10 }
 0x39d   : > { %3539 = vmatpush.msra.mxu0 %v3514_v11 }
 0x39f   : > { %3540 = vmatpush.msra.mxu0 %v3513_v12 }
 0x3a1   : > { %3541 = vmatpush.msra.mxu0 %v3512_v15 }
 0x3a3   : > { %3542 = vmatpush.msra.mxu0 %v3511_v16 }
 0x3a5   : > { %3543 = vmatpush.msra.mxu0 %v3510_v18 }
 0x3a7   : > { %3544 = vmatpush.msra.mxu0 %v3509_v19 }
 0x3a8   : > { %3545 = vmatmul.f32.vlgmr.msra.gmra.mxu0 %v3508_v20 }
 0x425   : > { %v3546_v22 = vpop.f32.mrf.mxu0 }
 0x426   : > { %v3547_v23 = vadd.f32 %v3681_v21, %v3546_v22 }
 0x428   : > { %3550 = vst.msk [vmem:[%s5376_s5] sm:$0x3] %vm3549_vm0, %v3547_v23 }
 0x429 PF: > { %p18_p8 = scmp.ge.s32.totalorder %s3841_s24, 5   ;;  %s5381_s20 = smov %s3772_s21 }
 0x42a   : > { %s5382_s21 = smov %s3776_s22  ;;  %s5383_s22 = smov %s3851_s27 }
 0x42b   : > { %s5384_s23 = smov %s3841_s24  ;;  %20 = sbr.rel (!%p18_p8) target bundleno = 7 (0x7), region = 92 }
 0x430   :  { %3562 = vsyncpa [#allocation5], 1 }
 0x431   :  { %3564 = vsyncpa [#allocation5 + $0x1], 1 }
 0x432   :  { %3565 = vsyncpa [#allocation7], 1 }

</bundles_post_ra>
